<compile_context>
chip_gen: v6e
topology: v6e:2x2x1
jax: 0.10.0
libtpu: 0.0.40
codegen_flags: <defaults>
</compile_context>

<pallas_src>
import jax
import jax.numpy as jnp
from jax import lax
from jax.experimental import pallas as pl
from jax.experimental.pallas import tpu as pltpu

GP = 128                          # padded lane width per LSTM gate (one vreg row)


# ---------------------------------------------------------------------------
# Sizing helpers (all host-side Python on static shapes).
# ---------------------------------------------------------------------------
def _vmem_limit_bytes():
    """~75% of this generation's physical VMEM (falls back to 48 MiB)."""
    cap = 64 * 1024 * 1024
    try:
        info = pltpu.get_tpu_info()
        for name in ("vmem_capacity_bytes", "vmem_bytes", "vmem_size_bytes"):
            v = getattr(info, name, None)
            if v:
                cap = int(v)
                break
    except Exception:
        pass
    return (cap * 3) // 4


def _pick_batch_tile(Bp, T, C, Hd, budget_bytes):
    """Largest batch tile (multiple of 8) whose per-tile VMEM cost fits the
    budget, preferring >=2 grid tiles so megacore can shard the batch axis."""
    fixed = 8 * 1024 * 1024        # weights + table + count temporaries + slack

    def cost(bb):
        return (2 * T * bb * 4 * GP * 4        # two (T*bb, 4*GP) f32 gate scratches
                + 2 * T * bb * C * 4           # double-buffered int32 char ids
                + 2 * T * bb * 2 * Hd * 4      # double-buffered f32 output tile
                + fixed)

    cands = [t for t in (128, 64, 32, 16, 8) if Bp % t == 0] or [Bp]
    fitting = [bb for bb in cands if cost(bb) <= budget_bytes] or [min(cands)]
    multi = [bb for bb in fitting if Bp // bb >= 2]
    return max(multi) if multi else max(fitting)


def _pick_time_chunk(T, bb, target_rows=256, max_chunks=64):
    """Divisor TB of T: the projection matmuls process TB*bb rows per chunk."""
    divs = [d for d in range(1, T + 1) if T % d == 0]
    for d in divs:                                    # smallest chunk filling the MXU
        if d * bb >= target_rows and T // d <= max_chunks:
            return d
    for d in reversed(divs):                          # else fewest / biggest chunks
        if T // d <= max_chunks:
            return d
    return T


# ---------------------------------------------------------------------------
# Fused kernel: char histogram -> embedding -> input projection -> BiLSTM.
# ---------------------------------------------------------------------------
def char_encoder2_kernel(ids_ref, table_ref,
                         wih_f_ref, whh_f_ref, b_f_ref,
                         wih_b_ref, whh_b_ref, b_b_ref,
                         out_ref, gxf_ref, gxb_ref):
    """One batch tile.

    ids_ref:   (T*bb, C) int32, rows ordered r = t*bb + i (time-major in tile)
    table_ref: (Vpad, E) bf16, bert_gamma pre-folded, vocab padded to 128
    wih_*:     (E, 4*GP) f32; whh_*: (GP, 4*GP) f32; b_*: (1, 4*GP) f32
               (each LSTM gate i,f,g,o padded to its own 128-lane block)
    out_ref:   (T, bb, 2*Hd) f32 time-major output tile
    gx*_ref:   (T*bb, 4*GP) f32 VMEM scratch (hoisted input projections)
    """
    T, bb = out_ref.shape[0], out_ref.shape[1]
    C = ids_ref.shape[-1]
    Vpad = table_ref.shape[0]
    Hd = out_ref.shape[-1] // 2

    # ---- phase 1: flattened input projection (big MXU matmuls, no per-t loop)
    TB = _pick_time_chunk(T, bb)
    RB = TB * bb                                        # rows per chunk
    vocab = lax.broadcasted_iota(jnp.int32, (RB, Vpad), 1)
    for tc in range(T // TB):                           # small static chunk count
        r0 = tc * RB
        idsc = ids_ref[r0:r0 + RB]                      # (RB, C) int32
        counts = jnp.zeros((RB, Vpad), jnp.float32)
        for c in range(C):                              # C is small and static
            counts += (vocab == idsc[:, c:c + 1]).astype(jnp.float32)
        # counts are small integers -> exact in bf16; one big MXU matmul.
        emb = jnp.dot(counts.astype(jnp.bfloat16), table_ref[...],
                      preferred_element_type=jnp.float32)           # (RB, E)
        gxf_ref[r0:r0 + RB] = (jnp.dot(emb, wih_f_ref[...],
                                       preferred_element_type=jnp.float32)
                               + b_f_ref[...])
        gxb_ref[r0:r0 + RB] = (jnp.dot(emb, wih_b_ref[...],
                                       preferred_element_type=jnp.float32)
                               + b_b_ref[...])

    # ---- phase 2: fused forward/backward LSTM recurrence --------------------
    def step(gx, h, c, whh_ref):
        g = gx + jnp.dot(h, whh_ref[...], preferred_element_type=jnp.float32)
        i = jax.nn.sigmoid(g[:, 0 * GP:1 * GP])         # every gate slice is a
        f = jax.nn.sigmoid(g[:, 1 * GP:2 * GP])         # 128-lane (vreg) block
        gg = jnp.tanh(g[:, 2 * GP:3 * GP])
        o = jax.nn.sigmoid(g[:, 3 * GP:4 * GP])
        c_new = f * c + i * gg                          # padded lanes stay exactly 0
        h_new = o * jnp.tanh(c_new)
        return h_new, c_new

    def gx_rows(gref, t):                               # aligned dynamic row slice
        return gref[pl.ds(pl.multiple_of(t * bb, 8), bb), :]

    zeros = jnp.zeros((bb, GP), jnp.float32)

    def rec_body(s, carry):
        hf, cf, hb, cb = carry
        tb = T - 1 - s
        hf, cf = step(gx_rows(gxf_ref, s), hf, cf, whh_f_ref)
        hb, cb = step(gx_rows(gxb_ref, tb), hb, cb, whh_b_ref)
        out_ref[s, :, 0:Hd] = hf[:, 0:Hd]               # both directions land in
        out_ref[tb, :, Hd:2 * Hd] = hb[:, 0:Hd]         # one ref: no XLA concat
        return (hf, cf, hb, cb)

    rec_unroll = True if T <= 32 else 4                 # full unroll only for small T
    lax.fori_loop(0, T, rec_body, (zeros, zeros, zeros, zeros),
                  unroll=rec_unroll)


# ---------------------------------------------------------------------------
# Parameter / input preparation (done once, outside the per-call path).
# ---------------------------------------------------------------------------
def prepare_char_table(table, gamma):
    """Fold bert_gamma into the embedding table, cast to bf16 and pad the vocab
    dimension up to a multiple of 128 (padded rows are never counted)."""
    V, _ = table.shape
    Vpad = ((V + 127) // 128) * 128
    t = (gamma[0, 0] * table).astype(jnp.bfloat16)
    return jnp.pad(t, ((0, Vpad - V), (0, 0)))


def prepare_bilstm_params(wih_f, whh_f, bih_f, bhh_f,
                          wih_b, whh_b, bih_b, bhh_b):
    """Pack PyTorch nn.LSTM weights (weight_ih (4Hd,E), weight_hh (4Hd,Hd),
    bias_ih, bias_hh per direction) into transposed weights where each gate
    block (i,f,g,o) is padded to its own 128-lane slot; b_ih+b_hh are folded."""
    Hd = whh_f.shape[1]

    def pack(wih, whh, bih, bhh):
        E = wih.shape[1]
        wih_p = jnp.zeros((E, 4 * GP), jnp.float32)
        whh_p = jnp.zeros((GP, 4 * GP), jnp.float32)
        b_p = jnp.zeros((1, 4 * GP), jnp.float32)
        for k in range(4):
            src = slice(k * Hd, (k + 1) * Hd)
            dst = slice(k * GP, k * GP + Hd)
            wih_p = wih_p.at[:, dst].set(wih[src, :].T)
            whh_p = whh_p.at[:Hd, dst].set(whh[src, :].T)
            b_p = b_p.at[:, dst].set((bih[src] + bhh[src])[None, :])
        return wih_p, whh_p, b_p

    wih_fp, whh_fp, b_fp = pack(wih_f, whh_f, bih_f, bhh_f)
    wih_bp, whh_bp, b_bp = pack(wih_b, whh_b, bih_b, bhh_b)
    return dict(Hd=Hd, wih_f=wih_fp, whh_f=whh_fp, b_f=b_fp,
                wih_b=wih_bp, whh_b=whh_bp, b_b=b_bp)


def _tile_ids(char_ids_padded, bb):
    """(Bp, T, C) int32 -> (Bp//bb, T*bb, C); tile rows ordered r = t*bb + i."""
    Bp, T, C = char_ids_padded.shape
    nj = Bp // bb
    x = jnp.transpose(char_ids_padded, (1, 0, 2))       # (T, Bp, C)  tiny int32
    x = x.reshape(T, nj, bb, C)
    x = jnp.transpose(x, (1, 0, 2, 3))                  # (nj, T, bb, C)
    return x.reshape(nj, T * bb, C)


# ---------------------------------------------------------------------------
# Forward wrapper (mirrors CHAREncoder2.forward).
# ---------------------------------------------------------------------------
def char_encoder2_forward(batch, table_scaled, lstm_params):
    """batch[4]=char_ids (B,T,C) int32; batch[1]=mask (eval-mode no-op)."""
    char_ids = batch[4]
    B, T, C = char_ids.shape
    Hd = lstm_params["Hd"]
    G4 = 4 * GP

    Bp = ((B + 7) // 8) * 8                              # sublane-aligned batch
    if Bp != B:
        char_ids = jnp.pad(char_ids, ((0, Bp - B), (0, 0), (0, 0)))

    vmem_limit = _vmem_limit_bytes()
    bb = _pick_batch_tile(Bp, T, C, Hd, budget_bytes=(vmem_limit * 7) // 10)
    nj = Bp // bb
    ids_tiles = _tile_ids(char_ids, bb)                  # (nj, T*bb, C) int32
    Vpad, E = table_scaled.shape

    full2d = lambda shape: pl.BlockSpec(shape, lambda j: (0, 0))

    out_tm = pl.pallas_call(
        char_encoder2_kernel,
        out_shape=jax.ShapeDtypeStruct((T, Bp, 2 * Hd), jnp.float32),
        grid_spec=pltpu.PrefetchScalarGridSpec(
            num_scalar_prefetch=0,
            grid=(nj,),
            in_specs=[pl.BlockSpec((None, T * bb, C), lambda j: (j, 0, 0)),
                      full2d((Vpad, E)),
                      full2d((E, G4)), full2d((GP, G4)), full2d((1, G4)),
                      full2d((E, G4)), full2d((GP, G4)), full2d((1, G4))],
            out_specs=pl.BlockSpec((T, bb, 2 * Hd), lambda j: (0, j, 0)),
            scratch_shapes=[pltpu.VMEM((T * bb, G4), jnp.float32),   # gates_x fwd
                            pltpu.VMEM((T * bb, G4), jnp.float32)]), # gates_x bwd
        compiler_params=pltpu.CompilerParams(
            dimension_semantics=("parallel",),
            vmem_limit_bytes=vmem_limit),
    )(ids_tiles, table_scaled,
      lstm_params["wih_f"], lstm_params["whh_f"], lstm_params["b_f"],
      lstm_params["wih_b"], lstm_params["whh_b"], lstm_params["b_b"])

    # Single cheap transpose back to PyTorch's batch_first layout; drop batch pad.
    return jnp.transpose(out_tm, (1, 0, 2))[:B]          # (B, T, hidden_dim)


# ---------------------------------------------------------------------------
# Pure-JAX reference (mirrors the PyTorch module, full-length sequences).
# ---------------------------------------------------------------------------
def _reference_forward(char_ids, table, gamma, raw):
    emb = table[char_ids]                                # (B, T, C, E)
    x = gamma[0, 0] * jnp.sum(emb, axis=2)               # (B, T, E)
    Hd = raw["whh_f"].shape[1]

    def run(x_seq, wih, whh, bih, bhh):
        Bv, Tv, _ = x_seq.shape
        h = jnp.zeros((Bv, Hd), jnp.float32)
        c = jnp.zeros((Bv, Hd), jnp.float32)
        hs = []
        for t in range(Tv):
            g = x_seq[:, t] @ wih.T + h @ whh.T + bih + bhh
            i = jax.nn.sigmoid(g[:, 0:Hd])
            f = jax.nn.sigmoid(g[:, Hd:2 * Hd])
            gg = jnp.tanh(g[:, 2 * Hd:3 * Hd])
            o = jax.nn.sigmoid(g[:, 3 * Hd:4 * Hd])
            c = f * c + i * gg
            h = o * jnp.tanh(c)
            hs.append(h)
        return jnp.stack(hs, axis=1)                     # (B, T, Hd)

    of = run(x, raw["wih_f"], raw["whh_f"], raw["bih_f"], raw["bhh_f"])
    ob = run(x[:, ::-1], raw["wih_b"], raw["whh_b"],
             raw["bih_b"], raw["bhh_b"])[:, ::-1]
    return jnp.concatenate([of, ob], axis=-1)


if __name__ == "__main__":
    B, T, C = 2, 8, 6            # batch, word-seq length, chars per word
    V, E, H = 399, 32, 64        # num_char_dict, embedding_size, hidden_dim
    Hd = H // 2                  # per-direction LSTM hidden size

    key = jax.random.PRNGKey(0)
    ks = jax.random.split(key, 13)

    table = 0.1 * jax.random.normal(ks[0], (V, E), jnp.float32)      # Embedding
    gamma = jax.random.normal(ks[1], (1, 1), jnp.float32)            # bert_gamma
    _bert_weights = jax.random.normal(ks[2], (12, 1), jnp.float32)   # unused

    bound = 1.0 / (Hd ** 0.5)    # PyTorch LSTM default uniform init range

    def unif(k, shape):
        return jax.random.uniform(k, shape, jnp.float32, -bound, bound)

    raw = dict(
        wih_f=unif(ks[3], (4 * Hd, E)), whh_f=unif(ks[4], (4 * Hd, Hd)),
        bih_f=unif(ks[5], (4 * Hd,)), bhh_f=unif(ks[6], (4 * Hd,)),
        wih_b=unif(ks[7], (4 * Hd, E)), whh_b=unif(ks[8], (4 * Hd, Hd)),
        bih_b=unif(ks[9], (4 * Hd,)), bhh_b=unif(ks[10], (4 * Hd,)),
    )
    lstm_params = prepare_bilstm_params(**raw)
    table_scaled = prepare_char_table(table, gamma)      # prepared once

    char_ids = jax.random.randint(ks[11], (B, T, C), 0, V, dtype=jnp.int32)
    input_mask = jnp.ones((B, T), jnp.int32)   # batch[1]: full-length sequences
    batch = (None, input_mask, None, None, char_ids)

    out = char_encoder2_forward(batch, table_scaled, lstm_params)
    out = jax.block_until_ready(out)
    assert out.shape == (B, T, H) and out.dtype == jnp.float32

    # Sanity check vs pure-JAX reference (loose tolerance: bf16 embedding matmul).
    ref = _reference_forward(char_ids, table, gamma, raw)
    err = float(jnp.max(jnp.abs(out - ref)))
    assert err < 1e-1, f"max |diff| vs reference too large: {err}"
    print("KERNEL_OK")
</pallas_src>

<mosaic_0001>
module attributes {stable_mosaic.version = 11 : i64} {
  func.func @char_encoder2_kernel(%arg0: i32, %arg1: memref<1x64x6xi32, #tpu.memory_space<vmem>>, %arg2: memref<512x32xbf16, #tpu.memory_space<vmem>>, %arg3: memref<32x512xf32, #tpu.memory_space<vmem>>, %arg4: memref<128x512xf32, #tpu.memory_space<vmem>>, %arg5: memref<1x512xf32, #tpu.memory_space<vmem>>, %arg6: memref<32x512xf32, #tpu.memory_space<vmem>>, %arg7: memref<128x512xf32, #tpu.memory_space<vmem>>, %arg8: memref<1x512xf32, #tpu.memory_space<vmem>>, %arg9: memref<8x8x64xf32, #tpu.memory_space<vmem>>, %arg10: memref<64x512xf32, #tpu.memory_space<vmem>>, %arg11: memref<64x512xf32, #tpu.memory_space<vmem>>) attributes {dimension_semantics = [#tpu.dimension_semantics<parallel>], iteration_bounds = array<i64: 1>, scalar_prefetch = 0 : i64, scratch_operands = 2 : i64, tpu.core_type = #tpu.core_type<tc>, window_params = [{transform_indices = @transform_0, window_bounds = array<i64: 1, 64, 6>}, {pipeline_mode = #tpu.pipeline_mode<synchronous>, transform_indices = @transform_1, window_bounds = array<i64: 512, 32>}, {pipeline_mode = #tpu.pipeline_mode<synchronous>, transform_indices = @transform_2, window_bounds = array<i64: 32, 512>}, {pipeline_mode = #tpu.pipeline_mode<synchronous>, transform_indices = @transform_3, window_bounds = array<i64: 128, 512>}, {pipeline_mode = #tpu.pipeline_mode<synchronous>, transform_indices = @transform_4, window_bounds = array<i64: 1, 512>}, {pipeline_mode = #tpu.pipeline_mode<synchronous>, transform_indices = @transform_5, window_bounds = array<i64: 32, 512>}, {pipeline_mode = #tpu.pipeline_mode<synchronous>, transform_indices = @transform_6, window_bounds = array<i64: 128, 512>}, {pipeline_mode = #tpu.pipeline_mode<synchronous>, transform_indices = @transform_7, window_bounds = array<i64: 1, 512>}, {transform_indices = @transform_8, window_bounds = array<i64: 8, 8, 64>}]} {
    %0 = tpu.iota {dimensions = array<i32: 1>} : vector<64x512xi32>
    %c0 = arith.constant 0 : index
    %c0_0 = arith.constant 0 : index
    %c0_1 = arith.constant 0 : index
    %1 = vector.load %arg1[%c0, %c0_0, %c0_1] : memref<1x64x6xi32, #tpu.memory_space<vmem>>, vector<1x64x6xi32>
    %2 = vector.shape_cast %1 : vector<1x64x6xi32> to vector<64x6xi32>
    %cst = arith.constant 0.000000e+00 : f32
    %3 = vector.broadcast %cst : f32 to vector<64x512xf32>
    %4 = vector.extract_strided_slice %2 {offsets = [0, 0], sizes = [64, 1], strides = [1, 1]} : vector<64x6xi32> to vector<64x1xi32>
    %5 = vector.broadcast %4 : vector<64x1xi32> to vector<64x512xi32>
    %6 = arith.cmpi eq, %0, %5 : vector<64x512xi32>
    %7 = arith.extui %6 : vector<64x512xi1> to vector<64x512xi32>
    %8 = arith.sitofp %7 : vector<64x512xi32> to vector<64x512xf32>
    %9 = arith.addf %3, %8 : vector<64x512xf32>
    %10 = vector.extract_strided_slice %2 {offsets = [0, 1], sizes = [64, 1], strides = [1, 1]} : vector<64x6xi32> to vector<64x1xi32>
    %11 = vector.broadcast %10 : vector<64x1xi32> to vector<64x512xi32>
    %12 = arith.cmpi eq, %0, %11 : vector<64x512xi32>
    %13 = arith.extui %12 : vector<64x512xi1> to vector<64x512xi32>
    %14 = arith.sitofp %13 : vector<64x512xi32> to vector<64x512xf32>
    %15 = arith.addf %9, %14 : vector<64x512xf32>
    %16 = vector.extract_strided_slice %2 {offsets = [0, 2], sizes = [64, 1], strides = [1, 1]} : vector<64x6xi32> to vector<64x1xi32>
    %17 = vector.broadcast %16 : vector<64x1xi32> to vector<64x512xi32>
    %18 = arith.cmpi eq, %0, %17 : vector<64x512xi32>
    %19 = arith.extui %18 : vector<64x512xi1> to vector<64x512xi32>
    %20 = arith.sitofp %19 : vector<64x512xi32> to vector<64x512xf32>
    %21 = arith.addf %15, %20 : vector<64x512xf32>
    %22 = vector.extract_strided_slice %2 {offsets = [0, 3], sizes = [64, 1], strides = [1, 1]} : vector<64x6xi32> to vector<64x1xi32>
    %23 = vector.broadcast %22 : vector<64x1xi32> to vector<64x512xi32>
    %24 = arith.cmpi eq, %0, %23 : vector<64x512xi32>
    %25 = arith.extui %24 : vector<64x512xi1> to vector<64x512xi32>
    %26 = arith.sitofp %25 : vector<64x512xi32> to vector<64x512xf32>
    %27 = arith.addf %21, %26 : vector<64x512xf32>
    %28 = vector.extract_strided_slice %2 {offsets = [0, 4], sizes = [64, 1], strides = [1, 1]} : vector<64x6xi32> to vector<64x1xi32>
    %29 = vector.broadcast %28 : vector<64x1xi32> to vector<64x512xi32>
    %30 = arith.cmpi eq, %0, %29 : vector<64x512xi32>
    %31 = arith.extui %30 : vector<64x512xi1> to vector<64x512xi32>
    %32 = arith.sitofp %31 : vector<64x512xi32> to vector<64x512xf32>
    %33 = arith.addf %27, %32 : vector<64x512xf32>
    %34 = vector.extract_strided_slice %2 {offsets = [0, 5], sizes = [64, 1], strides = [1, 1]} : vector<64x6xi32> to vector<64x1xi32>
    %35 = vector.broadcast %34 : vector<64x1xi32> to vector<64x512xi32>
    %36 = arith.cmpi eq, %0, %35 : vector<64x512xi32>
    %37 = arith.extui %36 : vector<64x512xi1> to vector<64x512xi32>
    %38 = arith.sitofp %37 : vector<64x512xi32> to vector<64x512xf32>
    %39 = arith.addf %33, %38 : vector<64x512xf32>
    %40 = arith.truncf %39 : vector<64x512xf32> to vector<64x512xbf16>
    %c0_2 = arith.constant 0 : index
    %c0_3 = arith.constant 0 : index
    %41 = vector.load %arg2[%c0_2, %c0_3] : memref<512x32xbf16, #tpu.memory_space<vmem>>, vector<512x32xbf16>
    %cst_4 = arith.constant dense<0.000000e+00> : vector<64x32xf32>
    %42 = tpu.matmul %40, %41, %cst_4 {dimension_numbers = #tpu.dot_dimension_numbers<[1], [0], [0], [1], [0, 0, 1, 1], [], []>} : vector<64x512xbf16>, vector<512x32xbf16>, vector<64x32xf32> -> vector<64x32xf32>
    %c0_5 = arith.constant 0 : index
    %c0_6 = arith.constant 0 : index
    %43 = vector.load %arg3[%c0_5, %c0_6] : memref<32x512xf32, #tpu.memory_space<vmem>>, vector<32x512xf32>
    %cst_7 = arith.constant dense<0.000000e+00> : vector<64x512xf32>
    %44 = tpu.matmul %42, %43, %cst_7 {dimension_numbers = #tpu.dot_dimension_numbers<[1], [0], [0], [1], [0, 0, 1, 1], [], []>} : vector<64x32xf32>, vector<32x512xf32>, vector<64x512xf32> -> vector<64x512xf32>
    %c0_8 = arith.constant 0 : index
    %c0_9 = arith.constant 0 : index
    %45 = vector.load %arg5[%c0_8, %c0_9] : memref<1x512xf32, #tpu.memory_space<vmem>>, vector<1x512xf32>
    %46 = vector.broadcast %45 : vector<1x512xf32> to vector<64x512xf32>
    %47 = arith.addf %44, %46 : vector<64x512xf32>
    %c0_10 = arith.constant 0 : index
    %c0_11 = arith.constant 0 : index
    %48 = vector.load %arg10[%c0_10, %c0_11] : memref<64x512xf32, #tpu.memory_space<vmem>>, vector<64x512xf32>
    tpu.vector_store %arg10[%c0_10, %c0_11], %47 {strides = array<i32>} : memref<64x512xf32, #tpu.memory_space<vmem>>, vector<64x512xf32>,
    %c0_12 = arith.constant 0 : index
    %c0_13 = arith.constant 0 : index
    %49 = vector.load %arg6[%c0_12, %c0_13] : memref<32x512xf32, #tpu.memory_space<vmem>>, vector<32x512xf32>
    %cst_14 = arith.constant dense<0.000000e+00> : vector<64x512xf32>
    %50 = tpu.matmul %42, %49, %cst_14 {dimension_numbers = #tpu.dot_dimension_numbers<[1], [0], [0], [1], [0, 0, 1, 1], [], []>} : vector<64x32xf32>, vector<32x512xf32>, vector<64x512xf32> -> vector<64x512xf32>
    %c0_15 = arith.constant 0 : index
    %c0_16 = arith.constant 0 : index
    %51 = vector.load %arg8[%c0_15, %c0_16] : memref<1x512xf32, #tpu.memory_space<vmem>>, vector<1x512xf32>
    %52 = vector.broadcast %51 : vector<1x512xf32> to vector<64x512xf32>
    %53 = arith.addf %50, %52 : vector<64x512xf32>
    %c0_17 = arith.constant 0 : index
    %c0_18 = arith.constant 0 : index
    %54 = vector.load %arg11[%c0_17, %c0_18] : memref<64x512xf32, #tpu.memory_space<vmem>>, vector<64x512xf32>
    tpu.vector_store %arg11[%c0_17, %c0_18], %53 {strides = array<i32>} : memref<64x512xf32, #tpu.memory_space<vmem>>, vector<64x512xf32>,
    %cst_19 = arith.constant 0.000000e+00 : f32
    %55 = vector.broadcast %cst_19 : f32 to vector<8x128xf32>
    %c0_i32 = arith.constant 0 : i32
    %c7_i32 = arith.constant 7 : i32
    %56 = arith.subi %c7_i32, %c0_i32 : i32
    %c8_i32 = arith.constant 8 : i32
    %57 = arith.muli %c0_i32, %c8_i32 : i32
    %58 = tpu.assume_multiple %57, 8 : i32
    %59 = arith.index_cast %58 : i32 to index
    %c0_20 = arith.constant 0 : index
    %60 = vector.load %arg10[%59, %c0_20] : memref<64x512xf32, #tpu.memory_space<vmem>>, vector<8x512xf32>
    %c0_21 = arith.constant 0 : index
    %c0_22 = arith.constant 0 : index
    %61 = vector.load %arg4[%c0_21, %c0_22] : memref<128x512xf32, #tpu.memory_space<vmem>>, vector<128x512xf32>
    %cst_23 = arith.constant dense<0.000000e+00> : vector<8x512xf32>
    %62 = tpu.matmul %55, %61, %cst_23 {dimension_numbers = #tpu.dot_dimension_numbers<[1], [0], [0], [1], [0, 0, 1, 1], [], []>} : vector<8x128xf32>, vector<128x512xf32>, vector<8x512xf32> -> vector<8x512xf32>
    %63 = arith.addf %60, %62 : vector<8x512xf32>
    %64 = vector.extract_strided_slice %63 {offsets = [0, 0], sizes = [8, 128], strides = [1, 1]} : vector<8x512xf32> to vector<8x128xf32>
    %65 = arith.negf %64 : vector<8x128xf32>
    %66 = math.exp %65 : vector<8x128xf32>
    %cst_24 = arith.constant 1.000000e+00 : f32
    %67 = vector.broadcast %cst_24 : f32 to vector<8x128xf32>
    %68 = arith.addf %67, %66 : vector<8x128xf32>
    %69 = arith.divf %67, %68 : vector<8x128xf32>
    %70 = vector.extract_strided_slice %63 {offsets = [0, 128], sizes = [8, 128], strides = [1, 1]} : vector<8x512xf32> to vector<8x128xf32>
    %71 = arith.negf %70 : vector<8x128xf32>
    %72 = math.exp %71 : vector<8x128xf32>
    %cst_25 = arith.constant 1.000000e+00 : f32
    %73 = vector.broadcast %cst_25 : f32 to vector<8x128xf32>
    %74 = arith.addf %73, %72 : vector<8x128xf32>
    %75 = arith.divf %73, %74 : vector<8x128xf32>
    %76 = vector.extract_strided_slice %63 {offsets = [0, 256], sizes = [8, 128], strides = [1, 1]} : vector<8x512xf32> to vector<8x128xf32>
    %77 = math.tanh %76 : vector<8x128xf32>
    %78 = vector.extract_strided_slice %63 {offsets = [0, 384], sizes = [8, 128], strides = [1, 1]} : vector<8x512xf32> to vector<8x128xf32>
    %79 = arith.negf %78 : vector<8x128xf32>
    %80 = math.exp %79 : vector<8x128xf32>
    %cst_26 = arith.constant 1.000000e+00 : f32
    %81 = vector.broadcast %cst_26 : f32 to vector<8x128xf32>
    %82 = arith.addf %81, %80 : vector<8x128xf32>
    %83 = arith.divf %81, %82 : vector<8x128xf32>
    %84 = arith.mulf %75, %55 : vector<8x128xf32>
    %85 = arith.mulf %69, %77 : vector<8x128xf32>
    %86 = arith.addf %84, %85 : vector<8x128xf32>
    %87 = math.tanh %86 : vector<8x128xf32>
    %88 = arith.mulf %83, %87 : vector<8x128xf32>
    %c8_i32_27 = arith.constant 8 : i32
    %89 = arith.muli %56, %c8_i32_27 : i32
    %90 = tpu.assume_multiple %89, 8 : i32
    %91 = arith.index_cast %90 : i32 to index
    %c0_28 = arith.constant 0 : index
    %92 = vector.load %arg11[%91, %c0_28] : memref<64x512xf32, #tpu.memory_space<vmem>>, vector<8x512xf32>
    %c0_29 = arith.constant 0 : index
    %c0_30 = arith.constant 0 : index
    %93 = vector.load %arg7[%c0_29, %c0_30] : memref<128x512xf32, #tpu.memory_space<vmem>>, vector<128x512xf32>
    %cst_31 = arith.constant dense<0.000000e+00> : vector<8x512xf32>
    %94 = tpu.matmul %55, %93, %cst_31 {dimension_numbers = #tpu.dot_dimension_numbers<[1], [0], [0], [1], [0, 0, 1, 1], [], []>} : vector<8x128xf32>, vector<128x512xf32>, vector<8x512xf32> -> vector<8x512xf32>
    %95 = arith.addf %92, %94 : vector<8x512xf32>
    %96 = vector.extract_strided_slice %95 {offsets = [0, 0], sizes = [8, 128], strides = [1, 1]} : vector<8x512xf32> to vector<8x128xf32>
    %97 = arith.negf %96 : vector<8x128xf32>
    %98 = math.exp %97 : vector<8x128xf32>
    %cst_32 = arith.constant 1.000000e+00 : f32
    %99 = vector.broadcast %cst_32 : f32 to vector<8x128xf32>
    %100 = arith.addf %99, %98 : vector<8x128xf32>
    %101 = arith.divf %99, %100 : vector<8x128xf32>
    %102 = vector.extract_strided_slice %95 {offsets = [0, 128], sizes = [8, 128], strides = [1, 1]} : vector<8x512xf32> to vector<8x128xf32>
    %103 = arith.negf %102 : vector<8x128xf32>
    %104 = math.exp %103 : vector<8x128xf32>
    %cst_33 = arith.constant 1.000000e+00 : f32
    %105 = vector.broadcast %cst_33 : f32 to vector<8x128xf32>
    %106 = arith.addf %105, %104 : vector<8x128xf32>
    %107 = arith.divf %105, %106 : vector<8x128xf32>
    %108 = vector.extract_strided_slice %95 {offsets = [0, 256], sizes = [8, 128], strides = [1, 1]} : vector<8x512xf32> to vector<8x128xf32>
    %109 = math.tanh %108 : vector<8x128xf32>
    %110 = vector.extract_strided_slice %95 {offsets = [0, 384], sizes = [8, 128], strides = [1, 1]} : vector<8x512xf32> to vector<8x128xf32>
    %111 = arith.negf %110 : vector<8x128xf32>
    %112 = math.exp %111 : vector<8x128xf32>
    %cst_34 = arith.constant 1.000000e+00 : f32
    %113 = vector.broadcast %cst_34 : f32 to vector<8x128xf32>
    %114 = arith.addf %113, %112 : vector<8x128xf32>
    %115 = arith.divf %113, %114 : vector<8x128xf32>
    %116 = arith.mulf %107, %55 : vector<8x128xf32>
    %117 = arith.mulf %101, %109 : vector<8x128xf32>
    %118 = arith.addf %116, %117 : vector<8x128xf32>
    %119 = math.tanh %118 : vector<8x128xf32>
    %120 = arith.mulf %115, %119 : vector<8x128xf32>
    %121 = vector.extract_strided_slice %88 {offsets = [0, 0], sizes = [8, 32], strides = [1, 1]} : vector<8x128xf32> to vector<8x32xf32>
    %122 = arith.index_cast %c0_i32 : i32 to index
    %c0_35 = arith.constant 0 : index
    %c0_36 = arith.constant 0 : index
    %123 = vector.load %arg9[%122, %c0_35, %c0_36] : memref<8x8x64xf32, #tpu.memory_space<vmem>>, vector<1x8x32xf32>
    %124 = vector.shape_cast %123 : vector<1x8x32xf32> to vector<8x32xf32>
    %125 = vector.shape_cast %121 : vector<8x32xf32> to vector<1x8x32xf32>
    tpu.vector_store %arg9[%122, %c0_35, %c0_36], %125 {strides = array<i32>} : memref<8x8x64xf32, #tpu.memory_space<vmem>>, vector<1x8x32xf32>,
    %126 = vector.extract_strided_slice %120 {offsets = [0, 0], sizes = [8, 32], strides = [1, 1]} : vector<8x128xf32> to vector<8x32xf32>
    %127 = arith.index_cast %56 : i32 to index
    %c0_37 = arith.constant 0 : index
    %c32 = arith.constant 32 : index
    %128 = vector.load %arg9[%127, %c0_37, %c32] : memref<8x8x64xf32, #tpu.memory_space<vmem>>, vector<1x8x32xf32>
    %129 = vector.shape_cast %128 : vector<1x8x32xf32> to vector<8x32xf32>
    %130 = vector.shape_cast %126 : vector<8x32xf32> to vector<1x8x32xf32>
    tpu.vector_store %arg9[%127, %c0_37, %c32], %130 {strides = array<i32>} : memref<8x8x64xf32, #tpu.memory_space<vmem>>, vector<1x8x32xf32>,
    %c1_i32 = arith.constant 1 : i32
    %c7_i32_38 = arith.constant 7 : i32
    %131 = arith.subi %c7_i32_38, %c1_i32 : i32
    %c8_i32_39 = arith.constant 8 : i32
    %132 = arith.muli %c1_i32, %c8_i32_39 : i32
    %133 = tpu.assume_multiple %132, 8 : i32
    %134 = arith.index_cast %133 : i32 to index
    %c0_40 = arith.constant 0 : index
    %135 = vector.load %arg10[%134, %c0_40] : memref<64x512xf32, #tpu.memory_space<vmem>>, vector<8x512xf32>
    %c0_41 = arith.constant 0 : index
    %c0_42 = arith.constant 0 : index
    %136 = vector.load %arg4[%c0_41, %c0_42] : memref<128x512xf32, #tpu.memory_space<vmem>>, vector<128x512xf32>
    %cst_43 = arith.constant dense<0.000000e+00> : vector<8x512xf32>
    %137 = tpu.matmul %88, %136, %cst_43 {dimension_numbers = #tpu.dot_dimension_numbers<[1], [0], [0], [1], [0, 0, 1, 1], [], []>} : vector<8x128xf32>, vector<128x512xf32>, vector<8x512xf32> -> vector<8x512xf32>
    %138 = arith.addf %135, %137 : vector<8x512xf32>
    %139 = vector.extract_strided_slice %138 {offsets = [0, 0], sizes = [8, 128], strides = [1, 1]} : vector<8x512xf32> to vector<8x128xf32>
    %140 = arith.negf %139 : vector<8x128xf32>
    %141 = math.exp %140 : vector<8x128xf32>
    %cst_44 = arith.constant 1.000000e+00 : f32
    %142 = vector.broadcast %cst_44 : f32 to vector<8x128xf32>
    %143 = arith.addf %142, %141 : vector<8x128xf32>
    %144 = arith.divf %142, %143 : vector<8x128xf32>
    %145 = vector.extract_strided_slice %138 {offsets = [0, 128], sizes = [8, 128], strides = [1, 1]} : vector<8x512xf32> to vector<8x128xf32>
    %146 = arith.negf %145 : vector<8x128xf32>
    %147 = math.exp %146 : vector<8x128xf32>
    %cst_45 = arith.constant 1.000000e+00 : f32
    %148 = vector.broadcast %cst_45 : f32 to vector<8x128xf32>
    %149 = arith.addf %148, %147 : vector<8x128xf32>
    %150 = arith.divf %148, %149 : vector<8x128xf32>
    %151 = vector.extract_strided_slice %138 {offsets = [0, 256], sizes = [8, 128], strides = [1, 1]} : vector<8x512xf32> to vector<8x128xf32>
    %152 = math.tanh %151 : vector<8x128xf32>
    %153 = vector.extract_strided_slice %138 {offsets = [0, 384], sizes = [8, 128], strides = [1, 1]} : vector<8x512xf32> to vector<8x128xf32>
    %154 = arith.negf %153 : vector<8x128xf32>
    %155 = math.exp %154 : vector<8x128xf32>
    %cst_46 = arith.constant 1.000000e+00 : f32
    %156 = vector.broadcast %cst_46 : f32 to vector<8x128xf32>
    %157 = arith.addf %156, %155 : vector<8x128xf32>
    %158 = arith.divf %156, %157 : vector<8x128xf32>
    %159 = arith.mulf %150, %86 : vector<8x128xf32>
    %160 = arith.mulf %144, %152 : vector<8x128xf32>
    %161 = arith.addf %159, %160 : vector<8x128xf32>
    %162 = math.tanh %161 : vector<8x128xf32>
    %163 = arith.mulf %158, %162 : vector<8x128xf32>
    %c8_i32_47 = arith.constant 8 : i32
    %164 = arith.muli %131, %c8_i32_47 : i32
    %165 = tpu.assume_multiple %164, 8 : i32
    %166 = arith.index_cast %165 : i32 to index
    %c0_48 = arith.constant 0 : index
    %167 = vector.load %arg11[%166, %c0_48] : memref<64x512xf32, #tpu.memory_space<vmem>>, vector<8x512xf32>
    %c0_49 = arith.constant 0 : index
    %c0_50 = arith.constant 0 : index
    %168 = vector.load %arg7[%c0_49, %c0_50] : memref<128x512xf32, #tpu.memory_space<vmem>>, vector<128x512xf32>
    %cst_51 = arith.constant dense<0.000000e+00> : vector<8x512xf32>
    %169 = tpu.matmul %120, %168, %cst_51 {dimension_numbers = #tpu.dot_dimension_numbers<[1], [0], [0], [1], [0, 0, 1, 1], [], []>} : vector<8x128xf32>, vector<128x512xf32>, vector<8x512xf32> -> vector<8x512xf32>
    %170 = arith.addf %167, %169 : vector<8x512xf32>
    %171 = vector.extract_strided_slice %170 {offsets = [0, 0], sizes = [8, 128], strides = [1, 1]} : vector<8x512xf32> to vector<8x128xf32>
    %172 = arith.negf %171 : vector<8x128xf32>
    %173 = math.exp %172 : vector<8x128xf32>
    %cst_52 = arith.constant 1.000000e+00 : f32
    %174 = vector.broadcast %cst_52 : f32 to vector<8x128xf32>
    %175 = arith.addf %174, %173 : vector<8x128xf32>
    %176 = arith.divf %174, %175 : vector<8x128xf32>
    %177 = vector.extract_strided_slice %170 {offsets = [0, 128], sizes = [8, 128], strides = [1, 1]} : vector<8x512xf32> to vector<8x128xf32>
    %178 = arith.negf %177 : vector<8x128xf32>
    %179 = math.exp %178 : vector<8x128xf32>
    %cst_53 = arith.constant 1.000000e+00 : f32
    %180 = vector.broadcast %cst_53 : f32 to vector<8x128xf32>
    %181 = arith.addf %180, %179 : vector<8x128xf32>
    %182 = arith.divf %180, %181 : vector<8x128xf32>
    %183 = vector.extract_strided_slice %170 {offsets = [0, 256], sizes = [8, 128], strides = [1, 1]} : vector<8x512xf32> to vector<8x128xf32>
    %184 = math.tanh %183 : vector<8x128xf32>
    %185 = vector.extract_strided_slice %170 {offsets = [0, 384], sizes = [8, 128], strides = [1, 1]} : vector<8x512xf32> to vector<8x128xf32>
    %186 = arith.negf %185 : vector<8x128xf32>
    %187 = math.exp %186 : vector<8x128xf32>
    %cst_54 = arith.constant 1.000000e+00 : f32
    %188 = vector.broadcast %cst_54 : f32 to vector<8x128xf32>
    %189 = arith.addf %188, %187 : vector<8x128xf32>
    %190 = arith.divf %188, %189 : vector<8x128xf32>
    %191 = arith.mulf %182, %118 : vector<8x128xf32>
    %192 = arith.mulf %176, %184 : vector<8x128xf32>
    %193 = arith.addf %191, %192 : vector<8x128xf32>
    %194 = math.tanh %193 : vector<8x128xf32>
    %195 = arith.mulf %190, %194 : vector<8x128xf32>
    %196 = vector.extract_strided_slice %163 {offsets = [0, 0], sizes = [8, 32], strides = [1, 1]} : vector<8x128xf32> to vector<8x32xf32>
    %197 = arith.index_cast %c1_i32 : i32 to index
    %c0_55 = arith.constant 0 : index
    %c0_56 = arith.constant 0 : index
    %198 = vector.load %arg9[%197, %c0_55, %c0_56] : memref<8x8x64xf32, #tpu.memory_space<vmem>>, vector<1x8x32xf32>
    %199 = vector.shape_cast %198 : vector<1x8x32xf32> to vector<8x32xf32>
    %200 = vector.shape_cast %196 : vector<8x32xf32> to vector<1x8x32xf32>
    tpu.vector_store %arg9[%197, %c0_55, %c0_56], %200 {strides = array<i32>} : memref<8x8x64xf32, #tpu.memory_space<vmem>>, vector<1x8x32xf32>,
    %201 = vector.extract_strided_slice %195 {offsets = [0, 0], sizes = [8, 32], strides = [1, 1]} : vector<8x128xf32> to vector<8x32xf32>
    %202 = arith.index_cast %131 : i32 to index
    %c0_57 = arith.constant 0 : index
    %c32_58 = arith.constant 32 : index
    %203 = vector.load %arg9[%202, %c0_57, %c32_58] : memref<8x8x64xf32, #tpu.memory_space<vmem>>, vector<1x8x32xf32>
    %204 = vector.shape_cast %203 : vector<1x8x32xf32> to vector<8x32xf32>
    %205 = vector.shape_cast %201 : vector<8x32xf32> to vector<1x8x32xf32>
    tpu.vector_store %arg9[%202, %c0_57, %c32_58], %205 {strides = array<i32>} : memref<8x8x64xf32, #tpu.memory_space<vmem>>, vector<1x8x32xf32>,
    %c2_i32 = arith.constant 2 : i32
    %c7_i32_59 = arith.constant 7 : i32
    %206 = arith.subi %c7_i32_59, %c2_i32 : i32
    %c8_i32_60 = arith.constant 8 : i32
    %207 = arith.muli %c2_i32, %c8_i32_60 : i32
    %208 = tpu.assume_multiple %207, 8 : i32
    %209 = arith.index_cast %208 : i32 to index
    %c0_61 = arith.constant 0 : index
    %210 = vector.load %arg10[%209, %c0_61] : memref<64x512xf32, #tpu.memory_space<vmem>>, vector<8x512xf32>
    %c0_62 = arith.constant 0 : index
    %c0_63 = arith.constant 0 : index
    %211 = vector.load %arg4[%c0_62, %c0_63] : memref<128x512xf32, #tpu.memory_space<vmem>>, vector<128x512xf32>
    %cst_64 = arith.constant dense<0.000000e+00> : vector<8x512xf32>
    %212 = tpu.matmul %163, %211, %cst_64 {dimension_numbers = #tpu.dot_dimension_numbers<[1], [0], [0], [1], [0, 0, 1, 1], [], []>} : vector<8x128xf32>, vector<128x512xf32>, vector<8x512xf32> -> vector<8x512xf32>
    %213 = arith.addf %210, %212 : vector<8x512xf32>
    %214 = vector.extract_strided_slice %213 {offsets = [0, 0], sizes = [8, 128], strides = [1, 1]} : vector<8x512xf32> to vector<8x128xf32>
    %215 = arith.negf %214 : vector<8x128xf32>
    %216 = math.exp %215 : vector<8x128xf32>
    %cst_65 = arith.constant 1.000000e+00 : f32
    %217 = vector.broadcast %cst_65 : f32 to vector<8x128xf32>
    %218 = arith.addf %217, %216 : vector<8x128xf32>
    %219 = arith.divf %217, %218 : vector<8x128xf32>
    %220 = vector.extract_strided_slice %213 {offsets = [0, 128], sizes = [8, 128], strides = [1, 1]} : vector<8x512xf32> to vector<8x128xf32>
    %221 = arith.negf %220 : vector<8x128xf32>
    %222 = math.exp %221 : vector<8x128xf32>
    %cst_66 = arith.constant 1.000000e+00 : f32
    %223 = vector.broadcast %cst_66 : f32 to vector<8x128xf32>
    %224 = arith.addf %223, %222 : vector<8x128xf32>
    %225 = arith.divf %223, %224 : vector<8x128xf32>
    %226 = vector.extract_strided_slice %213 {offsets = [0, 256], sizes = [8, 128], strides = [1, 1]} : vector<8x512xf32> to vector<8x128xf32>
    %227 = math.tanh %226 : vector<8x128xf32>
    %228 = vector.extract_strided_slice %213 {offsets = [0, 384], sizes = [8, 128], strides = [1, 1]} : vector<8x512xf32> to vector<8x128xf32>
    %229 = arith.negf %228 : vector<8x128xf32>
    %230 = math.exp %229 : vector<8x128xf32>
    %cst_67 = arith.constant 1.000000e+00 : f32
    %231 = vector.broadcast %cst_67 : f32 to vector<8x128xf32>
    %232 = arith.addf %231, %230 : vector<8x128xf32>
    %233 = arith.divf %231, %232 : vector<8x128xf32>
    %234 = arith.mulf %225, %161 : vector<8x128xf32>
    %235 = arith.mulf %219, %227 : vector<8x128xf32>
    %236 = arith.addf %234, %235 : vector<8x128xf32>
    %237 = math.tanh %236 : vector<8x128xf32>
    %238 = arith.mulf %233, %237 : vector<8x128xf32>
    %c8_i32_68 = arith.constant 8 : i32
    %239 = arith.muli %206, %c8_i32_68 : i32
    %240 = tpu.assume_multiple %239, 8 : i32
    %241 = arith.index_cast %240 : i32 to index
    %c0_69 = arith.constant 0 : index
    %242 = vector.load %arg11[%241, %c0_69] : memref<64x512xf32, #tpu.memory_space<vmem>>, vector<8x512xf32>
    %c0_70 = arith.constant 0 : index
    %c0_71 = arith.constant 0 : index
    %243 = vector.load %arg7[%c0_70, %c0_71] : memref<128x512xf32, #tpu.memory_space<vmem>>, vector<128x512xf32>
    %cst_72 = arith.constant dense<0.000000e+00> : vector<8x512xf32>
    %244 = tpu.matmul %195, %243, %cst_72 {dimension_numbers = #tpu.dot_dimension_numbers<[1], [0], [0], [1], [0, 0, 1, 1], [], []>} : vector<8x128xf32>, vector<128x512xf32>, vector<8x512xf32> -> vector<8x512xf32>
    %245 = arith.addf %242, %244 : vector<8x512xf32>
    %246 = vector.extract_strided_slice %245 {offsets = [0, 0], sizes = [8, 128], strides = [1, 1]} : vector<8x512xf32> to vector<8x128xf32>
    %247 = arith.negf %246 : vector<8x128xf32>
    %248 = math.exp %247 : vector<8x128xf32>
    %cst_73 = arith.constant 1.000000e+00 : f32
    %249 = vector.broadcast %cst_73 : f32 to vector<8x128xf32>
    %250 = arith.addf %249, %248 : vector<8x128xf32>
    %251 = arith.divf %249, %250 : vector<8x128xf32>
    %252 = vector.extract_strided_slice %245 {offsets = [0, 128], sizes = [8, 128], strides = [1, 1]} : vector<8x512xf32> to vector<8x128xf32>
    %253 = arith.negf %252 : vector<8x128xf32>
    %254 = math.exp %253 : vector<8x128xf32>
    %cst_74 = arith.constant 1.000000e+00 : f32
    %255 = vector.broadcast %cst_74 : f32 to vector<8x128xf32>
    %256 = arith.addf %255, %254 : vector<8x128xf32>
    %257 = arith.divf %255, %256 : vector<8x128xf32>
    %258 = vector.extract_strided_slice %245 {offsets = [0, 256], sizes = [8, 128], strides = [1, 1]} : vector<8x512xf32> to vector<8x128xf32>
    %259 = math.tanh %258 : vector<8x128xf32>
    %260 = vector.extract_strided_slice %245 {offsets = [0, 384], sizes = [8, 128], strides = [1, 1]} : vector<8x512xf32> to vector<8x128xf32>
    %261 = arith.negf %260 : vector<8x128xf32>
    %262 = math.exp %261 : vector<8x128xf32>
    %cst_75 = arith.constant 1.000000e+00 : f32
    %263 = vector.broadcast %cst_75 : f32 to vector<8x128xf32>
    %264 = arith.addf %263, %262 : vector<8x128xf32>
    %265 = arith.divf %263, %264 : vector<8x128xf32>
    %266 = arith.mulf %257, %193 : vector<8x128xf32>
    %267 = arith.mulf %251, %259 : vector<8x128xf32>
    %268 = arith.addf %266, %267 : vector<8x128xf32>
    %269 = math.tanh %268 : vector<8x128xf32>
    %270 = arith.mulf %265, %269 : vector<8x128xf32>
    %271 = vector.extract_strided_slice %238 {offsets = [0, 0], sizes = [8, 32], strides = [1, 1]} : vector<8x128xf32> to vector<8x32xf32>
    %272 = arith.index_cast %c2_i32 : i32 to index
    %c0_76 = arith.constant 0 : index
    %c0_77 = arith.constant 0 : index
    %273 = vector.load %arg9[%272, %c0_76, %c0_77] : memref<8x8x64xf32, #tpu.memory_space<vmem>>, vector<1x8x32xf32>
    %274 = vector.shape_cast %273 : vector<1x8x32xf32> to vector<8x32xf32>
    %275 = vector.shape_cast %271 : vector<8x32xf32> to vector<1x8x32xf32>
    tpu.vector_store %arg9[%272, %c0_76, %c0_77], %275 {strides = array<i32>} : memref<8x8x64xf32, #tpu.memory_space<vmem>>, vector<1x8x32xf32>,
    %276 = vector.extract_strided_slice %270 {offsets = [0, 0], sizes = [8, 32], strides = [1, 1]} : vector<8x128xf32> to vector<8x32xf32>
    %277 = arith.index_cast %206 : i32 to index
    %c0_78 = arith.constant 0 : index
    %c32_79 = arith.constant 32 : index
    %278 = vector.load %arg9[%277, %c0_78, %c32_79] : memref<8x8x64xf32, #tpu.memory_space<vmem>>, vector<1x8x32xf32>
    %279 = vector.shape_cast %278 : vector<1x8x32xf32> to vector<8x32xf32>
    %280 = vector.shape_cast %276 : vector<8x32xf32> to vector<1x8x32xf32>
    tpu.vector_store %arg9[%277, %c0_78, %c32_79], %280 {strides = array<i32>} : memref<8x8x64xf32, #tpu.memory_space<vmem>>, vector<1x8x32xf32>,
    %c3_i32 = arith.constant 3 : i32
    %c7_i32_80 = arith.constant 7 : i32
    %281 = arith.subi %c7_i32_80, %c3_i32 : i32
    %c8_i32_81 = arith.constant 8 : i32
    %282 = arith.muli %c3_i32, %c8_i32_81 : i32
    %283 = tpu.assume_multiple %282, 8 : i32
    %284 = arith.index_cast %283 : i32 to index
    %c0_82 = arith.constant 0 : index
    %285 = vector.load %arg10[%284, %c0_82] : memref<64x512xf32, #tpu.memory_space<vmem>>, vector<8x512xf32>
    %c0_83 = arith.constant 0 : index
    %c0_84 = arith.constant 0 : index
    %286 = vector.load %arg4[%c0_83, %c0_84] : memref<128x512xf32, #tpu.memory_space<vmem>>, vector<128x512xf32>
    %cst_85 = arith.constant dense<0.000000e+00> : vector<8x512xf32>
    %287 = tpu.matmul %238, %286, %cst_85 {dimension_numbers = #tpu.dot_dimension_numbers<[1], [0], [0], [1], [0, 0, 1, 1], [], []>} : vector<8x128xf32>, vector<128x512xf32>, vector<8x512xf32> -> vector<8x512xf32>
    %288 = arith.addf %285, %287 : vector<8x512xf32>
    %289 = vector.extract_strided_slice %288 {offsets = [0, 0], sizes = [8, 128], strides = [1, 1]} : vector<8x512xf32> to vector<8x128xf32>
    %290 = arith.negf %289 : vector<8x128xf32>
    %291 = math.exp %290 : vector<8x128xf32>
    %cst_86 = arith.constant 1.000000e+00 : f32
    %292 = vector.broadcast %cst_86 : f32 to vector<8x128xf32>
    %293 = arith.addf %292, %291 : vector<8x128xf32>
    %294 = arith.divf %292, %293 : vector<8x128xf32>
    %295 = vector.extract_strided_slice %288 {offsets = [0, 128], sizes = [8, 128], strides = [1, 1]} : vector<8x512xf32> to vector<8x128xf32>
    %296 = arith.negf %295 : vector<8x128xf32>
    %297 = math.exp %296 : vector<8x128xf32>
    %cst_87 = arith.constant 1.000000e+00 : f32
    %298 = vector.broadcast %cst_87 : f32 to vector<8x128xf32>
    %299 = arith.addf %298, %297 : vector<8x128xf32>
    %300 = arith.divf %298, %299 : vector<8x128xf32>
    %301 = vector.extract_strided_slice %288 {offsets = [0, 256], sizes = [8, 128], strides = [1, 1]} : vector<8x512xf32> to vector<8x128xf32>
    %302 = math.tanh %301 : vector<8x128xf32>
    %303 = vector.extract_strided_slice %288 {offsets = [0, 384], sizes = [8, 128], strides = [1, 1]} : vector<8x512xf32> to vector<8x128xf32>
    %304 = arith.negf %303 : vector<8x128xf32>
    %305 = math.exp %304 : vector<8x128xf32>
    %cst_88 = arith.constant 1.000000e+00 : f32
    %306 = vector.broadcast %cst_88 : f32 to vector<8x128xf32>
    %307 = arith.addf %306, %305 : vector<8x128xf32>
    %308 = arith.divf %306, %307 : vector<8x128xf32>
    %309 = arith.mulf %300, %236 : vector<8x128xf32>
    %310 = arith.mulf %294, %302 : vector<8x128xf32>
    %311 = arith.addf %309, %310 : vector<8x128xf32>
    %312 = math.tanh %311 : vector<8x128xf32>
    %313 = arith.mulf %308, %312 : vector<8x128xf32>
    %c8_i32_89 = arith.constant 8 : i32
    %314 = arith.muli %281, %c8_i32_89 : i32
    %315 = tpu.assume_multiple %314, 8 : i32
    %316 = arith.index_cast %315 : i32 to index
    %c0_90 = arith.constant 0 : index
    %317 = vector.load %arg11[%316, %c0_90] : memref<64x512xf32, #tpu.memory_space<vmem>>, vector<8x512xf32>
    %c0_91 = arith.constant 0 : index
    %c0_92 = arith.constant 0 : index
    %318 = vector.load %arg7[%c0_91, %c0_92] : memref<128x512xf32, #tpu.memory_space<vmem>>, vector<128x512xf32>
    %cst_93 = arith.constant dense<0.000000e+00> : vector<8x512xf32>
    %319 = tpu.matmul %270, %318, %cst_93 {dimension_numbers = #tpu.dot_dimension_numbers<[1], [0], [0], [1], [0, 0, 1, 1], [], []>} : vector<8x128xf32>, vector<128x512xf32>, vector<8x512xf32> -> vector<8x512xf32>
    %320 = arith.addf %317, %319 : vector<8x512xf32>
    %321 = vector.extract_strided_slice %320 {offsets = [0, 0], sizes = [8, 128], strides = [1, 1]} : vector<8x512xf32> to vector<8x128xf32>
    %322 = arith.negf %321 : vector<8x128xf32>
    %323 = math.exp %322 : vector<8x128xf32>
    %cst_94 = arith.constant 1.000000e+00 : f32
    %324 = vector.broadcast %cst_94 : f32 to vector<8x128xf32>
    %325 = arith.addf %324, %323 : vector<8x128xf32>
    %326 = arith.divf %324, %325 : vector<8x128xf32>
    %327 = vector.extract_strided_slice %320 {offsets = [0, 128], sizes = [8, 128], strides = [1, 1]} : vector<8x512xf32> to vector<8x128xf32>
    %328 = arith.negf %327 : vector<8x128xf32>
    %329 = math.exp %328 : vector<8x128xf32>
    %cst_95 = arith.constant 1.000000e+00 : f32
    %330 = vector.broadcast %cst_95 : f32 to vector<8x128xf32>
    %331 = arith.addf %330, %329 : vector<8x128xf32>
    %332 = arith.divf %330, %331 : vector<8x128xf32>
    %333 = vector.extract_strided_slice %320 {offsets = [0, 256], sizes = [8, 128], strides = [1, 1]} : vector<8x512xf32> to vector<8x128xf32>
    %334 = math.tanh %333 : vector<8x128xf32>
    %335 = vector.extract_strided_slice %320 {offsets = [0, 384], sizes = [8, 128], strides = [1, 1]} : vector<8x512xf32> to vector<8x128xf32>
    %336 = arith.negf %335 : vector<8x128xf32>
    %337 = math.exp %336 : vector<8x128xf32>
    %cst_96 = arith.constant 1.000000e+00 : f32
    %338 = vector.broadcast %cst_96 : f32 to vector<8x128xf32>
    %339 = arith.addf %338, %337 : vector<8x128xf32>
    %340 = arith.divf %338, %339 : vector<8x128xf32>
    %341 = arith.mulf %332, %268 : vector<8x128xf32>
    %342 = arith.mulf %326, %334 : vector<8x128xf32>
    %343 = arith.addf %341, %342 : vector<8x128xf32>
    %344 = math.tanh %343 : vector<8x128xf32>
    %345 = arith.mulf %340, %344 : vector<8x128xf32>
    %346 = vector.extract_strided_slice %313 {offsets = [0, 0], sizes = [8, 32], strides = [1, 1]} : vector<8x128xf32> to vector<8x32xf32>
    %347 = arith.index_cast %c3_i32 : i32 to index
    %c0_97 = arith.constant 0 : index
    %c0_98 = arith.constant 0 : index
    %348 = vector.load %arg9[%347, %c0_97, %c0_98] : memref<8x8x64xf32, #tpu.memory_space<vmem>>, vector<1x8x32xf32>
    %349 = vector.shape_cast %348 : vector<1x8x32xf32> to vector<8x32xf32>
    %350 = vector.shape_cast %346 : vector<8x32xf32> to vector<1x8x32xf32>
    tpu.vector_store %arg9[%347, %c0_97, %c0_98], %350 {strides = array<i32>} : memref<8x8x64xf32, #tpu.memory_space<vmem>>, vector<1x8x32xf32>,
    %351 = vector.extract_strided_slice %345 {offsets = [0, 0], sizes = [8, 32], strides = [1, 1]} : vector<8x128xf32> to vector<8x32xf32>
    %352 = arith.index_cast %281 : i32 to index
    %c0_99 = arith.constant 0 : index
    %c32_100 = arith.constant 32 : index
    %353 = vector.load %arg9[%352, %c0_99, %c32_100] : memref<8x8x64xf32, #tpu.memory_space<vmem>>, vector<1x8x32xf32>
    %354 = vector.shape_cast %353 : vector<1x8x32xf32> to vector<8x32xf32>
    %355 = vector.shape_cast %351 : vector<8x32xf32> to vector<1x8x32xf32>
    tpu.vector_store %arg9[%352, %c0_99, %c32_100], %355 {strides = array<i32>} : memref<8x8x64xf32, #tpu.memory_space<vmem>>, vector<1x8x32xf32>,
    %c4_i32 = arith.constant 4 : i32
    %c7_i32_101 = arith.constant 7 : i32
    %356 = arith.subi %c7_i32_101, %c4_i32 : i32
    %c8_i32_102 = arith.constant 8 : i32
    %357 = arith.muli %c4_i32, %c8_i32_102 : i32
    %358 = tpu.assume_multiple %357, 8 : i32
    %359 = arith.index_cast %358 : i32 to index
    %c0_103 = arith.constant 0 : index
    %360 = vector.load %arg10[%359, %c0_103] : memref<64x512xf32, #tpu.memory_space<vmem>>, vector<8x512xf32>
    %c0_104 = arith.constant 0 : index
    %c0_105 = arith.constant 0 : index
    %361 = vector.load %arg4[%c0_104, %c0_105] : memref<128x512xf32, #tpu.memory_space<vmem>>, vector<128x512xf32>
    %cst_106 = arith.constant dense<0.000000e+00> : vector<8x512xf32>
    %362 = tpu.matmul %313, %361, %cst_106 {dimension_numbers = #tpu.dot_dimension_numbers<[1], [0], [0], [1], [0, 0, 1, 1], [], []>} : vector<8x128xf32>, vector<128x512xf32>, vector<8x512xf32> -> vector<8x512xf32>
    %363 = arith.addf %360, %362 : vector<8x512xf32>
    %364 = vector.extract_strided_slice %363 {offsets = [0, 0], sizes = [8, 128], strides = [1, 1]} : vector<8x512xf32> to vector<8x128xf32>
    %365 = arith.negf %364 : vector<8x128xf32>
    %366 = math.exp %365 : vector<8x128xf32>
    %cst_107 = arith.constant 1.000000e+00 : f32
    %367 = vector.broadcast %cst_107 : f32 to vector<8x128xf32>
    %368 = arith.addf %367, %366 : vector<8x128xf32>
    %369 = arith.divf %367, %368 : vector<8x128xf32>
    %370 = vector.extract_strided_slice %363 {offsets = [0, 128], sizes = [8, 128], strides = [1, 1]} : vector<8x512xf32> to vector<8x128xf32>
    %371 = arith.negf %370 : vector<8x128xf32>
    %372 = math.exp %371 : vector<8x128xf32>
    %cst_108 = arith.constant 1.000000e+00 : f32
    %373 = vector.broadcast %cst_108 : f32 to vector<8x128xf32>
    %374 = arith.addf %373, %372 : vector<8x128xf32>
    %375 = arith.divf %373, %374 : vector<8x128xf32>
    %376 = vector.extract_strided_slice %363 {offsets = [0, 256], sizes = [8, 128], strides = [1, 1]} : vector<8x512xf32> to vector<8x128xf32>
    %377 = math.tanh %376 : vector<8x128xf32>
    %378 = vector.extract_strided_slice %363 {offsets = [0, 384], sizes = [8, 128], strides = [1, 1]} : vector<8x512xf32> to vector<8x128xf32>
    %379 = arith.negf %378 : vector<8x128xf32>
    %380 = math.exp %379 : vector<8x128xf32>
    %cst_109 = arith.constant 1.000000e+00 : f32
    %381 = vector.broadcast %cst_109 : f32 to vector<8x128xf32>
    %382 = arith.addf %381, %380 : vector<8x128xf32>
    %383 = arith.divf %381, %382 : vector<8x128xf32>
    %384 = arith.mulf %375, %311 : vector<8x128xf32>
    %385 = arith.mulf %369, %377 : vector<8x128xf32>
    %386 = arith.addf %384, %385 : vector<8x128xf32>
    %387 = math.tanh %386 : vector<8x128xf32>
    %388 = arith.mulf %383, %387 : vector<8x128xf32>
    %c8_i32_110 = arith.constant 8 : i32
    %389 = arith.muli %356, %c8_i32_110 : i32
    %390 = tpu.assume_multiple %389, 8 : i32
    %391 = arith.index_cast %390 : i32 to index
    %c0_111 = arith.constant 0 : index
    %392 = vector.load %arg11[%391, %c0_111] : memref<64x512xf32, #tpu.memory_space<vmem>>, vector<8x512xf32>
    %c0_112 = arith.constant 0 : index
    %c0_113 = arith.constant 0 : index
    %393 = vector.load %arg7[%c0_112, %c0_113] : memref<128x512xf32, #tpu.memory_space<vmem>>, vector<128x512xf32>
    %cst_114 = arith.constant dense<0.000000e+00> : vector<8x512xf32>
    %394 = tpu.matmul %345, %393, %cst_114 {dimension_numbers = #tpu.dot_dimension_numbers<[1], [0], [0], [1], [0, 0, 1, 1], [], []>} : vector<8x128xf32>, vector<128x512xf32>, vector<8x512xf32> -> vector<8x512xf32>
    %395 = arith.addf %392, %394 : vector<8x512xf32>
    %396 = vector.extract_strided_slice %395 {offsets = [0, 0], sizes = [8, 128], strides = [1, 1]} : vector<8x512xf32> to vector<8x128xf32>
    %397 = arith.negf %396 : vector<8x128xf32>
    %398 = math.exp %397 : vector<8x128xf32>
    %cst_115 = arith.constant 1.000000e+00 : f32
    %399 = vector.broadcast %cst_115 : f32 to vector<8x128xf32>
    %400 = arith.addf %399, %398 : vector<8x128xf32>
    %401 = arith.divf %399, %400 : vector<8x128xf32>
    %402 = vector.extract_strided_slice %395 {offsets = [0, 128], sizes = [8, 128], strides = [1, 1]} : vector<8x512xf32> to vector<8x128xf32>
    %403 = arith.negf %402 : vector<8x128xf32>
    %404 = math.exp %403 : vector<8x128xf32>
    %cst_116 = arith.constant 1.000000e+00 : f32
    %405 = vector.broadcast %cst_116 : f32 to vector<8x128xf32>
    %406 = arith.addf %405, %404 : vector<8x128xf32>
    %407 = arith.divf %405, %406 : vector<8x128xf32>
    %408 = vector.extract_strided_slice %395 {offsets = [0, 256], sizes = [8, 128], strides = [1, 1]} : vector<8x512xf32> to vector<8x128xf32>
    %409 = math.tanh %408 : vector<8x128xf32>
    %410 = vector.extract_strided_slice %395 {offsets = [0, 384], sizes = [8, 128], strides = [1, 1]} : vector<8x512xf32> to vector<8x128xf32>
    %411 = arith.negf %410 : vector<8x128xf32>
    %412 = math.exp %411 : vector<8x128xf32>
    %cst_117 = arith.constant 1.000000e+00 : f32
    %413 = vector.broadcast %cst_117 : f32 to vector<8x128xf32>
    %414 = arith.addf %413, %412 : vector<8x128xf32>
    %415 = arith.divf %413, %414 : vector<8x128xf32>
    %416 = arith.mulf %407, %343 : vector<8x128xf32>
    %417 = arith.mulf %401, %409 : vector<8x128xf32>
    %418 = arith.addf %416, %417 : vector<8x128xf32>
    %419 = math.tanh %418 : vector<8x128xf32>
    %420 = arith.mulf %415, %419 : vector<8x128xf32>
    %421 = vector.extract_strided_slice %388 {offsets = [0, 0], sizes = [8, 32], strides = [1, 1]} : vector<8x128xf32> to vector<8x32xf32>
    %422 = arith.index_cast %c4_i32 : i32 to index
    %c0_118 = arith.constant 0 : index
    %c0_119 = arith.constant 0 : index
    %423 = vector.load %arg9[%422, %c0_118, %c0_119] : memref<8x8x64xf32, #tpu.memory_space<vmem>>, vector<1x8x32xf32>
    %424 = vector.shape_cast %423 : vector<1x8x32xf32> to vector<8x32xf32>
    %425 = vector.shape_cast %421 : vector<8x32xf32> to vector<1x8x32xf32>
    tpu.vector_store %arg9[%422, %c0_118, %c0_119], %425 {strides = array<i32>} : memref<8x8x64xf32, #tpu.memory_space<vmem>>, vector<1x8x32xf32>,
    %426 = vector.extract_strided_slice %420 {offsets = [0, 0], sizes = [8, 32], strides = [1, 1]} : vector<8x128xf32> to vector<8x32xf32>
    %427 = arith.index_cast %356 : i32 to index
    %c0_120 = arith.constant 0 : index
    %c32_121 = arith.constant 32 : index
    %428 = vector.load %arg9[%427, %c0_120, %c32_121] : memref<8x8x64xf32, #tpu.memory_space<vmem>>, vector<1x8x32xf32>
    %429 = vector.shape_cast %428 : vector<1x8x32xf32> to vector<8x32xf32>
    %430 = vector.shape_cast %426 : vector<8x32xf32> to vector<1x8x32xf32>
    tpu.vector_store %arg9[%427, %c0_120, %c32_121], %430 {strides = array<i32>} : memref<8x8x64xf32, #tpu.memory_space<vmem>>, vector<1x8x32xf32>,
    %c5_i32 = arith.constant 5 : i32
    %c7_i32_122 = arith.constant 7 : i32
    %431 = arith.subi %c7_i32_122, %c5_i32 : i32
    %c8_i32_123 = arith.constant 8 : i32
    %432 = arith.muli %c5_i32, %c8_i32_123 : i32
    %433 = tpu.assume_multiple %432, 8 : i32
    %434 = arith.index_cast %433 : i32 to index
    %c0_124 = arith.constant 0 : index
    %435 = vector.load %arg10[%434, %c0_124] : memref<64x512xf32, #tpu.memory_space<vmem>>, vector<8x512xf32>
    %c0_125 = arith.constant 0 : index
    %c0_126 = arith.constant 0 : index
    %436 = vector.load %arg4[%c0_125, %c0_126] : memref<128x512xf32, #tpu.memory_space<vmem>>, vector<128x512xf32>
    %cst_127 = arith.constant dense<0.000000e+00> : vector<8x512xf32>
    %437 = tpu.matmul %388, %436, %cst_127 {dimension_numbers = #tpu.dot_dimension_numbers<[1], [0], [0], [1], [0, 0, 1, 1], [], []>} : vector<8x128xf32>, vector<128x512xf32>, vector<8x512xf32> -> vector<8x512xf32>
    %438 = arith.addf %435, %437 : vector<8x512xf32>
    %439 = vector.extract_strided_slice %438 {offsets = [0, 0], sizes = [8, 128], strides = [1, 1]} : vector<8x512xf32> to vector<8x128xf32>
    %440 = arith.negf %439 : vector<8x128xf32>
    %441 = math.exp %440 : vector<8x128xf32>
    %cst_128 = arith.constant 1.000000e+00 : f32
    %442 = vector.broadcast %cst_128 : f32 to vector<8x128xf32>
    %443 = arith.addf %442, %441 : vector<8x128xf32>
    %444 = arith.divf %442, %443 : vector<8x128xf32>
    %445 = vector.extract_strided_slice %438 {offsets = [0, 128], sizes = [8, 128], strides = [1, 1]} : vector<8x512xf32> to vector<8x128xf32>
    %446 = arith.negf %445 : vector<8x128xf32>
    %447 = math.exp %446 : vector<8x128xf32>
    %cst_129 = arith.constant 1.000000e+00 : f32
    %448 = vector.broadcast %cst_129 : f32 to vector<8x128xf32>
    %449 = arith.addf %448, %447 : vector<8x128xf32>
    %450 = arith.divf %448, %449 : vector<8x128xf32>
    %451 = vector.extract_strided_slice %438 {offsets = [0, 256], sizes = [8, 128], strides = [1, 1]} : vector<8x512xf32> to vector<8x128xf32>
    %452 = math.tanh %451 : vector<8x128xf32>
    %453 = vector.extract_strided_slice %438 {offsets = [0, 384], sizes = [8, 128], strides = [1, 1]} : vector<8x512xf32> to vector<8x128xf32>
    %454 = arith.negf %453 : vector<8x128xf32>
    %455 = math.exp %454 : vector<8x128xf32>
    %cst_130 = arith.constant 1.000000e+00 : f32
    %456 = vector.broadcast %cst_130 : f32 to vector<8x128xf32>
    %457 = arith.addf %456, %455 : vector<8x128xf32>
    %458 = arith.divf %456, %457 : vector<8x128xf32>
    %459 = arith.mulf %450, %386 : vector<8x128xf32>
    %460 = arith.mulf %444, %452 : vector<8x128xf32>
    %461 = arith.addf %459, %460 : vector<8x128xf32>
    %462 = math.tanh %461 : vector<8x128xf32>
    %463 = arith.mulf %458, %462 : vector<8x128xf32>
    %c8_i32_131 = arith.constant 8 : i32
    %464 = arith.muli %431, %c8_i32_131 : i32
    %465 = tpu.assume_multiple %464, 8 : i32
    %466 = arith.index_cast %465 : i32 to index
    %c0_132 = arith.constant 0 : index
    %467 = vector.load %arg11[%466, %c0_132] : memref<64x512xf32, #tpu.memory_space<vmem>>, vector<8x512xf32>
    %c0_133 = arith.constant 0 : index
    %c0_134 = arith.constant 0 : index
    %468 = vector.load %arg7[%c0_133, %c0_134] : memref<128x512xf32, #tpu.memory_space<vmem>>, vector<128x512xf32>
    %cst_135 = arith.constant dense<0.000000e+00> : vector<8x512xf32>
    %469 = tpu.matmul %420, %468, %cst_135 {dimension_numbers = #tpu.dot_dimension_numbers<[1], [0], [0], [1], [0, 0, 1, 1], [], []>} : vector<8x128xf32>, vector<128x512xf32>, vector<8x512xf32> -> vector<8x512xf32>
    %470 = arith.addf %467, %469 : vector<8x512xf32>
    %471 = vector.extract_strided_slice %470 {offsets = [0, 0], sizes = [8, 128], strides = [1, 1]} : vector<8x512xf32> to vector<8x128xf32>
    %472 = arith.negf %471 : vector<8x128xf32>
    %473 = math.exp %472 : vector<8x128xf32>
    %cst_136 = arith.constant 1.000000e+00 : f32
    %474 = vector.broadcast %cst_136 : f32 to vector<8x128xf32>
    %475 = arith.addf %474, %473 : vector<8x128xf32>
    %476 = arith.divf %474, %475 : vector<8x128xf32>
    %477 = vector.extract_strided_slice %470 {offsets = [0, 128], sizes = [8, 128], strides = [1, 1]} : vector<8x512xf32> to vector<8x128xf32>
    %478 = arith.negf %477 : vector<8x128xf32>
    %479 = math.exp %478 : vector<8x128xf32>
    %cst_137 = arith.constant 1.000000e+00 : f32
    %480 = vector.broadcast %cst_137 : f32 to vector<8x128xf32>
    %481 = arith.addf %480, %479 : vector<8x128xf32>
    %482 = arith.divf %480, %481 : vector<8x128xf32>
    %483 = vector.extract_strided_slice %470 {offsets = [0, 256], sizes = [8, 128], strides = [1, 1]} : vector<8x512xf32> to vector<8x128xf32>
    %484 = math.tanh %483 : vector<8x128xf32>
    %485 = vector.extract_strided_slice %470 {offsets = [0, 384], sizes = [8, 128], strides = [1, 1]} : vector<8x512xf32> to vector<8x128xf32>
    %486 = arith.negf %485 : vector<8x128xf32>
    %487 = math.exp %486 : vector<8x128xf32>
    %cst_138 = arith.constant 1.000000e+00 : f32
    %488 = vector.broadcast %cst_138 : f32 to vector<8x128xf32>
    %489 = arith.addf %488, %487 : vector<8x128xf32>
    %490 = arith.divf %488, %489 : vector<8x128xf32>
    %491 = arith.mulf %482, %418 : vector<8x128xf32>
    %492 = arith.mulf %476, %484 : vector<8x128xf32>
    %493 = arith.addf %491, %492 : vector<8x128xf32>
    %494 = math.tanh %493 : vector<8x128xf32>
    %495 = arith.mulf %490, %494 : vector<8x128xf32>
    %496 = vector.extract_strided_slice %463 {offsets = [0, 0], sizes = [8, 32], strides = [1, 1]} : vector<8x128xf32> to vector<8x32xf32>
    %497 = arith.index_cast %c5_i32 : i32 to index
    %c0_139 = arith.constant 0 : index
    %c0_140 = arith.constant 0 : index
    %498 = vector.load %arg9[%497, %c0_139, %c0_140] : memref<8x8x64xf32, #tpu.memory_space<vmem>>, vector<1x8x32xf32>
    %499 = vector.shape_cast %498 : vector<1x8x32xf32> to vector<8x32xf32>
    %500 = vector.shape_cast %496 : vector<8x32xf32> to vector<1x8x32xf32>
    tpu.vector_store %arg9[%497, %c0_139, %c0_140], %500 {strides = array<i32>} : memref<8x8x64xf32, #tpu.memory_space<vmem>>, vector<1x8x32xf32>,
    %501 = vector.extract_strided_slice %495 {offsets = [0, 0], sizes = [8, 32], strides = [1, 1]} : vector<8x128xf32> to vector<8x32xf32>
    %502 = arith.index_cast %431 : i32 to index
    %c0_141 = arith.constant 0 : index
    %c32_142 = arith.constant 32 : index
    %503 = vector.load %arg9[%502, %c0_141, %c32_142] : memref<8x8x64xf32, #tpu.memory_space<vmem>>, vector<1x8x32xf32>
    %504 = vector.shape_cast %503 : vector<1x8x32xf32> to vector<8x32xf32>
    %505 = vector.shape_cast %501 : vector<8x32xf32> to vector<1x8x32xf32>
    tpu.vector_store %arg9[%502, %c0_141, %c32_142], %505 {strides = array<i32>} : memref<8x8x64xf32, #tpu.memory_space<vmem>>, vector<1x8x32xf32>,
    %c6_i32 = arith.constant 6 : i32
    %c7_i32_143 = arith.constant 7 : i32
    %506 = arith.subi %c7_i32_143, %c6_i32 : i32
    %c8_i32_144 = arith.constant 8 : i32
    %507 = arith.muli %c6_i32, %c8_i32_144 : i32
    %508 = tpu.assume_multiple %507, 8 : i32
    %509 = arith.index_cast %508 : i32 to index
    %c0_145 = arith.constant 0 : index
    %510 = vector.load %arg10[%509, %c0_145] : memref<64x512xf32, #tpu.memory_space<vmem>>, vector<8x512xf32>
    %c0_146 = arith.constant 0 : index
    %c0_147 = arith.constant 0 : index
    %511 = vector.load %arg4[%c0_146, %c0_147] : memref<128x512xf32, #tpu.memory_space<vmem>>, vector<128x512xf32>
    %cst_148 = arith.constant dense<0.000000e+00> : vector<8x512xf32>
    %512 = tpu.matmul %463, %511, %cst_148 {dimension_numbers = #tpu.dot_dimension_numbers<[1], [0], [0], [1], [0, 0, 1, 1], [], []>} : vector<8x128xf32>, vector<128x512xf32>, vector<8x512xf32> -> vector<8x512xf32>
    %513 = arith.addf %510, %512 : vector<8x512xf32>
    %514 = vector.extract_strided_slice %513 {offsets = [0, 0], sizes = [8, 128], strides = [1, 1]} : vector<8x512xf32> to vector<8x128xf32>
    %515 = arith.negf %514 : vector<8x128xf32>
    %516 = math.exp %515 : vector<8x128xf32>
    %cst_149 = arith.constant 1.000000e+00 : f32
    %517 = vector.broadcast %cst_149 : f32 to vector<8x128xf32>
    %518 = arith.addf %517, %516 : vector<8x128xf32>
    %519 = arith.divf %517, %518 : vector<8x128xf32>
    %520 = vector.extract_strided_slice %513 {offsets = [0, 128], sizes = [8, 128], strides = [1, 1]} : vector<8x512xf32> to vector<8x128xf32>
    %521 = arith.negf %520 : vector<8x128xf32>
    %522 = math.exp %521 : vector<8x128xf32>
    %cst_150 = arith.constant 1.000000e+00 : f32
    %523 = vector.broadcast %cst_150 : f32 to vector<8x128xf32>
    %524 = arith.addf %523, %522 : vector<8x128xf32>
    %525 = arith.divf %523, %524 : vector<8x128xf32>
    %526 = vector.extract_strided_slice %513 {offsets = [0, 256], sizes = [8, 128], strides = [1, 1]} : vector<8x512xf32> to vector<8x128xf32>
    %527 = math.tanh %526 : vector<8x128xf32>
    %528 = vector.extract_strided_slice %513 {offsets = [0, 384], sizes = [8, 128], strides = [1, 1]} : vector<8x512xf32> to vector<8x128xf32>
    %529 = arith.negf %528 : vector<8x128xf32>
    %530 = math.exp %529 : vector<8x128xf32>
    %cst_151 = arith.constant 1.000000e+00 : f32
    %531 = vector.broadcast %cst_151 : f32 to vector<8x128xf32>
    %532 = arith.addf %531, %530 : vector<8x128xf32>
    %533 = arith.divf %531, %532 : vector<8x128xf32>
    %534 = arith.mulf %525, %461 : vector<8x128xf32>
    %535 = arith.mulf %519, %527 : vector<8x128xf32>
    %536 = arith.addf %534, %535 : vector<8x128xf32>
    %537 = math.tanh %536 : vector<8x128xf32>
    %538 = arith.mulf %533, %537 : vector<8x128xf32>
    %c8_i32_152 = arith.constant 8 : i32
    %539 = arith.muli %506, %c8_i32_152 : i32
    %540 = tpu.assume_multiple %539, 8 : i32
    %541 = arith.index_cast %540 : i32 to index
    %c0_153 = arith.constant 0 : index
    %542 = vector.load %arg11[%541, %c0_153] : memref<64x512xf32, #tpu.memory_space<vmem>>, vector<8x512xf32>
    %c0_154 = arith.constant 0 : index
    %c0_155 = arith.constant 0 : index
    %543 = vector.load %arg7[%c0_154, %c0_155] : memref<128x512xf32, #tpu.memory_space<vmem>>, vector<128x512xf32>
    %cst_156 = arith.constant dense<0.000000e+00> : vector<8x512xf32>
    %544 = tpu.matmul %495, %543, %cst_156 {dimension_numbers = #tpu.dot_dimension_numbers<[1], [0], [0], [1], [0, 0, 1, 1], [], []>} : vector<8x128xf32>, vector<128x512xf32>, vector<8x512xf32> -> vector<8x512xf32>
    %545 = arith.addf %542, %544 : vector<8x512xf32>
    %546 = vector.extract_strided_slice %545 {offsets = [0, 0], sizes = [8, 128], strides = [1, 1]} : vector<8x512xf32> to vector<8x128xf32>
    %547 = arith.negf %546 : vector<8x128xf32>
    %548 = math.exp %547 : vector<8x128xf32>
    %cst_157 = arith.constant 1.000000e+00 : f32
    %549 = vector.broadcast %cst_157 : f32 to vector<8x128xf32>
    %550 = arith.addf %549, %548 : vector<8x128xf32>
    %551 = arith.divf %549, %550 : vector<8x128xf32>
    %552 = vector.extract_strided_slice %545 {offsets = [0, 128], sizes = [8, 128], strides = [1, 1]} : vector<8x512xf32> to vector<8x128xf32>
    %553 = arith.negf %552 : vector<8x128xf32>
    %554 = math.exp %553 : vector<8x128xf32>
    %cst_158 = arith.constant 1.000000e+00 : f32
    %555 = vector.broadcast %cst_158 : f32 to vector<8x128xf32>
    %556 = arith.addf %555, %554 : vector<8x128xf32>
    %557 = arith.divf %555, %556 : vector<8x128xf32>
    %558 = vector.extract_strided_slice %545 {offsets = [0, 256], sizes = [8, 128], strides = [1, 1]} : vector<8x512xf32> to vector<8x128xf32>
    %559 = math.tanh %558 : vector<8x128xf32>
    %560 = vector.extract_strided_slice %545 {offsets = [0, 384], sizes = [8, 128], strides = [1, 1]} : vector<8x512xf32> to vector<8x128xf32>
    %561 = arith.negf %560 : vector<8x128xf32>
    %562 = math.exp %561 : vector<8x128xf32>
    %cst_159 = arith.constant 1.000000e+00 : f32
    %563 = vector.broadcast %cst_159 : f32 to vector<8x128xf32>
    %564 = arith.addf %563, %562 : vector<8x128xf32>
    %565 = arith.divf %563, %564 : vector<8x128xf32>
    %566 = arith.mulf %557, %493 : vector<8x128xf32>
    %567 = arith.mulf %551, %559 : vector<8x128xf32>
    %568 = arith.addf %566, %567 : vector<8x128xf32>
    %569 = math.tanh %568 : vector<8x128xf32>
    %570 = arith.mulf %565, %569 : vector<8x128xf32>
    %571 = vector.extract_strided_slice %538 {offsets = [0, 0], sizes = [8, 32], strides = [1, 1]} : vector<8x128xf32> to vector<8x32xf32>
    %572 = arith.index_cast %c6_i32 : i32 to index
    %c0_160 = arith.constant 0 : index
    %c0_161 = arith.constant 0 : index
    %573 = vector.load %arg9[%572, %c0_160, %c0_161] : memref<8x8x64xf32, #tpu.memory_space<vmem>>, vector<1x8x32xf32>
    %574 = vector.shape_cast %573 : vector<1x8x32xf32> to vector<8x32xf32>
    %575 = vector.shape_cast %571 : vector<8x32xf32> to vector<1x8x32xf32>
    tpu.vector_store %arg9[%572, %c0_160, %c0_161], %575 {strides = array<i32>} : memref<8x8x64xf32, #tpu.memory_space<vmem>>, vector<1x8x32xf32>,
    %576 = vector.extract_strided_slice %570 {offsets = [0, 0], sizes = [8, 32], strides = [1, 1]} : vector<8x128xf32> to vector<8x32xf32>
    %577 = arith.index_cast %506 : i32 to index
    %c0_162 = arith.constant 0 : index
    %c32_163 = arith.constant 32 : index
    %578 = vector.load %arg9[%577, %c0_162, %c32_163] : memref<8x8x64xf32, #tpu.memory_space<vmem>>, vector<1x8x32xf32>
    %579 = vector.shape_cast %578 : vector<1x8x32xf32> to vector<8x32xf32>
    %580 = vector.shape_cast %576 : vector<8x32xf32> to vector<1x8x32xf32>
    tpu.vector_store %arg9[%577, %c0_162, %c32_163], %580 {strides = array<i32>} : memref<8x8x64xf32, #tpu.memory_space<vmem>>, vector<1x8x32xf32>,
    %c7_i32_164 = arith.constant 7 : i32
    %c7_i32_165 = arith.constant 7 : i32
    %581 = arith.subi %c7_i32_165, %c7_i32_164 : i32
    %c8_i32_166 = arith.constant 8 : i32
    %582 = arith.muli %c7_i32_164, %c8_i32_166 : i32
    %583 = tpu.assume_multiple %582, 8 : i32
    %584 = arith.index_cast %583 : i32 to index
    %c0_167 = arith.constant 0 : index
    %585 = vector.load %arg10[%584, %c0_167] : memref<64x512xf32, #tpu.memory_space<vmem>>, vector<8x512xf32>
    %c0_168 = arith.constant 0 : index
    %c0_169 = arith.constant 0 : index
    %586 = vector.load %arg4[%c0_168, %c0_169] : memref<128x512xf32, #tpu.memory_space<vmem>>, vector<128x512xf32>
    %cst_170 = arith.constant dense<0.000000e+00> : vector<8x512xf32>
    %587 = tpu.matmul %538, %586, %cst_170 {dimension_numbers = #tpu.dot_dimension_numbers<[1], [0], [0], [1], [0, 0, 1, 1], [], []>} : vector<8x128xf32>, vector<128x512xf32>, vector<8x512xf32> -> vector<8x512xf32>
    %588 = arith.addf %585, %587 : vector<8x512xf32>
    %589 = vector.extract_strided_slice %588 {offsets = [0, 0], sizes = [8, 128], strides = [1, 1]} : vector<8x512xf32> to vector<8x128xf32>
    %590 = arith.negf %589 : vector<8x128xf32>
    %591 = math.exp %590 : vector<8x128xf32>
    %cst_171 = arith.constant 1.000000e+00 : f32
    %592 = vector.broadcast %cst_171 : f32 to vector<8x128xf32>
    %593 = arith.addf %592, %591 : vector<8x128xf32>
    %594 = arith.divf %592, %593 : vector<8x128xf32>
    %595 = vector.extract_strided_slice %588 {offsets = [0, 128], sizes = [8, 128], strides = [1, 1]} : vector<8x512xf32> to vector<8x128xf32>
    %596 = arith.negf %595 : vector<8x128xf32>
    %597 = math.exp %596 : vector<8x128xf32>
    %cst_172 = arith.constant 1.000000e+00 : f32
    %598 = vector.broadcast %cst_172 : f32 to vector<8x128xf32>
    %599 = arith.addf %598, %597 : vector<8x128xf32>
    %600 = arith.divf %598, %599 : vector<8x128xf32>
    %601 = vector.extract_strided_slice %588 {offsets = [0, 256], sizes = [8, 128], strides = [1, 1]} : vector<8x512xf32> to vector<8x128xf32>
    %602 = math.tanh %601 : vector<8x128xf32>
    %603 = vector.extract_strided_slice %588 {offsets = [0, 384], sizes = [8, 128], strides = [1, 1]} : vector<8x512xf32> to vector<8x128xf32>
    %604 = arith.negf %603 : vector<8x128xf32>
    %605 = math.exp %604 : vector<8x128xf32>
    %cst_173 = arith.constant 1.000000e+00 : f32
    %606 = vector.broadcast %cst_173 : f32 to vector<8x128xf32>
    %607 = arith.addf %606, %605 : vector<8x128xf32>
    %608 = arith.divf %606, %607 : vector<8x128xf32>
    %609 = arith.mulf %600, %536 : vector<8x128xf32>
    %610 = arith.mulf %594, %602 : vector<8x128xf32>
    %611 = arith.addf %609, %610 : vector<8x128xf32>
    %612 = math.tanh %611 : vector<8x128xf32>
    %613 = arith.mulf %608, %612 : vector<8x128xf32>
    %c8_i32_174 = arith.constant 8 : i32
    %614 = arith.muli %581, %c8_i32_174 : i32
    %615 = tpu.assume_multiple %614, 8 : i32
    %616 = arith.index_cast %615 : i32 to index
    %c0_175 = arith.constant 0 : index
    %617 = vector.load %arg11[%616, %c0_175] : memref<64x512xf32, #tpu.memory_space<vmem>>, vector<8x512xf32>
    %c0_176 = arith.constant 0 : index
    %c0_177 = arith.constant 0 : index
    %618 = vector.load %arg7[%c0_176, %c0_177] : memref<128x512xf32, #tpu.memory_space<vmem>>, vector<128x512xf32>
    %cst_178 = arith.constant dense<0.000000e+00> : vector<8x512xf32>
    %619 = tpu.matmul %570, %618, %cst_178 {dimension_numbers = #tpu.dot_dimension_numbers<[1], [0], [0], [1], [0, 0, 1, 1], [], []>} : vector<8x128xf32>, vector<128x512xf32>, vector<8x512xf32> -> vector<8x512xf32>
    %620 = arith.addf %617, %619 : vector<8x512xf32>
    %621 = vector.extract_strided_slice %620 {offsets = [0, 0], sizes = [8, 128], strides = [1, 1]} : vector<8x512xf32> to vector<8x128xf32>
    %622 = arith.negf %621 : vector<8x128xf32>
    %623 = math.exp %622 : vector<8x128xf32>
    %cst_179 = arith.constant 1.000000e+00 : f32
    %624 = vector.broadcast %cst_179 : f32 to vector<8x128xf32>
    %625 = arith.addf %624, %623 : vector<8x128xf32>
    %626 = arith.divf %624, %625 : vector<8x128xf32>
    %627 = vector.extract_strided_slice %620 {offsets = [0, 128], sizes = [8, 128], strides = [1, 1]} : vector<8x512xf32> to vector<8x128xf32>
    %628 = arith.negf %627 : vector<8x128xf32>
    %629 = math.exp %628 : vector<8x128xf32>
    %cst_180 = arith.constant 1.000000e+00 : f32
    %630 = vector.broadcast %cst_180 : f32 to vector<8x128xf32>
    %631 = arith.addf %630, %629 : vector<8x128xf32>
    %632 = arith.divf %630, %631 : vector<8x128xf32>
    %633 = vector.extract_strided_slice %620 {offsets = [0, 256], sizes = [8, 128], strides = [1, 1]} : vector<8x512xf32> to vector<8x128xf32>
    %634 = math.tanh %633 : vector<8x128xf32>
    %635 = vector.extract_strided_slice %620 {offsets = [0, 384], sizes = [8, 128], strides = [1, 1]} : vector<8x512xf32> to vector<8x128xf32>
    %636 = arith.negf %635 : vector<8x128xf32>
    %637 = math.exp %636 : vector<8x128xf32>
    %cst_181 = arith.constant 1.000000e+00 : f32
    %638 = vector.broadcast %cst_181 : f32 to vector<8x128xf32>
    %639 = arith.addf %638, %637 : vector<8x128xf32>
    %640 = arith.divf %638, %639 : vector<8x128xf32>
    %641 = arith.mulf %632, %568 : vector<8x128xf32>
    %642 = arith.mulf %626, %634 : vector<8x128xf32>
    %643 = arith.addf %641, %642 : vector<8x128xf32>
    %644 = math.tanh %643 : vector<8x128xf32>
    %645 = arith.mulf %640, %644 : vector<8x128xf32>
    %646 = vector.extract_strided_slice %613 {offsets = [0, 0], sizes = [8, 32], strides = [1, 1]} : vector<8x128xf32> to vector<8x32xf32>
    %647 = arith.index_cast %c7_i32_164 : i32 to index
    %c0_182 = arith.constant 0 : index
    %c0_183 = arith.constant 0 : index
    %648 = vector.load %arg9[%647, %c0_182, %c0_183] : memref<8x8x64xf32, #tpu.memory_space<vmem>>, vector<1x8x32xf32>
    %649 = vector.shape_cast %648 : vector<1x8x32xf32> to vector<8x32xf32>
    %650 = vector.shape_cast %646 : vector<8x32xf32> to vector<1x8x32xf32>
    tpu.vector_store %arg9[%647, %c0_182, %c0_183], %650 {strides = array<i32>} : memref<8x8x64xf32, #tpu.memory_space<vmem>>, vector<1x8x32xf32>,
    %651 = vector.extract_strided_slice %645 {offsets = [0, 0], sizes = [8, 32], strides = [1, 1]} : vector<8x128xf32> to vector<8x32xf32>
    %652 = arith.index_cast %581 : i32 to index
    %c0_184 = arith.constant 0 : index
    %c32_185 = arith.constant 32 : index
    %653 = vector.load %arg9[%652, %c0_184, %c32_185] : memref<8x8x64xf32, #tpu.memory_space<vmem>>, vector<1x8x32xf32>
    %654 = vector.shape_cast %653 : vector<1x8x32xf32> to vector<8x32xf32>
    %655 = vector.shape_cast %651 : vector<8x32xf32> to vector<1x8x32xf32>
    tpu.vector_store %arg9[%652, %c0_184, %c32_185], %655 {strides = array<i32>} : memref<8x8x64xf32, #tpu.memory_space<vmem>>, vector<1x8x32xf32>,
    %c8_i32_186 = arith.constant 8 : i32
    return
  }
  func.func @transform_0(%arg0: i32) -> (i32, i32, i32) {
    %c0_i32 = arith.constant 0 : i32
    %c0_i32_0 = arith.constant 0 : i32
    %c0_i32_1 = arith.constant 0 : i32
    return %arg0, %c0_i32, %c0_i32_0 : i32, i32, i32
  }
  func.func @transform_1(%arg0: i32) -> (i32, i32) {
    %c0_i32 = arith.constant 0 : i32
    %c0_i32_0 = arith.constant 0 : i32
    %c0_i32_1 = arith.constant 0 : i32
    return %c0_i32, %c0_i32_0 : i32, i32
  }
  func.func @transform_2(%arg0: i32) -> (i32, i32) {
    %c0_i32 = arith.constant 0 : i32
    %c0_i32_0 = arith.constant 0 : i32
    %c0_i32_1 = arith.constant 0 : i32
    return %c0_i32, %c0_i32_0 : i32, i32
  }
  func.func @transform_3(%arg0: i32) -> (i32, i32) {
    %c0_i32 = arith.constant 0 : i32
    %c0_i32_0 = arith.constant 0 : i32
    %c0_i32_1 = arith.constant 0 : i32
    return %c0_i32, %c0_i32_0 : i32, i32
  }
  func.func @transform_4(%arg0: i32) -> (i32, i32) {
    %c0_i32 = arith.constant 0 : i32
    %c0_i32_0 = arith.constant 0 : i32
    %c0_i32_1 = arith.constant 0 : i32
    return %c0_i32, %c0_i32_0 : i32, i32
  }
  func.func @transform_5(%arg0: i32) -> (i32, i32) {
    %c0_i32 = arith.constant 0 : i32
    %c0_i32_0 = arith.constant 0 : i32
    %c0_i32_1 = arith.constant 0 : i32
    return %c0_i32, %c0_i32_0 : i32, i32
  }
  func.func @transform_6(%arg0: i32) -> (i32, i32) {
    %c0_i32 = arith.constant 0 : i32
    %c0_i32_0 = arith.constant 0 : i32
    %c0_i32_1 = arith.constant 0 : i32
    return %c0_i32, %c0_i32_0 : i32, i32
  }
  func.func @transform_7(%arg0: i32) -> (i32, i32) {
    %c0_i32 = arith.constant 0 : i32
    %c0_i32_0 = arith.constant 0 : i32
    %c0_i32_1 = arith.constant 0 : i32
    return %c0_i32, %c0_i32_0 : i32, i32
  }
  func.func @transform_8(%arg0: i32) -> (i32, i32, i32) {
    %c0_i32 = arith.constant 0 : i32
    %c0_i32_0 = arith.constant 0 : i32
    %c0_i32_1 = arith.constant 0 : i32
    return %c0_i32, %arg0, %c0_i32_0 : i32, i32, i32
  }
}

</mosaic_0001>

<bundles_post_ra>
// kernel: tpu_custom_call.1
= control target key start
LH: loop header
LB: loop body
LE: loop exit
PB: predicated region body
PF: predicated region fallthrough
CT: control target
= control target key end

     0   :  { %13 = vsyncpa [#allocation5], 0  ;;  %s10463_s0 = inlined_call_operand.vmem [shape: s32[1,64,6], index: 0, kind: input, shape index: {}]   ;;  %s10464_s1 = inlined_call_operand.vmem [shape: bf16[512,32], index: 1, kind: input, shape index: {}]   ;;  %s10465_s2 = inlined_call_operand.vmem [shape: f32[32,512], index: 2, kind: input, shape index: {}]   ;;  %s10466_s3 = inlined_call_operand.hbm [shape: f32[128,512], index: 3, kind: input, shape index: {}]   ;;  %s10467_s4 = inlined_call_operand.vmem [shape: f32[1,512], index: 4, kind: input, shape index: {}]   ;;  %s10468_s5 = inlined_call_operand.vmem [shape: f32[32,512], index: 5, kind: input, shape index: {}]   ;;  %s10469_s6 = inlined_call_operand.hbm [shape: f32[128,512], index: 6, kind: input, shape index: {}]   ;;  %s10470_s7 = inlined_call_operand.vmem [shape: f32[1,512], index: 7, kind: input, shape index: {}]   ;;  %s10471_s8 = inlined_call_operand.hbm [shape: f32[8,8,64], index: 8, kind: output, shape index: {}]  }
   0x1   :  { %14 = vsyncpa [#allocation8], 0 }
   0x2   :  { %15 = vsyncpa [#allocation6], 0  ;;  %s6720_s27 = smov [#allocation4]  }
   0x3   :  { %s27_s28 = sshll.u32 %s6720_s27, 4  ;;  %s28_s28 = int_to_ptr.vmem [resolvable:$true] %s27_s28 }
   0x4   :  { %s6662_s29 = scalar_lea.vmem %s28_s28, 8192  ;;  %p6667_p1 = scmp.lt.s32.totalorder %s28_s28, %s28_s28 }
   0x5   :  { %p6663_p0 = scmp.ne.s32.totalorder %s28_s28, %s6662_s29  ;;  %p6668_p2 = scmp.lt.s32.totalorder %s6662_s29, %s6662_s29 }
   0x7   :  { %p6669_p3 = por %p6668_p2, %p6667_p1 }
   0x9   :  { %p6670_p4 = pnand %p6669_p3, %p6663_p0 }
   0xb   :  { %6673 = shalt.err (!%p6670_p4)
}
   0xc   :  { %s6721_s30 = smov 512   ;;  %s6722_s9 = smov 32  }
   0xd   :  { %33 = dma.hbm_to_vmem [thread:$0]  %s10466_s3, 8192, %s28_s28, [#allocation5], %s6721_s30, %s6721_s30, %s6722_s9  }
   0xe   :  { %s6723_s12 = smov [#allocation7]  }
   0xf   :  { %s43_s13 = sshll.u32 %s6723_s12, 4  ;;  %s44_s13 = int_to_ptr.vmem [resolvable:$true] %s43_s13 }
  0x10   :  { %s6682_s14 = scalar_lea.vmem %s44_s13, 8192  ;;  %p6687_p6 = scmp.lt.s32.totalorder %s44_s13, %s44_s13 }
  0x11   :  { %p6683_p5 = scmp.ne.s32.totalorder %s44_s13, %s6682_s14  ;;  %p6688_p7 = scmp.lt.s32.totalorder %s6682_s14, %s6682_s14 }
  0x13   :  { %p6689_p8 = por %p6688_p7, %p6687_p6 }
  0x15   :  { %p6690_p9 = pnand %p6689_p8, %p6683_p5 }
  0x17   :  { %6693 = shalt.err (!%p6690_p9)
}
  0x18   :  { %49 = dma.hbm_to_vmem [thread:$0]  %s10469_s6, 8192, %s44_s13, [#allocation8], %s6721_s30, %s6721_s30, %s6722_s9  }
  0x19   :  { %6714 = dma.done.wait [#allocation5], 8192  }
  0x1a   :  { %6715 = vsyncadd [#allocation5], 4294959104 }
  0x1b   :  { %6716 = dma.done.wait [#allocation8], 8192  }
  0x1c   :  { %6717 = vsyncadd [#allocation8], 4294959104  ;;  %v6724_v0 = vmov 3   ;;  %v6725_v1 = vmov 1   ;;  %v6792_v2 = vld [vmem:[%s10463_s0 + $0x8] sm:$0xff]  ;;  %v6797_v3 = vld [vmem:[%s10463_s0] sm:$0xff]  ;;  %v10472_v46 = vlaneseq }
  0x1d   :  { %6340 = vset.pattern.permute.xlu0 %v6724_v0  ;;  %6337 = vset.pattern.permute.xlu1 %v6725_v1  ;;  %v6804_v4 = vld [vmem:[%s10463_s0 + $0x18] sm:$0xff]  ;;  %v6726_v5 = vmov 0   ;;  %v6727_v6 = vmov 2   ;;  %v6815_v7 = vld [vmem:[%s10463_s0 + $0x10] sm:$0xff]  ;;  %v6823_v8 = vld [vmem:[%s10463_s0 + $0x20] sm:$0xff]  ;;  %v6728_v9 = vmov 4  }
  0x1e   :  { %532 = vperm.xlu0 %6340, %v6792_v2   ;;  %225 = vperm.xlu1 %6337, %v6797_v3   ;;  %v6831_v10 = vld [vmem:[%s10463_s0 + $0x30] sm:$0xff]  ;;  %v6366_v11 = vld [vmem:[%s10464_s1 + $0x78] sm:$0xff]   ;;  %v6374_v19 = vld [vmem:[%s10464_s1 + $0x68] sm:$0xff]   ;;  %v6729_v29 = vmov 5   ;;  %v6993_v47 = vand.u32 127, %v10472_v46  ;;  %v10474_v57 = vmov 0.0  }
  0x1f   :  { %v6367_v12 = vld [vmem:[%s10464_s1 + $0xf8] sm:$0xff]   ;;  %6243 = vmatprep.subr.bf16.mxu0 %v6366_v11  ;;  %v6370_v15 = vld [vmem:[%s10464_s1 + $0x70] sm:$0xff]   ;;  %v6375_v20 = vld [vmem:[%s10464_s1 + $0xe8] sm:$0xff]  }
  0x20   :  { %v6368_v13 = vld [vmem:[%s10464_s1 + $0x38] sm:$0xff]   ;;  %6283 = vmatprep.subr.bf16.mxu1 %v6367_v12  ;;  %v6371_v16 = vld [vmem:[%s10464_s1 + $0xf0] sm:$0xff]   ;;  %v6873_v21 = vld [vmem:[%s10463_s0 + $0x28] sm:$0xff]  ;;  %v6997_v50 = vadd.s32 128, %v6993_v47  ;;  %v7000_v51 = vadd.s32 256, %v6993_v47  ;;  %v7003_v52 = vadd.s32 384, %v6993_v47 }
  0x21   :  { %v6369_v14 = vld [vmem:[%s10464_s1 + $0xb8] sm:$0xff]   ;;  %6244 = vmatpush3.bf16.msra.mxu0 %v6368_v13  ;;  %v6372_v17 = vld [vmem:[%s10464_s1 + $0x30] sm:$0xff]   ;;  %v6376_v22 = vld [vmem:[%s10464_s1 + $0x28] sm:$0xff]  }
  0x22   :  { %538 = vperm.xlu0 %6340, %v6804_v4   ;;  %228 = vperm.xlu1 %6337, %v6792_v2   ;;  %v6373_v18 = vld [vmem:[%s10464_s1 + $0xb0] sm:$0xff]   ;;  %v6377_v23 = vld [vmem:[%s10464_s1 + $0xa8] sm:$0xff]   ;;  %v6887_v24 = vld [vmem:[%s10463_s0 + $0x38] sm:$0xff] }
  0x23   :  { %6284 = vmatpush3.bf16.msra.mxu1 %v6369_v14  ;;  %6245 = vmatprep.subr.bf16.mxu0 %v6370_v15  ;;  %v6378_v25 = vld [vmem:[%s10464_s1 + $0x60] sm:$0xff]   ;;  %v6382_v30 = vld [vmem:[%s10464_s1 + $0x58] sm:$0xff]   ;;  %v6386_v34 = vld [vmem:[%s10464_s1 + $0x50] sm:$0xff]  }
  0x24   :  { %6285 = vmatprep.subr.bf16.mxu1 %v6371_v16  ;;  %v6379_v26 = vld [vmem:[%s10464_s1 + $0xe0] sm:$0xff]   ;;  %v6383_v31 = vld [vmem:[%s10464_s1 + $0xd8] sm:$0xff]   ;;  %v6387_v35 = vld [vmem:[%s10464_s1 + $0xd0] sm:$0xff]  }
  0x25   :  { %6246 = vmatpush3.bf16.msra.mxu0 %v6372_v17  ;;  %v6380_v27 = vld [vmem:[%s10464_s1 + $0x20] sm:$0xff]   ;;  %v6384_v32 = vld [vmem:[%s10464_s1 + $0x18] sm:$0xff]   ;;  %v6388_v36 = vld [vmem:[%s10464_s1 + $0x10] sm:$0xff]  }
  0x26   :  { %6347 = vset.pattern.permute.xlu0 %v6726_v5  ;;  %6338 = vset.pattern.permute.xlu1 %v6727_v6  ;;  %v6381_v28 = vld [vmem:[%s10464_s1 + $0xa0] sm:$0xff]   ;;  %v6385_v33 = vld [vmem:[%s10464_s1 + $0x98] sm:$0xff]   ;;  %v6389_v37 = vld [vmem:[%s10464_s1 + $0x90] sm:$0xff]  }
  0x27   :  { %73 = vperm.xlu0 %6347, %v6797_v3   ;;  %380 = vperm.xlu1 %6338, %v6792_v2   ;;  %v6390_v38 = vld [vmem:[%s10464_s1 + $0x48] sm:$0xff]   ;;  %v6394_v42 = vld [vmem:[%s10464_s1 + $0x40] sm:$0xff]  }
  0x28   :  { %6286 = vmatpush3.bf16.msra.mxu1 %v6373_v18  ;;  %6247 = vmatprep.subr.bf16.mxu0 %v6374_v19  ;;  %v6391_v39 = vld [vmem:[%s10464_s1 + $0xc8] sm:$0xff]   ;;  %v6395_v43 = vld [vmem:[%s10464_s1 + $0xc0] sm:$0xff]  }
  0x29   :  { %6287 = vmatprep.subr.bf16.mxu1 %v6375_v20  ;;  %6248 = vmatpush3.bf16.msra.mxu0 %v6376_v22  ;;  %v6392_v40 = vld [vmem:[%s10464_s1 + $0x8] sm:$0xff]   ;;  %v6396_v44 = vld [vmem:[%s10464_s1] sm:$0xff]  }
  0x2a   :  { %6249 = vmatprep.subr.bf16.mxu0 %v6378_v25  ;;  %v6393_v41 = vld [vmem:[%s10464_s1 + $0x88] sm:$0xff]   ;;  %v6397_v45 = vld [vmem:[%s10464_s1 + $0x80] sm:$0xff]  }
  0x2b   :  { %76 = vperm.xlu0 %6347, %v6792_v2   ;;  %6339 = vset.pattern.permute.xlu1 %v6724_v0 }
  0x2c   :  { %529 = vperm.xlu1 %6339, %v6797_v3   ;;  %6288 = vmatpush3.bf16.msra.mxu1 %v6377_v23 }
  0x2d   :  { %6289 = vmatprep.subr.bf16.mxu1 %v6379_v26  ;;  %6250 = vmatpush3.bf16.msra.mxu0 %v6380_v27 }
  0x2e   :  { %6251 = vmatprep.subr.bf16.mxu0 %v6382_v30 }
  0x2f   :  { %79 = vperm.xlu0 %6347, %v6815_v7  }
  0x30   :  { %6341 = vset.pattern.permute.xlu1 %v6728_v9  ;;  %6290 = vmatpush3.bf16.msra.mxu1 %v6381_v28 }
  0x31   :  { %681 = vperm.xlu1 %6341, %v6797_v3   ;;  %6291 = vmatprep.subr.bf16.mxu1 %v6383_v31 }
  0x32   :  { %6252 = vmatpush3.bf16.msra.mxu0 %v6384_v32 }
  0x33   :  { %85 = vperm.xlu0 %6347, %v6823_v8   ;;  %6253 = vmatprep.subr.bf16.mxu0 %v6386_v34  ;;  %v1401_v34 = vld [vmem:[%s10465_s2 + $0x78] sm:$0xff] }
  0x34   :  { %6292 = vmatpush3.bf16.msra.mxu1 %v6385_v33  ;;  %v1399_v33 = vld [vmem:[%s10465_s2 + $0x68] sm:$0xff] }
  0x35   :  { %684 = vperm.xlu1 %6341, %v6792_v2   ;;  %6293 = vmatprep.subr.bf16.mxu1 %v6387_v35 }
  0x36   :  { %6254 = vmatpush3.bf16.msra.mxu0 %v6388_v36 }
  0x37   :  { %91 = vperm.xlu0 %6347, %v6831_v10   ;;  %6255 = vmatprep.subr.bf16.mxu0 %v6390_v38 }
  0x38   :  { %6294 = vmatpush3.bf16.msra.mxu1 %v6389_v37 }
  0x39   :  { %6342 = vset.pattern.permute.xlu1 %v6726_v5  ;;  %6295 = vmatprep.subr.bf16.mxu1 %v6391_v39 }
  0x3a   :  { %82 = vperm.xlu1 %6342, %v6804_v4   ;;  %6256 = vmatpush3.bf16.msra.mxu0 %v6392_v40 }
  0x3b   :  { %6355 = vset.pattern.permute.xlu0 %v6725_v1  ;;  %6257 = vmatprep.subr.bf16.mxu0 %v6394_v42 }
  0x3c   :  { %234 = vperm.xlu0 %6355, %v6804_v4   ;;  %6296 = vmatpush3.bf16.msra.mxu1 %v6393_v41 }
  0x3d   :  { %6297 = vmatprep.subr.bf16.mxu1 %v6395_v43 }
  0x3e   :  { %6343 = vset.pattern.permute.xlu1 %v6725_v1  ;;  %6258 = vmatpush3.bf16.msra.mxu0 %v6396_v44 }
  0x3f   :  { %231 = vperm.xlu1 %6343, %v6815_v7   ;;  %1473 = vmatprep.subr.mxu0 %v1399_v33 }
  0x40   :  { %240 = vperm.xlu0 %6355, %v6873_v21   ;;  %6298 = vmatpush3.bf16.msra.mxu1 %v6397_v45 }
  0x41   :  { %1586 = vmatprep.subr.mxu1 %v1401_v34 }
  0x43   :  { %6344 = vset.pattern.permute.xlu1 %v6729_v29 }
  0x44   :  { %246 = vperm.xlu0 %6355, %v6887_v24   ;;  %833 = vperm.xlu1 %6344, %v6797_v3  }
  0x48   :  { %6358 = vset.pattern.permute.xlu0 %v6727_v6  ;;  %836 = vperm.xlu1 %6344, %v6792_v2  }
  0x49   :  { %377 = vperm.xlu0 %6358, %v6797_v3  }
  0x4c   :  { %6345 = vset.pattern.permute.xlu1 %v6727_v6 }
  0x4d   :  { %383 = vperm.xlu0 %6358, %v6815_v7   ;;  %386 = vperm.xlu1 %6345, %v6804_v4  }
  0x51   :  { %6346 = vset.pattern.permute.xlu1 %v6724_v0  ;;  %389 = vperm.xlu0 %6358, %v6823_v8  }
  0x52   :  { %535 = vperm.xlu1 %6346, %v6815_v7  }
  0x55   :  { %395 = vperm.xlu0 %6358, %v6831_v10  }
  0x56   :  { %6348 = vset.pattern.permute.xlu1 %v6728_v9 }
  0x57   :  { %687 = vperm.xlu1 %6348, %v6815_v7  }
  0x59   :  { %6360 = vset.pattern.permute.xlu0 %v6724_v0 }
  0x5a   :  { %544 = vperm.xlu0 %6360, %v6873_v21  }
  0x5b   :  { %690 = vperm.xlu1 %6348, %v6804_v4  }
  0x5e   :  { %550 = vperm.xlu0 %6360, %v6887_v24  }
  0x5f   :  { %6349 = vset.pattern.permute.xlu1 %v6726_v5 }
  0x60   :  { %88 = vperm.xlu1 %6349, %v6873_v21  }
  0x62   :  { %6364 = vset.pattern.permute.xlu0 %v6729_v29 }
  0x63   :  { %851 = vperm.xlu0 %6364, %v6831_v10  }
  0x64   :  { %6350 = vset.pattern.permute.xlu1 %v6725_v1 }
  0x65   :  { %237 = vperm.xlu1 %6350, %v6823_v8  }
  0x69   :  { %6351 = vset.pattern.permute.xlu1 %v6729_v29 }
  0x6a   :  { %839 = vperm.xlu1 %6351, %v6815_v7  }
  0x6e   :  { %842 = vperm.xlu1 %6351, %v6804_v4  }
  0x72   :  { %6352 = vset.pattern.permute.xlu1 %v6727_v6 }
  0x73   :  { %392 = vperm.xlu1 %6352, %v6873_v21  }
  0x77   :  { %6353 = vset.pattern.permute.xlu1 %v6724_v0 }
  0x78   :  { %541 = vperm.xlu1 %6353, %v6823_v8  }
  0x7c   :  { %6354 = vset.pattern.permute.xlu1 %v6728_v9 }
  0x7d   :  { %693 = vperm.xlu1 %6354, %v6823_v8  }
  0x81   :  { %696 = vperm.xlu1 %6354, %v6873_v21  }
  0x85   :  { %6356 = vset.pattern.permute.xlu1 %v6726_v5 }
  0x86   :  { %94 = vperm.xlu1 %6356, %v6887_v24  }
  0x8a   :  { %6357 = vset.pattern.permute.xlu1 %v6725_v1 }
  0x8b   :  { %243 = vperm.xlu1 %6357, %v6831_v10  }
  0x8f   :  { %6359 = vset.pattern.permute.xlu1 %v6729_v29 }
  0x90   :  { %845 = vperm.xlu1 %6359, %v6823_v8  }
  0x94   :  { %848 = vperm.xlu1 %6359, %v6873_v21  }
  0x98   :  { %6361 = vset.pattern.permute.xlu1 %v6727_v6 }
  0x99   :  { %398 = vperm.xlu1 %6361, %v6887_v24   ;;  %v226_v48 = vpop.permute.xlu1 %225  ;;  %v533_v49 = vpop.permute.xlu0 %532 }
  0x9a   :  { %vm248_vm0 = vcmp.eq.s32.totalorder %v6993_v47, %v226_v48  ;;  %vm249_vm1 = vcmp.eq.s32.totalorder %v6997_v50, %v226_v48  ;;  %vm250_vm2 = vcmp.eq.s32.totalorder %v7000_v51, %v226_v48  ;;  %vm251_vm3 = vcmp.eq.s32.totalorder %v7003_v52, %v226_v48 }
  0x9b   :  { %vm556_vm4 = vcmp.eq.s32.totalorder %v6993_v47, %v533_v49  ;;  %vm557_vm5 = vcmp.eq.s32.totalorder %v6997_v50, %v533_v49  ;;  %vm558_vm6 = vcmp.eq.s32.totalorder %v7000_v51, %v533_v49  ;;  %vm559_vm7 = vcmp.eq.s32.totalorder %v7003_v52, %v533_v49 }
  0x9c   :  { %v5971_v58 = vsel %vm248_vm0, 1.0, %v10474_v57  ;;  %v5972_v59 = vsel %vm249_vm1, 1.0, %v10474_v57  ;;  %v5973_v60 = vsel %vm250_vm2, 1.0, %v10474_v57  ;;  %v5974_v61 = vsel %vm251_vm3, 1.0, %v10474_v57 }
  0x9d   :  { %6362 = vset.pattern.permute.xlu1 %v6724_v0  ;;  %v229_v53 = vpop.permute.xlu1 %228  ;;  %v539_v54 = vpop.permute.xlu0 %538  ;;  %v7031_v62 = vsel %vm556_vm4, 1.0, %v10474_v57  ;;  %v7036_v63 = vsel %vm557_vm5, 1.0, %v10474_v57  ;;  %v7042_v0 = vsel %vm558_vm6, 1.0, %v10474_v57  ;;  %v7047_v1 = vsel %vm559_vm7, 1.0, %v10474_v57 }
  0x9e   :  { %547 = vperm.xlu1 %6362, %v6831_v10   ;;  %vm252_vm8 = vcmp.eq.s32.totalorder %v6993_v47, %v229_v53  ;;  %vm253_vm9 = vcmp.eq.s32.totalorder %v6997_v50, %v229_v53  ;;  %vm254_vm10 = vcmp.eq.s32.totalorder %v7000_v51, %v229_v53  ;;  %vm255_vm11 = vcmp.eq.s32.totalorder %v7003_v52, %v229_v53 }
  0x9f   :  { %v5975_v2 = vsel %vm252_vm8, 1.0, %v10474_v57  ;;  %v5976_v3 = vsel %vm253_vm9, 1.0, %v10474_v57  ;;  %v5977_v4 = vsel %vm254_vm10, 1.0, %v10474_v57  ;;  %vm564_vm12 = vcmp.eq.s32.totalorder %v6993_v47, %v539_v54 }
  0xa0   :  { %vm565_vm13 = vcmp.eq.s32.totalorder %v6997_v50, %v539_v54  ;;  %vm566_vm14 = vcmp.eq.s32.totalorder %v7000_v51, %v539_v54  ;;  %v5978_v6 = vsel %vm255_vm11, 1.0, %v10474_v57  ;;  %vm567_vm15 = vcmp.eq.s32.totalorder %v7003_v52, %v539_v54 }
  0xa1   :  { %v7069_v8 = vsel %vm564_vm12, 1.0, %v10474_v57  ;;  %v7079_v11 = vsel %vm567_vm15, 1.0, %v10474_v57 }
  0xa2   :  { %v74_v55 = vpop.permute.xlu0 %73  ;;  %6363 = vset.pattern.permute.xlu1 %v6728_v9  ;;  %v7018_v56 = vpop.permute.xlu1 %380  ;;  %v7072_v9 = vsel %vm565_vm13, 1.0, %v10474_v57 }
  0xa3   :  { %699 = vperm.xlu1 %6363, %v6831_v10   ;;  %vm96_vm0 = vcmp.eq.s32.totalorder %v6993_v47, %v74_v55  ;;  %vm97_vm1 = vcmp.eq.s32.totalorder %v6997_v50, %v74_v55  ;;  %vm98_vm2 = vcmp.eq.s32.totalorder %v7000_v51, %v74_v55  ;;  %vm99_vm3 = vcmp.eq.s32.totalorder %v7003_v52, %v74_v55 }
  0xa4   :  { %v7075_v10 = vsel %vm566_vm14, 1.0, %v10474_v57  ;;  %v5939_v12 = vsel %vm96_vm0, 1.0, %v10474_v57  ;;  %v5940_v13 = vsel %vm97_vm1, 1.0, %v10474_v57  ;;  %v5941_v16 = vsel %vm98_vm2, 1.0, %v10474_v57 }
  0xa5   :  { %v5942_v17 = vsel %vm99_vm3, 1.0, %v10474_v57  ;;  %vm404_vm8 = vcmp.eq.s32.totalorder %v6993_v47, %v7018_v56  ;;  %vm405_vm9 = vcmp.eq.s32.totalorder %v6997_v50, %v7018_v56  ;;  %vm406_vm10 = vcmp.eq.s32.totalorder %v7000_v51, %v7018_v56 }
  0xa6   :  { %v77_v5 = vpop.permute.xlu0 %76  ;;  %v7099_v21 = vadd.f32 %v5971_v58, %v5939_v12  ;;  %v7101_v22 = vadd.f32 %v5972_v59, %v5940_v13  ;;  %vm407_vm11 = vcmp.eq.s32.totalorder %v7003_v52, %v7018_v56  ;;  %v7105_v25 = vadd.f32 %v5973_v60, %v5941_v16 }
  0xa7   :  { %702 = vperm.xlu1 %6363, %v6887_v24   ;;  %v530_v7 = vpop.permute.xlu1 %529  ;;  %vm100_vm4 = vcmp.eq.s32.totalorder %v6993_v47, %v77_v5  ;;  %vm102_vm5 = vcmp.eq.s32.totalorder %v7000_v51, %v77_v5  ;;  %vm101_vm6 = vcmp.eq.s32.totalorder %v6997_v50, %v77_v5  ;;  %vm103_vm7 = vcmp.eq.s32.totalorder %v7003_v52, %v77_v5 }
  0xa8   :  { %v5943_v14 = vsel %vm100_vm4, 1.0, %v10474_v57  ;;  %v5945_v18 = vsel %vm102_vm5, 1.0, %v10474_v57  ;;  %v5944_v19 = vsel %vm101_vm6, 1.0, %v10474_v57  ;;  %v7107_v26 = vadd.f32 %v5974_v61, %v5942_v17 }
  0xa9   :  { %v348_v23 = vadd.f32 %v5975_v2, %v5943_v14  ;;  %v5946_v27 = vsel %vm103_vm7, 1.0, %v10474_v57  ;;  %v350_v28 = vadd.f32 %v5977_v4, %v5945_v18  ;;  %v7112_v30 = vsel %vm405_vm9, 1.0, %v10474_v57 }
  0xaa   :  { %v80_v15 = vpop.permute.xlu0 %79  ;;  %v6009_v31 = vsel %vm406_vm10, 1.0, %v10474_v57  ;;  %v7115_v32 = vadd.f32 %v5976_v3, %v5944_v19  ;;  %v7124_v35 = vsel %vm407_vm11, 1.0, %v10474_v57  ;;  %vm552_vm12 = vcmp.eq.s32.totalorder %v6993_v47, %v530_v7 }
  0xab   :  { %6365 = vset.pattern.permute.xlu1 %v6729_v29  ;;  %vm553_vm13 = vcmp.eq.s32.totalorder %v6997_v50, %v530_v7  ;;  %vm554_vm14 = vcmp.eq.s32.totalorder %v7000_v51, %v530_v7  ;;  %v7131_v37 = vadd.f32 %v5978_v6, %v5946_v27  ;;  %vm555_vm15 = vcmp.eq.s32.totalorder %v7003_v52, %v530_v7 }
  0xac   :  { %854 = vperm.xlu1 %6365, %v6887_v24   ;;  %v7097_v20 = vpop.permute.xlu1 %681  ;;  %v6007_v24 = vsel %vm404_vm8, 1.0, %v10474_v57  ;;  %vm104_vm0 = vcmp.eq.s32.totalorder %v6993_v47, %v80_v15  ;;  %v502_v39 = vadd.f32 %v6009_v31, %v350_v28  ;;  %vm105_vm1 = vcmp.eq.s32.totalorder %v6997_v50, %v80_v15 }
  0xad   :  { %v500_v38 = vadd.f32 %v6007_v24, %v348_v23  ;;  %vm106_vm2 = vcmp.eq.s32.totalorder %v7000_v51, %v80_v15  ;;  %vm107_vm3 = vcmp.eq.s32.totalorder %v7003_v52, %v80_v15  ;;  %v7139_v41 = vsel %vm552_vm12, 1.0, %v10474_v57 }
  0xae   :  { %v86_v29 = vpop.permute.xlu0 %85  ;;  %v7142_v42 = vsel %vm553_vm13, 1.0, %v10474_v57  ;;  %v7145_v43 = vsel %vm554_vm14, 1.0, %v10474_v57  ;;  %vm704_vm4 = vcmp.eq.s32.totalorder %v6993_v47, %v7097_v20  ;;  %v7150_v44 = vsel %vm555_vm15, 1.0, %v10474_v57 }
  0xaf   :  { %v7153_v45 = vsel %vm104_vm0, 1.0, %v10474_v57  ;;  %v7160_v48 = vsel %vm105_vm1, 1.0, %v10474_v57  ;;  %v7163_v49 = vsel %vm106_vm2, 1.0, %v10474_v57  ;;  %v7166_v53 = vsel %vm107_vm3, 1.0, %v10474_v57 }
  0xb0   :  { %v7129_v36 = vpop.permute.xlu1 %684  ;;  %vm706_vm7 = vcmp.eq.s32.totalorder %v7000_v51, %v7097_v20  ;;  %v7171_v55 = vsel %vm704_vm4, 1.0, %v10474_v57  ;;  %vm112_vm8 = vcmp.eq.s32.totalorder %v6993_v47, %v86_v29  ;;  %vm113_vm9 = vcmp.eq.s32.totalorder %v6997_v50, %v86_v29 }
  0xb1   :  { %vm708_vm5 = vcmp.eq.s32.totalorder %v6993_v47, %v7129_v36  ;;  %vm710_vm6 = vcmp.eq.s32.totalorder %v7000_v51, %v7129_v36  ;;  %vm114_vm10 = vcmp.eq.s32.totalorder %v7000_v51, %v86_v29  ;;  %vm115_vm11 = vcmp.eq.s32.totalorder %v7003_v52, %v86_v29 }
  0xb2   :  { %v92_v40 = vpop.permute.xlu0 %91  ;;  %v652_v56 = vadd.f32 %v7031_v62, %v500_v38  ;;  %v6071_v58 = vsel %vm708_vm5, 1.0, %v10474_v57  ;;  %v6073_v59 = vsel %vm710_vm6, 1.0, %v10474_v57  ;;  %v654_v61 = vadd.f32 %v7042_v0, %v502_v39 }
  0xb3   :  { %vm120_vm12 = vcmp.eq.s32.totalorder %v6993_v47, %v92_v40  ;;  %vm121_vm13 = vcmp.eq.s32.totalorder %v6997_v50, %v92_v40  ;;  %vm122_vm14 = vcmp.eq.s32.totalorder %v7000_v51, %v92_v40  ;;  %v7185_v2 = vsel %vm706_vm7, 1.0, %v10474_v57 }
  0xb4   :  { %v7188_v3 = vsel %vm112_vm8, 1.0, %v10474_v57  ;;  %v7191_v62 = vsel %vm113_vm9, 1.0, %v10474_v57  ;;  %vm123_vm15 = vcmp.eq.s32.totalorder %v7003_v52, %v92_v40  ;;  %v7195_v4 = vsel %vm114_vm10, 1.0, %v10474_v57 }
  0xb5   :  { %v83_v54 = vpop.permute.xlu1 %82  ;;  %v7198_v0 = vsel %vm115_vm11, 1.0, %v10474_v57  ;;  %v7200_v5 = vadd.f32 %v6071_v58, %v652_v56  ;;  %v7202_v6 = vadd.f32 %v6073_v59, %v654_v61  ;;  %v7205_v12 = vsel %vm120_vm12, 1.0, %v10474_v57 }
  0xb6   :  { %10767 = vst [vmem:[#allocation13_spill] sm:$0xff] %v7205_v12  ;;  %v7208_v13 = vsel %vm121_vm13, 1.0, %v10474_v57  ;;  %v7211_v14 = vsel %vm122_vm14, 1.0, %v10474_v57  ;;  %v7215_v16 = vsel %vm123_vm15, 1.0, %v10474_v57  ;;  %vm108_vm1 = vcmp.eq.s32.totalorder %v6993_v47, %v83_v54 }
  0xb7   :  { %v235_v60 = vpop.permute.xlu0 %234  ;;  %10768 = vst [vmem:[#allocation14_spill] sm:$0xff] %v7208_v13  ;;  %10769 = vst [vmem:[#allocation15_spill] sm:$0xff] %v7211_v14  ;;  %vm109_vm4 = vcmp.eq.s32.totalorder %v6997_v50, %v83_v54  ;;  %vm110_vm8 = vcmp.eq.s32.totalorder %v7000_v51, %v83_v54  ;;  %vm111_vm9 = vcmp.eq.s32.totalorder %v7003_v52, %v83_v54  ;;  %v5951_v18 = vsel %vm108_vm1, 1.0, %v10474_v57 }
  0xb8   :  { %vm260_vm0 = vcmp.eq.s32.totalorder %v6993_v47, %v235_v60  ;;  %10770 = vst [vmem:[#allocation16_spill] sm:$0xff] %v7215_v16  ;;  %vm261_vm2 = vcmp.eq.s32.totalorder %v6997_v50, %v235_v60  ;;  %vm262_vm3 = vcmp.eq.s32.totalorder %v7000_v51, %v235_v60  ;;  %vm263_vm5 = vcmp.eq.s32.totalorder %v7003_v52, %v235_v60 }
  0xb9   :  { %v5983_v17 = vsel %vm260_vm0, 1.0, %v10474_v57  ;;  %v5984_v19 = vsel %vm261_vm2, 1.0, %v10474_v57  ;;  %v5985_v23 = vsel %vm262_vm3, 1.0, %v10474_v57  ;;  %v5952_v29 = vsel %vm109_vm4, 1.0, %v10474_v57 }
  0xba   :  { %v232_v7 = vpop.permute.xlu1 %231  ;;  %v5986_v24 = vsel %vm263_vm5, 1.0, %v10474_v57  ;;  %v5953_v34 = vsel %vm110_vm8, 1.0, %v10474_v57  ;;  %v5954_v38 = vsel %vm111_vm9, 1.0, %v10474_v57  ;;  %v7242_v39 = vadd.f32 %v5983_v17, %v5951_v18 }
  0xbb   :  { %v241_v15 = vpop.permute.xlu0 %240  ;;  %vm256_vm6 = vcmp.eq.s32.totalorder %v6993_v47, %v232_v7  ;;  %vm257_vm7 = vcmp.eq.s32.totalorder %v6997_v50, %v232_v7  ;;  %vm258_vm10 = vcmp.eq.s32.totalorder %v7000_v51, %v232_v7  ;;  %vm259_vm11 = vcmp.eq.s32.totalorder %v7003_v52, %v232_v7 }
  0xbc   :  { %v5979_v31 = vsel %vm256_vm6, 1.0, %v10474_v57  ;;  %v5980_v33 = vsel %vm257_vm7, 1.0, %v10474_v57  ;;  %v5981_v40 = vsel %vm258_vm10, 1.0, %v10474_v57  ;;  %v7245_v54 = vadd.f32 %v5984_v19, %v5952_v29 }
  0xbd   :  { %v7247_v56 = vadd.f32 %v5985_v23, %v5953_v34  ;;  %v5982_v58 = vsel %vm259_vm11, 1.0, %v10474_v57  ;;  %vm268_vm12 = vcmp.eq.s32.totalorder %v6993_v47, %v241_v15  ;;  %v7251_v59 = vadd.f32 %v5986_v24, %v5954_v38 }
  0xbe   :  { %v352_v60 = vadd.f32 %v5979_v31, %v7153_v45  ;;  %v353_v61 = vadd.f32 %v5980_v33, %v7160_v48  ;;  %vm269_vm13 = vcmp.eq.s32.totalorder %v6997_v50, %v241_v15  ;;  %vm705_vm14 = vcmp.eq.s32.totalorder %v6997_v50, %v7097_v20 }
  0xbf   :  { %v7232_v27 = vpop.permute.xlu1 %833  ;;  %v7234_v28 = vpop.permute.xlu0 %246  ;;  %v354_v17 = vadd.f32 %v5981_v40, %v7163_v49  ;;  %vm270_vm15 = vcmp.eq.s32.totalorder %v7000_v51, %v241_v15  ;;  %vm271_vm0 = vcmp.eq.s32.totalorder %v7003_v52, %v241_v15  ;;  %v355_v45 = vadd.f32 %v5982_v58, %v7166_v53 }
  0xc0   :  { %vm856_vm1 = vcmp.eq.s32.totalorder %v6993_v47, %v7232_v27  ;;  %v7267_v48 = vsel %vm268_vm12, 1.0, %v10474_v57  ;;  %vm858_vm2 = vcmp.eq.s32.totalorder %v7000_v51, %v7232_v27  ;;  %v7273_v49 = vsel %vm269_vm13, 1.0, %v10474_v57 }
  0xc1   :  { %vm276_vm4 = vcmp.eq.s32.totalorder %v6993_v47, %v7234_v28  ;;  %v7280_v53 = vsel %vm270_vm15, 1.0, %v10474_v57  ;;  %v7283_v15 = vsel %vm271_vm0, 1.0, %v10474_v57  ;;  %v7286_v19 = vsel %vm856_vm1, 1.0, %v10474_v57 }
  0xc2   :  { %10771 = vst [vmem:[#allocation17_spill] sm:$0xff] %v7280_v53  ;;  %10772 = vst [vmem:[#allocation18_spill] sm:$0xff] %v7283_v15  ;;  %vm277_vm7 = vcmp.eq.s32.totalorder %v6997_v50, %v7234_v28  ;;  %vm709_vm8 = vcmp.eq.s32.totalorder %v6997_v50, %v7129_v36  ;;  %v7293_v23 = vsel %vm858_vm2, 1.0, %v10474_v57  ;;  %v7301_v33 = vsel %vm276_vm4, 1.0, %v10474_v57 }
  0xc3   :  { %v7256_v7 = vpop.permute.xlu1 %836  ;;  %10773 = vst [vmem:[#allocation19_spill] sm:$0xff] %v7301_v33  ;;  %vm707_vm12 = vcmp.eq.s32.totalorder %v7003_v52, %v7097_v20  ;;  %vm711_vm13 = vcmp.eq.s32.totalorder %v7003_v52, %v7129_v36  ;;  %v7311_v40 = vsel %vm277_vm7, 1.0, %v10474_v57  ;;  %vm857_vm7 = vcmp.eq.s32.totalorder %v6997_v50, %v7232_v27 }
  0xc4   :  { %v378_v18 = vpop.permute.xlu0 %377  ;;  %vm860_vm9 = vcmp.eq.s32.totalorder %v6993_v47, %v7256_v7  ;;  %vm862_vm10 = vcmp.eq.s32.totalorder %v7000_v51, %v7256_v7  ;;  %10774 = vst [vmem:[#allocation20_spill] sm:$0xff] %v7311_v40 }
  0xc5   :  { %vm400_vm3 = vcmp.eq.s32.totalorder %v6993_v47, %v378_v18  ;;  %vm401_vm5 = vcmp.eq.s32.totalorder %v6997_v50, %v378_v18  ;;  %vm402_vm6 = vcmp.eq.s32.totalorder %v7000_v51, %v378_v18  ;;  %vm403_vm11 = vcmp.eq.s32.totalorder %v7003_v52, %v378_v18 }
  0xc6   :  { %v6003_v29 = vsel %vm400_vm3, 1.0, %v10474_v57  ;;  %v6004_v34 = vsel %vm401_vm5, 1.0, %v10474_v57  ;;  %v6005_v38 = vsel %vm402_vm6, 1.0, %v10474_v57  ;;  %v7317_v58 = vsel %vm860_vm9, 1.0, %v10474_v57 }
  0xc7   :  { %v7320_v18 = vsel %vm862_vm10, 1.0, %v10474_v57  ;;  %v496_v46 = vadd.f32 %v6003_v29, %v7099_v21  ;;  %v6006_v16 = vsel %vm403_vm11, 1.0, %v10474_v57  ;;  %v497_v14 = vadd.f32 %v6004_v34, %v7101_v22 }
  0xc8   :  { %v384_v24 = vpop.permute.xlu0 %383  ;;  %v387_v31 = vpop.permute.xlu1 %386  ;;  %v498_v13 = vadd.f32 %v6005_v38, %v7105_v25  ;;  %v501_v21 = vadd.f32 %v7112_v30, %v7115_v32  ;;  %v499_v22 = vadd.f32 %v6006_v16, %v7107_v26  ;;  %v6068_v34 = vsel %vm705_vm14, 1.0, %v10474_v57 }
  0xc9   :  { %vm408_vm15 = vcmp.eq.s32.totalorder %v6993_v47, %v384_v24  ;;  %vm409_vm0 = vcmp.eq.s32.totalorder %v6997_v50, %v384_v24  ;;  %vm410_vm1 = vcmp.eq.s32.totalorder %v7000_v51, %v384_v24  ;;  %vm411_vm2 = vcmp.eq.s32.totalorder %v7003_v52, %v384_v24 }
  0xca   :  { %vm412_vm3 = vcmp.eq.s32.totalorder %v6993_v47, %v387_v31  ;;  %v6011_v12 = vsel %vm408_vm15, 1.0, %v10474_v57  ;;  %v6012_v40 = vsel %vm409_vm0, 1.0, %v10474_v57  ;;  %v6013_v33 = vsel %vm410_vm1, 1.0, %v10474_v57 }
  0xcb   :  { %v6014_v29 = vsel %vm411_vm2, 1.0, %v10474_v57  ;;  %vm413_vm4 = vcmp.eq.s32.totalorder %v6997_v50, %v387_v31  ;;  %vm414_vm5 = vcmp.eq.s32.totalorder %v7000_v51, %v387_v31  ;;  %vm415_vm6 = vcmp.eq.s32.totalorder %v7003_v52, %v387_v31 }
  0xcc   :  { %v648_v25 = vadd.f32 %v7139_v41, %v496_v46  ;;  %v6015_v24 = vsel %vm412_vm3, 1.0, %v10474_v57  ;;  %v650_v30 = vadd.f32 %v7145_v43, %v498_v13  ;;  %v7347_v32 = vadd.f32 %v6011_v12, %v352_v60 }
  0xcd   :  { %v7331_v15 = vpop.permute.xlu1 %535  ;;  %v7349_v38 = vadd.f32 %v6012_v40, %v353_v61  ;;  %v7351_v53 = vadd.f32 %v6013_v33, %v354_v17  ;;  %v7353_v31 = vadd.f32 %v6014_v29, %v355_v45  ;;  %v6016_v26 = vsel %vm413_vm4, 1.0, %v10474_v57 }
  0xce   :  { %v6017_v46 = vsel %vm414_vm5, 1.0, %v10474_v57  ;;  %v6018_v41 = vsel %vm415_vm6, 1.0, %v10474_v57  ;;  %v7359_v16 = vadd.f32 %v6015_v24, %v7242_v39  ;;  %vm560_vm14 = vcmp.eq.s32.totalorder %v6993_v47, %v7331_v15 }
  0xcf   :  { %v649_v43 = vadd.f32 %v7142_v42, %v497_v14  ;;  %v653_v12 = vadd.f32 %v7036_v63, %v501_v21  ;;  %v6072_v60 = vsel %vm709_vm8, 1.0, %v10474_v57  ;;  %vm861_vm9 = vcmp.eq.s32.totalorder %v6997_v50, %v7256_v7 }
  0xd0   :  { %v503_v39 = vadd.f32 %v7124_v35, %v7131_v37  ;;  %v6100_v63 = vsel %vm857_vm7, 1.0, %v10474_v57  ;;  %v6104_v14 = vsel %vm861_vm9, 1.0, %v10474_v57  ;;  %v651_v17 = vadd.f32 %v7150_v44, %v499_v22 }
  0xd1   :  { %v801_v61 = vadd.f32 %v6068_v34, %v649_v43  ;;  %v805_v42 = vadd.f32 %v6072_v60, %v653_v12  ;;  %v6070_v33 = vsel %vm707_vm12, 1.0, %v10474_v57  ;;  %v6074_v35 = vsel %vm711_vm13, 1.0, %v10474_v57 }
  0xd2   :  { %v7365_v13 = vpop.permute.xlu1 %687  ;;  %v655_v45 = vadd.f32 %v7047_v1, %v503_v39  ;;  %vm278_vm8 = vcmp.eq.s32.totalorder %v7000_v51, %v7234_v28  ;;  %vm279_vm10 = vcmp.eq.s32.totalorder %v7003_v52, %v7234_v28  ;;  %vm859_vm11 = vcmp.eq.s32.totalorder %v7003_v52, %v7232_v27 }
  0xd3   :  { %v953_v37 = vadd.f32 %v6100_v63, %v801_v61  ;;  %v957_v44 = vadd.f32 %v6104_v14, %v805_v42  ;;  %vm863_vm15 = vcmp.eq.s32.totalorder %v7003_v52, %v7256_v7  ;;  %vm561_vm12 = vcmp.eq.s32.totalorder %v6997_v50, %v7331_v15 }
  0xd4   :  { %v803_v20 = vadd.f32 %v6070_v33, %v651_v17  ;;  %v807_v36 = vadd.f32 %v6074_v35, %v655_v45  ;;  %v6106_v40 = vsel %vm863_vm15, 1.0, %v10474_v57  ;;  %v6102_v29 = vsel %vm859_vm11, 1.0, %v10474_v57 }
  0xd5   :  { %v985_v21 = vpack.c.bf16 %v957_v44, %v953_v37  ;;  %v800_v22 = vadd.f32 %v7171_v55, %v648_v25  ;;  %v802_v24 = vadd.f32 %v7185_v2, %v650_v30  ;;  %vm562_vm13 = vcmp.eq.s32.totalorder %v7000_v51, %v7331_v15 }
  0xd6   :  { %v7397_v1 = vpop.permute.xlu1 %690  ;;  %vm563_vm0 = vcmp.eq.s32.totalorder %v7003_v52, %v7331_v15  ;;  %v955_v27 = vadd.f32 %v6102_v29, %v803_v20  ;;  %v959_v7 = vadd.f32 %v6106_v40, %v807_v36  ;;  %v956_v43 = vadd.f32 %v7317_v58, %v7200_v5 }
  0xd7   :  { %1288 = vmatprep.mubr.bf16.mxu0 %v985_v21  ;;  %v952_v34 = vadd.f32 %v7286_v19, %v800_v22  ;;  %v954_v12 = vadd.f32 %v7293_v23, %v802_v24  ;;  %v958_v55 = vadd.f32 %v7320_v18, %v7202_v6  ;;  %v6043_v2 = vsel %vm560_vm14, 1.0, %v10474_v57 }
  0xd8   :  { %v6044_v25 = vsel %vm561_vm12, 1.0, %v10474_v57  ;;  %v987_v30 = vpack.c.bf16 %v959_v7, %v955_v27  ;;  %vm712_vm1 = vcmp.eq.s32.totalorder %v6993_v47, %v7365_v13  ;;  %vm713_vm2 = vcmp.eq.s32.totalorder %v6997_v50, %v7365_v13 }
  0xd9   :  { %v984_v19 = vpack.c.bf16 %v956_v43, %v952_v34  ;;  %v986_v23 = vpack.c.bf16 %v958_v55, %v954_v12  ;;  %vm714_vm3 = vcmp.eq.s32.totalorder %v7000_v51, %v7365_v13  ;;  %v509_v6 = vadd.f32 %v6016_v26, %v7245_v54 }
  0xda   :  { %v510_v58 = vadd.f32 %v6017_v46, %v7247_v56  ;;  %v6045_v18 = vsel %vm562_vm13, 1.0, %v10474_v57  ;;  %1353 = vmatprep.mubr.bf16.mxu1 %v987_v30  ;;  %vm715_vm4 = vcmp.eq.s32.totalorder %v7003_v52, %v7365_v13  ;;  %v511_v60 = vadd.f32 %v6018_v41, %v7251_v59 }
  0xdb   :  { %v7425_v5 = vpop.permute.xlu1 %88  ;;  %v6046_v39 = vsel %vm563_vm0, 1.0, %v10474_v57  ;;  %v656_v54 = vadd.f32 %v6043_v2, %v7347_v32  ;;  %v657_v56 = vadd.f32 %v6044_v25, %v7349_v38  ;;  %1289 = vmatmul.mubr.bf16.vlgmr.msra.gmra.mxu0 %v984_v19  ;;  %1354 = vmatmul.mubr.bf16.vlgmr.msra.gmra.mxu1 %v986_v23  ;;  %v6075_v26 = vsel %vm712_vm1, 1.0, %v10474_v57 }
  0xdc   :  { %v6076_v46 = vsel %vm713_vm2, 1.0, %v10474_v57  ;;  %v6077_v59 = vsel %vm714_vm3, 1.0, %v10474_v57  ;;  %vm716_vm5 = vcmp.eq.s32.totalorder %v6993_v47, %v7397_v1  ;;  %v658_v15 = vadd.f32 %v6045_v18, %v7351_v53 }
  0xdd   :  { %v6078_v32 = vsel %vm715_vm4, 1.0, %v10474_v57  ;;  %vm717_vm6 = vcmp.eq.s32.totalorder %v6997_v50, %v7397_v1  ;;  %vm718_vm14 = vcmp.eq.s32.totalorder %v7000_v51, %v7397_v1  ;;  %v7464_v41 = vsel %vm278_vm8, 1.0, %v10474_v57 }
  0xde   :  { %v7470_v53 = vsel %vm279_vm10, 1.0, %v10474_v57  ;;  %v659_v13 = vadd.f32 %v6046_v39, %v7353_v31  ;;  %vm719_vm7 = vcmp.eq.s32.totalorder %v7003_v52, %v7397_v1  ;;  %v7475_v61 = vadd.f32 %v6075_v26, %v656_v54 }
  0xdf   :  { %v7477_v42 = vadd.f32 %v6076_v46, %v657_v56  ;;  %v7479_v63 = vadd.f32 %v6077_v59, %v658_v15  ;;  %v6079_v14 = vsel %vm716_vm5, 1.0, %v10474_v57  ;;  %v660_v28 = vadd.f32 %v7069_v8, %v7359_v16  ;;  %v390_v8 = vpop.permute.xlu0 %389 }
  0xe0   :  { %v238_v38 = vpop.permute.xlu1 %237  ;;  %v7482_v17 = vadd.f32 %v6078_v32, %v659_v13  ;;  %v6080_v45 = vsel %vm717_vm6, 1.0, %v10474_v57  ;;  %v6081_v31 = vsel %vm718_vm14, 1.0, %v10474_v57  ;;  %v661_v33 = vadd.f32 %v7072_v9, %v509_v6 }
  0xe1   :  { %v662_v35 = vadd.f32 %v7075_v10, %v510_v58  ;;  %v663_v37 = vadd.f32 %v7079_v11, %v511_v60  ;;  %v6082_v44 = vsel %vm719_vm7, 1.0, %v10474_v57  ;;  %v7492_v1 = vadd.f32 %v6079_v14, %v660_v28 }
  0xe2   :  { %vm264_vm9 = vcmp.eq.s32.totalorder %v6993_v47, %v238_v38  ;;  %vm265_vm8 = vcmp.eq.s32.totalorder %v6997_v50, %v238_v38  ;;  %vm266_vm10 = vcmp.eq.s32.totalorder %v7000_v51, %v238_v38  ;;  %v7497_v20 = vadd.f32 %v6080_v45, %v661_v33 }
  0xe3   :  { %v7499_v36 = vadd.f32 %v6081_v31, %v662_v35  ;;  %vm116_vm11 = vcmp.eq.s32.totalorder %v6993_v47, %v7425_v5  ;;  %vm267_vm15 = vcmp.eq.s32.totalorder %v7003_v52, %v238_v38  ;;  %vm117_vm12 = vcmp.eq.s32.totalorder %v6997_v50, %v7425_v5 }
  0xe4   :  { %vm118_vm13 = vcmp.eq.s32.totalorder %v7000_v51, %v7425_v5  ;;  %vm119_vm0 = vcmp.eq.s32.totalorder %v7003_v52, %v7425_v5  ;;  %v5987_v9 = vsel %vm264_vm9, 1.0, %v10474_v57  ;;  %v5988_v10 = vsel %vm265_vm8, 1.0, %v10474_v57 }
  0xe5   :  { %v840_v16 = vpop.permute.xlu1 %839  ;;  %v5989_v11 = vsel %vm266_vm10, 1.0, %v10474_v57  ;;  %v5990_v40 = vsel %vm267_vm15, 1.0, %v10474_v57  ;;  %vm416_vm1 = vcmp.eq.s32.totalorder %v6993_v47, %v390_v8  ;;  %v5959_v21 = vsel %vm116_vm11, 1.0, %v10474_v57 }
  0xe6   :  { %vm417_vm2 = vcmp.eq.s32.totalorder %v6997_v50, %v390_v8  ;;  %vm418_vm3 = vcmp.eq.s32.totalorder %v7000_v51, %v390_v8  ;;  %vm419_vm4 = vcmp.eq.s32.totalorder %v7003_v52, %v390_v8  ;;  %v5960_v22 = vsel %vm117_vm12, 1.0, %v10474_v57 }
  0xe7   :  { %v5961_v24 = vsel %vm118_vm13, 1.0, %v10474_v57  ;;  %v5962_v27 = vsel %vm119_vm0, 1.0, %v10474_v57  ;;  %v360_v7 = vadd.f32 %v5987_v9, %v7188_v3  ;;  %v361_v34 = vadd.f32 %v5988_v10, %v7191_v62  ;;  %v7534_v3 = vpop.permute.xlu0 %395  ;;  %v10775_v62 = vld [vmem:[#allocation17_spill] sm:$0xff] }
  0xe8   :  { %v362_v43 = vadd.f32 %v5989_v11, %v7195_v4  ;;  %v363_v12 = vadd.f32 %v5990_v40, %v7198_v0  ;;  %v6019_v55 = vsel %vm416_vm1, 1.0, %v10474_v57  ;;  %v815_v2 = vadd.f32 %v6082_v44, %v663_v37  ;;  %v10776_v0 = vld [vmem:[#allocation18_spill] sm:$0xff] }
  0xe9   :  { %v843_v29 = vpop.permute.xlu1 %842  ;;  %v6020_v25 = vsel %vm417_vm2, 1.0, %v10474_v57  ;;  %v6021_v30 = vsel %vm418_vm3, 1.0, %v10474_v57  ;;  %v6022_v5 = vsel %vm419_vm4, 1.0, %v10474_v57  ;;  %v364_v19 = vadd.f32 %v7267_v48, %v5959_v21 }
  0xea   :  { %v365_v23 = vadd.f32 %v7273_v49, %v5960_v22  ;;  %vm864_vm5 = vcmp.eq.s32.totalorder %v6993_v47, %v840_v16  ;;  %vm865_vm6 = vcmp.eq.s32.totalorder %v6997_v50, %v840_v16  ;;  %v366_v4 = vadd.f32 %v10775_v62, %v5961_v24 }
  0xeb   :  { %v367_v6 = vadd.f32 %v10776_v0, %v5962_v27  ;;  %v7538_v58 = vadd.f32 %v6019_v55, %v360_v7  ;;  %vm866_vm14 = vcmp.eq.s32.totalorder %v7000_v51, %v840_v16  ;;  %v7541_v60 = vadd.f32 %v6020_v25, %v361_v34  ;;  %v545_v32 = vpop.permute.xlu0 %544 }
  0xec   :  { %v7543_v48 = vadd.f32 %v6021_v30, %v362_v43  ;;  %v7545_v49 = vadd.f32 %v6022_v5, %v363_v12  ;;  %vm867_vm7 = vcmp.eq.s32.totalorder %v7003_v52, %v840_v16  ;;  %v6107_v39 = vsel %vm864_vm5, 1.0, %v10474_v57 }
  0xed   :  { %v6108_v54 = vsel %vm865_vm6, 1.0, %v10474_v57  ;;  %vm868_vm9 = vcmp.eq.s32.totalorder %v6993_v47, %v843_v29  ;;  %vm869_vm8 = vcmp.eq.s32.totalorder %v6997_v50, %v843_v29  ;;  %v6109_v56 = vsel %vm866_vm14, 1.0, %v10474_v57 }
  0xee   :  { %v393_v18 = vpop.permute.xlu1 %392  ;;  %vm870_vm10 = vcmp.eq.s32.totalorder %v7000_v51, %v843_v29  ;;  %vm871_vm11 = vcmp.eq.s32.totalorder %v7003_v52, %v843_v29  ;;  %v6110_v26 = vsel %vm867_vm7, 1.0, %v10474_v57  ;;  %vm424_vm12 = vcmp.eq.s32.totalorder %v6993_v47, %v7534_v3 }
  0xef   :  { %vm420_vm15 = vcmp.eq.s32.totalorder %v6993_v47, %v393_v18  ;;  %vm421_vm13 = vcmp.eq.s32.totalorder %v6997_v50, %v393_v18  ;;  %vm422_vm0 = vcmp.eq.s32.totalorder %v7000_v51, %v393_v18  ;;  %v6111_v46 = vsel %vm868_vm9, 1.0, %v10474_v57 }
  0xf0   :  { %v6112_v59 = vsel %vm869_vm8, 1.0, %v10474_v57  ;;  %vm423_vm1 = vcmp.eq.s32.totalorder %v7003_v52, %v393_v18  ;;  %v6023_v15 = vsel %vm420_vm15, 1.0, %v10474_v57  ;;  %v6113_v13 = vsel %vm870_vm10, 1.0, %v10474_v57 }
  0xf1   :  { %v6114_v14 = vsel %vm871_vm11, 1.0, %v10474_v57  ;;  %vm425_vm2 = vcmp.eq.s32.totalorder %v6997_v50, %v7534_v3  ;;  %vm426_vm3 = vcmp.eq.s32.totalorder %v7000_v51, %v7534_v3  ;;  %vm427_vm4 = vcmp.eq.s32.totalorder %v7003_v52, %v7534_v3 }
  0xf2   :  { %v7574_v28 = vsel %vm424_vm12, 1.0, %v10474_v57  ;;  %v6024_v45 = vsel %vm421_vm13, 1.0, %v10474_v57  ;;  %v6025_v31 = vsel %vm422_vm0, 1.0, %v10474_v57  ;;  %v6026_v33 = vsel %vm423_vm1, 1.0, %v10474_v57 }
  0xf3   :  { %v542_v38 = vpop.permute.xlu1 %541  ;;  %v516_v35 = vadd.f32 %v6023_v15, %v364_v19  ;;  %vm572_vm5 = vcmp.eq.s32.totalorder %v6993_v47, %v545_v32  ;;  %vm573_vm6 = vcmp.eq.s32.totalorder %v6997_v50, %v545_v32  ;;  %vm574_vm14 = vcmp.eq.s32.totalorder %v7000_v51, %v545_v32 }
  0xf4   :  { %vm575_vm7 = vcmp.eq.s32.totalorder %v7003_v52, %v545_v32  ;;  %v961_v37 = vadd.f32 %v6108_v54, %v7477_v42  ;;  %v965_v44 = vadd.f32 %v6112_v59, %v7497_v20  ;;  %v963_v8 = vadd.f32 %v6110_v26, %v7482_v17 }
  0xf5   :  { %v967_v16 = vadd.f32 %v6114_v14, %v815_v2  ;;  %v960_v9 = vadd.f32 %v6107_v39, %v7475_v61  ;;  %v964_v10 = vadd.f32 %v6111_v46, %v7492_v1  ;;  %v962_v21 = vadd.f32 %v6109_v56, %v7479_v63 }
  0xf6   :  { %v989_v40 = vpack.c.bf16 %v965_v44, %v961_v37  ;;  %v966_v29 = vadd.f32 %v6113_v13, %v7499_v36  ;;  %vm568_vm9 = vcmp.eq.s32.totalorder %v6993_v47, %v542_v38  ;;  %vm569_vm8 = vcmp.eq.s32.totalorder %v6997_v50, %v542_v38 }
  0xf7   :  { %v991_v22 = vpack.c.bf16 %v967_v16, %v963_v8  ;;  %v988_v24 = vpack.c.bf16 %v964_v10, %v960_v9  ;;  %vm570_vm10 = vcmp.eq.s32.totalorder %v7000_v51, %v542_v38  ;;  %v517_v42 = vadd.f32 %v6024_v45, %v365_v23  ;;  %v10777_v16 = vld [vmem:[#allocation19_spill] sm:$0xff]  ;;  %v10778_v10 = vld [vmem:[#allocation20_spill] sm:$0xff] }
  0xf8   :  { %v694_v11 = vpop.permute.xlu1 %693  ;;  %v518_v17 = vadd.f32 %v6025_v31, %v366_v4  ;;  %1296 = vmatprep.mubr.bf16.mxu0 %v989_v40  ;;  %v990_v61 = vpack.c.bf16 %v966_v29, %v962_v21  ;;  %vm571_vm11 = vcmp.eq.s32.totalorder %v7003_v52, %v542_v38  ;;  %v519_v1 = vadd.f32 %v6026_v33, %v367_v6  ;;  %v7664_v33 = vpop.permute.xlu0 %550 }
  0xf9   :  { %v6055_v63 = vsel %vm572_vm5, 1.0, %v10474_v57  ;;  %v6056_v20 = vsel %vm573_vm6, 1.0, %v10474_v57  ;;  %v6057_v36 = vsel %vm574_vm14, 1.0, %v10474_v57  ;;  %1361 = vmatprep.mubr.bf16.mxu1 %v991_v22  ;;  %1297 = vmatmul.mubr.bf16.gmra.mxu0 %v988_v24  ;;  %v6058_v7 = vsel %vm575_vm7, 1.0, %v10474_v57 }
  0xfa   :  { %1362 = vmatmul.mubr.bf16.gmra.mxu1 %v990_v61  ;;  %v6051_v34 = vsel %vm568_vm9, 1.0, %v10474_v57  ;;  %v6052_v43 = vsel %vm569_vm8, 1.0, %v10474_v57  ;;  %v6053_v12 = vsel %vm570_vm10, 1.0, %v10474_v57  ;;  %v7619_v55 = vsel %vm425_vm2, 1.0, %v10474_v57 }
  0xfb   :  { %v7625_v2 = vsel %vm426_vm3, 1.0, %v10474_v57  ;;  %v7631_v25 = vsel %vm427_vm4, 1.0, %v10474_v57  ;;  %v6054_v30 = vsel %vm571_vm11, 1.0, %v10474_v57  ;;  %v668_v5 = vadd.f32 %v6055_v63, %v516_v35  ;;  %v10779_v63 = vld [vmem:[#allocation13_spill] sm:$0xff] }
  0xfc   :  { %v697_v27 = vpop.permute.xlu1 %696  ;;  %v669_v19 = vadd.f32 %v6056_v20, %v517_v42  ;;  %v670_v23 = vadd.f32 %v6057_v36, %v518_v17  ;;  %vm720_vm15 = vcmp.eq.s32.totalorder %v6993_v47, %v694_v11  ;;  %v671_v62 = vadd.f32 %v6058_v7, %v519_v1 }
  0xfd   :  { %v664_v4 = vadd.f32 %v6051_v34, %v7538_v58  ;;  %v665_v0 = vadd.f32 %v6052_v43, %v7541_v60  ;;  %v666_v6 = vadd.f32 %v6053_v12, %v7543_v48  ;;  %v667_v3 = vadd.f32 %v6054_v30, %v7545_v49 }
  0xfe   :  { %vm721_vm12 = vcmp.eq.s32.totalorder %v6997_v50, %v694_v11  ;;  %vm722_vm13 = vcmp.eq.s32.totalorder %v7000_v51, %v694_v11  ;;  %vm723_vm0 = vcmp.eq.s32.totalorder %v7003_v52, %v694_v11  ;;  %v6083_v39 = vsel %vm720_vm15, 1.0, %v10474_v57 }
  0xff   :  { %vm724_vm1 = vcmp.eq.s32.totalorder %v6993_v47, %v697_v27  ;;  %vm725_vm2 = vcmp.eq.s32.totalorder %v6997_v50, %v697_v27  ;;  %vm726_vm3 = vcmp.eq.s32.totalorder %v7000_v51, %v697_v27  ;;  %vm727_vm4 = vcmp.eq.s32.totalorder %v7003_v52, %v697_v27 }
 0x100   :  { %v6084_v58 = vsel %vm721_vm12, 1.0, %v10474_v57  ;;  %v6085_v60 = vsel %vm722_vm13, 1.0, %v10474_v57  ;;  %v6086_v48 = vsel %vm723_vm0, 1.0, %v10474_v57  ;;  %v816_v49 = vadd.f32 %v6083_v39, %v664_v4 }
 0x101   :  { %v95_v18 = vpop.permute.xlu1 %94  ;;  %v6087_v54 = vsel %vm724_vm1, 1.0, %v10474_v57  ;;  %v6088_v56 = vsel %vm725_vm2, 1.0, %v10474_v57  ;;  %v6089_v26 = vsel %vm726_vm3, 1.0, %v10474_v57  ;;  %v6090_v46 = vsel %vm727_vm4, 1.0, %v10474_v57 }
 0x102   :  { %vm124_vm5 = vcmp.eq.s32.totalorder %v6993_v47, %v95_v18  ;;  %vm125_vm6 = vcmp.eq.s32.totalorder %v6997_v50, %v95_v18  ;;  %vm126_vm14 = vcmp.eq.s32.totalorder %v7000_v51, %v95_v18  ;;  %vm127_vm7 = vcmp.eq.s32.totalorder %v7003_v52, %v95_v18  ;;  %v10781_v18 = vld [vmem:[#allocation15_spill] sm:$0xff] }
 0x103   :  { %v5967_v59 = vsel %vm124_vm5, 1.0, %v10474_v57  ;;  %v5968_v15 = vsel %vm125_vm6, 1.0, %v10474_v57  ;;  %v5969_v32 = vsel %vm126_vm14, 1.0, %v10474_v57  ;;  %v817_v13 = vadd.f32 %v6084_v58, %v665_v0  ;;  %v10782_v58 = vld [vmem:[#allocation16_spill] sm:$0xff] }
 0x104   :  { %v818_v14 = vadd.f32 %v6085_v60, %v666_v6  ;;  %v819_v45 = vadd.f32 %v6086_v48, %v667_v3  ;;  %v5970_v31 = vsel %vm127_vm7, 1.0, %v10474_v57  ;;  %v820_v35 = vadd.f32 %v6087_v54, %v668_v5  ;;  %v10780_v6 = vld [vmem:[#allocation14_spill] sm:$0xff] }
 0x105   :  { %v821_v37 = vadd.f32 %v6088_v56, %v669_v19  ;;  %v822_v44 = vadd.f32 %v6089_v26, %v670_v23  ;;  %v823_v8 = vadd.f32 %v6090_v46, %v671_v62  ;;  %v7668_v9 = vadd.f32 %v10777_v16, %v5967_v59 }
 0x106   :  { %v244_v38 = vpop.permute.xlu1 %243  ;;  %v7671_v11 = vadd.f32 %v10778_v10, %v5968_v15  ;;  %v7674_v40 = vadd.f32 %v7464_v41, %v5969_v32  ;;  %v7677_v21 = vadd.f32 %v7470_v53, %v5970_v31  ;;  %vm580_vm8 = vcmp.eq.s32.totalorder %v6993_v47, %v7664_v33  ;;  %v852_v32 = vpop.permute.xlu0 %851 }
 0x107   :  { %vm272_vm9 = vcmp.eq.s32.totalorder %v6993_v47, %v244_v38  ;;  %vm581_vm10 = vcmp.eq.s32.totalorder %v6997_v50, %v7664_v33  ;;  %vm582_vm11 = vcmp.eq.s32.totalorder %v7000_v51, %v7664_v33  ;;  %vm273_vm15 = vcmp.eq.s32.totalorder %v6997_v50, %v244_v38 }
 0x108   :  { %vm274_vm12 = vcmp.eq.s32.totalorder %v7000_v51, %v244_v38  ;;  %vm275_vm13 = vcmp.eq.s32.totalorder %v7003_v52, %v244_v38  ;;  %v5995_v41 = vsel %vm272_vm9, 1.0, %v10474_v57  ;;  %v5996_v17 = vsel %vm273_vm15, 1.0, %v10474_v57 }
 0x109   :  { %v5997_v61 = vsel %vm274_vm12, 1.0, %v10474_v57  ;;  %v5998_v1 = vsel %vm275_vm13, 1.0, %v10474_v57  ;;  %v368_v20 = vadd.f32 %v5995_v41, %v10779_v63  ;;  %v369_v3 = vadd.f32 %v5996_v17, %v10780_v6  ;;  %v1394_v6 = vld [vmem:[%s10465_s2 + $0x40] sm:$0xff] }
 0x10a   :  { %v370_v39 = vadd.f32 %v5997_v61, %v10781_v18  ;;  %v371_v60 = vadd.f32 %v5998_v1, %v10782_v58  ;;  %vm583_vm7 = vcmp.eq.s32.totalorder %v7003_v52, %v7664_v33  ;;  %v6063_v46 = vsel %vm580_vm8, 1.0, %v10474_v57  ;;  %v1391_v18 = vld [vmem:[%s10465_s2 + $0x28] sm:$0xff] }
 0x10b   :  { %v846_v29 = vpop.permute.xlu1 %845  ;;  %v6064_v59 = vsel %vm581_vm10, 1.0, %v10474_v57  ;;  %v6065_v15 = vsel %vm582_vm11, 1.0, %v10474_v57  ;;  %v6066_v38 = vsel %vm583_vm7, 1.0, %v10474_v57  ;;  %vm880_vm8 = vcmp.eq.s32.totalorder %v6993_v47, %v852_v32 }
 0x10c   :  { %vm872_vm0 = vcmp.eq.s32.totalorder %v6993_v47, %v846_v29  ;;  %vm873_vm1 = vcmp.eq.s32.totalorder %v6997_v50, %v846_v29  ;;  %vm874_vm2 = vcmp.eq.s32.totalorder %v7000_v51, %v846_v29  ;;  %vm875_vm3 = vcmp.eq.s32.totalorder %v7003_v52, %v846_v29 }
 0x10d   :  { %v6115_v53 = vsel %vm872_vm0, 1.0, %v10474_v57  ;;  %v6116_v22 = vsel %vm873_vm1, 1.0, %v10474_v57  ;;  %v6117_v24 = vsel %vm874_vm2, 1.0, %v10474_v57  ;;  %v6118_v42 = vsel %vm875_vm3, 1.0, %v10474_v57 }
 0x10e   :  { %v969_v27 = vadd.f32 %v6116_v22, %v817_v13  ;;  %v971_v7 = vadd.f32 %v6118_v42, %v819_v45  ;;  %v968_v34 = vadd.f32 %v6115_v53, %v816_v49  ;;  %v970_v43 = vadd.f32 %v6117_v24, %v818_v14 }
 0x10f   :  { %v849_v36 = vpop.permute.xlu1 %848  ;;  %v520_v13 = vadd.f32 %v7574_v28, %v368_v20  ;;  %v521_v14 = vadd.f32 %v7619_v55, %v369_v3  ;;  %v522_v45 = vadd.f32 %v7625_v2, %v370_v39  ;;  %v523_v31 = vadd.f32 %v7631_v25, %v371_v60  ;;  %v1398_v20 = vld [vmem:[%s10465_s2 + $0x60] sm:$0xff]  ;;  %v1396_v3 = vld [vmem:[%s10465_s2 + $0x50] sm:$0xff] }
 0x110   :  { %vm876_vm4 = vcmp.eq.s32.totalorder %v6993_v47, %v849_v36  ;;  %vm877_vm5 = vcmp.eq.s32.totalorder %v6997_v50, %v849_v36  ;;  %vm878_vm6 = vcmp.eq.s32.totalorder %v7000_v51, %v849_v36  ;;  %vm879_vm14 = vcmp.eq.s32.totalorder %v7003_v52, %v849_v36  ;;  %1474 = vmatpush1.msra.mxu0 %v1398_v20 }
 0x111   :  { %v6119_v12 = vsel %vm876_vm4, 1.0, %v10474_v57  ;;  %v6120_v30 = vsel %vm877_vm5, 1.0, %v10474_v57  ;;  %v6121_v5 = vsel %vm878_vm6, 1.0, %v10474_v57  ;;  %v6122_v19 = vsel %vm879_vm14, 1.0, %v10474_v57 }
 0x112   :  { %v973_v23 = vadd.f32 %v6120_v30, %v821_v37  ;;  %v975_v62 = vadd.f32 %v6122_v19, %v823_v8  ;;  %v972_v4 = vadd.f32 %v6119_v12, %v820_v35  ;;  %v974_v0 = vadd.f32 %v6121_v5, %v822_v44 }
 0x113   :  { %vm881_vm10 = vcmp.eq.s32.totalorder %v6997_v50, %v852_v32  ;;  %vm882_vm11 = vcmp.eq.s32.totalorder %v7000_v51, %v852_v32  ;;  %vm883_vm0 = vcmp.eq.s32.totalorder %v7003_v52, %v852_v32  ;;  %v7763_v10 = vsel %vm880_vm8, 1.0, %v10474_v57 }
 0x114   :  { %v399_v48 = vpop.permute.xlu1 %398  ;;  %v993_v49 = vpack.c.bf16 %v973_v23, %v969_v27  ;;  %v995_v54 = vpack.c.bf16 %v975_v62, %v971_v7  ;;  %v992_v56 = vpack.c.bf16 %v972_v4, %v968_v34  ;;  %v994_v26 = vpack.c.bf16 %v974_v0, %v970_v43 }
 0x115   :  { %vm428_vm9 = vcmp.eq.s32.totalorder %v6993_v47, %v399_v48  ;;  %vm429_vm15 = vcmp.eq.s32.totalorder %v6997_v50, %v399_v48  ;;  %vm430_vm12 = vcmp.eq.s32.totalorder %v7000_v51, %v399_v48  ;;  %vm431_vm13 = vcmp.eq.s32.totalorder %v7003_v52, %v399_v48 }
 0x116   :  { %1304 = vmatprep.mubr.bf16.mxu0 %v993_v49  ;;  %1369 = vmatprep.mubr.bf16.mxu1 %v995_v54  ;;  %v6031_v33 = vsel %vm428_vm9, 1.0, %v10474_v57  ;;  %v6032_v28 = vsel %vm429_vm15, 1.0, %v10474_v57  ;;  %v6033_v55 = vsel %vm430_vm12, 1.0, %v10474_v57  ;;  %v6034_v2 = vsel %vm431_vm13, 1.0, %v10474_v57  ;;  %v1393_v49 = vld [vmem:[%s10465_s2 + $0x38] sm:$0xff]  ;;  %v1390_v54 = vld [vmem:[%s10465_s2 + $0x20] sm:$0xff] }
 0x117   :  { %1305 = vmatmul.mubr.bf16.gmra.mxu0 %v992_v56  ;;  %1370 = vmatmul.mubr.bf16.gmra.mxu1 %v994_v26  ;;  %v524_v16 = vadd.f32 %v6031_v33, %v7668_v9  ;;  %v6124_v41 = vsel %vm881_vm10, 1.0, %v10474_v57  ;;  %v7771_v29 = vsel %vm882_vm11, 1.0, %v10474_v57  ;;  %v525_v53 = vadd.f32 %v6032_v28, %v7671_v11  ;;  %v1400_v11 = vld [vmem:[%s10465_s2 + $0x70] sm:$0xff]  ;;  %v1386_v28 = vld [vmem:[%s10465_s2] sm:$0xff] }
 0x118   :  { %v526_v22 = vadd.f32 %v6033_v55, %v7674_v40  ;;  %v527_v9 = vadd.f32 %v6034_v2, %v7677_v21  ;;  %v6126_v24 = vsel %vm883_vm0, 1.0, %v10474_v57  ;;  %v1395_v40 = vld [vmem:[%s10465_s2 + $0x48] sm:$0xff]  ;;  %v1397_v21 = vld [vmem:[%s10465_s2 + $0x58] sm:$0xff]  ;;  %1587 = vmatpush1.msra.mxu1 %v1400_v11  ;;  %v1392_v26 = vld [vmem:[%s10465_s2 + $0x30] sm:$0xff] }
 0x119   :  { %v548_v25 = vpop.permute.xlu1 %547  ;;  %1475 = vmatprep.subr.mxu0 %v1395_v40  ;;  %v676_v43 = vadd.f32 %v6063_v46, %v524_v16  ;;  %v677_v12 = vadd.f32 %v6064_v59, %v525_v53  ;;  %1588 = vmatprep.subr.mxu1 %v1397_v21  ;;  %v1387_v46 = vld [vmem:[%s10465_s2 + $0x8] sm:$0xff]  ;;  %v1388_v55 = vld [vmem:[%s10465_s2 + $0x10] sm:$0xff]  ;;  %v1719_v40 = vld [vmem:[%s10468_s5 + $0x60] sm:$0xff] }
 0x11a   :  { %vm576_vm1 = vcmp.eq.s32.totalorder %v6993_v47, %v548_v25  ;;  %vm577_vm2 = vcmp.eq.s32.totalorder %v6997_v50, %v548_v25  ;;  %vm578_vm3 = vcmp.eq.s32.totalorder %v7000_v51, %v548_v25  ;;  %vm579_vm4 = vcmp.eq.s32.totalorder %v7003_v52, %v548_v25  ;;  %1476 = vmatpush1.msra.mxu0 %v1394_v6  ;;  %v1721_v21 = vld [vmem:[%s10468_s5 + $0x70] sm:$0xff]  ;;  %v1707_v6 = vld [vmem:[%s10468_s5] sm:$0xff] }
 0x11b   :  { %v6059_v35 = vsel %vm576_vm1, 1.0, %v10474_v57  ;;  %v6060_v37 = vsel %vm577_vm2, 1.0, %v10474_v57  ;;  %v6061_v44 = vsel %vm578_vm3, 1.0, %v10474_v57  ;;  %v6062_v8 = vsel %vm579_vm4, 1.0, %v10474_v57  ;;  %1589 = vmatpush1.msra.mxu1 %v1396_v3  ;;  %1477 = vmatprep.subr.mxu0 %v1391_v18  ;;  %v1709_v3 = vld [vmem:[%s10468_s5 + $0x10] sm:$0xff]  ;;  %v7913_v18 = vld [vmem:[#allocation4 + $0x1e8] sm:$0xff] }
 0x11c   :  { %v672_v42 = vadd.f32 %v6059_v35, %v520_v13  ;;  %v673_v17 = vadd.f32 %v6060_v37, %v521_v14  ;;  %v674_v61 = vadd.f32 %v6061_v44, %v522_v45  ;;  %v675_v1 = vadd.f32 %v6062_v8, %v523_v31  ;;  %1590 = vmatprep.subr.mxu1 %v1393_v49  ;;  %v1389_v13 = vld [vmem:[%s10465_s2 + $0x18] sm:$0xff] }
 0x11d   :  { %v678_v30 = vadd.f32 %v6065_v15, %v526_v22  ;;  %v679_v5 = vadd.f32 %v6066_v38, %v527_v9  ;;  %1478 = vmatpush1.msra.mxu0 %v1390_v54  ;;  %1591 = vmatpush1.msra.mxu1 %v1392_v26  ;;  %vm1424_vm1 = vcmask 261120   ;;  %vm2491_vm2 = vcmask 523520  }
 0x11e   :  { %v700_v63 = vpop.permute.xlu1 %699  ;;  %1479 = vmatprep.subr.mxu0 %v1387_v46  ;;  %1592 = vmatprep.subr.mxu1 %v1389_v13 }
 0x11f   :  { %vm728_vm5 = vcmp.eq.s32.totalorder %v6993_v47, %v700_v63  ;;  %vm729_vm6 = vcmp.eq.s32.totalorder %v6997_v50, %v700_v63  ;;  %vm730_vm14 = vcmp.eq.s32.totalorder %v7000_v51, %v700_v63  ;;  %vm731_vm7 = vcmp.eq.s32.totalorder %v7003_v52, %v700_v63  ;;  %1480 = vmatpush1.msra.mxu0 %v1386_v28 }
 0x120   :  { %v6091_v36 = vsel %vm728_vm5, 1.0, %v10474_v57  ;;  %v6092_v27 = vsel %vm729_vm6, 1.0, %v10474_v57  ;;  %v6093_v7 = vsel %vm730_vm14, 1.0, %v10474_v57  ;;  %v6094_v34 = vsel %vm731_vm7, 1.0, %v10474_v57  ;;  %1593 = vmatpush1.msra.mxu1 %v1388_v55 }
 0x121   :  { %v824_v19 = vadd.f32 %v6091_v36, %v672_v42  ;;  %v825_v23 = vadd.f32 %v6092_v27, %v673_v17  ;;  %v826_v62 = vadd.f32 %v6093_v7, %v674_v61  ;;  %v827_v4 = vadd.f32 %v6094_v34, %v675_v1  ;;  %v1716_v7 = vld [vmem:[%s10468_s5 + $0x48] sm:$0xff]  ;;  %v1718_v34 = vld [vmem:[%s10468_s5 + $0x58] sm:$0xff] }
 0x122   :  { %v703_v0 = vpop.permute.xlu1 %702 }
 0x123   :  { %vm732_vm9 = vcmp.eq.s32.totalorder %v6993_v47, %v703_v0  ;;  %vm733_vm15 = vcmp.eq.s32.totalorder %v6997_v50, %v703_v0  ;;  %vm734_vm12 = vcmp.eq.s32.totalorder %v7000_v51, %v703_v0  ;;  %vm735_vm13 = vcmp.eq.s32.totalorder %v7003_v52, %v703_v0  ;;  %v1710_v0 = vld [vmem:[%s10468_s5 + $0x18] sm:$0xff] }
 0x124   :  { %v6095_v39 = vsel %vm732_vm9, 1.0, %v10474_v57  ;;  %v6096_v58 = vsel %vm733_vm15, 1.0, %v10474_v57  ;;  %v6097_v60 = vsel %vm734_vm12, 1.0, %v10474_v57  ;;  %v6098_v48 = vsel %vm735_vm13, 1.0, %v10474_v57 }
 0x125   :  { %v828_v56 = vadd.f32 %v6095_v39, %v676_v43  ;;  %v829_v59 = vadd.f32 %v6096_v58, %v677_v12  ;;  %v830_v15 = vadd.f32 %v6097_v60, %v678_v30  ;;  %v831_v32 = vadd.f32 %v6098_v48, %v679_v5  ;;  %v1715_v12 = vld [vmem:[%s10468_s5 + $0x40] sm:$0xff]  ;;  %v1717_v30 = vld [vmem:[%s10468_s5 + $0x50] sm:$0xff]  ;;  %v1712_v5 = vld [vmem:[%s10468_s5 + $0x28] sm:$0xff] }
 0x126   :  { %v977_v38 = vadd.f32 %v6124_v41, %v825_v23  ;;  %v979_v45 = vadd.f32 %v6126_v24, %v827_v4  ;;  %v976_v31 = vadd.f32 %v7763_v10, %v824_v19  ;;  %v978_v33 = vadd.f32 %v7771_v29, %v826_v62  ;;  %v1720_v41 = vld [vmem:[%s10468_s5 + $0x68] sm:$0xff]  ;;  %v1722_v29 = vld [vmem:[%s10468_s5 + $0x78] sm:$0xff]  ;;  %v1711_v23 = vld [vmem:[%s10468_s5 + $0x20] sm:$0xff] }
 0x127   :  { %v855_v14 = vpop.permute.xlu1 %854  ;;  %1769 = vmatprep.subr.mxu0 %v1720_v41  ;;  %1882 = vmatprep.subr.mxu1 %v1722_v29  ;;  %v1714_v19 = vld [vmem:[%s10468_s5 + $0x38] sm:$0xff]  ;;  %v1713_v62 = vld [vmem:[%s10468_s5 + $0x30] sm:$0xff]  ;;  %v1708_v4 = vld [vmem:[%s10468_s5 + $0x8] sm:$0xff] }
 0x128   :  { %vm884_vm8 = vcmp.eq.s32.totalorder %v6993_v47, %v855_v14  ;;  %vm885_vm10 = vcmp.eq.s32.totalorder %v6997_v50, %v855_v14  ;;  %vm886_vm11 = vcmp.eq.s32.totalorder %v7000_v51, %v855_v14  ;;  %vm887_vm0 = vcmp.eq.s32.totalorder %v7003_v52, %v855_v14  ;;  %v7915_v39 = vld [vmem:[#allocation4 + $0x1f8] sm:$0xff] }
 0x129   :  { %v6127_v2 = vsel %vm884_vm8, 1.0, %v10474_v57  ;;  %v6128_v25 = vsel %vm885_vm10, 1.0, %v10474_v57  ;;  %v6129_v35 = vsel %vm886_vm11, 1.0, %v10474_v57  ;;  %v6130_v37 = vsel %vm887_vm0, 1.0, %v10474_v57 }
 0x12a   :  { %v981_v44 = vadd.f32 %v6128_v25, %v829_v59  ;;  %v983_v8 = vadd.f32 %v6130_v37, %v831_v32  ;;  %v980_v47 = vadd.f32 %v6127_v2, %v828_v56  ;;  %v982_v16 = vadd.f32 %v6129_v35, %v830_v15 }
 0x12c   :  { %v997_v50 = vpack.c.bf16 %v981_v44, %v977_v38  ;;  %v999_v51 = vpack.c.bf16 %v983_v8, %v979_v45  ;;  %v996_v10 = vpack.c.bf16 %v980_v47, %v976_v31  ;;  %v998_v52 = vpack.c.bf16 %v982_v16, %v978_v33 }
 0x12e   :  { %1312 = vmatprep.mubr.bf16.mxu0 %v997_v50  ;;  %1377 = vmatprep.mubr.bf16.mxu1 %v999_v51 }
 0x12f   :  { %1313 = vmatmul.mubr.bf16.gmra.mxu0 %v996_v10  ;;  %1378 = vmatmul.mubr.bf16.gmra.mxu1 %v998_v52 }
 0x130   :  { %1513 = vmatprep.mubr.f32.mxu0 %v10474_v57  ;;  %1626 = vmatprep.mubr.f32.mxu1 %v10474_v57 }
 0x19b   :  { %v6259_v53 = vpop.f32.mrf.mxu0  ;;  %v6299_v22 = vpop.f32.mrf.mxu1 }
 0x19d   :  { %v6260_v9 = vpop.f32.mrf.mxu0  ;;  %v6300_v24 = vpop.f32.mrf.mxu1 }
 0x19e   :  { %v6261_v42 = vadd.f32 %v6260_v9, %v6259_v53  ;;  %v6301_v17 = vadd.f32 %v6300_v24, %v6299_v22 }
 0x19f   :  { %v6262_v61 = vpop.f32.mrf.mxu0  ;;  %v6302_v1 = vpop.f32.mrf.mxu1 }
 0x1a0   :  { %v7855_v63 = vadd.f32 %v6301_v17, %v6261_v42 }
 0x1a1   :  { %v6263_v20 = vpop.f32.mrf.mxu0  ;;  %v6303_v11 = vpop.f32.mrf.mxu1 }
 0x1a2   :  { %v6264_v36 = vadd.f32 %v6263_v20, %v6262_v61  ;;  %v6304_v27 = vadd.f32 %v6303_v11, %v6302_v1  ;;  %6163 = vmatmul.mubr.msk.f32.vlgmr.msra.gmra.mxu0 %vm1424_vm1, %v7855_v63  ;;  %6171 = vmatmul.mubr.msk.f32.vlgmr.msra.gmra.mxu1 %vm1424_vm1, %v7855_v63  ;;  %v7967_v11 = vld [vmem:[#allocation4 + $0x1e0] sm:$0xff] }
 0x1a3   :  { %1519 = vmatprep.mubr.f32.mxu0 %v10474_v57  ;;  %1632 = vmatprep.mubr.f32.mxu1 %v10474_v57 }
 0x1a4   :  { %v7875_v43 = vadd.f32 %v6304_v27, %v6264_v36  ;;  %1770 = vmatpush1.msra.mxu0 %v1719_v40  ;;  %1883 = vmatpush1.msra.mxu1 %v1721_v21  ;;  %v7969_v40 = vld [vmem:[#allocation4 + $0x1f0] sm:$0xff]  ;;  %v7971_v21 = vld [vmem:[#allocation4 + $0x1c8] sm:$0xff]  ;;  %v7973_v36 = vld [vmem:[#allocation4 + $0x1d8] sm:$0xff] }
 0x1a5   :  { %1771 = vmatprep.subr.mxu0 %v1716_v7  ;;  %1884 = vmatprep.subr.mxu1 %v1718_v34  ;;  %v7979_v27 = vld [vmem:[#allocation4 + $0x1c0] sm:$0xff]  ;;  %v7981_v7 = vld [vmem:[#allocation4 + $0x1d0] sm:$0xff]  ;;  %v7987_v34 = vld [vmem:[#allocation4 + $0x1a8] sm:$0xff] }
 0x1a6   :  { %6164 = vmatmul.mubr.msk.f32.gmra.mxu0 %vm1424_vm1, %v7875_v43  ;;  %6172 = vmatmul.mubr.msk.f32.gmra.mxu1 %vm1424_vm1, %v7875_v43 }
 0x1a7   :  { %1525 = vmatprep.mubr.f32.mxu0 %v10474_v57  ;;  %1638 = vmatprep.mubr.f32.mxu1 %v10474_v57 }
 0x1a8   :  { %1772 = vmatpush1.msra.mxu0 %v1715_v12  ;;  %1885 = vmatpush1.msra.mxu1 %v1717_v30  ;;  %v7989_v12 = vld [vmem:[#allocation4 + $0x1b8] sm:$0xff]  ;;  %v7997_v30 = vld [vmem:[#allocation4 + $0x1b0] sm:$0xff] }
 0x1a9   :  { %1773 = vmatprep.subr.mxu0 %v1712_v5  ;;  %1886 = vmatprep.subr.mxu1 %v1714_v19  ;;  %v8001_v5 = vld [vmem:[#allocation4 + $0x188] sm:$0xff]  ;;  %v8003_v19 = vld [vmem:[#allocation4 + $0x198] sm:$0xff] }
 0x1aa   :  { %1774 = vmatpush1.msra.mxu0 %v1711_v23  ;;  %1887 = vmatpush1.msra.mxu1 %v1713_v62  ;;  %v8009_v23 = vld [vmem:[#allocation4 + $0x180] sm:$0xff]  ;;  %v8011_v62 = vld [vmem:[#allocation4 + $0x190] sm:$0xff] }
 0x1ab   :  { %1775 = vmatprep.subr.mxu0 %v1708_v4  ;;  %1888 = vmatprep.subr.mxu1 %v1710_v0  ;;  %v8017_v4 = vld [vmem:[#allocation4 + $0x168] sm:$0xff]  ;;  %v8019_v0 = vld [vmem:[#allocation4 + $0x178] sm:$0xff] }
 0x1ac   :  { %1776 = vmatpush1.msra.mxu0 %v1707_v6  ;;  %1889 = vmatpush1.msra.mxu1 %v1709_v3  ;;  %v8027_v6 = vld [vmem:[#allocation4 + $0x170] sm:$0xff]  ;;  %v8031_v3 = vld [vmem:[#allocation4 + $0x148] sm:$0xff] }
 0x1ad   :  { %2074 = vmatprep.subr.mxu0 %v7913_v18  ;;  %2145 = vmatprep.subr.mxu1 %v7915_v39 }
 0x1b9   :  { %v6265_v58 = vpop.f32.mrf.mxu0 }
 0x1ba   :  { %v6305_v60 = vpop.f32.mrf.mxu1 }
 0x1bb   :  { %v6266_v48 = vpop.f32.mrf.mxu0 }
 0x1bc   :  { %v6267_v49 = vadd.f32 %v6266_v48, %v6265_v58  ;;  %v6306_v54 = vpop.f32.mrf.mxu1  ;;  %v8033_v58 = vld [vmem:[#allocation4 + $0x158] sm:$0xff]  ;;  %v8041_v48 = vld [vmem:[#allocation4 + $0x150] sm:$0xff] }
 0x1bd   :  { %v6307_v56 = vadd.f32 %v6306_v54, %v6305_v60  ;;  %v6268_v26 = vpop.f32.mrf.mxu0  ;;  %v8039_v60 = vld [vmem:[#allocation4 + $0x140] sm:$0xff]  ;;  %v8049_v54 = vld [vmem:[#allocation4 + $0x138] sm:$0xff] }
 0x1be   :  { %v6308_v46 = vpop.f32.mrf.mxu1 }
 0x1bf   :  { %v7919_v59 = vadd.f32 %v6307_v56, %v6267_v49  ;;  %v6269_v15 = vpop.f32.mrf.mxu0  ;;  %v8047_v49 = vld [vmem:[#allocation4 + $0x128] sm:$0xff]  ;;  %v8055_v56 = vld [vmem:[#allocation4 + $0x120] sm:$0xff] }
 0x1c0   :  { %v6270_v32 = vadd.f32 %v6269_v15, %v6268_v26  ;;  %v6309_v38 = vpop.f32.mrf.mxu1  ;;  %v8057_v26 = vld [vmem:[#allocation4 + $0x130] sm:$0xff]  ;;  %v8069_v15 = vld [vmem:[#allocation4 + $0x100] sm:$0xff] }
 0x1c1   :  { %v6310_v13 = vadd.f32 %v6309_v38, %v6308_v46  ;;  %6165 = vmatmul.mubr.msk.f32.gmra.mxu0 %vm1424_vm1, %v7919_v59  ;;  %6173 = vmatmul.mubr.msk.f32.gmra.mxu1 %vm1424_vm1, %v7919_v59  ;;  %v8061_v46 = vld [vmem:[#allocation4 + $0x108] sm:$0xff] }
 0x1c2   :  { %1531 = vmatprep.mubr.f32.mxu0 %v10474_v57  ;;  %1644 = vmatprep.mubr.f32.mxu1 %v10474_v57  ;;  %v8077_v38 = vld [vmem:[#allocation4 + $0xe8] sm:$0xff] }
 0x1c3   :  { %v7927_v14 = vadd.f32 %v6310_v13, %v6270_v32  ;;  %v8071_v32 = vld [vmem:[#allocation4 + $0x110] sm:$0xff]  ;;  %v8079_v13 = vld [vmem:[#allocation4 + $0xf8] sm:$0xff] }
 0x1c5   :  { %6166 = vmatmul.mubr.msk.f32.gmra.mxu0 %vm1424_vm1, %v7927_v14  ;;  %6174 = vmatmul.mubr.msk.f32.gmra.mxu1 %vm1424_vm1, %v7927_v14 }
 0x1c6   :  { %1537 = vmatprep.mubr.f32.mxu0 %v10474_v57  ;;  %1650 = vmatprep.mubr.f32.mxu1 %v10474_v57 }
 0x1d7   :  { %v6271_v45 = vpop.f32.mrf.mxu0  ;;  %v6311_v31 = vpop.f32.mrf.mxu1 }
 0x1d9   :  { %v6272_v33 = vpop.f32.mrf.mxu0  ;;  %v6312_v55 = vpop.f32.mrf.mxu1 }
 0x1da   :  { %v6273_v28 = vadd.f32 %v6272_v33, %v6271_v45  ;;  %v6313_v2 = vadd.f32 %v6312_v55, %v6311_v31  ;;  %v8087_v45 = vld [vmem:[#allocation4 + $0xf0] sm:$0xff]  ;;  %v8091_v31 = vld [vmem:[#allocation4 + $0xc8] sm:$0xff]  ;;  %v8093_v33 = vld [vmem:[#allocation4 + $0xd8] sm:$0xff] }
 0x1db   :  { %v6274_v25 = vpop.f32.mrf.mxu0  ;;  %v6314_v35 = vpop.f32.mrf.mxu1  ;;  %v8101_v55 = vld [vmem:[#allocation4 + $0xd0] sm:$0xff] }
 0x1dc   :  { %v7935_v37 = vadd.f32 %v6313_v2, %v6273_v28  ;;  %v8099_v28 = vld [vmem:[#allocation4 + $0xc0] sm:$0xff]  ;;  %v8107_v2 = vld [vmem:[#allocation4 + $0xa8] sm:$0xff] }
 0x1dd   :  { %v6275_v44 = vpop.f32.mrf.mxu0  ;;  %v6315_v47 = vpop.f32.mrf.mxu1 }
 0x1de   :  { %v6276_v8 = vadd.f32 %v6275_v44, %v6274_v25  ;;  %v6316_v16 = vadd.f32 %v6315_v47, %v6314_v35  ;;  %6167 = vmatmul.mubr.msk.f32.gmra.mxu0 %vm1424_vm1, %v7935_v37  ;;  %6175 = vmatmul.mubr.msk.f32.gmra.mxu1 %vm1424_vm1, %v7935_v37  ;;  %v8109_v25 = vld [vmem:[#allocation4 + $0xb8] sm:$0xff]  ;;  %v8115_v35 = vld [vmem:[#allocation4 + $0xa0] sm:$0xff]  ;;  %v8121_v44 = vld [vmem:[#allocation4 + $0x88] sm:$0xff] }
 0x1df   :  { %1543 = vmatprep.mubr.f32.mxu0 %v10474_v57  ;;  %1656 = vmatprep.mubr.f32.mxu1 %v10474_v57  ;;  %v8129_v47 = vld [vmem:[#allocation4 + $0x80] sm:$0xff] }
 0x1e0   :  { %v7943_v50 = vadd.f32 %v6316_v16, %v6276_v8  ;;  %v8123_v8 = vld [vmem:[#allocation4 + $0x98] sm:$0xff]  ;;  %v8131_v16 = vld [vmem:[#allocation4 + $0x90] sm:$0xff] }
 0x1e2   :  { %6168 = vmatmul.mubr.msk.f32.gmra.mxu0 %vm1424_vm1, %v7943_v50  ;;  %6176 = vmatmul.mubr.msk.f32.gmra.mxu1 %vm1424_vm1, %v7943_v50 }
 0x1e3   :  { %1549 = vmatprep.mubr.f32.mxu0 %v10474_v57  ;;  %1662 = vmatprep.mubr.f32.mxu1 %v10474_v57 }
 0x1ef   :  { %v6277_v51 = vpop.f32.mrf.mxu0  ;;  %v6317_v10 = vpop.f32.mrf.mxu1 }
 0x1f1   :  { %v6278_v52 = vpop.f32.mrf.mxu0  ;;  %v6318_v41 = vpop.f32.mrf.mxu1 }
 0x1f2   :  { %v6279_v29 = vadd.f32 %v6278_v52, %v6277_v51  ;;  %v6319_v53 = vadd.f32 %v6318_v41, %v6317_v10  ;;  %v8137_v51 = vld [vmem:[#allocation4 + $0x68] sm:$0xff]  ;;  %v8139_v10 = vld [vmem:[#allocation4 + $0x78] sm:$0xff]  ;;  %v8147_v52 = vld [vmem:[#allocation4 + $0x70] sm:$0xff] }
 0x1f3   :  { %v6280_v22 = vpop.f32.mrf.mxu0  ;;  %v6320_v9 = vpop.f32.mrf.mxu1  ;;  %v8151_v41 = vld [vmem:[#allocation4 + $0x48] sm:$0xff] }
 0x1f4   :  { %v7951_v24 = vadd.f32 %v6319_v53, %v6279_v29  ;;  %10783 = vst [vmem:[#allocation17_spill] sm:$0xff] %v8151_v41  ;;  %v8153_v29 = vld [vmem:[#allocation4 + $0x58] sm:$0xff]  ;;  %v8159_v53 = vld [vmem:[#allocation4 + $0x40] sm:$0xff] }
 0x1f5   :  { %v6281_v42 = vpop.f32.mrf.mxu0  ;;  %v6321_v17 = vpop.f32.mrf.mxu1  ;;  %10784 = vst [vmem:[#allocation18_spill] sm:$0xff] %v8153_v29  ;;  %10785 = vst [vmem:[#allocation19_spill] sm:$0xff] %v8159_v53 }
 0x1f6   :  { %v6282_v61 = vadd.f32 %v6281_v42, %v6280_v22  ;;  %v6322_v1 = vadd.f32 %v6321_v17, %v6320_v9  ;;  %6169 = vmatmul.mubr.msk.f32.gmra.mxu0 %vm1424_vm1, %v7951_v24  ;;  %6177 = vmatmul.mubr.msk.f32.gmra.mxu1 %vm1424_vm1, %v7951_v24  ;;  %v8161_v22 = vld [vmem:[#allocation4 + $0x50] sm:$0xff]  ;;  %v8167_v9 = vld [vmem:[#allocation4 + $0x28] sm:$0xff]  ;;  %v8169_v42 = vld [vmem:[#allocation4 + $0x38] sm:$0xff] }
 0x1f7   :  { %1555 = vmatprep.mubr.f32.mxu0 %v10474_v57  ;;  %1668 = vmatprep.mubr.f32.mxu1 %v10474_v57  ;;  %10786 = vst [vmem:[#allocation20_spill] sm:$0xff] %v8161_v22  ;;  %10787 = vst [vmem:[#allocation13_spill] sm:$0xff] %v8167_v9  ;;  %v8177_v17 = vld [vmem:[#allocation4 + $0x30] sm:$0xff] }
 0x1f8   :  { %v7959_v20 = vadd.f32 %v6322_v1, %v6282_v61  ;;  %10788 = vst [vmem:[#allocation14_spill] sm:$0xff] %v8169_v42  ;;  %10790 = vst [vmem:[#allocation16_spill] sm:$0xff] %v8177_v17  ;;  %v8181_v61 = vld [vmem:[#allocation4 + $0x8] sm:$0xff]  ;;  %v8183_v1 = vld [vmem:[#allocation4 + $0x18] sm:$0xff] }
 0x1f9   :  { %10791 = vst [vmem:[#allocation21_spill] sm:$0xff] %v8181_v61  ;;  %10792 = vst [vmem:[#allocation22_spill] sm:$0xff] %v8183_v1 }
 0x1fa   :  { %6170 = vmatmul.mubr.msk.f32.gmra.mxu0 %vm1424_vm1, %v7959_v20  ;;  %6178 = vmatmul.mubr.msk.f32.gmra.mxu1 %vm1424_vm1, %v7959_v20 }
 0x1fb   :  { %1809 = vmatprep.mubr.f32.mxu0 %v10474_v57  ;;  %1922 = vmatprep.mubr.f32.mxu1 %v10474_v57 }
 0x1fe   :  { %6179 = vmatmul.mubr.msk.f32.vlgmr.msra.gmra.mxu0 %vm1424_vm1, %v7855_v63  ;;  %6187 = vmatmul.mubr.msk.f32.vlgmr.msra.gmra.mxu1 %vm1424_vm1, %v7855_v63  ;;  %v7995_v63 = vld [vmem:[#allocation4 + $0x1a0] sm:$0xff] }
 0x1ff   :  { %2075 = vmatpush1.msra.mxu0 %v7967_v11  ;;  %2146 = vmatpush1.msra.mxu1 %v7969_v40 }
 0x200   :  { %2076 = vmatprep.subr.mxu0 %v7971_v21  ;;  %2147 = vmatprep.subr.mxu1 %v7973_v36 }
 0x201   :  { %2077 = vmatpush1.msra.mxu0 %v7979_v27  ;;  %2148 = vmatpush1.msra.mxu1 %v7981_v7 }
 0x202   :  { %1815 = vmatprep.mubr.f32.mxu0 %v10474_v57  ;;  %1928 = vmatprep.mubr.f32.mxu1 %v10474_v57 }
 0x203   :  { %2078 = vmatprep.subr.mxu0 %v7987_v34  ;;  %2149 = vmatprep.subr.mxu1 %v7989_v12 }
 0x204   :  { %6180 = vmatmul.mubr.msk.f32.gmra.mxu0 %vm1424_vm1, %v7875_v43  ;;  %6188 = vmatmul.mubr.msk.f32.gmra.mxu1 %vm1424_vm1, %v7875_v43  ;;  %v8025_v43 = vld [vmem:[#allocation4 + $0x160] sm:$0xff] }
 0x205   :  { %2079 = vmatpush1.msra.mxu0 %v7995_v63  ;;  %2150 = vmatpush1.msra.mxu1 %v7997_v30 }
 0x206   :  { %2080 = vmatprep.subr.mxu0 %v8001_v5  ;;  %2151 = vmatprep.subr.mxu1 %v8003_v19 }
 0x207   :  { %2081 = vmatpush1.msra.mxu0 %v8009_v23  ;;  %2152 = vmatpush1.msra.mxu1 %v8011_v62 }
 0x208   :  { %1821 = vmatprep.mubr.f32.mxu0 %v10474_v57  ;;  %1934 = vmatprep.mubr.f32.mxu1 %v10474_v57 }
 0x209   :  { %2082 = vmatprep.subr.mxu0 %v8017_v4  ;;  %2153 = vmatprep.subr.mxu1 %v8019_v0 }
 0x20a   :  { %6181 = vmatmul.mubr.msk.f32.gmra.mxu0 %vm1424_vm1, %v7919_v59  ;;  %6189 = vmatmul.mubr.msk.f32.gmra.mxu1 %vm1424_vm1, %v7919_v59  ;;  %v8063_v59 = vld [vmem:[#allocation4 + $0x118] sm:$0xff] }
 0x20b   :  { %2083 = vmatpush1.msra.mxu0 %v8025_v43  ;;  %2154 = vmatpush1.msra.mxu1 %v8027_v6 }
 0x20c   :  { %2084 = vmatprep.subr.mxu0 %v8031_v3  ;;  %2155 = vmatprep.subr.mxu1 %v8033_v58 }
 0x20d   :  { %2085 = vmatpush1.msra.mxu0 %v8039_v60  ;;  %2156 = vmatpush1.msra.mxu1 %v8041_v48 }
 0x20e   :  { %1827 = vmatprep.mubr.f32.mxu0 %v10474_v57  ;;  %1940 = vmatprep.mubr.f32.mxu1 %v10474_v57 }
 0x20f   :  { %2086 = vmatprep.subr.mxu0 %v8047_v49  ;;  %2157 = vmatprep.subr.mxu1 %v8049_v54 }
 0x210   :  { %6182 = vmatmul.mubr.msk.f32.gmra.mxu0 %vm1424_vm1, %v7927_v14  ;;  %6190 = vmatmul.mubr.msk.f32.gmra.mxu1 %vm1424_vm1, %v7927_v14  ;;  %v8085_v14 = vld [vmem:[#allocation4 + $0xe0] sm:$0xff] }
 0x211   :  { %2087 = vmatpush1.msra.mxu0 %v8055_v56  ;;  %2158 = vmatpush1.msra.mxu1 %v8057_v26 }
 0x212   :  { %2088 = vmatprep.subr.mxu0 %v8061_v46  ;;  %2159 = vmatprep.subr.mxu1 %v8063_v59 }
 0x213   :  { %2089 = vmatpush1.msra.mxu0 %v8069_v15  ;;  %2160 = vmatpush1.msra.mxu1 %v8071_v32 }
 0x214   :  { %1833 = vmatprep.mubr.f32.mxu0 %v10474_v57  ;;  %1946 = vmatprep.mubr.f32.mxu1 %v10474_v57 }
 0x215   :  { %2090 = vmatprep.subr.mxu0 %v8077_v38  ;;  %2161 = vmatprep.subr.mxu1 %v8079_v13 }
 0x216   :  { %6183 = vmatmul.mubr.msk.f32.gmra.mxu0 %vm1424_vm1, %v7935_v37  ;;  %6191 = vmatmul.mubr.msk.f32.gmra.mxu1 %vm1424_vm1, %v7935_v37  ;;  %v8117_v37 = vld [vmem:[#allocation4 + $0xb0] sm:$0xff] }
 0x217   :  { %2091 = vmatpush1.msra.mxu0 %v8085_v14  ;;  %2162 = vmatpush1.msra.mxu1 %v8087_v45 }
 0x218   :  { %2092 = vmatprep.subr.mxu0 %v8091_v31  ;;  %2163 = vmatprep.subr.mxu1 %v8093_v33 }
 0x219   :  { %2093 = vmatpush1.msra.mxu0 %v8099_v28  ;;  %2164 = vmatpush1.msra.mxu1 %v8101_v55 }
 0x21a   :  { %1839 = vmatprep.mubr.f32.mxu0 %v10474_v57  ;;  %1952 = vmatprep.mubr.f32.mxu1 %v10474_v57 }
 0x21b   :  { %2094 = vmatprep.subr.mxu0 %v8107_v2  ;;  %2165 = vmatprep.subr.mxu1 %v8109_v25 }
 0x21c   :  { %6184 = vmatmul.mubr.msk.f32.gmra.mxu0 %vm1424_vm1, %v7943_v50  ;;  %6192 = vmatmul.mubr.msk.f32.gmra.mxu1 %vm1424_vm1, %v7943_v50  ;;  %v8145_v50 = vld [vmem:[#allocation4 + $0x60] sm:$0xff] }
 0x21d   :  { %2095 = vmatpush1.msra.mxu0 %v8115_v35  ;;  %2166 = vmatpush1.msra.mxu1 %v8117_v37 }
 0x21e   :  { %2096 = vmatprep.subr.mxu0 %v8121_v44  ;;  %2167 = vmatprep.subr.mxu1 %v8123_v8 }
 0x21f   :  { %2097 = vmatpush1.msra.mxu0 %v8129_v47  ;;  %2168 = vmatpush1.msra.mxu1 %v8131_v16 }
 0x220   :  { %1845 = vmatprep.mubr.f32.mxu0 %v10474_v57  ;;  %1958 = vmatprep.mubr.f32.mxu1 %v10474_v57 }
 0x221   :  { %2098 = vmatprep.subr.mxu0 %v8137_v51  ;;  %2169 = vmatprep.subr.mxu1 %v8139_v10 }
 0x222   :  { %6185 = vmatmul.mubr.msk.f32.gmra.mxu0 %vm1424_vm1, %v7951_v24  ;;  %6193 = vmatmul.mubr.msk.f32.gmra.mxu1 %vm1424_vm1, %v7951_v24  ;;  %v8175_v24 = vld [vmem:[#allocation4 + $0x20] sm:$0xff] }
 0x223   :  { %2099 = vmatpush1.msra.mxu0 %v8145_v50  ;;  %2170 = vmatpush1.msra.mxu1 %v8147_v52  ;;  %10789 = vst [vmem:[#allocation15_spill] sm:$0xff] %v8175_v24 }
 0x224   :  { %2100 = vmatprep.subr.mxu0 %v8151_v41  ;;  %2171 = vmatprep.subr.mxu1 %v8153_v29  ;;  %v8231_v29 = vld [vmem:[#allocation7 + $0x1b0] sm:$0xff]  ;;  %v8235_v41 = vld [vmem:[#allocation7 + $0x188] sm:$0xff] }
 0x225   :  { %2101 = vmatpush1.msra.mxu0 %v8159_v53  ;;  %2172 = vmatpush1.msra.mxu1 %v8161_v22  ;;  %v8189_v22 = vld [vmem:[#allocation4] sm:$0xff]  ;;  %10807 = vst [vmem:[#allocation36_spill] sm:$0xff] %v8231_v29  ;;  %10808 = vst [vmem:[#allocation37_spill] sm:$0xff] %v8235_v41 }
 0x226   :  { %1851 = vmatprep.mubr.f32.mxu0 %v10474_v57  ;;  %1964 = vmatprep.mubr.f32.mxu1 %v10474_v57  ;;  %10793 = vst [vmem:[#allocation23_spill] sm:$0xff] %v8189_v22  ;;  %v8191_v57 = vld [vmem:[#allocation4 + $0x10] sm:$0xff]  ;;  %v8205_v53 = vld [vmem:[#allocation7 + $0x1e0] sm:$0xff] }
 0x227   :  { %2102 = vmatprep.subr.mxu0 %v8167_v9  ;;  %2173 = vmatprep.subr.mxu1 %v8169_v42  ;;  %10794 = vst [vmem:[#allocation24_spill] sm:$0xff] %v8191_v57  ;;  %v8197_v42 = vld [vmem:[#allocation7 + $0x1e8] sm:$0xff]  ;;  %v8199_v9 = vld [vmem:[#allocation7 + $0x1f8] sm:$0xff]  ;;  %10798 = vst [vmem:[#allocation27_spill] sm:$0xff] %v8205_v53 }
 0x228   :  { %6186 = vmatmul.mubr.msk.f32.gmra.mxu0 %vm1424_vm1, %v7959_v20  ;;  %6194 = vmatmul.mubr.msk.f32.gmra.mxu1 %vm1424_vm1, %v7959_v20  ;;  %10795 = vst [vmem:[#allocation25_spill] sm:$0xff] %v8197_v42  ;;  %10796 = vst [vmem:[#allocation26_spill] sm:$0xff] %v8199_v9  ;;  %v10797_v20 = vmov 0.0  }
 0x229   :  { %2103 = vmatpush1.msra.mxu0 %v8175_v24  ;;  %2174 = vmatpush1.msra.mxu1 %v8177_v17  ;;  %v8207_v24 = vld [vmem:[#allocation7 + $0x1f0] sm:$0xff]  ;;  %v8223_v17 = vld [vmem:[#allocation7 + $0x1a8] sm:$0xff] }
 0x22a   :  { %2104 = vmatprep.subr.mxu0 %v8181_v61  ;;  %2175 = vmatprep.subr.mxu1 %v8183_v1  ;;  %10799 = vst [vmem:[#allocation28_spill] sm:$0xff] %v8207_v24  ;;  %v8211_v1 = vld [vmem:[#allocation7 + $0x1c8] sm:$0xff]  ;;  %v8213_v61 = vld [vmem:[#allocation7 + $0x1d8] sm:$0xff]  ;;  %10804 = vst [vmem:[#allocation33_spill] sm:$0xff] %v8223_v17 }
 0x22b   :  { %2105 = vmatpush1.msra.mxu0 %v8189_v22  ;;  %2176 = vmatpush1.msra.mxu1 %v8191_v57  ;;  %10800 = vst [vmem:[#allocation29_spill] sm:$0xff] %v8211_v1  ;;  %10801 = vst [vmem:[#allocation30_spill] sm:$0xff] %v8213_v61  ;;  %v8217_v57 = vld [vmem:[#allocation7 + $0x1c0] sm:$0xff]  ;;  %v8219_v22 = vld [vmem:[#allocation7 + $0x1d0] sm:$0xff] }
 0x22c   :  { %2138 = vmatprep.mubr.f32.mxu0 %v10797_v20  ;;  %2209 = vmatprep.mubr.f32.mxu1 %v10797_v20  ;;  %10802 = vst [vmem:[#allocation31_spill] sm:$0xff] %v8217_v57  ;;  %10803 = vst [vmem:[#allocation32_spill] sm:$0xff] %v8219_v22 }
 0x22d   :  { %2315 = vmatprep.subr.mxu0 %v8197_v42  ;;  %2386 = vmatprep.subr.mxu1 %v8199_v9  ;;  %v8225_v42 = vld [vmem:[#allocation7 + $0x1b8] sm:$0xff]  ;;  %v8229_v9 = vld [vmem:[#allocation7 + $0x1a0] sm:$0xff] }
 0x22e   :  { %2139 = vmatmul.mubr.f32.vlgmr.msra.gmra.mxu0 %v10797_v20  ;;  %2210 = vmatmul.mubr.f32.vlgmr.msra.gmra.mxu1 %v10797_v20  ;;  %10805 = vst [vmem:[#allocation34_spill] sm:$0xff] %v8225_v42  ;;  %10806 = vst [vmem:[#allocation35_spill] sm:$0xff] %v8229_v9 }
 0x22f   :  { %2316 = vmatpush1.msra.mxu0 %v8205_v53  ;;  %2387 = vmatpush1.msra.mxu1 %v8207_v24  ;;  %v8237_v53 = vld [vmem:[#allocation7 + $0x198] sm:$0xff]  ;;  %v8241_v24 = vld [vmem:[#allocation7 + $0x180] sm:$0xff] }
 0x230   :  { %2317 = vmatprep.subr.mxu0 %v8211_v1  ;;  %2388 = vmatprep.subr.mxu1 %v8213_v61  ;;  %10809 = vst [vmem:[#allocation38_spill] sm:$0xff] %v8237_v53  ;;  %10810 = vst [vmem:[#allocation39_spill] sm:$0xff] %v8241_v24  ;;  %v8243_v1 = vld [vmem:[#allocation7 + $0x190] sm:$0xff]  ;;  %v8247_v61 = vld [vmem:[#allocation7 + $0x168] sm:$0xff] }
 0x231   :  { %2318 = vmatpush1.msra.mxu0 %v8217_v57  ;;  %2389 = vmatpush1.msra.mxu1 %v8219_v22  ;;  %10811 = vst [vmem:[#allocation40_spill] sm:$0xff] %v8243_v1  ;;  %10812 = vst [vmem:[#allocation41_spill] sm:$0xff] %v8247_v61  ;;  %v8249_v57 = vld [vmem:[#allocation7 + $0x178] sm:$0xff]  ;;  %v8253_v22 = vld [vmem:[#allocation7 + $0x160] sm:$0xff] }
 0x232   :  { %2319 = vmatprep.subr.mxu0 %v8223_v17  ;;  %2390 = vmatprep.subr.mxu1 %v8225_v42  ;;  %10813 = vst [vmem:[#allocation42_spill] sm:$0xff] %v8249_v57  ;;  %10814 = vst [vmem:[#allocation43_spill] sm:$0xff] %v8253_v22  ;;  %v8255_v17 = vld [vmem:[#allocation7 + $0x170] sm:$0xff]  ;;  %v8259_v42 = vld [vmem:[#allocation7 + $0x148] sm:$0xff] }
 0x233   :  { %2320 = vmatpush1.msra.mxu0 %v8229_v9  ;;  %2391 = vmatpush1.msra.mxu1 %v8231_v29  ;;  %10815 = vst [vmem:[#allocation44_spill] sm:$0xff] %v8255_v17  ;;  %10816 = vst [vmem:[#allocation45_spill] sm:$0xff] %v8259_v42  ;;  %v8261_v9 = vld [vmem:[#allocation7 + $0x158] sm:$0xff]  ;;  %v8265_v29 = vld [vmem:[#allocation7 + $0x140] sm:$0xff] }
 0x234   :  { %2321 = vmatprep.subr.mxu0 %v8235_v41  ;;  %2392 = vmatprep.subr.mxu1 %v8237_v53  ;;  %10817 = vst [vmem:[#allocation46_spill] sm:$0xff] %v8261_v9  ;;  %10818 = vst [vmem:[#allocation47_spill] sm:$0xff] %v8265_v29  ;;  %v8267_v41 = vld [vmem:[#allocation7 + $0x150] sm:$0xff]  ;;  %v8271_v53 = vld [vmem:[#allocation7 + $0x128] sm:$0xff] }
 0x235   :  { %2322 = vmatpush1.msra.mxu0 %v8241_v24  ;;  %2393 = vmatpush1.msra.mxu1 %v8243_v1  ;;  %10819 = vst [vmem:[#allocation48_spill] sm:$0xff] %v8267_v41  ;;  %10820 = vst [vmem:[#allocation49_spill] sm:$0xff] %v8271_v53  ;;  %v8273_v24 = vld [vmem:[#allocation7 + $0x138] sm:$0xff]  ;;  %v8277_v1 = vld [vmem:[#allocation7 + $0x120] sm:$0xff] }
 0x236   :  { %2323 = vmatprep.subr.mxu0 %v8247_v61  ;;  %2394 = vmatprep.subr.mxu1 %v8249_v57  ;;  %10821 = vst [vmem:[#allocation50_spill] sm:$0xff] %v8273_v24  ;;  %10822 = vst [vmem:[#allocation51_spill] sm:$0xff] %v8277_v1  ;;  %v8279_v61 = vld [vmem:[#allocation7 + $0x130] sm:$0xff]  ;;  %v8283_v57 = vld [vmem:[#allocation7 + $0x108] sm:$0xff] }
 0x237   :  { %2324 = vmatpush1.msra.mxu0 %v8253_v22  ;;  %2395 = vmatpush1.msra.mxu1 %v8255_v17  ;;  %10823 = vst [vmem:[#allocation52_spill] sm:$0xff] %v8279_v61  ;;  %10824 = vst [vmem:[#allocation53_spill] sm:$0xff] %v8283_v57  ;;  %v8285_v22 = vld [vmem:[#allocation7 + $0x118] sm:$0xff]  ;;  %v8289_v17 = vld [vmem:[#allocation7 + $0x100] sm:$0xff] }
 0x238   :  { %2325 = vmatprep.subr.mxu0 %v8259_v42  ;;  %2396 = vmatprep.subr.mxu1 %v8261_v9  ;;  %10825 = vst [vmem:[#allocation54_spill] sm:$0xff] %v8285_v22  ;;  %10826 = vst [vmem:[#allocation55_spill] sm:$0xff] %v8289_v17  ;;  %v8291_v42 = vld [vmem:[#allocation7 + $0x110] sm:$0xff]  ;;  %v8295_v9 = vld [vmem:[#allocation7 + $0xe8] sm:$0xff] }
 0x239   :  { %2326 = vmatpush1.msra.mxu0 %v8265_v29  ;;  %2397 = vmatpush1.msra.mxu1 %v8267_v41  ;;  %10827 = vst [vmem:[#allocation56_spill] sm:$0xff] %v8291_v42  ;;  %10828 = vst [vmem:[#allocation57_spill] sm:$0xff] %v8295_v9  ;;  %v8297_v29 = vld [vmem:[#allocation7 + $0xf8] sm:$0xff]  ;;  %v8301_v41 = vld [vmem:[#allocation7 + $0xe0] sm:$0xff] }
 0x23a   :  { %2327 = vmatprep.subr.mxu0 %v8271_v53  ;;  %2398 = vmatprep.subr.mxu1 %v8273_v24  ;;  %10829 = vst [vmem:[#allocation58_spill] sm:$0xff] %v8297_v29  ;;  %10830 = vst [vmem:[#allocation59_spill] sm:$0xff] %v8301_v41  ;;  %v8303_v53 = vld [vmem:[#allocation7 + $0xf0] sm:$0xff]  ;;  %v8307_v24 = vld [vmem:[#allocation7 + $0xc8] sm:$0xff] }
 0x23b   :  { %2328 = vmatpush1.msra.mxu0 %v8277_v1  ;;  %2399 = vmatpush1.msra.mxu1 %v8279_v61  ;;  %10831 = vst [vmem:[#allocation60_spill] sm:$0xff] %v8303_v53  ;;  %10832 = vst [vmem:[#allocation61_spill] sm:$0xff] %v8307_v24  ;;  %v8309_v1 = vld [vmem:[#allocation7 + $0xd8] sm:$0xff]  ;;  %v8313_v61 = vld [vmem:[#allocation7 + $0xc0] sm:$0xff] }
 0x23c   :  { %2329 = vmatprep.subr.mxu0 %v8283_v57  ;;  %2400 = vmatprep.subr.mxu1 %v8285_v22  ;;  %10833 = vst [vmem:[#allocation62_spill] sm:$0xff] %v8309_v1  ;;  %10834 = vst [vmem:[#allocation63_spill] sm:$0xff] %v8313_v61  ;;  %v8315_v57 = vld [vmem:[#allocation7 + $0xd0] sm:$0xff]  ;;  %v8319_v22 = vld [vmem:[#allocation7 + $0xa8] sm:$0xff] }
 0x23d   :  { %2330 = vmatpush1.msra.mxu0 %v8289_v17  ;;  %2401 = vmatpush1.msra.mxu1 %v8291_v42  ;;  %10835 = vst [vmem:[#allocation64_spill] sm:$0xff] %v8315_v57  ;;  %10836 = vst [vmem:[#allocation65_spill] sm:$0xff] %v8319_v22  ;;  %v8321_v17 = vld [vmem:[#allocation7 + $0xb8] sm:$0xff]  ;;  %v8325_v42 = vld [vmem:[#allocation7 + $0xa0] sm:$0xff] }
 0x23e   :  { %2331 = vmatprep.subr.mxu0 %v8295_v9  ;;  %2402 = vmatprep.subr.mxu1 %v8297_v29  ;;  %10837 = vst [vmem:[#allocation66_spill] sm:$0xff] %v8321_v17  ;;  %10838 = vst [vmem:[#allocation67_spill] sm:$0xff] %v8325_v42  ;;  %v8327_v9 = vld [vmem:[#allocation7 + $0xb0] sm:$0xff]  ;;  %v8331_v29 = vld [vmem:[#allocation7 + $0x88] sm:$0xff] }
 0x23f   :  { %2332 = vmatpush1.msra.mxu0 %v8301_v41  ;;  %2403 = vmatpush1.msra.mxu1 %v8303_v53  ;;  %10839 = vst [vmem:[#allocation68_spill] sm:$0xff] %v8327_v9  ;;  %10840 = vst [vmem:[#allocation69_spill] sm:$0xff] %v8331_v29  ;;  %v8333_v41 = vld [vmem:[#allocation7 + $0x98] sm:$0xff]  ;;  %v8337_v53 = vld [vmem:[#allocation7 + $0x80] sm:$0xff] }
 0x240   :  { %2333 = vmatprep.subr.mxu0 %v8307_v24  ;;  %2404 = vmatprep.subr.mxu1 %v8309_v1  ;;  %10841 = vst [vmem:[#allocation70_spill] sm:$0xff] %v8333_v41  ;;  %10842 = vst [vmem:[#allocation71_spill] sm:$0xff] %v8337_v53  ;;  %v8339_v24 = vld [vmem:[#allocation7 + $0x90] sm:$0xff]  ;;  %v8343_v1 = vld [vmem:[#allocation7 + $0x68] sm:$0xff] }
 0x241   :  { %2334 = vmatpush1.msra.mxu0 %v8313_v61  ;;  %2405 = vmatpush1.msra.mxu1 %v8315_v57  ;;  %10843 = vst [vmem:[#allocation72_spill] sm:$0xff] %v8339_v24  ;;  %10844 = vst [vmem:[#allocation73_spill] sm:$0xff] %v8343_v1  ;;  %v8345_v61 = vld [vmem:[#allocation7 + $0x78] sm:$0xff]  ;;  %v8349_v57 = vld [vmem:[#allocation7 + $0x60] sm:$0xff] }
 0x242   :  { %2335 = vmatprep.subr.mxu0 %v8319_v22  ;;  %2406 = vmatprep.subr.mxu1 %v8321_v17  ;;  %10845 = vst [vmem:[#allocation74_spill] sm:$0xff] %v8345_v61  ;;  %10846 = vst [vmem:[#allocation75_spill] sm:$0xff] %v8349_v57  ;;  %v8351_v22 = vld [vmem:[#allocation7 + $0x70] sm:$0xff]  ;;  %v8355_v17 = vld [vmem:[#allocation7 + $0x48] sm:$0xff] }
 0x243   :  { %2336 = vmatpush1.msra.mxu0 %v8325_v42  ;;  %2407 = vmatpush1.msra.mxu1 %v8327_v9  ;;  %10847 = vst [vmem:[#allocation76_spill] sm:$0xff] %v8351_v22  ;;  %v8357_v42 = vld [vmem:[#allocation7 + $0x58] sm:$0xff]  ;;  %v8361_v9 = vld [vmem:[#allocation7 + $0x40] sm:$0xff] }
 0x244   :  { %2337 = vmatprep.subr.mxu0 %v8331_v29  ;;  %2408 = vmatprep.subr.mxu1 %v8333_v41  ;;  %10848 = vst [vmem:[#allocation77_spill] sm:$0xff] %v8357_v42  ;;  %v8363_v29 = vld [vmem:[#allocation7 + $0x50] sm:$0xff]  ;;  %v8367_v41 = vld [vmem:[#allocation7 + $0x28] sm:$0xff] }
 0x245   :  { %2338 = vmatpush1.msra.mxu0 %v8337_v53  ;;  %2409 = vmatpush1.msra.mxu1 %v8339_v24  ;;  %v8369_v53 = vld [vmem:[#allocation7 + $0x38] sm:$0xff]  ;;  %v8373_v24 = vld [vmem:[#allocation7 + $0x20] sm:$0xff] }
 0x246   :  { %2339 = vmatprep.subr.mxu0 %v8343_v1  ;;  %2410 = vmatprep.subr.mxu1 %v8345_v61  ;;  %v8375_v1 = vld [vmem:[#allocation7 + $0x30] sm:$0xff]  ;;  %v8379_v61 = vld [vmem:[#allocation7 + $0x8] sm:$0xff] }
 0x247   :  { %2340 = vmatpush1.msra.mxu0 %v8349_v57  ;;  %2411 = vmatpush1.msra.mxu1 %v8351_v22  ;;  %v8381_v57 = vld [vmem:[#allocation7 + $0x18] sm:$0xff]  ;;  %v8385_v22 = vld [vmem:[#allocation7] sm:$0xff] }
 0x248   :  { %2341 = vmatprep.subr.mxu0 %v8355_v17  ;;  %2412 = vmatprep.subr.mxu1 %v8357_v42  ;;  %v8389_v42 = vld [vmem:[#allocation7 + $0x10] sm:$0xff] }
 0x249   :  { %2342 = vmatpush1.msra.mxu0 %v8361_v9  ;;  %2413 = vmatpush1.msra.mxu1 %v8363_v29 }
 0x24a   :  { %2343 = vmatprep.subr.mxu0 %v8367_v41  ;;  %2414 = vmatprep.subr.mxu1 %v8369_v53 }
 0x24b   :  { %2344 = vmatpush1.msra.mxu0 %v8373_v24  ;;  %2415 = vmatpush1.msra.mxu1 %v8375_v1 }
 0x24c   :  { %2345 = vmatprep.subr.mxu0 %v8379_v61  ;;  %2416 = vmatprep.subr.mxu1 %v8381_v57 }
 0x24d   :  { %2346 = vmatpush1.msra.mxu0 %v8385_v22  ;;  %2379 = vmatprep.mubr.f32.mxu0 %v10797_v20 }
 0x24e   :  { %2417 = vmatpush1.msra.mxu1 %v8389_v42  ;;  %2450 = vmatprep.mubr.f32.mxu1 %v10797_v20 }
 0x24f   :  { %2380 = vmatmul.mubr.f32.vlgmr.msra.gmra.mxu0 %v10797_v20  ;;  %2451 = vmatmul.mubr.f32.vlgmr.msra.gmra.mxu1 %v10797_v20 }
 0x250   :  { %2564 = vmatprep.subr.mxu0 %v7913_v18  ;;  %2635 = vmatprep.subr.mxu1 %v7915_v39  ;;  %v10849_v18 = vld [vmem:[#allocation17_spill] sm:$0xff]  ;;  %v10850_v39 = vld [vmem:[#allocation18_spill] sm:$0xff] }
 0x251   :  { %2565 = vmatpush1.msra.mxu0 %v7967_v11  ;;  %2636 = vmatpush1.msra.mxu1 %v7969_v40  ;;  %v10851_v11 = vld [vmem:[#allocation19_spill] sm:$0xff]  ;;  %v10852_v40 = vld [vmem:[#allocation20_spill] sm:$0xff] }
 0x252   :  { %2566 = vmatprep.subr.mxu0 %v7971_v21  ;;  %2637 = vmatprep.subr.mxu1 %v7973_v36  ;;  %v10853_v21 = vld [vmem:[#allocation13_spill] sm:$0xff]  ;;  %v10854_v36 = vld [vmem:[#allocation14_spill] sm:$0xff] }
 0x253   :  { %2567 = vmatpush1.msra.mxu0 %v7979_v27  ;;  %2638 = vmatpush1.msra.mxu1 %v7981_v7  ;;  %v10855_v27 = vld [vmem:[#allocation15_spill] sm:$0xff]  ;;  %v10856_v7 = vld [vmem:[#allocation16_spill] sm:$0xff] }
 0x254   :  { %2568 = vmatprep.subr.mxu0 %v7987_v34  ;;  %2639 = vmatprep.subr.mxu1 %v7989_v12  ;;  %v10857_v34 = vld [vmem:[#allocation21_spill] sm:$0xff]  ;;  %v10858_v12 = vld [vmem:[#allocation22_spill] sm:$0xff] }
 0x255   :  { %2569 = vmatpush1.msra.mxu0 %v7995_v63  ;;  %2640 = vmatpush1.msra.mxu1 %v7997_v30  ;;  %v10859_v63 = vld [vmem:[#allocation23_spill] sm:$0xff]  ;;  %v10860_v30 = vld [vmem:[#allocation24_spill] sm:$0xff] }
 0x256   :  { %2570 = vmatprep.subr.mxu0 %v8001_v5  ;;  %2641 = vmatprep.subr.mxu1 %v8003_v19  ;;  %v10861_v5 = vld [vmem:[#allocation25_spill] sm:$0xff]  ;;  %v10862_v19 = vld [vmem:[#allocation26_spill] sm:$0xff] }
 0x257   :  { %2571 = vmatpush1.msra.mxu0 %v8009_v23  ;;  %2642 = vmatpush1.msra.mxu1 %v8011_v62 }
 0x258   :  { %2572 = vmatprep.subr.mxu0 %v8017_v4  ;;  %2643 = vmatprep.subr.mxu1 %v8019_v0 }
 0x259   :  { %2573 = vmatpush1.msra.mxu0 %v8025_v43  ;;  %2644 = vmatpush1.msra.mxu1 %v8027_v6 }
 0x25a   :  { %2574 = vmatprep.subr.mxu0 %v8031_v3  ;;  %2645 = vmatprep.subr.mxu1 %v8033_v58 }
 0x25b   :  { %2575 = vmatpush1.msra.mxu0 %v8039_v60  ;;  %2646 = vmatpush1.msra.mxu1 %v8041_v48 }
 0x25c   :  { %2576 = vmatprep.subr.mxu0 %v8047_v49  ;;  %2647 = vmatprep.subr.mxu1 %v8049_v54 }
 0x25d   :  { %2577 = vmatpush1.msra.mxu0 %v8055_v56  ;;  %2648 = vmatpush1.msra.mxu1 %v8057_v26 }
 0x25e   :  { %2578 = vmatprep.subr.mxu0 %v8061_v46  ;;  %2649 = vmatprep.subr.mxu1 %v8063_v59 }
 0x25f   :  { %2579 = vmatpush1.msra.mxu0 %v8069_v15  ;;  %2650 = vmatpush1.msra.mxu1 %v8071_v32 }
 0x260   :  { %2580 = vmatprep.subr.mxu0 %v8077_v38  ;;  %2651 = vmatprep.subr.mxu1 %v8079_v13 }
 0x261   :  { %2581 = vmatpush1.msra.mxu0 %v8085_v14  ;;  %2652 = vmatpush1.msra.mxu1 %v8087_v45 }
 0x262   :  { %2582 = vmatprep.subr.mxu0 %v8091_v31  ;;  %2653 = vmatprep.subr.mxu1 %v8093_v33  ;;  %v8467_v23 = vpop.f32.mrf.mxu0  ;;  %v8469_v62 = vpop.f32.mrf.mxu1 }
 0x263   :  { %2583 = vmatpush1.msra.mxu0 %v8099_v28  ;;  %2654 = vmatpush1.msra.mxu1 %v8101_v55  ;;  %v10879_v28 = vlaneseq }
 0x264   :  { %2584 = vmatprep.subr.mxu0 %v8107_v2  ;;  %2655 = vmatprep.subr.mxu1 %v8109_v25  ;;  %v8471_v4 = vpop.f32.mrf.mxu0  ;;  %v8473_v0 = vpop.f32.mrf.mxu1 }
 0x265   :  { %2585 = vmatpush1.msra.mxu0 %v8115_v35  ;;  %2656 = vmatpush1.msra.mxu1 %v8117_v37  ;;  %v8516_v55 = vshrl.u32 %v10879_v28, 7 }
 0x266   :  { %2586 = vmatprep.subr.mxu0 %v8121_v44  ;;  %2657 = vmatprep.subr.mxu1 %v8123_v8  ;;  %v8475_v43 = vpop.f32.mrf.mxu0  ;;  %v8477_v6 = vpop.f32.mrf.mxu1  ;;  %v1723_v44 = vld [vmem:[%s10470_s7] sm:$0xf] }
 0x267   :  { %2587 = vmatpush1.msra.mxu0 %v8129_v47  ;;  %2658 = vmatpush1.msra.mxu1 %v8131_v16  ;;  %v10543_v8 = vsub.s32 0, %v8516_v55  ;;  %v10540_v47 = vsub.s32 2, %v8516_v55 }
 0x268   :  { %2588 = vmatprep.subr.mxu0 %v8137_v51  ;;  %2659 = vmatprep.subr.mxu1 %v8139_v10  ;;  %v8479_v3 = vpop.f32.mrf.mxu0  ;;  %v8481_v58 = vpop.f32.mrf.mxu1  ;;  %v10542_v10 = vsub.s32 1, %v8516_v55 }
 0x269   :  { %2589 = vmatpush1.msra.mxu0 %v8145_v50  ;;  %2660 = vmatpush1.msra.mxu1 %v8147_v52  ;;  %v10541_v50 = vsub.s32 3, %v8516_v55  ;;  %v8539_v52 = vrot.slane %v1723_v44, %v10543_v8 }
 0x26a   :  { %2590 = vmatprep.subr.mxu0 %v10849_v18  ;;  %2661 = vmatprep.subr.mxu1 %v10850_v39  ;;  %v8543_v18 = vrot.slane %v1723_v44, %v10540_v47 }
 0x26b   :  { %2591 = vmatpush1.msra.mxu0 %v10851_v11  ;;  %2662 = vmatpush1.msra.mxu1 %v10852_v40  ;;  %v8551_v40 = vrot.slane %v1723_v44, %v10542_v10 }
 0x26c   :  { %2592 = vmatprep.subr.mxu0 %v10853_v21  ;;  %2663 = vmatprep.subr.mxu1 %v10854_v36  ;;  %v8555_v21 = vrot.slane %v1723_v44, %v10541_v50 }
 0x26d   :  { %2593 = vmatpush1.msra.mxu0 %v10855_v27  ;;  %2664 = vmatpush1.msra.mxu1 %v10856_v7 }
 0x26e   :  { %2594 = vmatprep.subr.mxu0 %v10857_v34  ;;  %2665 = vmatprep.subr.mxu1 %v10858_v12 }
 0x26f   :  { %2595 = vmatpush1.msra.mxu0 %v10859_v63  ;;  %2666 = vmatpush1.msra.mxu1 %v10860_v30 }
 0x270   :  { %2628 = vmatprep.mubr.f32.mxu0 %v10797_v20  ;;  %2699 = vmatprep.mubr.f32.mxu1 %v10797_v20 }
 0x271   :  { %2805 = vmatprep.subr.mxu0 %v10861_v5  ;;  %2876 = vmatprep.subr.mxu1 %v10862_v19 }
 0x281   :  { %v8483_v60 = vpop.f32.mrf.mxu0  ;;  %v8485_v48 = vpop.f32.mrf.mxu1 }
 0x282   :  { %10863 = vst [vmem:[#allocation17_spill] sm:$0xff] %v8483_v60  ;;  %10864 = vst [vmem:[#allocation18_spill] sm:$0xff] %v8485_v48  ;;  %v8880_v48 = vld [vmem:[#allocation4 + $0x98] sm:$0xff]  ;;  %v8888_v60 = vld [vmem:[#allocation4 + $0x68] sm:$0xff] }
 0x283   :  { %v8487_v49 = vpop.f32.mrf.mxu0  ;;  %v8489_v54 = vpop.f32.mrf.mxu1 }
 0x284   :  { %10865 = vst [vmem:[#allocation19_spill] sm:$0xff] %v8487_v49  ;;  %10866 = vst [vmem:[#allocation20_spill] sm:$0xff] %v8489_v54  ;;  %v8884_v54 = vld [vmem:[#allocation4 + $0x80] sm:$0xff]  ;;  %v8886_v49 = vld [vmem:[#allocation4 + $0x90] sm:$0xff] }
 0x285   :  { %v8491_v56 = vpop.f32.mrf.mxu0  ;;  %v8493_v26 = vpop.f32.mrf.mxu1 }
 0x286   :  { %10867 = vst [vmem:[#allocation13_spill] sm:$0xff] %v8491_v56  ;;  %10868 = vst [vmem:[#allocation14_spill] sm:$0xff] %v8493_v26  ;;  %v8856_v26 = vld [vmem:[#allocation4 + $0xd8] sm:$0xff]  ;;  %v8866_v56 = vld [vmem:[#allocation4 + $0xa8] sm:$0xff] }
 0x287   :  { %v8495_v46 = vpop.f32.mrf.mxu0  ;;  %v8497_v59 = vpop.f32.mrf.mxu1 }
 0x288   :  { %10869 = vst [vmem:[#allocation15_spill] sm:$0xff] %v8495_v46  ;;  %10870 = vst [vmem:[#allocation16_spill] sm:$0xff] %v8497_v59  ;;  %v8860_v59 = vld [vmem:[#allocation4 + $0xc0] sm:$0xff]  ;;  %v8862_v46 = vld [vmem:[#allocation4 + $0xd0] sm:$0xff] }
 0x29e   :  { %v8499_v15 = vpop.f32.mrf.mxu0  ;;  %v8501_v32 = vpop.f32.mrf.mxu1 }
 0x29f   :  { %10871 = vst [vmem:[#allocation21_spill] sm:$0xff] %v8499_v15  ;;  %10872 = vst [vmem:[#allocation22_spill] sm:$0xff] %v8501_v32 }
 0x2a0   :  { %v8503_v38 = vpop.f32.mrf.mxu0  ;;  %v8505_v13 = vpop.f32.mrf.mxu1 }
 0x2a1   :  { %10873 = vst [vmem:[#allocation23_spill] sm:$0xff] %v8503_v38  ;;  %10874 = vst [vmem:[#allocation24_spill] sm:$0xff] %v8505_v13  ;;  %v10915_v13 = vsub.s32 3, %v8516_v55 }
 0x2a2   :  { %v8507_v14 = vpop.f32.mrf.mxu0  ;;  %v8509_v45 = vpop.f32.mrf.mxu1 }
 0x2a3   :  { %10875 = vst [vmem:[#allocation25_spill] sm:$0xff] %v8507_v14  ;;  %10876 = vst [vmem:[#allocation26_spill] sm:$0xff] %v8509_v45 }
 0x2a4   :  { %v8511_v31 = vpop.f32.mrf.mxu0  ;;  %v8513_v33 = vpop.f32.mrf.mxu1 }
 0x2a5   :  { %10877 = vst [vmem:[#allocation78_spill] sm:$0xff] %v8511_v31  ;;  %10878 = vst [vmem:[#allocation79_spill] sm:$0xff] %v8513_v33  ;;  %v10914_v33 = vsub.s32 1, %v8516_v55 }
 0x2b6   :  { %v8518_v2 = vpop.f32.mrf.mxu0  ;;  %v8520_v25 = vpop.f32.mrf.mxu1 }
 0x2b7   :  { %10880 = vst [vmem:[#allocation80_spill] sm:$0xff] %v8518_v2  ;;  %10881 = vst [vmem:[#allocation81_spill] sm:$0xff] %v8520_v25 }
 0x2b8   :  { %v8522_v35 = vpop.f32.mrf.mxu0  ;;  %v8524_v37 = vpop.f32.mrf.mxu1 }
 0x2b9   :  { %10882 = vst [vmem:[#allocation82_spill] sm:$0xff] %v8522_v35  ;;  %10883 = vst [vmem:[#allocation83_spill] sm:$0xff] %v8524_v37 }
 0x2ba   :  { %v8531_v16 = vpop.f32.mrf.mxu0  ;;  %v8533_v51 = vpop.f32.mrf.mxu1 }
 0x2bb   :  { %10884 = vst [vmem:[#allocation84_spill] sm:$0xff] %v8531_v16  ;;  %10885 = vst [vmem:[#allocation85_spill] sm:$0xff] %v8533_v51 }
 0x2bc   :  { %v8545_v39 = vpop.f32.mrf.mxu0  ;;  %v8547_v11 = vpop.f32.mrf.mxu1 }
 0x2bd   :  { %10886 = vst [vmem:[#allocation86_spill] sm:$0xff] %v8545_v39  ;;  %10887 = vst [vmem:[#allocation87_spill] sm:$0xff] %v8547_v11 }
 0x2be   :  { %v1811_v36 = vpop.f32.mrf.mxu0  ;;  %v1924_v27 = vpop.f32.mrf.mxu1 }
 0x2bf   :  { %v8558_v7 = vadd.f32 %v1811_v36, %v8539_v52  ;;  %v8561_v34 = vadd.f32 %v1924_v27, %v8543_v18 }
 0x2c0   :  { %v1813_v12 = vpop.f32.mrf.mxu0  ;;  %v1926_v63 = vpop.f32.mrf.mxu1 }
 0x2c1   :  { %10888 = vst [vmem:[#allocation88_spill] sm:$0xff] %v8558_v7  ;;  %10889 = vst [vmem:[#allocation89_spill] sm:$0xff] %v8561_v34  ;;  %v8564_v30 = vadd.f32 %v1813_v12, %v8551_v40  ;;  %v8567_v5 = vadd.f32 %v1926_v63, %v8555_v21 }
 0x2c3   :  { %10890 = vst [vmem:[#allocation90_spill] sm:$0xff] %v8564_v30  ;;  %10891 = vst [vmem:[#allocation91_spill] sm:$0xff] %v8567_v5 }
 0x2c4   :  { %v1817_v19 = vpop.f32.mrf.mxu0  ;;  %v1930_v28 = vpop.f32.mrf.mxu1 }
 0x2c5   :  { %v8570_v44 = vadd.f32 %v1817_v19, %v8539_v52  ;;  %v8573_v47 = vadd.f32 %v1930_v28, %v8543_v18 }
 0x2c6   :  { %v1819_v36 = vpop.f32.mrf.mxu0  ;;  %v1932_v50 = vpop.f32.mrf.mxu1 }
 0x2c7   :  { %10892 = vst [vmem:[#allocation92_spill] sm:$0xff] %v8570_v44  ;;  %10893 = vst [vmem:[#allocation93_spill] sm:$0xff] %v8573_v47  ;;  %v8576_v27 = vadd.f32 %v1819_v36, %v8551_v40  ;;  %v8579_v10 = vadd.f32 %v1932_v50, %v8555_v21 }
 0x2c9   :  { %10894 = vst [vmem:[#allocation94_spill] sm:$0xff] %v8576_v27  ;;  %10895 = vst [vmem:[#allocation95_spill] sm:$0xff] %v8579_v10 }
 0x2ca   :  { %v1823_v12 = vpop.f32.mrf.mxu0  ;;  %v1936_v8 = vpop.f32.mrf.mxu1 }
 0x2cb   :  { %v8582_v63 = vadd.f32 %v1823_v12, %v8539_v52  ;;  %v8585_v34 = vadd.f32 %v1936_v8, %v8543_v18 }
 0x2cc   :  { %v1825_v19 = vpop.f32.mrf.mxu0  ;;  %v1938_v5 = vpop.f32.mrf.mxu1 }
 0x2cd   :  { %10896 = vst [vmem:[#allocation96_spill] sm:$0xff] %v8582_v63  ;;  %10897 = vst [vmem:[#allocation97_spill] sm:$0xff] %v8585_v34  ;;  %v8588_v28 = vadd.f32 %v1825_v19, %v8551_v40  ;;  %v8591_v30 = vadd.f32 %v1938_v5, %v8555_v21  ;;  %v10912_v63 = vsub.s32 0, %v8516_v55 }
 0x2cf   :  { %10898 = vst [vmem:[#allocation98_spill] sm:$0xff] %v8588_v28  ;;  %10899 = vst [vmem:[#allocation99_spill] sm:$0xff] %v8591_v30 }
 0x2d0   :  { %v1829_v36 = vpop.f32.mrf.mxu0  ;;  %v1942_v7 = vpop.f32.mrf.mxu1 }
 0x2d1   :  { %v8594_v50 = vadd.f32 %v1829_v36, %v8539_v52  ;;  %v8597_v51 = vadd.f32 %v1942_v7, %v8543_v18 }
 0x2d2   :  { %v1831_v12 = vpop.f32.mrf.mxu0  ;;  %v1944_v11 = vpop.f32.mrf.mxu1 }
 0x2d3   :  { %10900 = vst [vmem:[#allocation100_spill] sm:$0xff] %v8594_v50  ;;  %10901 = vst [vmem:[#allocation101_spill] sm:$0xff] %v8597_v51  ;;  %v8600_v8 = vadd.f32 %v1831_v12, %v8551_v40  ;;  %v8603_v39 = vadd.f32 %v1944_v11, %v8555_v21 }
 0x2d5   :  { %10902 = vst [vmem:[#allocation102_spill] sm:$0xff] %v8600_v8  ;;  %10903 = vst [vmem:[#allocation103_spill] sm:$0xff] %v8603_v39 }
 0x2d6   :  { %v1835_v19 = vpop.f32.mrf.mxu0  ;;  %v1948_v16 = vpop.f32.mrf.mxu1 }
 0x2d7   :  { %v8606_v5 = vadd.f32 %v1835_v19, %v8539_v52  ;;  %v8609_v47 = vadd.f32 %v1948_v16, %v8543_v18 }
 0x2d8   :  { %v1837_v36 = vpop.f32.mrf.mxu0  ;;  %v1950_v10 = vpop.f32.mrf.mxu1 }
 0x2d9   :  { %10904 = vst [vmem:[#allocation104_spill] sm:$0xff] %v8606_v5  ;;  %10905 = vst [vmem:[#allocation105_spill] sm:$0xff] %v8609_v47  ;;  %v8612_v7 = vadd.f32 %v1837_v36, %v8551_v40  ;;  %v8615_v27 = vadd.f32 %v1950_v10, %v8555_v21  ;;  %v10916_v47 = vsub.s32 2, %v8516_v55  ;;  %v8854_v5 = vld [vmem:[#allocation4 + $0xc8] sm:$0xff] }
 0x2db   :  { %10906 = vst [vmem:[#allocation106_spill] sm:$0xff] %v8612_v7  ;;  %10907 = vst [vmem:[#allocation107_spill] sm:$0xff] %v8615_v27  ;;  %v8850_v7 = vld [vmem:[#allocation4 + $0xf0] sm:$0xff] }
 0x2dc   :  { %v1841_v12 = vpop.f32.mrf.mxu0  ;;  %v1954_v44 = vpop.f32.mrf.mxu1 }
 0x2dd   :  { %v8618_v11 = vadd.f32 %v1841_v12, %v8539_v52  ;;  %v8621_v25 = vadd.f32 %v1954_v44, %v8543_v18 }
 0x2de   :  { %v1843_v19 = vpop.f32.mrf.mxu0  ;;  %v1956_v37 = vpop.f32.mrf.mxu1 }
 0x2df   :  { %10908 = vst [vmem:[#allocation108_spill] sm:$0xff] %v8618_v11  ;;  %10909 = vst [vmem:[#allocation109_spill] sm:$0xff] %v8621_v25  ;;  %v8624_v16 = vadd.f32 %v1843_v19, %v8551_v40  ;;  %v8627_v35 = vadd.f32 %v1956_v37, %v8555_v21  ;;  %v1402_v37 = vld [vmem:[%s10467_s4] sm:$0xf]  ;;  %v8868_v25 = vld [vmem:[#allocation4 + $0xb8] sm:$0xff]  ;;  %s6731_s4 = smov [#allocation9]  }
 0x2e0   :  { %v8650_v31 = vrot.slane %v1402_v37, %v10914_v33  ;;  %v8658_v38 = vrot.slane %v1402_v37, %v10915_v13  ;;  %v8664_v27 = vrot.slane %v1402_v37, %v10916_v47  ;;  %v8878_v11 = vld [vmem:[#allocation4 + $0x88] sm:$0xff]  ;;  %s5912_s16 = sshll.u32 %s6731_s4, 4  ;;  %s5913_s16 = int_to_ptr.vmem [resolvable:$true] %s5912_s16 }
 0x2e1   :  { %10910 = vst [vmem:[#allocation110_spill] sm:$0xff] %v8624_v16  ;;  %10911 = vst [vmem:[#allocation111_spill] sm:$0xff] %v8627_v35  ;;  %v8872_v35 = vld [vmem:[#allocation4 + $0xa0] sm:$0xff]  ;;  %v8874_v16 = vld [vmem:[#allocation4 + $0xb0] sm:$0xff]  ;;  %s6694_s3 = scalar_lea.vmem %s5913_s16, 1024  ;;  %p6699_p11 = scmp.lt.s32.totalorder %s5913_s16, %s5913_s16 }
 0x2e2   :  { %v1847_v36 = vpop.f32.mrf.mxu0  ;;  %v1960_v2 = vpop.f32.mrf.mxu1  ;;  %v1518_v51 = vadd.f32 %v8471_v4, %v8650_v31  ;;  %p6695_p10 = scmp.ne.s32.totalorder %s5913_s16, %s6694_s3  ;;  %p6700_p12 = scmp.lt.s32.totalorder %s6694_s3, %s6694_s3 }
 0x2e3   :  { %v8630_v10 = vadd.f32 %v1847_v36, %v8539_v52  ;;  %v8633_v34 = vadd.f32 %v1960_v2, %v8543_v18  ;;  %v8646_v36 = vrot.slane %v1402_v37, %v10912_v63 }
 0x2e4   :  { %v1849_v12 = vpop.f32.mrf.mxu0  ;;  %v1962_v30 = vpop.f32.mrf.mxu1  ;;  %p6701_p13 = por %p6700_p12, %p6699_p11 }
 0x2e5   :  { %v8636_v44 = vadd.f32 %v1849_v12, %v8551_v40  ;;  %v8639_v28 = vadd.f32 %v1962_v30, %v8555_v21  ;;  %10913 = vst [vmem:[#allocation112_spill] sm:$0xff] %v8646_v36  ;;  %v1516_v12 = vadd.f32 %v8467_v23, %v8646_v36  ;;  %v1631_v23 = vadd.f32 %v8473_v0, %v8658_v38 }
 0x2e6   :  { %p6702_p0 = pnand %p6701_p13, %p6695_p10 }
 0x2e8   :  { %v1853_v19 = vpop.f32.mrf.mxu0  ;;  %v1966_v45 = vpop.f32.mrf.mxu1 }
 0x2e9   :  { %v1854_v0 = vadd.f32 %v1853_v19, %v8539_v52 }
 0x2ea   :  { %v1855_v2 = vpop.f32.mrf.mxu0  ;;  %v1968_v30 = vpop.f32.mrf.mxu1 }
 0x2ee   :  { %v2140_v14 = vpop.f32.mrf.mxu0  ;;  %v2211_v63 = vpop.f32.mrf.mxu1 }
 0x2ef   :  { %v2216_v39 = vadd.f32 %v2140_v14, %v1516_v12  ;;  %v1629_v14 = vadd.f32 %v8469_v62, %v8664_v27 }
 0x2f0   :  { %v2142_v8 = vpop.f32.mrf.mxu0  ;;  %v2213_v15 = vpop.f32.mrf.mxu1 }
 0x2f1   :  { %v6195_v50 = vmul.f32 -1.442695, %v2216_v39  ;;  %v2217_v32 = vadd.f32 %v2142_v8, %v1518_v51  ;;  %v2219_v4 = vadd.f32 %v2213_v15, %v1631_v23  ;;  %v2218_v39 = vadd.f32 %v2211_v63, %v1629_v14 }
 0x2f2   :  { %v1856_v15 = vadd.f32 %v1855_v2, %v8551_v40  ;;  %v1969_v40 = vadd.f32 %v1968_v30, %v8555_v21  ;;  %v1967_v2 = vadd.f32 %v1966_v45, %v8543_v18  ;;  %v10917_v21 = vld [vmem:[#allocation27_spill] sm:$0xff]  ;;  %v10918_v45 = vld [vmem:[#allocation28_spill] sm:$0xff]  ;;  %v10919_v18 = vld [vmem:[#allocation29_spill] sm:$0xff] }
 0x2f3   :  { %6398 = vpow2.f32 %v6195_v50  ;;  %v6196_v33 = vmul.f32 -1.442695, %v2217_v32  ;;  %v6197_v51 = vmul.f32 -1.442695, %v2219_v4  ;;  %v10920_v30 = vld [vmem:[#allocation30_spill] sm:$0xff]  ;;  %10968 = vst [vmem:[#allocation27_spill] sm:$0xff] %v8850_v7 }
 0x2f4   :  { %10969 = vst [vmem:[#allocation28_spill] sm:$0xff] %v8854_v5  ;;  %10970 = vst [vmem:[#allocation29_spill] sm:$0xff] %v8856_v26 }
 0x2f5   :  { %6400 = vpow2.f32 %v6196_v33  ;;  %10971 = vst [vmem:[#allocation30_spill] sm:$0xff] %v8860_v59 }
 0x2f6   :  { %6402 = vpow2.f32 %v6197_v51 }
 0x2f7   :  { %6404 = vtanh.f32 %v2218_v39 }
 0x300   :  { %v6399_v8 = vpop.eup %6398 }
 0x301   :  { %v2223_v13 = vadd.f32 1.0, %v6399_v8 }
 0x302   :  { %v6401_v50 = vpop.eup %6400 }
 0x303   :  { %6406 = vrcp.f32 %v2223_v13  ;;  %v2229_v32 = vadd.f32 1.0, %v6401_v50  ;;  %v6403_v12 = vpop.eup %6402 }
 0x304   :  { %v6405_v55 = vpop.eup %6404  ;;  %v2236_v23 = vadd.f32 1.0, %v6403_v12 }
 0x305   :  { %6408 = vrcp.f32 %v2229_v32 }
 0x30f   :  { %v2381_v47 = vpop.f32.mrf.mxu0  ;;  %v2452_v39 = vpop.f32.mrf.mxu1 }
 0x310   :  { %v6407_v37 = vpop.eup %6406  ;;  %v2457_v33 = vadd.f32 %v2381_v47, %v1854_v0  ;;  %v2459_v0 = vadd.f32 %v2452_v39, %v1967_v2  ;;  %v10927_v39 = vld [vmem:[#allocation37_spill] sm:$0xff]  ;;  %v10932_v2 = vld [vmem:[#allocation42_spill] sm:$0xff] }
 0x311   :  { %v2240_v62 = vmul.f32 %v6407_v37, %v6405_v55  ;;  %v2383_v63 = vpop.f32.mrf.mxu0  ;;  %v2454_v52 = vpop.f32.mrf.mxu1  ;;  %10978 = vst [vmem:[#allocation37_spill] sm:$0xff] %v8880_v48 }
 0x312   :  { %v6409_v4 = vpop.eup %6408  ;;  %v6198_v14 = vmul.f32 -1.442695, %v2457_v33  ;;  %v2458_v51 = vadd.f32 %v2383_v63, %v1856_v15  ;;  %v2460_v19 = vadd.f32 %v2454_v52, %v1969_v40  ;;  %v10922_v63 = vld [vmem:[#allocation32_spill] sm:$0xff]  ;;  %v10929_v52 = vld [vmem:[#allocation39_spill] sm:$0xff] }
 0x313   :  { %v2239_v8 = vmul.f32 0.0, %v6409_v4  ;;  %v10923_v4 = vld [vmem:[#allocation33_spill] sm:$0xff]  ;;  %v10930_v40 = vld [vmem:[#allocation40_spill] sm:$0xff]  ;;  %10973 = vst [vmem:[#allocation32_spill] sm:$0xff] %v8866_v56  ;;  %10980 = vst [vmem:[#allocation39_spill] sm:$0xff] %v8886_v49 }
 0x314   :  { %6410 = vpow2.f32 %v6198_v14  ;;  %v6199_v13 = vmul.f32 -1.442695, %v2458_v51  ;;  %v6200_v32 = vmul.f32 -1.442695, %v2460_v19  ;;  %v10924_v14 = vld [vmem:[#allocation34_spill] sm:$0xff]  ;;  %v10925_v51 = vld [vmem:[#allocation35_spill] sm:$0xff] }
 0x315   :  { %v8670_v50 = vadd.f32 %v2240_v62, %v2239_v8  ;;  %6412 = vrcp.f32 %v2236_v23  ;;  %v10921_v23 = vld [vmem:[#allocation31_spill] sm:$0xff]  ;;  %v10926_v8 = vld [vmem:[#allocation36_spill] sm:$0xff]  ;;  %v10931_v19 = vld [vmem:[#allocation41_spill] sm:$0xff]  ;;  %10974 = vst [vmem:[#allocation33_spill] sm:$0xff] %v8868_v25 }
 0x316   :  { %6414 = vpow2.f32 %v6199_v13  ;;  %v10928_v13 = vld [vmem:[#allocation38_spill] sm:$0xff]  ;;  %10972 = vst [vmem:[#allocation31_spill] sm:$0xff] %v8862_v46  ;;  %10975 = vst [vmem:[#allocation34_spill] sm:$0xff] %v8872_v35 }
 0x317   :  { %6416 = vtanh.f32 %v8670_v50  ;;  %10976 = vst [vmem:[#allocation35_spill] sm:$0xff] %v8874_v16  ;;  %10977 = vst [vmem:[#allocation36_spill] sm:$0xff] %v8878_v11 }
 0x318   :  { %6418 = vpow2.f32 %v6200_v32  ;;  %10979 = vst [vmem:[#allocation38_spill] sm:$0xff] %v8884_v54  ;;  %10981 = vst [vmem:[#allocation40_spill] sm:$0xff] %v8888_v60 }
 0x321   :  { %v6411_v12 = vpop.eup %6410 }
 0x322   :  { %v6413_v55 = vpop.eup %6412  ;;  %v2464_v47 = vadd.f32 1.0, %v6411_v12  ;;  %v10933_v12 = vld [vmem:[#allocation43_spill] sm:$0xff] }
 0x323   :  { %v6415_v37 = vpop.eup %6414 }
 0x324   :  { %v6417_v15 = vpop.eup %6416  ;;  %6420 = vrcp.f32 %v2464_v47  ;;  %v2470_v33 = vadd.f32 1.0, %v6415_v37  ;;  %v10935_v47 = vld [vmem:[#allocation45_spill] sm:$0xff]  ;;  %v10936_v37 = vld [vmem:[#allocation46_spill] sm:$0xff] }
 0x325   :  { %6422 = vtanh.f32 %v2459_v0  ;;  %v2243_v62 = vmul.f32 %v6417_v15, %v6413_v55  ;;  %v6419_v32 = vpop.eup %6418  ;;  %v10934_v0 = vld [vmem:[#allocation44_spill] sm:$0xff] }
 0x326   :  { %6424 = vrcp.f32 %v2470_v33  ;;  %v10937_v33 = vld [vmem:[#allocation47_spill] sm:$0xff] }
 0x327   :  { %2629 = vmatmul.mubr.f32.vlgmr.msra.gmra.mxu0 %v2243_v62  ;;  %2485 = vst.msk [vmem:[#allocation9] sm:$0xff] %vm1424_vm1, %v2243_v62  ;;  %2700 = vmatmul.mubr.f32.vlgmr.msra.gmra.mxu1 %v2243_v62  ;;  %v10938_v62 = vld [vmem:[#allocation48_spill] sm:$0xff] }
 0x328   :  { %2806 = vmatpush1.msra.mxu0 %v10917_v21  ;;  %2877 = vmatpush1.msra.mxu1 %v10918_v45  ;;  %v2477_v45 = vadd.f32 1.0, %v6419_v32  ;;  %v10950_v32 = vld [vmem:[#allocation60_spill] sm:$0xff] }
 0x329   :  { %2807 = vmatprep.subr.mxu0 %v10919_v18  ;;  %2878 = vmatprep.subr.mxu1 %v10920_v30  ;;  %v10939_v18 = vld [vmem:[#allocation49_spill] sm:$0xff]  ;;  %v10940_v30 = vld [vmem:[#allocation50_spill] sm:$0xff] }
 0x32a   :  { %2808 = vmatpush1.msra.mxu0 %v10921_v23  ;;  %2879 = vmatpush1.msra.mxu1 %v10922_v63  ;;  %6426 = vrcp.f32 %v2477_v45  ;;  %v10960_v45 = vld [vmem:[#allocation70_spill] sm:$0xff] }
 0x32b   :  { %2809 = vmatprep.subr.mxu0 %v10923_v4  ;;  %2880 = vmatprep.subr.mxu1 %v10924_v14  ;;  %v10941_v4 = vld [vmem:[#allocation51_spill] sm:$0xff]  ;;  %v10942_v14 = vld [vmem:[#allocation52_spill] sm:$0xff] }
 0x32c   :  { %2810 = vmatpush1.msra.mxu0 %v10925_v51  ;;  %2881 = vmatpush1.msra.mxu1 %v10926_v8  ;;  %v10943_v51 = vld [vmem:[#allocation53_spill] sm:$0xff]  ;;  %v10944_v8 = vld [vmem:[#allocation54_spill] sm:$0xff] }
 0x32d   :  { %2811 = vmatprep.subr.mxu0 %v10927_v39  ;;  %2882 = vmatprep.subr.mxu1 %v10928_v13  ;;  %v10945_v13 = vld [vmem:[#allocation55_spill] sm:$0xff] }
 0x32e   :  { %2812 = vmatpush1.msra.mxu0 %v10929_v52  ;;  %2883 = vmatpush1.msra.mxu1 %v10930_v40  ;;  %v10946_v52 = vld [vmem:[#allocation56_spill] sm:$0xff]  ;;  %v10947_v40 = vld [vmem:[#allocation57_spill] sm:$0xff] }
 0x32f   :  { %2813 = vmatprep.subr.mxu0 %v10931_v19  ;;  %2884 = vmatprep.subr.mxu1 %v10932_v2  ;;  %v10948_v19 = vld [vmem:[#allocation58_spill] sm:$0xff]  ;;  %v10949_v2 = vld [vmem:[#allocation59_spill] sm:$0xff] }
 0x330   :  { %2814 = vmatpush1.msra.mxu0 %v10933_v12  ;;  %2885 = vmatpush1.msra.mxu1 %v10934_v0  ;;  %v10951_v12 = vld [vmem:[#allocation61_spill] sm:$0xff]  ;;  %v10952_v0 = vld [vmem:[#allocation62_spill] sm:$0xff] }
 0x331   :  { %v6421_v55 = vpop.eup %6420  ;;  %2815 = vmatprep.subr.mxu0 %v10935_v47  ;;  %2886 = vmatprep.subr.mxu1 %v10936_v37  ;;  %v10954_v47 = vld [vmem:[#allocation64_spill] sm:$0xff]  ;;  %v10955_v37 = vld [vmem:[#allocation65_spill] sm:$0xff] }
 0x332   :  { %v6423_v15 = vpop.eup %6422  ;;  %2816 = vmatpush1.msra.mxu0 %v10937_v33  ;;  %2887 = vmatpush1.msra.mxu1 %v10938_v62  ;;  %v10957_v33 = vld [vmem:[#allocation67_spill] sm:$0xff]  ;;  %v10958_v62 = vld [vmem:[#allocation68_spill] sm:$0xff] }
 0x333   :  { %v6425_v21 = vpop.eup %6424  ;;  %2817 = vmatprep.subr.mxu0 %v10939_v18  ;;  %2888 = vmatprep.subr.mxu1 %v10940_v30  ;;  %v2481_v63 = vmul.f32 %v6423_v15, %v6421_v55  ;;  %v10953_v55 = vld [vmem:[#allocation63_spill] sm:$0xff]  ;;  %v10956_v15 = vld [vmem:[#allocation66_spill] sm:$0xff]  ;;  %v10962_v30 = vld [vmem:[#allocation72_spill] sm:$0xff] }
 0x334   :  { %v2480_v23 = vmul.f32 0.0, %v6425_v21  ;;  %2818 = vmatpush1.msra.mxu0 %v10941_v4  ;;  %2889 = vmatpush1.msra.mxu1 %v10942_v14  ;;  %v10959_v21 = vld [vmem:[#allocation69_spill] sm:$0xff]  ;;  %v10961_v18 = vld [vmem:[#allocation71_spill] sm:$0xff]  ;;  %v10966_v14 = vld [vmem:[#allocation76_spill] sm:$0xff] }
 0x335   :  { %2819 = vmatprep.subr.mxu0 %v10943_v51  ;;  %2890 = vmatprep.subr.mxu1 %v10944_v8  ;;  %v10965_v4 = vld [vmem:[#allocation75_spill] sm:$0xff]  ;;  %v10967_v51 = vld [vmem:[#allocation77_spill] sm:$0xff] }
 0x336   :  { %v8704_v39 = vadd.f32 %v2481_v63, %v2480_v23  ;;  %2820 = vmatpush1.msra.mxu0 %v10945_v13  ;;  %2891 = vmatpush1.msra.mxu1 %v10946_v52  ;;  %v10963_v23 = vld [vmem:[#allocation73_spill] sm:$0xff]  ;;  %v10964_v63 = vld [vmem:[#allocation74_spill] sm:$0xff] }
 0x337   :  { %2821 = vmatprep.subr.mxu0 %v10947_v40  ;;  %2892 = vmatprep.subr.mxu1 %v10948_v19  ;;  %v6427_v8 = vpop.eup %6426  ;;  %v8772_v52 = vld [vmem:[#allocation4 + $0x1a0] sm:$0xff]  ;;  %v8774_v40 = vld [vmem:[#allocation4 + $0x1b0] sm:$0xff]  ;;  %v8778_v19 = vld [vmem:[#allocation4 + $0x188] sm:$0xff] }
 0x338   :  { %6428 = vtanh.f32 %v8704_v39  ;;  %2822 = vmatpush1.msra.mxu0 %v10949_v2  ;;  %2893 = vmatpush1.msra.mxu1 %v10950_v32  ;;  %v8780_v2 = vld [vmem:[#allocation4 + $0x198] sm:$0xff]  ;;  %v8788_v32 = vld [vmem:[#allocation4 + $0x180] sm:$0xff] }
 0x339   :  { %2823 = vmatprep.subr.mxu0 %v10951_v12  ;;  %2894 = vmatprep.subr.mxu1 %v10952_v0  ;;  %v8790_v12 = vld [vmem:[#allocation4 + $0x190] sm:$0xff]  ;;  %v8794_v0 = vld [vmem:[#allocation4 + $0x168] sm:$0xff] }
 0x33a   :  { %2824 = vmatpush1.msra.mxu0 %v10953_v55  ;;  %2895 = vmatpush1.msra.mxu1 %v10954_v47  ;;  %v8796_v55 = vld [vmem:[#allocation4 + $0x178] sm:$0xff]  ;;  %v8800_v47 = vld [vmem:[#allocation4 + $0x160] sm:$0xff] }
 0x33b   :  { %2825 = vmatprep.subr.mxu0 %v10955_v37  ;;  %2896 = vmatprep.subr.mxu1 %v10956_v15  ;;  %v8802_v37 = vld [vmem:[#allocation4 + $0x170] sm:$0xff]  ;;  %v8806_v15 = vld [vmem:[#allocation4 + $0x148] sm:$0xff] }
 0x33c   :  { %2826 = vmatpush1.msra.mxu0 %v10957_v33  ;;  %2897 = vmatpush1.msra.mxu1 %v10958_v62  ;;  %v8808_v33 = vld [vmem:[#allocation4 + $0x158] sm:$0xff]  ;;  %v8812_v62 = vld [vmem:[#allocation4 + $0x140] sm:$0xff] }
 0x33d   :  { %2827 = vmatprep.subr.mxu0 %v10959_v21  ;;  %2898 = vmatprep.subr.mxu1 %v10960_v45  ;;  %v8814_v21 = vld [vmem:[#allocation4 + $0x150] sm:$0xff]  ;;  %v8818_v45 = vld [vmem:[#allocation4 + $0x128] sm:$0xff] }
 0x33e   :  { %2828 = vmatpush1.msra.mxu0 %v10961_v18  ;;  %2899 = vmatpush1.msra.mxu1 %v10962_v30  ;;  %v8820_v18 = vld [vmem:[#allocation4 + $0x138] sm:$0xff]  ;;  %v8824_v30 = vld [vmem:[#allocation4 + $0x120] sm:$0xff] }
 0x33f   :  { %2829 = vmatprep.subr.mxu0 %v10963_v23  ;;  %2900 = vmatprep.subr.mxu1 %v10964_v63  ;;  %v8826_v23 = vld [vmem:[#allocation4 + $0x130] sm:$0xff]  ;;  %v8830_v63 = vld [vmem:[#allocation4 + $0x108] sm:$0xff] }
 0x340   :  { %2830 = vmatpush1.msra.mxu0 %v10965_v4  ;;  %2901 = vmatpush1.msra.mxu1 %v10966_v14  ;;  %v8832_v4 = vld [vmem:[#allocation4 + $0x118] sm:$0xff]  ;;  %v8836_v14 = vld [vmem:[#allocation4 + $0x100] sm:$0xff] }
 0x341   :  { %2831 = vmatprep.subr.mxu0 %v8355_v17  ;;  %2902 = vmatprep.subr.mxu1 %v10967_v51  ;;  %v8764_v17 = vld [vmem:[#allocation4 + $0x1d0] sm:$0xff] }
 0x342   :  { %2832 = vmatpush1.msra.mxu0 %v8361_v9  ;;  %2903 = vmatpush1.msra.mxu1 %v8363_v29  ;;  %v8750_v29 = vld [vmem:[#allocation4 + $0x1e0] sm:$0xff]  ;;  %v8838_v51 = vld [vmem:[#allocation4 + $0x110] sm:$0xff] }
 0x343   :  { %2833 = vmatprep.subr.mxu0 %v8367_v41  ;;  %2904 = vmatprep.subr.mxu1 %v8369_v53  ;;  %v8746_v41 = vld [vmem:[#allocation4 + $0x1e8] sm:$0xff]  ;;  %v8754_v53 = vld [vmem:[#allocation4 + $0x1f0] sm:$0xff] }
 0x344   :  { %2834 = vmatpush1.msra.mxu0 %v8373_v24  ;;  %2905 = vmatpush1.msra.mxu1 %v8375_v1  ;;  %v8762_v24 = vld [vmem:[#allocation4 + $0x1c0] sm:$0xff]  ;;  %v8770_v1 = vld [vmem:[#allocation4 + $0x1b8] sm:$0xff] }
 0x345   :  { %v6429_v13 = vpop.eup %6428  ;;  %2835 = vmatprep.subr.mxu0 %v8379_v61  ;;  %2906 = vmatprep.subr.mxu1 %v8381_v57  ;;  %v8748_v57 = vld [vmem:[#allocation4 + $0x1f8] sm:$0xff]  ;;  %v8766_v61 = vld [vmem:[#allocation4 + $0x1a8] sm:$0xff] }
 0x346   :  { %2836 = vmatpush1.msra.mxu0 %v8385_v22  ;;  %2869 = vmatprep.mubr.f32.mxu0 %v10797_v20  ;;  %v2484_v9 = vmul.f32 %v6429_v13, %v6427_v8  ;;  %v8756_v22 = vld [vmem:[#allocation4 + $0x1c8] sm:$0xff]  ;;  %v8844_v13 = vld [vmem:[#allocation4 + $0xf8] sm:$0xff] }
 0x347   :  { %2907 = vmatpush1.msra.mxu1 %v8389_v42  ;;  %2940 = vmatprep.mubr.f32.mxu1 %v10797_v20  ;;  %v8758_v42 = vld [vmem:[#allocation4 + $0x1d8] sm:$0xff]  ;;  %v8842_v8 = vld [vmem:[#allocation4 + $0xe8] sm:$0xff] }
 0x348   :  { %2487 = vrot.lane.b32.xlu1 %v2484_v9, %s6722_s9  ;;  %2870 = vmatmul.mubr.f32.vlgmr.msra.gmra.mxu0 %v2484_v9 }
 0x349   :  { %2941 = vmatmul.mubr.f32.vlgmr.msra.gmra.mxu1 %v2484_v9  ;;  %3118 = vmatprep.mubr.f32.mxu0 %v10797_v20  ;;  %v8848_v9 = vld [vmem:[#allocation4 + $0xe0] sm:$0xff] }
 0x34a   :  { %3189 = vmatprep.mubr.f32.mxu1 %v10797_v20  ;;  %3054 = vmatprep.subr.mxu0 %v8746_v41 }
 0x34b   :  { %3125 = vmatprep.subr.mxu1 %v8748_v57  ;;  %3055 = vmatpush1.msra.mxu0 %v8750_v29 }
 0x34c   :  { %3126 = vmatpush1.msra.mxu1 %v8754_v53  ;;  %3056 = vmatprep.subr.mxu0 %v8756_v22 }
 0x34d   :  { %3127 = vmatprep.subr.mxu1 %v8758_v42  ;;  %3057 = vmatpush1.msra.mxu0 %v8762_v24 }
 0x34e   :  { %3128 = vmatpush1.msra.mxu1 %v8764_v17  ;;  %3058 = vmatprep.subr.mxu0 %v8766_v61 }
 0x34f   :  { %3129 = vmatprep.subr.mxu1 %v8770_v1  ;;  %3059 = vmatpush1.msra.mxu0 %v8772_v52 }
 0x350   :  { %3130 = vmatpush1.msra.mxu1 %v8774_v40  ;;  %3060 = vmatprep.subr.mxu0 %v8778_v19 }
 0x351   :  { %3131 = vmatprep.subr.mxu1 %v8780_v2  ;;  %3061 = vmatpush1.msra.mxu0 %v8788_v32 }
 0x352   :  { %3132 = vmatpush1.msra.mxu1 %v8790_v12  ;;  %3062 = vmatprep.subr.mxu0 %v8794_v0 }
 0x353   :  { %3133 = vmatprep.subr.mxu1 %v8796_v55  ;;  %3063 = vmatpush1.msra.mxu0 %v8800_v47 }
 0x354   :  { %3134 = vmatpush1.msra.mxu1 %v8802_v37  ;;  %3064 = vmatprep.subr.mxu0 %v8806_v15 }
 0x355   :  { %3135 = vmatprep.subr.mxu1 %v8808_v33  ;;  %3065 = vmatpush1.msra.mxu0 %v8812_v62 }
 0x356   :  { %3136 = vmatpush1.msra.mxu1 %v8814_v21  ;;  %3066 = vmatprep.subr.mxu0 %v8818_v45 }
 0x357   :  { %3137 = vmatprep.subr.mxu1 %v8820_v18  ;;  %3067 = vmatpush1.msra.mxu0 %v8824_v30 }
 0x358   :  { %3138 = vmatpush1.msra.mxu1 %v8826_v23  ;;  %3068 = vmatprep.subr.mxu0 %v8830_v63 }
 0x359   :  { %3139 = vmatprep.subr.mxu1 %v8832_v4  ;;  %3069 = vmatpush1.msra.mxu0 %v8836_v14 }
 0x35a   :  { %3140 = vmatpush1.msra.mxu1 %v8838_v51  ;;  %3070 = vmatprep.subr.mxu0 %v8842_v8 }
 0x35b   :  { %3141 = vmatprep.subr.mxu1 %v8844_v13  ;;  %3071 = vmatpush1.msra.mxu0 %v8848_v9 }
 0x35c   :  { %3142 = vmatpush1.msra.mxu1 %v8850_v7  ;;  %3072 = vmatprep.subr.mxu0 %v8854_v5 }
 0x35d   :  { %3143 = vmatprep.subr.mxu1 %v8856_v26  ;;  %3073 = vmatpush1.msra.mxu0 %v8860_v59  ;;  %v8928_v59 = vld [vmem:[#allocation4] sm:$0xff]  ;;  %v1637_v26 = vadd.f32 %v8481_v58, %v8658_v38 }
 0x35e   :  { %3144 = vmatpush1.msra.mxu1 %v8862_v46  ;;  %3074 = vmatprep.subr.mxu0 %v8866_v56  ;;  %v8904_v56 = vld [vmem:[#allocation4 + $0x40] sm:$0xff]  ;;  %v8912_v46 = vld [vmem:[#allocation4 + $0x38] sm:$0xff]  ;;  %10995 = vst [vmem:[#allocation54_spill] sm:$0xff] %v8928_v59 }
 0x35f   :  { %3145 = vmatprep.subr.mxu1 %v8868_v25  ;;  %3075 = vmatpush1.msra.mxu0 %v8872_v35  ;;  %v8892_v35 = vld [vmem:[#allocation4 + $0x78] sm:$0xff]  ;;  %v8896_v25 = vld [vmem:[#allocation4 + $0x70] sm:$0xff]  ;;  %10987 = vst [vmem:[#allocation46_spill] sm:$0xff] %v8904_v56  ;;  %10990 = vst [vmem:[#allocation49_spill] sm:$0xff] %v8912_v46 }
 0x360   :  { %3146 = vmatpush1.msra.mxu1 %v8874_v16  ;;  %3076 = vmatprep.subr.mxu0 %v8878_v11  ;;  %10982 = vst [vmem:[#allocation41_spill] sm:$0xff] %v8892_v35  ;;  %v8894_v16 = vld [vmem:[#allocation4 + $0x60] sm:$0xff]  ;;  %10984 = vst [vmem:[#allocation43_spill] sm:$0xff] %v8896_v25  ;;  %v8902_v11 = vld [vmem:[#allocation4 + $0x58] sm:$0xff] }
 0x361   :  { %3147 = vmatprep.subr.mxu1 %v8880_v48  ;;  %3077 = vmatpush1.msra.mxu0 %v8884_v54  ;;  %10983 = vst [vmem:[#allocation42_spill] sm:$0xff] %v8894_v16  ;;  %v8900_v48 = vld [vmem:[#allocation4 + $0x48] sm:$0xff]  ;;  %10986 = vst [vmem:[#allocation45_spill] sm:$0xff] %v8902_v11 }
 0x362   :  { %3148 = vmatpush1.msra.mxu1 %v8886_v49  ;;  %3078 = vmatprep.subr.mxu0 %v8888_v60  ;;  %10985 = vst [vmem:[#allocation44_spill] sm:$0xff] %v8900_v48  ;;  %v8908_v49 = vld [vmem:[#allocation4 + $0x50] sm:$0xff]  ;;  %v8910_v54 = vld [vmem:[#allocation4 + $0x28] sm:$0xff] }
 0x363   :  { %3149 = vmatprep.subr.mxu1 %v8892_v35  ;;  %3079 = vmatpush1.msra.mxu0 %v8894_v16  ;;  %10988 = vst [vmem:[#allocation47_spill] sm:$0xff] %v8908_v49  ;;  %10989 = vst [vmem:[#allocation48_spill] sm:$0xff] %v8910_v54  ;;  %v8916_v35 = vld [vmem:[#allocation4 + $0x20] sm:$0xff]  ;;  %v8918_v60 = vld [vmem:[#allocation4 + $0x30] sm:$0xff] }
 0x364   :  { %3150 = vmatpush1.msra.mxu1 %v8896_v25  ;;  %3080 = vmatprep.subr.mxu0 %v8900_v48  ;;  %10991 = vst [vmem:[#allocation50_spill] sm:$0xff] %v8916_v35  ;;  %10992 = vst [vmem:[#allocation51_spill] sm:$0xff] %v8918_v60  ;;  %v8922_v16 = vld [vmem:[#allocation4 + $0x8] sm:$0xff]  ;;  %v8924_v25 = vld [vmem:[#allocation4 + $0x18] sm:$0xff] }
 0x365   :  { %3151 = vmatprep.subr.mxu1 %v8902_v11  ;;  %3081 = vmatpush1.msra.mxu0 %v8904_v56  ;;  %10993 = vst [vmem:[#allocation52_spill] sm:$0xff] %v8922_v16  ;;  %10994 = vst [vmem:[#allocation53_spill] sm:$0xff] %v8924_v25  ;;  %v8930_v48 = vld [vmem:[#allocation4 + $0x10] sm:$0xff]  ;;  %v8934_v11 = vld [vmem:[#allocation7 + $0x1e8] sm:$0xff] }
 0x366   :  { %3152 = vmatpush1.msra.mxu1 %v8908_v49  ;;  %3082 = vmatprep.subr.mxu0 %v8910_v54  ;;  %10996 = vst [vmem:[#allocation55_spill] sm:$0xff] %v8930_v48  ;;  %10997 = vst [vmem:[#allocation56_spill] sm:$0xff] %v8934_v11  ;;  %v8936_v56 = vld [vmem:[#allocation7 + $0x1f8] sm:$0xff] }
 0x367   :  { %3153 = vmatprep.subr.mxu1 %v8912_v46  ;;  %3083 = vmatpush1.msra.mxu0 %v8916_v35  ;;  %10998 = vst [vmem:[#allocation57_spill] sm:$0xff] %v8936_v56 }
 0x368   :  { %3154 = vmatpush1.msra.mxu1 %v8918_v60  ;;  %3084 = vmatprep.subr.mxu0 %v8922_v16  ;;  %v1522_v60 = vadd.f32 %v8475_v43, %v8646_v36  ;;  %v1524_v16 = vadd.f32 %v8479_v3, %v8650_v31  ;;  %v1635_v43 = vadd.f32 %v8477_v6, %v8664_v27 }
 0x369   :  { %3155 = vmatprep.subr.mxu1 %v8924_v25  ;;  %3085 = vmatpush1.msra.mxu0 %v8928_v59 }
 0x36a   :  { %3156 = vmatpush1.msra.mxu1 %v8930_v48  ;;  %3295 = vmatprep.subr.mxu0 %v8934_v11 }
 0x36b   :  { %3366 = vmatprep.subr.mxu1 %v8936_v56 }
 0x3ba   :  { %v2488_v35 = vpop.permute.xlu1 %2487 }
 0x3bb   :  { %2492 = vst.msk [vmem:[#allocation9 + $0x38] sm:$0xff] %vm2491_vm2, %v2488_v35 }
 0x3e7   :  { %v2630_v46 = vpop.f32.mrf.mxu0  ;;  %v2701_v48 = vpop.f32.mrf.mxu1 }
 0x3e8   :  { %v2706_v25 = vadd.f32 %v2630_v46, %v1522_v60  ;;  %v2708_v36 = vadd.f32 %v2701_v48, %v1635_v43 }
 0x3e9   :  { %v2632_v54 = vpop.f32.mrf.mxu0  ;;  %v2703_v56 = vpop.f32.mrf.mxu1 }
 0x3ea   :  { %v6201_v59 = vmul.f32 -1.442695, %v2706_v25  ;;  %v2707_v49 = vadd.f32 %v2632_v54, %v1524_v16  ;;  %v2709_v35 = vadd.f32 %v2703_v56, %v1637_v26 }
 0x3ec   :  { %6430 = vpow2.f32 %v6201_v59  ;;  %v6202_v11 = vmul.f32 -1.442695, %v2707_v49  ;;  %v6203_v5 = vmul.f32 -1.442695, %v2709_v35 }
 0x3ee   :  { %6432 = vpow2.f32 %v6202_v11 }
 0x3ef   :  { %6434 = vtanh.f32 %v2708_v36 }
 0x3f0   :  { %6436 = vpow2.f32 %v6203_v5 }
 0x3f9   :  { %v6431_v7 = vpop.eup %6430 }
 0x3fa   :  { %v2713_v3 = vadd.f32 1.0, %v6431_v7 }
 0x3fb   :  { %v6433_v60 = vpop.eup %6432 }
 0x3fc   :  { %6438 = vrcp.f32 %v2713_v3  ;;  %v2719_v54 = vadd.f32 1.0, %v6433_v60  ;;  %v6435_v49 = vpop.eup %6434 }
 0x3fd   :  { %v6437_v46 = vpop.eup %6436 }
 0x3fe   :  { %6440 = vrcp.f32 %v2719_v54  ;;  %v2726_v16 = vadd.f32 1.0, %v6437_v46 }
 0x408   :  { %v2871_v59 = vpop.f32.mrf.mxu0 }
 0x409   :  { %v6439_v25 = vpop.eup %6438  ;;  %v2947_v58 = vadd.f32 %v2871_v59, %v8630_v10  ;;  %v2942_v5 = vpop.f32.mrf.mxu1 }
 0x40a   :  { %v2730_v56 = vmul.f32 %v6439_v25, %v6435_v49  ;;  %v2873_v26 = vpop.f32.mrf.mxu0  ;;  %v2949_v3 = vadd.f32 %v2942_v5, %v8633_v34  ;;  %v8970_v34 = vld [vmem:[#allocation7 + $0x1c0] sm:$0xff]  ;;  %v8988_v5 = vld [vmem:[#allocation7 + $0x188] sm:$0xff] }
 0x40b   :  { %v6441_v11 = vpop.eup %6440  ;;  %v6204_v6 = vmul.f32 -1.442695, %v2947_v58  ;;  %v2948_v48 = vadd.f32 %v2873_v26, %v8636_v44  ;;  %v2944_v43 = vpop.f32.mrf.mxu1  ;;  %v8961_v58 = vld [vmem:[#allocation7 + $0x1e0] sm:$0xff]  ;;  %v8965_v26 = vld [vmem:[#allocation7 + $0x1c8] sm:$0xff]  ;;  %11002 = vst [vmem:[#allocation61_spill] sm:$0xff] %v8988_v5 }
 0x40c   :  { %v2729_v7 = vmul.f32 %v6441_v11, %v8670_v50  ;;  %v2950_v10 = vadd.f32 %v2944_v43, %v8639_v28  ;;  %v8967_v28 = vld [vmem:[#allocation7 + $0x1d8] sm:$0xff]  ;;  %v8972_v11 = vld [vmem:[#allocation7 + $0x1d0] sm:$0xff]  ;;  %v8994_v43 = vld [vmem:[#allocation7 + $0x180] sm:$0xff] }
 0x40d   :  { %6442 = vpow2.f32 %v6204_v6  ;;  %v6205_v36 = vmul.f32 -1.442695, %v2948_v48  ;;  %v8976_v6 = vld [vmem:[#allocation7 + $0x1a8] sm:$0xff]  ;;  %v8978_v48 = vld [vmem:[#allocation7 + $0x1b8] sm:$0xff]  ;;  %11004 = vst [vmem:[#allocation63_spill] sm:$0xff] %v8994_v43 }
 0x40e   :  { %v8956_v35 = vadd.f32 %v2730_v56, %v2729_v7  ;;  %v6206_v60 = vmul.f32 -1.442695, %v2950_v10  ;;  %v8963_v56 = vld [vmem:[#allocation7 + $0x1f0] sm:$0xff]  ;;  %10999 = vst [vmem:[#allocation58_spill] sm:$0xff] %v8978_v48  ;;  %v8982_v7 = vld [vmem:[#allocation7 + $0x1a0] sm:$0xff] }
 0x40f   :  { %6444 = vpow2.f32 %v6205_v36  ;;  %11000 = vst [vmem:[#allocation59_spill] sm:$0xff] %v8982_v7  ;;  %v8990_v36 = vld [vmem:[#allocation7 + $0x198] sm:$0xff]  ;;  %v8996_v10 = vld [vmem:[#allocation7 + $0x190] sm:$0xff] }
 0x410   :  { %6446 = vrcp.f32 %v2726_v16  ;;  %v8984_v16 = vld [vmem:[#allocation7 + $0x1b0] sm:$0xff]  ;;  %11003 = vst [vmem:[#allocation62_spill] sm:$0xff] %v8990_v36  ;;  %11005 = vst [vmem:[#allocation64_spill] sm:$0xff] %v8996_v10 }
 0x411   :  { %6448 = vtanh.f32 %v8956_v35  ;;  %11001 = vst [vmem:[#allocation60_spill] sm:$0xff] %v8984_v16 }
 0x412   :  { %6450 = vtanh.f32 %v2949_v3  ;;  %v9000_v3 = vld [vmem:[#allocation7 + $0x168] sm:$0xff] }
 0x413   :  { %6452 = vpow2.f32 %v6206_v60  ;;  %11006 = vst [vmem:[#allocation65_spill] sm:$0xff] %v9000_v3  ;;  %v9002_v60 = vld [vmem:[#allocation7 + $0x178] sm:$0xff] }
 0x414   :  { %11007 = vst [vmem:[#allocation66_spill] sm:$0xff] %v9002_v60 }
 0x41a   :  { %v6443_v54 = vpop.eup %6442 }
 0x41b   :  { %v2954_v44 = vadd.f32 1.0, %v6443_v54  ;;  %v9006_v54 = vld [vmem:[#allocation7 + $0x160] sm:$0xff] }
 0x41c   :  { %v6445_v50 = vpop.eup %6444  ;;  %11008 = vst [vmem:[#allocation67_spill] sm:$0xff] %v9006_v54 }
 0x41d   :  { %v6447_v49 = vpop.eup %6446  ;;  %6454 = vrcp.f32 %v2954_v44  ;;  %v2960_v46 = vadd.f32 1.0, %v6445_v50  ;;  %v9008_v44 = vld [vmem:[#allocation7 + $0x170] sm:$0xff] }
 0x41e   :  { %v6449_v59 = vpop.eup %6448  ;;  %11009 = vst [vmem:[#allocation68_spill] sm:$0xff] %v9008_v44 }
 0x41f   :  { %6456 = vrcp.f32 %v2960_v46  ;;  %v2733_v25 = vmul.f32 %v6449_v59, %v6447_v49  ;;  %v6451_v50 = vpop.eup %6450  ;;  %v9012_v49 = vld [vmem:[#allocation7 + $0x148] sm:$0xff]  ;;  %v9014_v46 = vld [vmem:[#allocation7 + $0x158] sm:$0xff] }
 0x420   :  { %11010 = vst [vmem:[#allocation69_spill] sm:$0xff] %v9014_v46  ;;  %v6453_v59 = vpop.eup %6452 }
 0x421   :  { %3119 = vmatmul.mubr.f32.vlgmr.msra.gmra.mxu0 %v2733_v25  ;;  %2976 = vst.msk [vmem:[#allocation9 + $0x8] sm:$0xff] %vm1424_vm1, %v2733_v25  ;;  %3190 = vmatmul.mubr.f32.vlgmr.msra.gmra.mxu1 %v2733_v25  ;;  %v9018_v25 = vld [vmem:[#allocation7 + $0x140] sm:$0xff] }
 0x422   :  { %3296 = vmatpush1.msra.mxu0 %v8961_v58  ;;  %3367 = vmatpush1.msra.mxu1 %v8963_v56 }
 0x423   :  { %3297 = vmatprep.subr.mxu0 %v8965_v26  ;;  %3368 = vmatprep.subr.mxu1 %v8967_v28 }
 0x424   :  { %3298 = vmatpush1.msra.mxu0 %v8970_v34  ;;  %3369 = vmatpush1.msra.mxu1 %v8972_v11 }
 0x425   :  { %3299 = vmatprep.subr.mxu0 %v8976_v6  ;;  %3370 = vmatprep.subr.mxu1 %v8978_v48  ;;  %v2967_v48 = vadd.f32 1.0, %v6453_v59  ;;  %v9049_v59 = vld [vmem:[#allocation7 + $0xe8] sm:$0xff] }
 0x426   :  { %3300 = vmatpush1.msra.mxu0 %v8982_v7  ;;  %3371 = vmatpush1.msra.mxu1 %v8984_v16  ;;  %11018 = vst [vmem:[#allocation77_spill] sm:$0xff] %v9049_v59 }
 0x427   :  { %3301 = vmatprep.subr.mxu0 %v8988_v5  ;;  %3372 = vmatprep.subr.mxu1 %v8990_v36  ;;  %v9020_v36 = vld [vmem:[#allocation7 + $0x150] sm:$0xff]  ;;  %6458 = vrcp.f32 %v2967_v48  ;;  %v9076_v48 = vld [vmem:[#allocation7 + $0xa8] sm:$0xff] }
 0x428   :  { %3302 = vmatpush1.msra.mxu0 %v8994_v43  ;;  %3373 = vmatpush1.msra.mxu1 %v8996_v10  ;;  %11011 = vst [vmem:[#allocation70_spill] sm:$0xff] %v9020_v36  ;;  %v9024_v43 = vld [vmem:[#allocation7 + $0x128] sm:$0xff]  ;;  %v9026_v10 = vld [vmem:[#allocation7 + $0x138] sm:$0xff]  ;;  %11026 = vst [vmem:[#allocation120_spill] sm:$0xff] %v9076_v48 }
 0x429   :  { %3303 = vmatprep.subr.mxu0 %v9000_v3  ;;  %3374 = vmatprep.subr.mxu1 %v9002_v60  ;;  %11012 = vst [vmem:[#allocation71_spill] sm:$0xff] %v9026_v10  ;;  %v9030_v3 = vld [vmem:[#allocation7 + $0x120] sm:$0xff]  ;;  %v9032_v60 = vld [vmem:[#allocation7 + $0x130] sm:$0xff] }
 0x42a   :  { %v6455_v5 = vpop.eup %6454  ;;  %3304 = vmatpush1.msra.mxu0 %v9006_v54  ;;  %3375 = vmatpush1.msra.mxu1 %v9008_v44  ;;  %11013 = vst [vmem:[#allocation72_spill] sm:$0xff] %v9030_v3  ;;  %11014 = vst [vmem:[#allocation73_spill] sm:$0xff] %v9032_v60  ;;  %v9036_v44 = vld [vmem:[#allocation7 + $0x108] sm:$0xff]  ;;  %v9038_v54 = vld [vmem:[#allocation7 + $0x118] sm:$0xff] }
 0x42b   :  { %v2971_v16 = vmul.f32 %v6455_v5, %v6451_v50  ;;  %3305 = vmatprep.subr.mxu0 %v9012_v49  ;;  %3376 = vmatprep.subr.mxu1 %v9014_v46  ;;  %11015 = vst [vmem:[#allocation74_spill] sm:$0xff] %v9036_v44  ;;  %11016 = vst [vmem:[#allocation75_spill] sm:$0xff] %v9038_v54  ;;  %v9043_v50 = vld [vmem:[#allocation7 + $0x100] sm:$0xff]  ;;  %v9045_v46 = vld [vmem:[#allocation7 + $0x110] sm:$0xff] }
 0x42c   :  { %v6457_v7 = vpop.eup %6456  ;;  %3306 = vmatpush1.msra.mxu0 %v9018_v25  ;;  %3377 = vmatpush1.msra.mxu1 %v9020_v36  ;;  %11017 = vst [vmem:[#allocation76_spill] sm:$0xff] %v9045_v46  ;;  %v9051_v36 = vld [vmem:[#allocation7 + $0xf8] sm:$0xff] }
 0x42d   :  { %v2970_v5 = vmul.f32 %v6457_v7, %v8704_v39  ;;  %3307 = vmatprep.subr.mxu0 %v9024_v43  ;;  %3378 = vmatprep.subr.mxu1 %v9026_v10  ;;  %11019 = vst [vmem:[#allocation113_spill] sm:$0xff] %v9051_v36  ;;  %v9055_v39 = vld [vmem:[#allocation7 + $0xe0] sm:$0xff]  ;;  %v9057_v7 = vld [vmem:[#allocation7 + $0xf0] sm:$0xff] }
 0x42e   :  { %3308 = vmatpush1.msra.mxu0 %v9030_v3  ;;  %3379 = vmatpush1.msra.mxu1 %v9032_v60  ;;  %11020 = vst [vmem:[#allocation114_spill] sm:$0xff] %v9055_v39  ;;  %11021 = vst [vmem:[#allocation115_spill] sm:$0xff] %v9057_v7  ;;  %v9063_v60 = vld [vmem:[#allocation7 + $0xc8] sm:$0xff]  ;;  %v9065_v3 = vld [vmem:[#allocation7 + $0xd8] sm:$0xff] }
 0x42f   :  { %3309 = vmatprep.subr.mxu0 %v9036_v44  ;;  %3380 = vmatprep.subr.mxu1 %v9038_v54  ;;  %v9059_v10 = vadd.f32 %v2971_v16, %v2970_v5  ;;  %11022 = vst [vmem:[#allocation116_spill] sm:$0xff] %v9063_v60  ;;  %11023 = vst [vmem:[#allocation117_spill] sm:$0xff] %v9065_v3  ;;  %v9069_v54 = vld [vmem:[#allocation7 + $0xc0] sm:$0xff]  ;;  %v9071_v44 = vld [vmem:[#allocation7 + $0xd0] sm:$0xff] }
 0x430   :  { %3310 = vmatpush1.msra.mxu0 %v9043_v50  ;;  %3381 = vmatpush1.msra.mxu1 %v9045_v46  ;;  %11024 = vst [vmem:[#allocation118_spill] sm:$0xff] %v9069_v54  ;;  %11025 = vst [vmem:[#allocation119_spill] sm:$0xff] %v9071_v44  ;;  %v9078_v16 = vld [vmem:[#allocation7 + $0xb8] sm:$0xff]  ;;  %v9082_v5 = vld [vmem:[#allocation7 + $0xa0] sm:$0xff] }
 0x431   :  { %3311 = vmatprep.subr.mxu0 %v9049_v59  ;;  %3382 = vmatprep.subr.mxu1 %v9051_v36  ;;  %6460 = vtanh.f32 %v9059_v10  ;;  %11027 = vst [vmem:[#allocation121_spill] sm:$0xff] %v9078_v16  ;;  %11028 = vst [vmem:[#allocation122_spill] sm:$0xff] %v9082_v5  ;;  %v9084_v36 = vld [vmem:[#allocation7 + $0xb0] sm:$0xff]  ;;  %v9088_v59 = vld [vmem:[#allocation7 + $0x88] sm:$0xff] }
 0x432   :  { %3312 = vmatpush1.msra.mxu0 %v9055_v39  ;;  %3383 = vmatpush1.msra.mxu1 %v9057_v7  ;;  %11029 = vst [vmem:[#allocation123_spill] sm:$0xff] %v9084_v36  ;;  %11030 = vst [vmem:[#allocation124_spill] sm:$0xff] %v9088_v59  ;;  %v9090_v39 = vld [vmem:[#allocation7 + $0x98] sm:$0xff]  ;;  %v9094_v7 = vld [vmem:[#allocation7 + $0x80] sm:$0xff] }
 0x433   :  { %3313 = vmatprep.subr.mxu0 %v9063_v60  ;;  %3384 = vmatprep.subr.mxu1 %v9065_v3  ;;  %11031 = vst [vmem:[#allocation125_spill] sm:$0xff] %v9090_v39  ;;  %11032 = vst [vmem:[#allocation126_spill] sm:$0xff] %v9094_v7  ;;  %v9096_v60 = vld [vmem:[#allocation7 + $0x90] sm:$0xff]  ;;  %v9100_v3 = vld [vmem:[#allocation7 + $0x68] sm:$0xff] }
 0x434   :  { %3314 = vmatpush1.msra.mxu0 %v9069_v54  ;;  %3385 = vmatpush1.msra.mxu1 %v9071_v44  ;;  %11033 = vst [vmem:[#allocation127_spill] sm:$0xff] %v9096_v60  ;;  %11034 = vst [vmem:[#allocation128_spill] sm:$0xff] %v9100_v3  ;;  %v9102_v54 = vld [vmem:[#allocation7 + $0x78] sm:$0xff]  ;;  %v9106_v44 = vld [vmem:[#allocation7 + $0x60] sm:$0xff] }
 0x435   :  { %3315 = vmatprep.subr.mxu0 %v9076_v48  ;;  %3386 = vmatprep.subr.mxu1 %v9078_v16  ;;  %11035 = vst [vmem:[#allocation129_spill] sm:$0xff] %v9102_v54  ;;  %11036 = vst [vmem:[#allocation130_spill] sm:$0xff] %v9106_v44  ;;  %v9108_v48 = vld [vmem:[#allocation7 + $0x70] sm:$0xff]  ;;  %v9112_v16 = vld [vmem:[#allocation7 + $0x48] sm:$0xff] }
 0x436   :  { %3316 = vmatpush1.msra.mxu0 %v9082_v5  ;;  %3387 = vmatpush1.msra.mxu1 %v9084_v36  ;;  %11037 = vst [vmem:[#allocation131_spill] sm:$0xff] %v9108_v48  ;;  %11038 = vst [vmem:[#allocation132_spill] sm:$0xff] %v9112_v16  ;;  %v9114_v5 = vld [vmem:[#allocation7 + $0x58] sm:$0xff]  ;;  %v9118_v36 = vld [vmem:[#allocation7 + $0x40] sm:$0xff] }
 0x437   :  { %3317 = vmatprep.subr.mxu0 %v9088_v59  ;;  %3388 = vmatprep.subr.mxu1 %v9090_v39  ;;  %11039 = vst [vmem:[#allocation133_spill] sm:$0xff] %v9114_v5  ;;  %v9120_v59 = vld [vmem:[#allocation7 + $0x50] sm:$0xff]  ;;  %v9124_v39 = vld [vmem:[#allocation7 + $0x28] sm:$0xff] }
 0x438   :  { %3318 = vmatpush1.msra.mxu0 %v9094_v7  ;;  %3389 = vmatpush1.msra.mxu1 %v9096_v60  ;;  %11040 = vst [vmem:[#allocation134_spill] sm:$0xff] %v9120_v59  ;;  %v9126_v7 = vld [vmem:[#allocation7 + $0x38] sm:$0xff]  ;;  %v9130_v60 = vld [vmem:[#allocation7 + $0x20] sm:$0xff]  ;;  %v9146_v46 = vld [vmem:[#allocation7 + $0x10] sm:$0xff] }
 0x439   :  { %3319 = vmatprep.subr.mxu0 %v9100_v3  ;;  %3390 = vmatprep.subr.mxu1 %v9102_v54  ;;  %v9132_v3 = vld [vmem:[#allocation7 + $0x30] sm:$0xff]  ;;  %v9136_v54 = vld [vmem:[#allocation7 + $0x8] sm:$0xff] }
 0x43a   :  { %3320 = vmatpush1.msra.mxu0 %v9106_v44  ;;  %3391 = vmatpush1.msra.mxu1 %v9108_v48  ;;  %v9138_v44 = vld [vmem:[#allocation7 + $0x18] sm:$0xff]  ;;  %v6459_v48 = vpop.eup %6458 }
 0x43b   :  { %3321 = vmatprep.subr.mxu0 %v9112_v16  ;;  %3392 = vmatprep.subr.mxu1 %v9114_v5  ;;  %v9142_v16 = vld [vmem:[#allocation7] sm:$0xff] }
 0x43c   :  { %3322 = vmatpush1.msra.mxu0 %v9118_v36  ;;  %3393 = vmatpush1.msra.mxu1 %v9120_v59 }
 0x43d   :  { %3323 = vmatprep.subr.mxu0 %v9124_v39  ;;  %3394 = vmatprep.subr.mxu1 %v9126_v7 }
 0x43e   :  { %v6461_v5 = vpop.eup %6460  ;;  %3324 = vmatpush1.msra.mxu0 %v9130_v60  ;;  %3395 = vmatpush1.msra.mxu1 %v9132_v3 }
 0x43f   :  { %3325 = vmatprep.subr.mxu0 %v9136_v54  ;;  %3396 = vmatprep.subr.mxu1 %v9138_v44  ;;  %v2974_v59 = vmul.f32 %v6461_v5, %v6459_v48  ;;  %v11074_v48 = vld [vmem:[#allocation19_spill] sm:$0xff] }
 0x440   :  { %3326 = vmatpush1.msra.mxu0 %v9142_v16  ;;  %3359 = vmatprep.mubr.f32.mxu0 %v10797_v20  ;;  %v1530_v5 = vadd.f32 %v11074_v48, %v8650_v31 }
 0x441   :  { %3397 = vmatpush1.msra.mxu1 %v9146_v46  ;;  %3430 = vmatprep.mubr.f32.mxu1 %v10797_v20 }
 0x442   :  { %2978 = vrot.lane.b32.xlu0 %v2974_v59, %s6722_s9  ;;  %3360 = vmatmul.mubr.f32.vlgmr.msra.gmra.mxu0 %v2974_v59 }
 0x443   :  { %3431 = vmatmul.mubr.f32.vlgmr.msra.gmra.mxu1 %v2974_v59  ;;  %3544 = vmatprep.subr.mxu0 %v8746_v41  ;;  %v11041_v41 = vld [vmem:[#allocation27_spill] sm:$0xff] }
 0x444   :  { %3615 = vmatprep.subr.mxu1 %v8748_v57  ;;  %3545 = vmatpush1.msra.mxu0 %v8750_v29  ;;  %v11042_v57 = vld [vmem:[#allocation28_spill] sm:$0xff]  ;;  %v11043_v29 = vld [vmem:[#allocation29_spill] sm:$0xff] }
 0x445   :  { %3616 = vmatpush1.msra.mxu1 %v8754_v53  ;;  %3546 = vmatprep.subr.mxu0 %v8756_v22  ;;  %v11044_v53 = vld [vmem:[#allocation30_spill] sm:$0xff]  ;;  %v11045_v22 = vld [vmem:[#allocation31_spill] sm:$0xff] }
 0x446   :  { %3617 = vmatprep.subr.mxu1 %v8758_v42  ;;  %3547 = vmatpush1.msra.mxu0 %v8762_v24  ;;  %v11046_v42 = vld [vmem:[#allocation32_spill] sm:$0xff]  ;;  %v11047_v24 = vld [vmem:[#allocation33_spill] sm:$0xff] }
 0x447   :  { %3618 = vmatpush1.msra.mxu1 %v8764_v17  ;;  %3548 = vmatprep.subr.mxu0 %v8766_v61  ;;  %v11048_v17 = vld [vmem:[#allocation34_spill] sm:$0xff]  ;;  %v11049_v61 = vld [vmem:[#allocation35_spill] sm:$0xff] }
 0x448   :  { %3619 = vmatprep.subr.mxu1 %v8770_v1  ;;  %3549 = vmatpush1.msra.mxu0 %v8772_v52  ;;  %v11050_v1 = vld [vmem:[#allocation36_spill] sm:$0xff]  ;;  %v11051_v52 = vld [vmem:[#allocation37_spill] sm:$0xff] }
 0x449   :  { %3620 = vmatpush1.msra.mxu1 %v8774_v40  ;;  %3550 = vmatprep.subr.mxu0 %v8778_v19  ;;  %v11052_v40 = vld [vmem:[#allocation38_spill] sm:$0xff]  ;;  %v11053_v19 = vld [vmem:[#allocation39_spill] sm:$0xff] }
 0x44a   :  { %3621 = vmatprep.subr.mxu1 %v8780_v2  ;;  %3551 = vmatpush1.msra.mxu0 %v8788_v32  ;;  %v11054_v2 = vld [vmem:[#allocation40_spill] sm:$0xff]  ;;  %v11055_v32 = vld [vmem:[#allocation41_spill] sm:$0xff] }
 0x44b   :  { %3622 = vmatpush1.msra.mxu1 %v8790_v12  ;;  %3552 = vmatprep.subr.mxu0 %v8794_v0  ;;  %v11056_v12 = vld [vmem:[#allocation42_spill] sm:$0xff]  ;;  %v11057_v0 = vld [vmem:[#allocation43_spill] sm:$0xff] }
 0x44c   :  { %3623 = vmatprep.subr.mxu1 %v8796_v55  ;;  %3553 = vmatpush1.msra.mxu0 %v8800_v47  ;;  %v11058_v55 = vld [vmem:[#allocation44_spill] sm:$0xff]  ;;  %v11059_v47 = vld [vmem:[#allocation45_spill] sm:$0xff] }
 0x44d   :  { %3624 = vmatpush1.msra.mxu1 %v8802_v37  ;;  %3554 = vmatprep.subr.mxu0 %v8806_v15  ;;  %v11060_v37 = vld [vmem:[#allocation46_spill] sm:$0xff]  ;;  %v11061_v15 = vld [vmem:[#allocation47_spill] sm:$0xff] }
 0x44e   :  { %3625 = vmatprep.subr.mxu1 %v8808_v33  ;;  %3555 = vmatpush1.msra.mxu0 %v8812_v62  ;;  %v11062_v33 = vld [vmem:[#allocation48_spill] sm:$0xff]  ;;  %v11063_v62 = vld [vmem:[#allocation49_spill] sm:$0xff] }
 0x44f   :  { %3626 = vmatpush1.msra.mxu1 %v8814_v21  ;;  %3556 = vmatprep.subr.mxu0 %v8818_v45  ;;  %v11064_v21 = vld [vmem:[#allocation50_spill] sm:$0xff]  ;;  %v11065_v45 = vld [vmem:[#allocation51_spill] sm:$0xff] }
 0x450   :  { %3627 = vmatprep.subr.mxu1 %v8820_v18  ;;  %3557 = vmatpush1.msra.mxu0 %v8824_v30  ;;  %v11066_v18 = vld [vmem:[#allocation52_spill] sm:$0xff]  ;;  %v11067_v30 = vld [vmem:[#allocation53_spill] sm:$0xff] }
 0x451   :  { %3628 = vmatpush1.msra.mxu1 %v8826_v23  ;;  %3558 = vmatprep.subr.mxu0 %v8830_v63  ;;  %v11068_v23 = vld [vmem:[#allocation54_spill] sm:$0xff]  ;;  %v11069_v63 = vld [vmem:[#allocation55_spill] sm:$0xff] }
 0x452   :  { %3629 = vmatprep.subr.mxu1 %v8832_v4  ;;  %3559 = vmatpush1.msra.mxu0 %v8836_v14  ;;  %v11070_v4 = vld [vmem:[#allocation56_spill] sm:$0xff]  ;;  %v11071_v14 = vld [vmem:[#allocation57_spill] sm:$0xff] }
 0x453   :  { %3630 = vmatpush1.msra.mxu1 %v8838_v51  ;;  %3560 = vmatprep.subr.mxu0 %v8842_v8  ;;  %v11072_v8 = vld [vmem:[#allocation112_spill] sm:$0xff] }
 0x454   :  { %3631 = vmatprep.subr.mxu1 %v8844_v13  ;;  %3561 = vmatpush1.msra.mxu0 %v8848_v9  ;;  %v11073_v13 = vld [vmem:[#allocation17_spill] sm:$0xff] }
 0x455   :  { %3632 = vmatpush1.msra.mxu1 %v11041_v41  ;;  %3562 = vmatprep.subr.mxu0 %v11042_v57  ;;  %v1528_v9 = vadd.f32 %v11073_v13, %v11072_v8 }
 0x456   :  { %3633 = vmatprep.subr.mxu1 %v11043_v29  ;;  %3563 = vmatpush1.msra.mxu0 %v11044_v53 }
 0x457   :  { %3634 = vmatpush1.msra.mxu1 %v11045_v22  ;;  %3564 = vmatprep.subr.mxu0 %v11046_v42 }
 0x458   :  { %3635 = vmatprep.subr.mxu1 %v11047_v24  ;;  %3565 = vmatpush1.msra.mxu0 %v11048_v17  ;;  %v11075_v17 = vld [vmem:[#allocation20_spill] sm:$0xff] }
 0x459   :  { %3636 = vmatpush1.msra.mxu1 %v11049_v61  ;;  %3566 = vmatprep.subr.mxu0 %v11050_v1  ;;  %v1643_v61 = vadd.f32 %v11075_v17, %v8658_v38 }
 0x45a   :  { %3637 = vmatprep.subr.mxu1 %v11051_v52  ;;  %3567 = vmatpush1.msra.mxu0 %v11052_v40  ;;  %v11076_v52 = vld [vmem:[#allocation18_spill] sm:$0xff] }
 0x45b   :  { %3638 = vmatpush1.msra.mxu1 %v11053_v19  ;;  %3568 = vmatprep.subr.mxu0 %v11054_v2  ;;  %v1641_v40 = vadd.f32 %v11076_v52, %v8664_v27  ;;  %v11081_v52 = vld [vmem:[#allocation58_spill] sm:$0xff] }
 0x45c   :  { %3639 = vmatprep.subr.mxu1 %v11055_v32  ;;  %3569 = vmatpush1.msra.mxu0 %v11056_v12 }
 0x45d   :  { %3640 = vmatpush1.msra.mxu1 %v11057_v0  ;;  %3570 = vmatprep.subr.mxu0 %v11058_v55 }
 0x45e   :  { %3641 = vmatprep.subr.mxu1 %v11059_v47  ;;  %3571 = vmatpush1.msra.mxu0 %v11060_v37 }
 0x45f   :  { %3642 = vmatpush1.msra.mxu1 %v11061_v15  ;;  %3572 = vmatprep.subr.mxu0 %v11062_v33 }
 0x460   :  { %3643 = vmatprep.subr.mxu1 %v11063_v62  ;;  %3573 = vmatpush1.msra.mxu0 %v11064_v21  ;;  %v11077_v62 = vld [vmem:[#allocation108_spill] sm:$0xff] }
 0x461   :  { %3644 = vmatpush1.msra.mxu1 %v11065_v45  ;;  %3574 = vmatprep.subr.mxu0 %v11066_v18 }
 0x462   :  { %3645 = vmatprep.subr.mxu1 %v11067_v30  ;;  %3575 = vmatpush1.msra.mxu0 %v11068_v23 }
 0x463   :  { %3646 = vmatpush1.msra.mxu1 %v11069_v63  ;;  %3608 = vmatprep.mubr.f32.mxu0 %v10797_v20  ;;  %v11078_v63 = vld [vmem:[#allocation110_spill] sm:$0xff] }
 0x464   :  { %3679 = vmatprep.mubr.f32.mxu1 %v10797_v20  ;;  %3785 = vmatprep.subr.mxu0 %v11070_v4 }
 0x465   :  { %3856 = vmatprep.subr.mxu1 %v11071_v14 }
 0x4b4   :  { %v2979_v51 = vpop.permute.xlu0 %2978 }
 0x4b5   :  { %2982 = vst.msk [vmem:[#allocation9 + $0x30] sm:$0xff] %vm2491_vm2, %v2979_v51 }
 0x4e1   :  { %v3120_v59 = vpop.f32.mrf.mxu0  ;;  %v3191_v22 = vpop.f32.mrf.mxu1 }
 0x4e2   :  { %v3196_v41 = vadd.f32 %v3120_v59, %v1528_v9  ;;  %v3198_v19 = vadd.f32 %v3191_v22, %v1641_v40  ;;  %v11082_v40 = vld [vmem:[#allocation59_spill] sm:$0xff] }
 0x4e3   :  { %v3122_v57 = vpop.f32.mrf.mxu0  ;;  %v3193_v24 = vpop.f32.mrf.mxu1 }
 0x4e4   :  { %v6207_v29 = vmul.f32 -1.442695, %v3196_v41  ;;  %v3197_v53 = vadd.f32 %v3122_v57, %v1530_v5  ;;  %v3199_v1 = vadd.f32 %v3193_v24, %v1643_v61  ;;  %v11079_v5 = vld [vmem:[#allocation111_spill] sm:$0xff]  ;;  %v11080_v57 = vld [vmem:[#allocation109_spill] sm:$0xff] }
 0x4e6   :  { %6462 = vpow2.f32 %v6207_v29  ;;  %v6208_v42 = vmul.f32 -1.442695, %v3197_v53  ;;  %v6209_v2 = vmul.f32 -1.442695, %v3199_v1 }
 0x4e8   :  { %6464 = vpow2.f32 %v6208_v42 }
 0x4e9   :  { %6466 = vtanh.f32 %v3198_v19  ;;  %v11083_v19 = vld [vmem:[#allocation60_spill] sm:$0xff] }
 0x4ea   :  { %6468 = vpow2.f32 %v6209_v2  ;;  %v11084_v2 = vld [vmem:[#allocation61_spill] sm:$0xff] }
 0x4f3   :  { %v6463_v32 = vpop.eup %6462 }
 0x4f4   :  { %v3203_v12 = vadd.f32 1.0, %v6463_v32  ;;  %v11088_v32 = vld [vmem:[#allocation65_spill] sm:$0xff] }
 0x4f5   :  { %v6465_v0 = vpop.eup %6464 }
 0x4f6   :  { %6470 = vrcp.f32 %v3203_v12  ;;  %v3209_v55 = vadd.f32 1.0, %v6465_v0  ;;  %v6467_v47 = vpop.eup %6466  ;;  %v11090_v12 = vld [vmem:[#allocation67_spill] sm:$0xff]  ;;  %v11091_v0 = vld [vmem:[#allocation68_spill] sm:$0xff] }
 0x4f7   :  { %v6469_v37 = vpop.eup %6468 }
 0x4f8   :  { %6472 = vrcp.f32 %v3209_v55  ;;  %v3216_v51 = vadd.f32 1.0, %v6469_v37 }
 0x502   :  { %v3361_v15 = vpop.f32.mrf.mxu0 }
 0x503   :  { %v6471_v33 = vpop.eup %6470  ;;  %v3437_v21 = vadd.f32 %v3361_v15, %v11077_v62  ;;  %v3432_v13 = vpop.f32.mrf.mxu1 }
 0x504   :  { %v3220_v45 = vmul.f32 %v6471_v33, %v6467_v47  ;;  %v3363_v18 = vpop.f32.mrf.mxu0  ;;  %v3439_v29 = vadd.f32 %v3432_v13, %v11080_v57  ;;  %v11092_v47 = vld [vmem:[#allocation69_spill] sm:$0xff]  ;;  %v11093_v33 = vld [vmem:[#allocation70_spill] sm:$0xff]  ;;  %v11112_v57 = vld [vmem:[#allocation124_spill] sm:$0xff] }
 0x505   :  { %v6473_v30 = vpop.eup %6472  ;;  %v6210_v23 = vmul.f32 -1.442695, %v3437_v21  ;;  %v3438_v4 = vadd.f32 %v3363_v18, %v11078_v63  ;;  %v3434_v48 = vpop.f32.mrf.mxu1  ;;  %v11094_v21 = vld [vmem:[#allocation71_spill] sm:$0xff]  ;;  %v11096_v18 = vld [vmem:[#allocation73_spill] sm:$0xff]  ;;  %v11102_v63 = vld [vmem:[#allocation114_spill] sm:$0xff] }
 0x506   :  { %v3219_v14 = vmul.f32 %v6473_v30, %v8956_v35  ;;  %v3440_v41 = vadd.f32 %v3434_v48, %v11079_v5  ;;  %v11097_v30 = vld [vmem:[#allocation74_spill] sm:$0xff]  ;;  %v11109_v48 = vld [vmem:[#allocation121_spill] sm:$0xff] }
 0x507   :  { %6474 = vpow2.f32 %v6210_v23  ;;  %v6211_v9 = vmul.f32 -1.442695, %v3438_v4  ;;  %v11103_v4 = vld [vmem:[#allocation115_spill] sm:$0xff]  ;;  %v11106_v13 = vld [vmem:[#allocation118_spill] sm:$0xff] }
 0x508   :  { %v9235_v59 = vadd.f32 %v3220_v45, %v3219_v14  ;;  %v6212_v53 = vmul.f32 -1.442695, %v3440_v41  ;;  %v11095_v45 = vld [vmem:[#allocation72_spill] sm:$0xff]  ;;  %v11110_v5 = vld [vmem:[#allocation122_spill] sm:$0xff]  ;;  %v11111_v41 = vld [vmem:[#allocation123_spill] sm:$0xff] }
 0x509   :  { %6476 = vpow2.f32 %v6211_v9  ;;  %v11104_v14 = vld [vmem:[#allocation116_spill] sm:$0xff]  ;;  %v11107_v9 = vld [vmem:[#allocation119_spill] sm:$0xff] }
 0x50a   :  { %6478 = vrcp.f32 %v3216_v51  ;;  %v11105_v51 = vld [vmem:[#allocation117_spill] sm:$0xff] }
 0x50b   :  { %6480 = vtanh.f32 %v9235_v59 }
 0x50c   :  { %6482 = vtanh.f32 %v3439_v29  ;;  %v11113_v29 = vld [vmem:[#allocation125_spill] sm:$0xff] }
 0x50d   :  { %6484 = vpow2.f32 %v6212_v53  ;;  %v11114_v53 = vld [vmem:[#allocation126_spill] sm:$0xff] }
 0x514   :  { %v6475_v22 = vpop.eup %6474 }
 0x515   :  { %v3444_v42 = vadd.f32 1.0, %v6475_v22  ;;  %v11115_v22 = vld [vmem:[#allocation127_spill] sm:$0xff] }
 0x516   :  { %v6477_v35 = vpop.eup %6476 }
 0x517   :  { %v6479_v24 = vpop.eup %6478  ;;  %6486 = vrcp.f32 %v3444_v42  ;;  %v3450_v17 = vadd.f32 1.0, %v6477_v35  ;;  %v11116_v42 = vld [vmem:[#allocation128_spill] sm:$0xff]  ;;  %v11117_v35 = vld [vmem:[#allocation129_spill] sm:$0xff] }
 0x518   :  { %v6481_v61 = vpop.eup %6480 }
 0x519   :  { %6488 = vrcp.f32 %v3450_v17  ;;  %v3223_v1 = vmul.f32 %v6481_v61, %v6479_v24  ;;  %v11118_v24 = vld [vmem:[#allocation130_spill] sm:$0xff]  ;;  %v11119_v17 = vld [vmem:[#allocation131_spill] sm:$0xff]  ;;  %v11120_v61 = vld [vmem:[#allocation132_spill] sm:$0xff] }
 0x51b   :  { %3609 = vmatmul.mubr.f32.vlgmr.msra.gmra.mxu0 %v3223_v1  ;;  %3466 = vst.msk [vmem:[#allocation9 + $0x10] sm:$0xff] %vm1424_vm1, %v3223_v1  ;;  %3680 = vmatmul.mubr.f32.vlgmr.msra.gmra.mxu1 %v3223_v1  ;;  %v11121_v1 = vld [vmem:[#allocation133_spill] sm:$0xff] }
 0x51c   :  { %3786 = vmatpush1.msra.mxu0 %v8961_v58  ;;  %3857 = vmatpush1.msra.mxu1 %v8963_v56  ;;  %v11085_v58 = vld [vmem:[#allocation62_spill] sm:$0xff]  ;;  %v6483_v56 = vpop.eup %6482 }
 0x51d   :  { %3787 = vmatprep.subr.mxu0 %v8965_v26  ;;  %3858 = vmatprep.subr.mxu1 %v8967_v28  ;;  %v11086_v26 = vld [vmem:[#allocation63_spill] sm:$0xff]  ;;  %v11087_v28 = vld [vmem:[#allocation64_spill] sm:$0xff] }
 0x51e   :  { %3788 = vmatpush1.msra.mxu0 %v8970_v34  ;;  %3859 = vmatpush1.msra.mxu1 %v8972_v11  ;;  %v6485_v34 = vpop.eup %6484  ;;  %v11089_v11 = vld [vmem:[#allocation66_spill] sm:$0xff] }
 0x51f   :  { %3789 = vmatprep.subr.mxu0 %v8976_v6  ;;  %3860 = vmatprep.subr.mxu1 %v11081_v52  ;;  %v3457_v15 = vadd.f32 1.0, %v6485_v34  ;;  %v11122_v52 = vld [vmem:[#allocation134_spill] sm:$0xff]  ;;  %v9346_v34 = vld [vmem:[#allocation4 + $0x198] sm:$0xff] }
 0x520   :  { %3790 = vmatpush1.msra.mxu0 %v11082_v40  ;;  %3861 = vmatpush1.msra.mxu1 %v11083_v19 }
 0x521   :  { %3791 = vmatprep.subr.mxu0 %v11084_v2  ;;  %3862 = vmatprep.subr.mxu1 %v11085_v58  ;;  %6490 = vrcp.f32 %v3457_v15  ;;  %v9336_v58 = vld [vmem:[#allocation4 + $0x1b8] sm:$0xff]  ;;  %v9378_v15 = vld [vmem:[#allocation4 + $0x140] sm:$0xff] }
 0x522   :  { %3792 = vmatpush1.msra.mxu0 %v11086_v26  ;;  %3863 = vmatpush1.msra.mxu1 %v11087_v28  ;;  %v9340_v26 = vld [vmem:[#allocation4 + $0x1b0] sm:$0xff]  ;;  %v9344_v28 = vld [vmem:[#allocation4 + $0x188] sm:$0xff] }
 0x523   :  { %3793 = vmatprep.subr.mxu0 %v11088_v32  ;;  %3864 = vmatprep.subr.mxu1 %v11089_v11  ;;  %v9354_v32 = vld [vmem:[#allocation4 + $0x180] sm:$0xff]  ;;  %v9356_v11 = vld [vmem:[#allocation4 + $0x190] sm:$0xff] }
 0x524   :  { %v6487_v6 = vpop.eup %6486  ;;  %3794 = vmatpush1.msra.mxu0 %v11090_v12  ;;  %3865 = vmatpush1.msra.mxu1 %v11091_v0  ;;  %v9362_v12 = vld [vmem:[#allocation4 + $0x178] sm:$0xff]  ;;  %v9366_v0 = vld [vmem:[#allocation4 + $0x160] sm:$0xff] }
 0x525   :  { %v3461_v55 = vmul.f32 %v6487_v6, %v6483_v56  ;;  %3795 = vmatprep.subr.mxu0 %v9012_v49  ;;  %3866 = vmatprep.subr.mxu1 %v11092_v47  ;;  %v11098_v49 = vld [vmem:[#allocation75_spill] sm:$0xff]  ;;  %v9338_v56 = vld [vmem:[#allocation4 + $0x1a0] sm:$0xff]  ;;  %v9360_v6 = vld [vmem:[#allocation4 + $0x168] sm:$0xff] }
 0x526   :  { %v6489_v37 = vpop.eup %6488  ;;  %3796 = vmatpush1.msra.mxu0 %v9018_v25  ;;  %3867 = vmatpush1.msra.mxu1 %v11093_v33  ;;  %v11099_v25 = vld [vmem:[#allocation76_spill] sm:$0xff]  ;;  %v9372_v47 = vld [vmem:[#allocation4 + $0x148] sm:$0xff]  ;;  %v9380_v33 = vld [vmem:[#allocation4 + $0x150] sm:$0xff] }
 0x527   :  { %v3460_v62 = vmul.f32 %v6489_v37, %v9059_v10  ;;  %3797 = vmatprep.subr.mxu0 %v9024_v43  ;;  %3868 = vmatprep.subr.mxu1 %v11094_v21  ;;  %v11100_v10 = vld [vmem:[#allocation77_spill] sm:$0xff]  ;;  %v9374_v37 = vld [vmem:[#allocation4 + $0x158] sm:$0xff] }
 0x528   :  { %3798 = vmatpush1.msra.mxu0 %v11095_v45  ;;  %3869 = vmatpush1.msra.mxu1 %v11096_v18  ;;  %v11101_v43 = vld [vmem:[#allocation113_spill] sm:$0xff]  ;;  %v9386_v21 = vld [vmem:[#allocation4 + $0x138] sm:$0xff]  ;;  %v9392_v18 = vld [vmem:[#allocation4 + $0x130] sm:$0xff] }
 0x529   :  { %3799 = vmatprep.subr.mxu0 %v11097_v30  ;;  %3870 = vmatprep.subr.mxu1 %v11098_v49  ;;  %v9270_v23 = vadd.f32 %v3461_v55, %v3460_v62  ;;  %v9368_v55 = vld [vmem:[#allocation4 + $0x170] sm:$0xff]  ;;  %v9384_v62 = vld [vmem:[#allocation4 + $0x128] sm:$0xff]  ;;  %v9390_v45 = vld [vmem:[#allocation4 + $0x120] sm:$0xff] }
 0x52a   :  { %3800 = vmatpush1.msra.mxu0 %v9043_v50  ;;  %3871 = vmatpush1.msra.mxu1 %v11099_v25  ;;  %v11108_v50 = vld [vmem:[#allocation120_spill] sm:$0xff]  ;;  %v9396_v30 = vld [vmem:[#allocation4 + $0x108] sm:$0xff]  ;;  %v9402_v25 = vld [vmem:[#allocation4 + $0x100] sm:$0xff] }
 0x52b   :  { %3801 = vmatprep.subr.mxu0 %v11100_v10  ;;  %3872 = vmatprep.subr.mxu1 %v11101_v43  ;;  %6492 = vtanh.f32 %v9270_v23  ;;  %v9398_v49 = vld [vmem:[#allocation4 + $0x118] sm:$0xff]  ;;  %v9404_v10 = vld [vmem:[#allocation4 + $0x110] sm:$0xff]  ;;  %v9408_v43 = vld [vmem:[#allocation4 + $0xe8] sm:$0xff] }
 0x52c   :  { %3802 = vmatpush1.msra.mxu0 %v11102_v63  ;;  %3873 = vmatpush1.msra.mxu1 %v11103_v4  ;;  %v9410_v63 = vld [vmem:[#allocation4 + $0xf8] sm:$0xff]  ;;  %v9414_v4 = vld [vmem:[#allocation4 + $0xe0] sm:$0xff] }
 0x52d   :  { %3803 = vmatprep.subr.mxu0 %v11104_v14  ;;  %3874 = vmatprep.subr.mxu1 %v11105_v51  ;;  %v9416_v14 = vld [vmem:[#allocation4 + $0xf0] sm:$0xff]  ;;  %v9420_v51 = vld [vmem:[#allocation4 + $0xc8] sm:$0xff] }
 0x52e   :  { %3804 = vmatpush1.msra.mxu0 %v11106_v13  ;;  %3875 = vmatpush1.msra.mxu1 %v11107_v9  ;;  %v6491_v40 = vpop.eup %6490  ;;  %v9422_v13 = vld [vmem:[#allocation4 + $0xd8] sm:$0xff]  ;;  %v9426_v9 = vld [vmem:[#allocation4 + $0xc0] sm:$0xff] }
 0x52f   :  { %3805 = vmatprep.subr.mxu0 %v11108_v50  ;;  %3876 = vmatprep.subr.mxu1 %v11109_v48  ;;  %v9428_v50 = vld [vmem:[#allocation4 + $0xd0] sm:$0xff]  ;;  %v9432_v48 = vld [vmem:[#allocation4 + $0xa8] sm:$0xff] }
 0x530   :  { %3806 = vmatpush1.msra.mxu0 %v11110_v5  ;;  %3877 = vmatpush1.msra.mxu1 %v11111_v41  ;;  %11123 = vst [vmem:[#allocation27_spill] sm:$0xff] %v9428_v50  ;;  %11124 = vst [vmem:[#allocation28_spill] sm:$0xff] %v9432_v48  ;;  %v9434_v5 = vld [vmem:[#allocation4 + $0xb8] sm:$0xff]  ;;  %v9438_v41 = vld [vmem:[#allocation4 + $0xa0] sm:$0xff] }
 0x531   :  { %3807 = vmatprep.subr.mxu0 %v11112_v57  ;;  %3878 = vmatprep.subr.mxu1 %v11113_v29  ;;  %11125 = vst [vmem:[#allocation29_spill] sm:$0xff] %v9434_v5  ;;  %11126 = vst [vmem:[#allocation30_spill] sm:$0xff] %v9438_v41  ;;  %v9440_v57 = vld [vmem:[#allocation4 + $0xb0] sm:$0xff]  ;;  %v9444_v29 = vld [vmem:[#allocation4 + $0x88] sm:$0xff] }
 0x532   :  { %3808 = vmatpush1.msra.mxu0 %v11114_v53  ;;  %3879 = vmatpush1.msra.mxu1 %v11115_v22  ;;  %11127 = vst [vmem:[#allocation31_spill] sm:$0xff] %v9440_v57  ;;  %11128 = vst [vmem:[#allocation32_spill] sm:$0xff] %v9444_v29  ;;  %v9446_v53 = vld [vmem:[#allocation4 + $0x98] sm:$0xff]  ;;  %v9450_v22 = vld [vmem:[#allocation4 + $0x80] sm:$0xff] }
 0x533   :  { %3809 = vmatprep.subr.mxu0 %v11116_v42  ;;  %3880 = vmatprep.subr.mxu1 %v11117_v35  ;;  %11129 = vst [vmem:[#allocation33_spill] sm:$0xff] %v9446_v53  ;;  %11130 = vst [vmem:[#allocation34_spill] sm:$0xff] %v9450_v22  ;;  %v9452_v42 = vld [vmem:[#allocation4 + $0x90] sm:$0xff]  ;;  %v9456_v35 = vld [vmem:[#allocation4 + $0x68] sm:$0xff] }
 0x534   :  { %3810 = vmatpush1.msra.mxu0 %v11118_v24  ;;  %3881 = vmatpush1.msra.mxu1 %v11119_v17  ;;  %11131 = vst [vmem:[#allocation35_spill] sm:$0xff] %v9452_v42  ;;  %11132 = vst [vmem:[#allocation36_spill] sm:$0xff] %v9456_v35  ;;  %v9458_v24 = vld [vmem:[#allocation4 + $0x78] sm:$0xff]  ;;  %v9462_v17 = vld [vmem:[#allocation4 + $0x60] sm:$0xff] }
 0x535   :  { %3811 = vmatprep.subr.mxu0 %v11120_v61  ;;  %3882 = vmatprep.subr.mxu1 %v11121_v1  ;;  %11133 = vst [vmem:[#allocation37_spill] sm:$0xff] %v9458_v24  ;;  %11134 = vst [vmem:[#allocation38_spill] sm:$0xff] %v9462_v17  ;;  %v9464_v61 = vld [vmem:[#allocation4 + $0x70] sm:$0xff]  ;;  %v9466_v1 = vld [vmem:[#allocation4 + $0x48] sm:$0xff] }
 0x536   :  { %3812 = vmatpush1.msra.mxu0 %v9118_v36  ;;  %3883 = vmatpush1.msra.mxu1 %v11122_v52  ;;  %v9312_v36 = vld [vmem:[#allocation4 + $0x1e8] sm:$0xff]  ;;  %11135 = vst [vmem:[#allocation39_spill] sm:$0xff] %v9464_v61  ;;  %11136 = vst [vmem:[#allocation40_spill] sm:$0xff] %v9466_v1  ;;  %v9470_v52 = vld [vmem:[#allocation4 + $0x58] sm:$0xff] }
 0x537   :  { %3813 = vmatprep.subr.mxu0 %v9124_v39  ;;  %3884 = vmatprep.subr.mxu1 %v9126_v7  ;;  %v9328_v39 = vld [vmem:[#allocation4 + $0x1c0] sm:$0xff]  ;;  %v9330_v7 = vld [vmem:[#allocation4 + $0x1d0] sm:$0xff]  ;;  %11137 = vst [vmem:[#allocation41_spill] sm:$0xff] %v9470_v52 }
 0x538   :  { %v6493_v19 = vpop.eup %6492  ;;  %3814 = vmatpush1.msra.mxu0 %v9130_v60  ;;  %3885 = vmatpush1.msra.mxu1 %v9132_v3  ;;  %v9314_v3 = vld [vmem:[#allocation4 + $0x1f8] sm:$0xff]  ;;  %v9316_v60 = vld [vmem:[#allocation4 + $0x1e0] sm:$0xff] }
 0x539   :  { %3815 = vmatprep.subr.mxu0 %v9136_v54  ;;  %3886 = vmatprep.subr.mxu1 %v9138_v44  ;;  %v3464_v2 = vmul.f32 %v6493_v19, %v6491_v40  ;;  %v9320_v54 = vld [vmem:[#allocation4 + $0x1f0] sm:$0xff]  ;;  %v9322_v44 = vld [vmem:[#allocation4 + $0x1c8] sm:$0xff]  ;;  %v9472_v40 = vld [vmem:[#allocation4 + $0x40] sm:$0xff] }
 0x53a   :  { %3816 = vmatpush1.msra.mxu0 %v9142_v16  ;;  %3849 = vmatprep.mubr.f32.mxu0 %v10797_v20  ;;  %v9332_v16 = vld [vmem:[#allocation4 + $0x1a8] sm:$0xff]  ;;  %11138 = vst [vmem:[#allocation42_spill] sm:$0xff] %v9472_v40  ;;  %v9474_v19 = vld [vmem:[#allocation4 + $0x50] sm:$0xff] }
 0x53b   :  { %3887 = vmatpush1.msra.mxu1 %v9146_v46  ;;  %3920 = vmatprep.mubr.f32.mxu1 %v10797_v20  ;;  %v9324_v46 = vld [vmem:[#allocation4 + $0x1d8] sm:$0xff]  ;;  %11139 = vst [vmem:[#allocation43_spill] sm:$0xff] %v9474_v19 }
 0x53c   :  { %3468 = vrot.lane.b32.xlu1 %v3464_v2, %s6722_s9  ;;  %3850 = vmatmul.mubr.f32.vlgmr.msra.gmra.mxu0 %v3464_v2 }
 0x53d   :  { %3921 = vmatmul.mubr.f32.vlgmr.msra.gmra.mxu1 %v3464_v2  ;;  %4097 = vmatprep.mubr.f32.mxu0 %v10797_v20  ;;  %v9478_v2 = vld [vmem:[#allocation4 + $0x28] sm:$0xff] }
 0x53e   :  { %4168 = vmatprep.mubr.f32.mxu1 %v10797_v20  ;;  %4033 = vmatprep.subr.mxu0 %v9312_v36  ;;  %11140 = vst [vmem:[#allocation44_spill] sm:$0xff] %v9478_v2 }
 0x53f   :  { %4104 = vmatprep.subr.mxu1 %v9314_v3  ;;  %4034 = vmatpush1.msra.mxu0 %v9316_v60 }
 0x540   :  { %4105 = vmatpush1.msra.mxu1 %v9320_v54  ;;  %4035 = vmatprep.subr.mxu0 %v9322_v44 }
 0x541   :  { %4106 = vmatprep.subr.mxu1 %v9324_v46  ;;  %4036 = vmatpush1.msra.mxu0 %v9328_v39 }
 0x542   :  { %4107 = vmatpush1.msra.mxu1 %v9330_v7  ;;  %4037 = vmatprep.subr.mxu0 %v9332_v16 }
 0x543   :  { %4108 = vmatprep.subr.mxu1 %v9336_v58  ;;  %4038 = vmatpush1.msra.mxu0 %v9338_v56 }
 0x544   :  { %4109 = vmatpush1.msra.mxu1 %v9340_v26  ;;  %4039 = vmatprep.subr.mxu0 %v9344_v28 }
 0x545   :  { %4110 = vmatprep.subr.mxu1 %v9346_v34  ;;  %4040 = vmatpush1.msra.mxu0 %v9354_v32 }
 0x546   :  { %4111 = vmatpush1.msra.mxu1 %v9356_v11  ;;  %4041 = vmatprep.subr.mxu0 %v9360_v6 }
 0x547   :  { %4112 = vmatprep.subr.mxu1 %v9362_v12  ;;  %4042 = vmatpush1.msra.mxu0 %v9366_v0 }
 0x548   :  { %4113 = vmatpush1.msra.mxu1 %v9368_v55  ;;  %4043 = vmatprep.subr.mxu0 %v9372_v47 }
 0x549   :  { %4114 = vmatprep.subr.mxu1 %v9374_v37  ;;  %4044 = vmatpush1.msra.mxu0 %v9378_v15 }
 0x54a   :  { %4115 = vmatpush1.msra.mxu1 %v9380_v33  ;;  %4045 = vmatprep.subr.mxu0 %v9384_v62 }
 0x54b   :  { %4116 = vmatprep.subr.mxu1 %v9386_v21  ;;  %4046 = vmatpush1.msra.mxu0 %v9390_v45 }
 0x54c   :  { %4117 = vmatpush1.msra.mxu1 %v9392_v18  ;;  %4047 = vmatprep.subr.mxu0 %v9396_v30 }
 0x54d   :  { %4118 = vmatprep.subr.mxu1 %v9398_v49  ;;  %4048 = vmatpush1.msra.mxu0 %v9402_v25 }
 0x54e   :  { %4119 = vmatpush1.msra.mxu1 %v9404_v10  ;;  %4049 = vmatprep.subr.mxu0 %v9408_v43 }
 0x54f   :  { %4120 = vmatprep.subr.mxu1 %v9410_v63  ;;  %4050 = vmatpush1.msra.mxu0 %v9414_v4 }
 0x550   :  { %4121 = vmatpush1.msra.mxu1 %v9416_v14  ;;  %4051 = vmatprep.subr.mxu0 %v9420_v51 }
 0x551   :  { %4122 = vmatprep.subr.mxu1 %v9422_v13  ;;  %4052 = vmatpush1.msra.mxu0 %v9426_v9 }
 0x552   :  { %4123 = vmatpush1.msra.mxu1 %v9428_v50  ;;  %4053 = vmatprep.subr.mxu0 %v9432_v48 }
 0x553   :  { %4124 = vmatprep.subr.mxu1 %v9434_v5  ;;  %4054 = vmatpush1.msra.mxu0 %v9438_v41  ;;  %v11153_v5 = vld [vmem:[#allocation14_spill] sm:$0xff] }
 0x554   :  { %4125 = vmatpush1.msra.mxu1 %v9440_v57  ;;  %4055 = vmatprep.subr.mxu0 %v9444_v29 }
 0x555   :  { %4126 = vmatprep.subr.mxu1 %v9446_v53  ;;  %4056 = vmatpush1.msra.mxu0 %v9450_v22  ;;  %v11151_v22 = vld [vmem:[#allocation15_spill] sm:$0xff] }
 0x556   :  { %4127 = vmatpush1.msra.mxu1 %v9452_v42  ;;  %4057 = vmatprep.subr.mxu0 %v9456_v35  ;;  %v9482_v35 = vld [vmem:[#allocation4 + $0x20] sm:$0xff]  ;;  %v9490_v42 = vld [vmem:[#allocation4 + $0x18] sm:$0xff] }
 0x557   :  { %4128 = vmatprep.subr.mxu1 %v9458_v24  ;;  %4058 = vmatpush1.msra.mxu0 %v9462_v17  ;;  %v9480_v24 = vld [vmem:[#allocation4 + $0x38] sm:$0xff]  ;;  %11142 = vst [vmem:[#allocation46_spill] sm:$0xff] %v9482_v35  ;;  %v9488_v17 = vld [vmem:[#allocation4 + $0x8] sm:$0xff]  ;;  %11145 = vst [vmem:[#allocation49_spill] sm:$0xff] %v9490_v42 }
 0x558   :  { %4129 = vmatpush1.msra.mxu1 %v9464_v61  ;;  %4059 = vmatprep.subr.mxu0 %v9466_v1  ;;  %11141 = vst [vmem:[#allocation45_spill] sm:$0xff] %v9480_v24  ;;  %v9486_v61 = vld [vmem:[#allocation4 + $0x30] sm:$0xff]  ;;  %11144 = vst [vmem:[#allocation48_spill] sm:$0xff] %v9488_v17 }
 0x559   :  { %4130 = vmatprep.subr.mxu1 %v9470_v52  ;;  %4060 = vmatpush1.msra.mxu0 %v9472_v40  ;;  %11143 = vst [vmem:[#allocation47_spill] sm:$0xff] %v9486_v61  ;;  %v9494_v52 = vld [vmem:[#allocation4] sm:$0xff]  ;;  %v9496_v1 = vld [vmem:[#allocation4 + $0x10] sm:$0xff]  ;;  %v9500_v40 = vld [vmem:[#allocation7 + $0x1e8] sm:$0xff] }
 0x55a   :  { %4131 = vmatpush1.msra.mxu1 %v9474_v19  ;;  %4061 = vmatprep.subr.mxu0 %v9478_v2  ;;  %11146 = vst [vmem:[#allocation50_spill] sm:$0xff] %v9494_v52  ;;  %11147 = vst [vmem:[#allocation51_spill] sm:$0xff] %v9496_v1  ;;  %v9502_v19 = vld [vmem:[#allocation7 + $0x1f8] sm:$0xff] }
 0x55b   :  { %4132 = vmatprep.subr.mxu1 %v9480_v24  ;;  %4062 = vmatpush1.msra.mxu0 %v9482_v35  ;;  %11148 = vst [vmem:[#allocation52_spill] sm:$0xff] %v9500_v40  ;;  %11149 = vst [vmem:[#allocation53_spill] sm:$0xff] %v9502_v19 }
 0x55c   :  { %4133 = vmatpush1.msra.mxu1 %v9486_v61  ;;  %4063 = vmatprep.subr.mxu0 %v9488_v17  ;;  %v11150_v61 = vld [vmem:[#allocation13_spill] sm:$0xff]  ;;  %v1536_v17 = vadd.f32 %v11151_v22, %v8650_v31 }
 0x55d   :  { %4134 = vmatprep.subr.mxu1 %v9490_v42  ;;  %4064 = vmatpush1.msra.mxu0 %v9494_v52  ;;  %v1534_v35 = vadd.f32 %v11150_v61, %v11072_v8  ;;  %v1647_v61 = vadd.f32 %v11153_v5, %v8664_v27 }
 0x55e   :  { %4135 = vmatpush1.msra.mxu1 %v9496_v1  ;;  %4273 = vmatprep.subr.mxu0 %v9500_v40 }
 0x55f   :  { %4344 = vmatprep.subr.mxu1 %v9502_v19  ;;  %v11152_v19 = vld [vmem:[#allocation16_spill] sm:$0xff] }
 0x560   :  { %v1649_v41 = vadd.f32 %v11152_v19, %v8658_v38 }
 0x5ae   :  { %v3469_v24 = vpop.permute.xlu1 %3468 }
 0x5af   :  { %3472 = vst.msk [vmem:[#allocation9 + $0x28] sm:$0xff] %vm2491_vm2, %v3469_v24 }
 0x5db   :  { %v3610_v2 = vpop.f32.mrf.mxu0  ;;  %v3681_v1 = vpop.f32.mrf.mxu1 }
 0x5dc   :  { %v3686_v53 = vadd.f32 %v3610_v2, %v1534_v35  ;;  %v3688_v8 = vadd.f32 %v3681_v1, %v1647_v61  ;;  %v11155_v1 = vld [vmem:[#allocation106_spill] sm:$0xff] }
 0x5dd   :  { %v3612_v42 = vpop.f32.mrf.mxu0  ;;  %v3683_v40 = vpop.f32.mrf.mxu1 }
 0x5de   :  { %v6213_v29 = vmul.f32 -1.442695, %v3686_v53  ;;  %v3687_v52 = vadd.f32 %v3612_v42, %v1536_v17  ;;  %v3689_v24 = vadd.f32 %v3683_v40, %v1649_v41 }
 0x5e0   :  { %6494 = vpow2.f32 %v6213_v29  ;;  %v6214_v57 = vmul.f32 -1.442695, %v3687_v52  ;;  %v6215_v48 = vmul.f32 -1.442695, %v3689_v24  ;;  %v11154_v52 = vld [vmem:[#allocation104_spill] sm:$0xff] }
 0x5e2   :  { %6496 = vpow2.f32 %v6214_v57 }
 0x5e3   :  { %6498 = vtanh.f32 %v3688_v8 }
 0x5e4   :  { %6500 = vpow2.f32 %v6215_v48 }
 0x5ed   :  { %v6495_v50 = vpop.eup %6494 }
 0x5ee   :  { %v3693_v22 = vadd.f32 1.0, %v6495_v50 }
 0x5ef   :  { %v6497_v35 = vpop.eup %6496 }
 0x5f0   :  { %6502 = vrcp.f32 %v3693_v22  ;;  %v3699_v29 = vadd.f32 1.0, %v6497_v35  ;;  %v6499_v53 = vpop.eup %6498 }
 0x5f1   :  { %v6501_v57 = vpop.eup %6500 }
 0x5f2   :  { %6504 = vrcp.f32 %v3699_v29  ;;  %v3706_v8 = vadd.f32 1.0, %v6501_v57  ;;  %v11156_v29 = vld [vmem:[#allocation107_spill] sm:$0xff] }
 0x5fc   :  { %v3851_v42 = vpop.f32.mrf.mxu0 }
 0x5fd   :  { %v6503_v17 = vpop.eup %6502  ;;  %v3927_v19 = vadd.f32 %v3851_v42, %v11154_v52  ;;  %v3922_v48 = vpop.f32.mrf.mxu1  ;;  %v11157_v42 = vld [vmem:[#allocation105_spill] sm:$0xff] }
 0x5fe   :  { %v3710_v41 = vmul.f32 %v6503_v17, %v6499_v53  ;;  %v3853_v40 = vpop.f32.mrf.mxu0  ;;  %v3929_v17 = vadd.f32 %v3922_v48, %v11157_v42  ;;  %v9536_v48 = vld [vmem:[#allocation7 + $0x1c0] sm:$0xff]  ;;  %v9550_v42 = vld [vmem:[#allocation7 + $0x1b0] sm:$0xff] }
 0x5ff   :  { %v6505_v2 = vpop.eup %6504  ;;  %v6216_v5 = vmul.f32 -1.442695, %v3927_v19  ;;  %v3928_v24 = vadd.f32 %v3853_v40, %v11155_v1  ;;  %v3924_v35 = vpop.f32.mrf.mxu1  ;;  %v9527_v1 = vld [vmem:[#allocation7 + $0x1e0] sm:$0xff]  ;;  %11159 = vst [vmem:[#allocation55_spill] sm:$0xff] %v9536_v48  ;;  %11164 = vst [vmem:[#allocation20_spill] sm:$0xff] %v9550_v42 }
 0x600   :  { %v3709_v50 = vmul.f32 %v6505_v2, %v9235_v59  ;;  %v3930_v53 = vadd.f32 %v3924_v35, %v11156_v29  ;;  %v9542_v35 = vld [vmem:[#allocation7 + $0x1a8] sm:$0xff]  ;;  %v9544_v29 = vld [vmem:[#allocation7 + $0x1b8] sm:$0xff] }
 0x601   :  { %6506 = vpow2.f32 %v6216_v5  ;;  %v6217_v61 = vmul.f32 -1.442695, %v3928_v24  ;;  %v9529_v24 = vld [vmem:[#allocation7 + $0x1f0] sm:$0xff]  ;;  %11161 = vst [vmem:[#allocation57_spill] sm:$0xff] %v9542_v35  ;;  %11162 = vst [vmem:[#allocation17_spill] sm:$0xff] %v9544_v29 }
 0x602   :  { %v9522_v22 = vadd.f32 %v3710_v41, %v3709_v50  ;;  %v6218_v52 = vmul.f32 -1.442695, %v3930_v53  ;;  %v9531_v50 = vld [vmem:[#allocation7 + $0x1c8] sm:$0xff]  ;;  %v9548_v53 = vld [vmem:[#allocation7 + $0x1a0] sm:$0xff] }
 0x603   :  { %6508 = vpow2.f32 %v6217_v61  ;;  %v9538_v61 = vld [vmem:[#allocation7 + $0x1d0] sm:$0xff]  ;;  %11163 = vst [vmem:[#allocation19_spill] sm:$0xff] %v9548_v53 }
 0x604   :  { %6510 = vrcp.f32 %v3706_v8  ;;  %v9533_v8 = vld [vmem:[#allocation7 + $0x1d8] sm:$0xff]  ;;  %11160 = vst [vmem:[#allocation56_spill] sm:$0xff] %v9538_v61 }
 0x605   :  { %6512 = vtanh.f32 %v9522_v22  ;;  %11158 = vst [vmem:[#allocation54_spill] sm:$0xff] %v9533_v8 }
 0x606   :  { %6514 = vtanh.f32 %v3929_v17  ;;  %v9554_v17 = vld [vmem:[#allocation7 + $0x188] sm:$0xff] }
 0x607   :  { %6516 = vpow2.f32 %v6218_v52  ;;  %11165 = vst [vmem:[#allocation18_spill] sm:$0xff] %v9554_v17  ;;  %v9556_v52 = vld [vmem:[#allocation7 + $0x198] sm:$0xff] }
 0x608   :  { %11166 = vst [vmem:[#allocation108_spill] sm:$0xff] %v9556_v52 }
 0x60e   :  { %v6507_v19 = vpop.eup %6506 }
 0x60f   :  { %v3934_v40 = vadd.f32 1.0, %v6507_v19  ;;  %v9560_v19 = vld [vmem:[#allocation7 + $0x180] sm:$0xff] }
 0x610   :  { %v6509_v59 = vpop.eup %6508  ;;  %11167 = vst [vmem:[#allocation110_spill] sm:$0xff] %v9560_v19 }
 0x611   :  { %v6511_v57 = vpop.eup %6510  ;;  %6518 = vrcp.f32 %v3934_v40  ;;  %v3940_v2 = vadd.f32 1.0, %v6509_v59  ;;  %v9562_v40 = vld [vmem:[#allocation7 + $0x190] sm:$0xff]  ;;  %v9566_v59 = vld [vmem:[#allocation7 + $0x168] sm:$0xff] }
 0x612   :  { %v6513_v41 = vpop.eup %6512  ;;  %11168 = vst [vmem:[#allocation111_spill] sm:$0xff] %v9562_v40  ;;  %11169 = vst [vmem:[#allocation109_spill] sm:$0xff] %v9566_v59 }
 0x613   :  { %6520 = vrcp.f32 %v3940_v2  ;;  %v3713_v5 = vmul.f32 %v6513_v41, %v6511_v57  ;;  %v9568_v57 = vld [vmem:[#allocation7 + $0x178] sm:$0xff]  ;;  %v9572_v2 = vld [vmem:[#allocation7 + $0x160] sm:$0xff]  ;;  %v9574_v41 = vld [vmem:[#allocation7 + $0x170] sm:$0xff] }
 0x614   :  { %11170 = vst [vmem:[#allocation58_spill] sm:$0xff] %v9568_v57  ;;  %11171 = vst [vmem:[#allocation59_spill] sm:$0xff] %v9572_v2 }
 0x615   :  { %4098 = vmatmul.mubr.f32.vlgmr.msra.gmra.mxu0 %v3713_v5  ;;  %3956 = vst.msk [vmem:[#allocation9 + $0x18] sm:$0xff] %vm1424_vm1, %v3713_v5  ;;  %4169 = vmatmul.mubr.f32.vlgmr.msra.gmra.mxu1 %v3713_v5  ;;  %11172 = vst [vmem:[#allocation60_spill] sm:$0xff] %v9574_v41  ;;  %v6515_v5 = vpop.eup %6514 }
 0x616   :  { %4274 = vmatpush1.msra.mxu0 %v9527_v1  ;;  %4345 = vmatpush1.msra.mxu1 %v9529_v24 }
 0x617   :  { %4275 = vmatprep.subr.mxu0 %v9531_v50  ;;  %4346 = vmatprep.subr.mxu1 %v9533_v8 }
 0x618   :  { %4276 = vmatpush1.msra.mxu0 %v9536_v48  ;;  %4347 = vmatpush1.msra.mxu1 %v9538_v61 }
 0x619   :  { %4277 = vmatprep.subr.mxu0 %v9542_v35  ;;  %4348 = vmatprep.subr.mxu1 %v9544_v29  ;;  %v6517_v29 = vpop.eup %6516 }
 0x61a   :  { %4278 = vmatpush1.msra.mxu0 %v9548_v53  ;;  %4349 = vmatpush1.msra.mxu1 %v9550_v42  ;;  %v9578_v53 = vld [vmem:[#allocation7 + $0x148] sm:$0xff]  ;;  %v9580_v42 = vld [vmem:[#allocation7 + $0x158] sm:$0xff]  ;;  %v3947_v8 = vadd.f32 1.0, %v6517_v29 }
 0x61b   :  { %4279 = vmatprep.subr.mxu0 %v9554_v17  ;;  %4350 = vmatprep.subr.mxu1 %v9556_v52  ;;  %11173 = vst [vmem:[#allocation61_spill] sm:$0xff] %v9580_v42  ;;  %v9584_v17 = vld [vmem:[#allocation7 + $0x140] sm:$0xff]  ;;  %v9586_v52 = vld [vmem:[#allocation7 + $0x150] sm:$0xff]  ;;  %v9615_v29 = vld [vmem:[#allocation7 + $0xe8] sm:$0xff] }
 0x61c   :  { %4280 = vmatpush1.msra.mxu0 %v9560_v19  ;;  %4351 = vmatpush1.msra.mxu1 %v9562_v40  ;;  %11174 = vst [vmem:[#allocation62_spill] sm:$0xff] %v9586_v52  ;;  %v9590_v19 = vld [vmem:[#allocation7 + $0x128] sm:$0xff]  ;;  %v9592_v40 = vld [vmem:[#allocation7 + $0x138] sm:$0xff]  ;;  %11181 = vst [vmem:[#allocation69_spill] sm:$0xff] %v9615_v29  ;;  %6522 = vrcp.f32 %v3947_v8 }
 0x61d   :  { %4281 = vmatprep.subr.mxu0 %v9566_v59  ;;  %4352 = vmatprep.subr.mxu1 %v9568_v57  ;;  %11175 = vst [vmem:[#allocation63_spill] sm:$0xff] %v9592_v40  ;;  %v9596_v59 = vld [vmem:[#allocation7 + $0x120] sm:$0xff]  ;;  %v9598_v57 = vld [vmem:[#allocation7 + $0x130] sm:$0xff]  ;;  %v9642_v8 = vld [vmem:[#allocation7 + $0xa8] sm:$0xff] }
 0x61e   :  { %v6519_v35 = vpop.eup %6518  ;;  %4282 = vmatpush1.msra.mxu0 %v9572_v2  ;;  %4353 = vmatpush1.msra.mxu1 %v9574_v41  ;;  %11176 = vst [vmem:[#allocation64_spill] sm:$0xff] %v9596_v59  ;;  %11177 = vst [vmem:[#allocation65_spill] sm:$0xff] %v9598_v57  ;;  %v9602_v41 = vld [vmem:[#allocation7 + $0x108] sm:$0xff]  ;;  %v9604_v2 = vld [vmem:[#allocation7 + $0x118] sm:$0xff] }
 0x61f   :  { %v3951_v61 = vmul.f32 %v6519_v35, %v6515_v5  ;;  %4283 = vmatprep.subr.mxu0 %v9578_v53  ;;  %4354 = vmatprep.subr.mxu1 %v9580_v42  ;;  %11178 = vst [vmem:[#allocation66_spill] sm:$0xff] %v9602_v41  ;;  %11179 = vst [vmem:[#allocation67_spill] sm:$0xff] %v9604_v2  ;;  %v9609_v5 = vld [vmem:[#allocation7 + $0x100] sm:$0xff]  ;;  %v9611_v42 = vld [vmem:[#allocation7 + $0x110] sm:$0xff] }
 0x620   :  { %v6521_v48 = vpop.eup %6520  ;;  %4284 = vmatpush1.msra.mxu0 %v9584_v17  ;;  %4355 = vmatpush1.msra.mxu1 %v9586_v52  ;;  %11180 = vst [vmem:[#allocation68_spill] sm:$0xff] %v9611_v42  ;;  %v9617_v52 = vld [vmem:[#allocation7 + $0xf8] sm:$0xff]  ;;  %11189 = vst [vmem:[#allocation77_spill] sm:$0xff] %v9642_v8 }
 0x621   :  { %v3950_v35 = vmul.f32 %v6521_v48, %v9270_v23  ;;  %4285 = vmatprep.subr.mxu0 %v9590_v19  ;;  %4356 = vmatprep.subr.mxu1 %v9592_v40  ;;  %11182 = vst [vmem:[#allocation70_spill] sm:$0xff] %v9617_v52  ;;  %v9621_v23 = vld [vmem:[#allocation7 + $0xe0] sm:$0xff]  ;;  %v9623_v48 = vld [vmem:[#allocation7 + $0xf0] sm:$0xff] }
 0x622   :  { %4286 = vmatpush1.msra.mxu0 %v9596_v59  ;;  %4357 = vmatpush1.msra.mxu1 %v9598_v57  ;;  %11183 = vst [vmem:[#allocation71_spill] sm:$0xff] %v9621_v23  ;;  %11184 = vst [vmem:[#allocation72_spill] sm:$0xff] %v9623_v48  ;;  %v9629_v57 = vld [vmem:[#allocation7 + $0xc8] sm:$0xff]  ;;  %v9631_v59 = vld [vmem:[#allocation7 + $0xd8] sm:$0xff] }
 0x623   :  { %4287 = vmatprep.subr.mxu0 %v9602_v41  ;;  %4358 = vmatprep.subr.mxu1 %v9604_v2  ;;  %v9625_v40 = vadd.f32 %v3951_v61, %v3950_v35  ;;  %11185 = vst [vmem:[#allocation73_spill] sm:$0xff] %v9629_v57  ;;  %11186 = vst [vmem:[#allocation74_spill] sm:$0xff] %v9631_v59  ;;  %v9635_v2 = vld [vmem:[#allocation7 + $0xc0] sm:$0xff]  ;;  %v9637_v41 = vld [vmem:[#allocation7 + $0xd0] sm:$0xff] }
 0x624   :  { %4288 = vmatpush1.msra.mxu0 %v9609_v5  ;;  %4359 = vmatpush1.msra.mxu1 %v9611_v42  ;;  %11187 = vst [vmem:[#allocation75_spill] sm:$0xff] %v9635_v2  ;;  %11188 = vst [vmem:[#allocation76_spill] sm:$0xff] %v9637_v41  ;;  %v9644_v61 = vld [vmem:[#allocation7 + $0xb8] sm:$0xff]  ;;  %v9648_v35 = vld [vmem:[#allocation7 + $0xa0] sm:$0xff] }
 0x625   :  { %4289 = vmatprep.subr.mxu0 %v9615_v29  ;;  %4360 = vmatprep.subr.mxu1 %v9617_v52  ;;  %6524 = vtanh.f32 %v9625_v40  ;;  %11190 = vst [vmem:[#allocation113_spill] sm:$0xff] %v9644_v61  ;;  %11191 = vst [vmem:[#allocation114_spill] sm:$0xff] %v9648_v35  ;;  %v9650_v52 = vld [vmem:[#allocation7 + $0xb0] sm:$0xff]  ;;  %v9654_v29 = vld [vmem:[#allocation7 + $0x88] sm:$0xff] }
 0x626   :  { %4290 = vmatpush1.msra.mxu0 %v9621_v23  ;;  %4361 = vmatpush1.msra.mxu1 %v9623_v48  ;;  %11192 = vst [vmem:[#allocation115_spill] sm:$0xff] %v9650_v52  ;;  %11193 = vst [vmem:[#allocation116_spill] sm:$0xff] %v9654_v29  ;;  %v9656_v23 = vld [vmem:[#allocation7 + $0x98] sm:$0xff]  ;;  %v9660_v48 = vld [vmem:[#allocation7 + $0x80] sm:$0xff] }
 0x627   :  { %4291 = vmatprep.subr.mxu0 %v9629_v57  ;;  %4362 = vmatprep.subr.mxu1 %v9631_v59  ;;  %11194 = vst [vmem:[#allocation117_spill] sm:$0xff] %v9656_v23  ;;  %11195 = vst [vmem:[#allocation118_spill] sm:$0xff] %v9660_v48  ;;  %v9662_v57 = vld [vmem:[#allocation7 + $0x90] sm:$0xff]  ;;  %v9666_v59 = vld [vmem:[#allocation7 + $0x68] sm:$0xff] }
 0x628   :  { %4292 = vmatpush1.msra.mxu0 %v9635_v2  ;;  %4363 = vmatpush1.msra.mxu1 %v9637_v41  ;;  %11196 = vst [vmem:[#allocation119_spill] sm:$0xff] %v9662_v57  ;;  %11197 = vst [vmem:[#allocation120_spill] sm:$0xff] %v9666_v59  ;;  %v9668_v2 = vld [vmem:[#allocation7 + $0x78] sm:$0xff]  ;;  %v9672_v41 = vld [vmem:[#allocation7 + $0x60] sm:$0xff] }
 0x629   :  { %4293 = vmatprep.subr.mxu0 %v9642_v8  ;;  %4364 = vmatprep.subr.mxu1 %v9644_v61  ;;  %11198 = vst [vmem:[#allocation121_spill] sm:$0xff] %v9668_v2  ;;  %11199 = vst [vmem:[#allocation122_spill] sm:$0xff] %v9672_v41  ;;  %v9674_v8 = vld [vmem:[#allocation7 + $0x70] sm:$0xff]  ;;  %v9678_v61 = vld [vmem:[#allocation7 + $0x48] sm:$0xff] }
 0x62a   :  { %4294 = vmatpush1.msra.mxu0 %v9648_v35  ;;  %4365 = vmatpush1.msra.mxu1 %v9650_v52  ;;  %11200 = vst [vmem:[#allocation123_spill] sm:$0xff] %v9674_v8  ;;  %11201 = vst [vmem:[#allocation124_spill] sm:$0xff] %v9678_v61  ;;  %v9680_v35 = vld [vmem:[#allocation7 + $0x58] sm:$0xff]  ;;  %v9684_v52 = vld [vmem:[#allocation7 + $0x40] sm:$0xff] }
 0x62b   :  { %4295 = vmatprep.subr.mxu0 %v9654_v29  ;;  %4366 = vmatprep.subr.mxu1 %v9656_v23  ;;  %11202 = vst [vmem:[#allocation125_spill] sm:$0xff] %v9680_v35  ;;  %v9686_v29 = vld [vmem:[#allocation7 + $0x50] sm:$0xff]  ;;  %v9690_v23 = vld [vmem:[#allocation7 + $0x28] sm:$0xff] }
 0x62c   :  { %4296 = vmatpush1.msra.mxu0 %v9660_v48  ;;  %4367 = vmatpush1.msra.mxu1 %v9662_v57  ;;  %11203 = vst [vmem:[#allocation126_spill] sm:$0xff] %v9686_v29  ;;  %v9692_v48 = vld [vmem:[#allocation7 + $0x38] sm:$0xff]  ;;  %v9696_v57 = vld [vmem:[#allocation7 + $0x20] sm:$0xff]  ;;  %v9712_v42 = vld [vmem:[#allocation7 + $0x10] sm:$0xff] }
 0x62d   :  { %4297 = vmatprep.subr.mxu0 %v9666_v59  ;;  %4368 = vmatprep.subr.mxu1 %v9668_v2  ;;  %v9698_v59 = vld [vmem:[#allocation7 + $0x30] sm:$0xff]  ;;  %v9702_v2 = vld [vmem:[#allocation7 + $0x8] sm:$0xff] }
 0x62e   :  { %4298 = vmatpush1.msra.mxu0 %v9672_v41  ;;  %4369 = vmatpush1.msra.mxu1 %v9674_v8  ;;  %v9704_v41 = vld [vmem:[#allocation7 + $0x18] sm:$0xff]  ;;  %v6523_v8 = vpop.eup %6522 }
 0x62f   :  { %4299 = vmatprep.subr.mxu0 %v9678_v61  ;;  %4370 = vmatprep.subr.mxu1 %v9680_v35  ;;  %v9708_v61 = vld [vmem:[#allocation7] sm:$0xff] }
 0x630   :  { %4300 = vmatpush1.msra.mxu0 %v9684_v52  ;;  %4371 = vmatpush1.msra.mxu1 %v9686_v29 }
 0x631   :  { %4301 = vmatprep.subr.mxu0 %v9690_v23  ;;  %4372 = vmatprep.subr.mxu1 %v9692_v48 }
 0x632   :  { %v6525_v35 = vpop.eup %6524  ;;  %4302 = vmatpush1.msra.mxu0 %v9696_v57  ;;  %4373 = vmatpush1.msra.mxu1 %v9698_v59 }
 0x633   :  { %4303 = vmatprep.subr.mxu0 %v9702_v2  ;;  %4374 = vmatprep.subr.mxu1 %v9704_v41  ;;  %v3954_v29 = vmul.f32 %v6525_v35, %v6523_v8  ;;  %v11234_v35 = vld [vmem:[#allocation24_spill] sm:$0xff] }
 0x634   :  { %4304 = vmatpush1.msra.mxu0 %v9708_v61  ;;  %4337 = vmatprep.mubr.f32.mxu0 %v10797_v20 }
 0x635   :  { %4375 = vmatpush1.msra.mxu1 %v9712_v42  ;;  %4408 = vmatprep.mubr.f32.mxu1 %v10797_v20 }
 0x636   :  { %3958 = vrot.lane.b32.xlu0 %v3954_v29, %s6722_s9  ;;  %4338 = vmatmul.mubr.f32.vlgmr.msra.gmra.mxu0 %v3954_v29 }
 0x637   :  { %4409 = vmatmul.mubr.f32.vlgmr.msra.gmra.mxu1 %v3954_v29  ;;  %4519 = vmatprep.subr.mxu0 %v9312_v36  ;;  %v11204_v36 = vld [vmem:[#allocation27_spill] sm:$0xff] }
 0x638   :  { %4590 = vmatprep.subr.mxu1 %v9314_v3  ;;  %4520 = vmatpush1.msra.mxu0 %v9316_v60  ;;  %v11205_v3 = vld [vmem:[#allocation28_spill] sm:$0xff]  ;;  %v11206_v60 = vld [vmem:[#allocation29_spill] sm:$0xff] }
 0x639   :  { %4591 = vmatpush1.msra.mxu1 %v9320_v54  ;;  %4521 = vmatprep.subr.mxu0 %v9322_v44  ;;  %v11207_v54 = vld [vmem:[#allocation30_spill] sm:$0xff]  ;;  %v11208_v44 = vld [vmem:[#allocation31_spill] sm:$0xff] }
 0x63a   :  { %4592 = vmatprep.subr.mxu1 %v9324_v46  ;;  %4522 = vmatpush1.msra.mxu0 %v9328_v39  ;;  %v11209_v46 = vld [vmem:[#allocation32_spill] sm:$0xff]  ;;  %v11210_v39 = vld [vmem:[#allocation33_spill] sm:$0xff] }
 0x63b   :  { %4593 = vmatpush1.msra.mxu1 %v9330_v7  ;;  %4523 = vmatprep.subr.mxu0 %v9332_v16  ;;  %v11211_v7 = vld [vmem:[#allocation34_spill] sm:$0xff]  ;;  %v11212_v16 = vld [vmem:[#allocation35_spill] sm:$0xff] }
 0x63c   :  { %4594 = vmatprep.subr.mxu1 %v9336_v58  ;;  %4524 = vmatpush1.msra.mxu0 %v9338_v56  ;;  %v11213_v58 = vld [vmem:[#allocation36_spill] sm:$0xff]  ;;  %v11214_v56 = vld [vmem:[#allocation37_spill] sm:$0xff] }
 0x63d   :  { %4595 = vmatpush1.msra.mxu1 %v9340_v26  ;;  %4525 = vmatprep.subr.mxu0 %v9344_v28  ;;  %v11215_v26 = vld [vmem:[#allocation38_spill] sm:$0xff]  ;;  %v11216_v28 = vld [vmem:[#allocation39_spill] sm:$0xff] }
 0x63e   :  { %4596 = vmatprep.subr.mxu1 %v9346_v34  ;;  %4526 = vmatpush1.msra.mxu0 %v9354_v32  ;;  %v11217_v34 = vld [vmem:[#allocation40_spill] sm:$0xff]  ;;  %v11218_v32 = vld [vmem:[#allocation41_spill] sm:$0xff] }
 0x63f   :  { %4597 = vmatpush1.msra.mxu1 %v9356_v11  ;;  %4527 = vmatprep.subr.mxu0 %v9360_v6  ;;  %v11219_v11 = vld [vmem:[#allocation42_spill] sm:$0xff]  ;;  %v11220_v6 = vld [vmem:[#allocation43_spill] sm:$0xff] }
 0x640   :  { %4598 = vmatprep.subr.mxu1 %v9362_v12  ;;  %4528 = vmatpush1.msra.mxu0 %v9366_v0  ;;  %v11221_v12 = vld [vmem:[#allocation44_spill] sm:$0xff]  ;;  %v11222_v0 = vld [vmem:[#allocation45_spill] sm:$0xff] }
 0x641   :  { %4599 = vmatpush1.msra.mxu1 %v9368_v55  ;;  %4529 = vmatprep.subr.mxu0 %v9372_v47  ;;  %v11223_v55 = vld [vmem:[#allocation46_spill] sm:$0xff]  ;;  %v11224_v47 = vld [vmem:[#allocation47_spill] sm:$0xff] }
 0x642   :  { %4600 = vmatprep.subr.mxu1 %v9374_v37  ;;  %4530 = vmatpush1.msra.mxu0 %v9378_v15  ;;  %v11225_v37 = vld [vmem:[#allocation48_spill] sm:$0xff]  ;;  %v11226_v15 = vld [vmem:[#allocation49_spill] sm:$0xff] }
 0x643   :  { %4601 = vmatpush1.msra.mxu1 %v9380_v33  ;;  %4531 = vmatprep.subr.mxu0 %v9384_v62  ;;  %v11227_v33 = vld [vmem:[#allocation50_spill] sm:$0xff]  ;;  %v11228_v62 = vld [vmem:[#allocation51_spill] sm:$0xff] }
 0x644   :  { %4602 = vmatprep.subr.mxu1 %v9386_v21  ;;  %4532 = vmatpush1.msra.mxu0 %v9390_v45  ;;  %v11229_v21 = vld [vmem:[#allocation52_spill] sm:$0xff]  ;;  %v11230_v45 = vld [vmem:[#allocation53_spill] sm:$0xff] }
 0x645   :  { %4603 = vmatpush1.msra.mxu1 %v9392_v18  ;;  %4533 = vmatprep.subr.mxu0 %v9396_v30  ;;  %v11231_v30 = vld [vmem:[#allocation112_spill] sm:$0xff] }
 0x646   :  { %4604 = vmatprep.subr.mxu1 %v9398_v49  ;;  %4534 = vmatpush1.msra.mxu0 %v9402_v25  ;;  %v11232_v49 = vld [vmem:[#allocation21_spill] sm:$0xff] }
 0x647   :  { %4605 = vmatpush1.msra.mxu1 %v9404_v10  ;;  %4535 = vmatprep.subr.mxu0 %v9408_v43  ;;  %v1540_v25 = vadd.f32 %v11232_v49, %v11231_v30  ;;  %v11233_v43 = vld [vmem:[#allocation23_spill] sm:$0xff] }
 0x648   :  { %4606 = vmatprep.subr.mxu1 %v9410_v63  ;;  %4536 = vmatpush1.msra.mxu0 %v9414_v4  ;;  %v1542_v63 = vadd.f32 %v11233_v43, %v8650_v31  ;;  %v11238_v49 = vld [vmem:[#allocation103_spill] sm:$0xff] }
 0x649   :  { %4607 = vmatpush1.msra.mxu1 %v9416_v14  ;;  %4537 = vmatprep.subr.mxu0 %v9420_v51 }
 0x64a   :  { %4608 = vmatprep.subr.mxu1 %v9422_v13  ;;  %4538 = vmatpush1.msra.mxu0 %v9426_v9 }
 0x64b   :  { %4609 = vmatpush1.msra.mxu1 %v11204_v36  ;;  %4539 = vmatprep.subr.mxu0 %v11205_v3  ;;  %v1655_v36 = vadd.f32 %v11234_v35, %v8658_v38  ;;  %v11241_v35 = vld [vmem:[#allocation55_spill] sm:$0xff] }
 0x64c   :  { %4610 = vmatprep.subr.mxu1 %v11206_v60  ;;  %4540 = vmatpush1.msra.mxu0 %v11207_v54  ;;  %v11235_v60 = vld [vmem:[#allocation22_spill] sm:$0xff] }
 0x64d   :  { %4611 = vmatpush1.msra.mxu1 %v11208_v44  ;;  %4541 = vmatprep.subr.mxu0 %v11209_v46  ;;  %v1653_v54 = vadd.f32 %v11235_v60, %v8664_v27  ;;  %v11244_v60 = vld [vmem:[#allocation17_spill] sm:$0xff] }
 0x64e   :  { %4612 = vmatprep.subr.mxu1 %v11210_v39  ;;  %4542 = vmatpush1.msra.mxu0 %v11211_v7 }
 0x64f   :  { %4613 = vmatpush1.msra.mxu1 %v11212_v16  ;;  %4543 = vmatprep.subr.mxu0 %v11213_v58 }
 0x650   :  { %4614 = vmatprep.subr.mxu1 %v11214_v56  ;;  %4544 = vmatpush1.msra.mxu0 %v11215_v26 }
 0x651   :  { %4615 = vmatpush1.msra.mxu1 %v11216_v28  ;;  %4545 = vmatprep.subr.mxu0 %v11217_v34 }
 0x652   :  { %4616 = vmatprep.subr.mxu1 %v11218_v32  ;;  %4546 = vmatpush1.msra.mxu0 %v11219_v11  ;;  %v11236_v32 = vld [vmem:[#allocation100_spill] sm:$0xff] }
 0x653   :  { %4617 = vmatpush1.msra.mxu1 %v11220_v6  ;;  %4547 = vmatprep.subr.mxu0 %v11221_v12 }
 0x654   :  { %4618 = vmatprep.subr.mxu1 %v11222_v0  ;;  %4548 = vmatpush1.msra.mxu0 %v11223_v55 }
 0x655   :  { %4619 = vmatpush1.msra.mxu1 %v11224_v47  ;;  %4549 = vmatprep.subr.mxu0 %v11225_v37  ;;  %v11237_v47 = vld [vmem:[#allocation102_spill] sm:$0xff] }
 0x656   :  { %4620 = vmatprep.subr.mxu1 %v11226_v15  ;;  %4550 = vmatpush1.msra.mxu0 %v11227_v33 }
 0x657   :  { %4621 = vmatpush1.msra.mxu1 %v11228_v62  ;;  %4583 = vmatprep.mubr.f32.mxu0 %v10797_v20 }
 0x658   :  { %4654 = vmatprep.mubr.f32.mxu1 %v10797_v20  ;;  %4759 = vmatprep.subr.mxu0 %v11229_v21 }
 0x659   :  { %4830 = vmatprep.subr.mxu1 %v11230_v45 }
 0x6a8   :  { %v3959_v18 = vpop.permute.xlu0 %3958 }
 0x6a9   :  { %3962 = vst.msk [vmem:[#allocation9 + $0x20] sm:$0xff] %vm2491_vm2, %v3959_v18 }
 0x6d5   :  { %v4099_v10 = vpop.f32.mrf.mxu0  ;;  %v4170_v9 = vpop.f32.mrf.mxu1 }
 0x6d6   :  { %v4175_v4 = vadd.f32 %v4099_v10, %v1540_v25  ;;  %v4177_v44 = vadd.f32 %v4170_v9, %v1653_v54  ;;  %v11239_v10 = vld [vmem:[#allocation101_spill] sm:$0xff]  ;;  %v11245_v54 = vld [vmem:[#allocation19_spill] sm:$0xff] }
 0x6d7   :  { %v4101_v14 = vpop.f32.mrf.mxu0  ;;  %v4172_v8 = vpop.f32.mrf.mxu1 }
 0x6d8   :  { %v6219_v51 = vmul.f32 -1.442695, %v4175_v4  ;;  %v4176_v13 = vadd.f32 %v4101_v14, %v1542_v63  ;;  %v4178_v3 = vadd.f32 %v4172_v8, %v1655_v36  ;;  %v11240_v8 = vld [vmem:[#allocation54_spill] sm:$0xff]  ;;  %v11242_v36 = vld [vmem:[#allocation56_spill] sm:$0xff] }
 0x6da   :  { %6526 = vpow2.f32 %v6219_v51  ;;  %v6220_v29 = vmul.f32 -1.442695, %v4176_v13  ;;  %v6221_v46 = vmul.f32 -1.442695, %v4178_v3  ;;  %v11243_v3 = vld [vmem:[#allocation57_spill] sm:$0xff] }
 0x6dc   :  { %6528 = vpow2.f32 %v6220_v29 }
 0x6dd   :  { %6530 = vtanh.f32 %v4177_v44  ;;  %v11246_v44 = vld [vmem:[#allocation20_spill] sm:$0xff] }
 0x6de   :  { %6532 = vpow2.f32 %v6221_v46  ;;  %v11247_v46 = vld [vmem:[#allocation18_spill] sm:$0xff] }
 0x6e7   :  { %v6527_v39 = vpop.eup %6526 }
 0x6e8   :  { %v4182_v7 = vadd.f32 1.0, %v6527_v39  ;;  %v11250_v39 = vld [vmem:[#allocation111_spill] sm:$0xff] }
 0x6e9   :  { %v6529_v16 = vpop.eup %6528 }
 0x6ea   :  { %6534 = vrcp.f32 %v4182_v7  ;;  %v4188_v58 = vadd.f32 1.0, %v6529_v16  ;;  %v6531_v56 = vpop.eup %6530  ;;  %v11251_v16 = vld [vmem:[#allocation109_spill] sm:$0xff] }
 0x6eb   :  { %v6533_v26 = vpop.eup %6532 }
 0x6ec   :  { %6536 = vrcp.f32 %v4188_v58  ;;  %v4195_v33 = vadd.f32 1.0, %v6533_v26  ;;  %v11252_v58 = vld [vmem:[#allocation58_spill] sm:$0xff]  ;;  %v11253_v26 = vld [vmem:[#allocation59_spill] sm:$0xff] }
 0x6f6   :  { %v4339_v28 = vpop.f32.mrf.mxu0 }
 0x6f7   :  { %v6535_v34 = vpop.eup %6534  ;;  %v4415_v11 = vadd.f32 %v4339_v28, %v11236_v32  ;;  %v4410_v62 = vpop.f32.mrf.mxu1  ;;  %v11254_v28 = vld [vmem:[#allocation60_spill] sm:$0xff]  ;;  %v11255_v32 = vld [vmem:[#allocation61_spill] sm:$0xff] }
 0x6f8   :  { %v4199_v6 = vmul.f32 %v6535_v34, %v6531_v56  ;;  %v4341_v12 = vpop.f32.mrf.mxu0  ;;  %v4417_v43 = vadd.f32 %v4410_v62, %v11239_v10  ;;  %v11265_v62 = vld [vmem:[#allocation71_spill] sm:$0xff]  ;;  %v11270_v10 = vld [vmem:[#allocation76_spill] sm:$0xff] }
 0x6f9   :  { %v6537_v0 = vpop.eup %6536  ;;  %v6222_v55 = vmul.f32 -1.442695, %v4415_v11  ;;  %v4416_v37 = vadd.f32 %v4341_v12, %v11237_v47  ;;  %v4412_v18 = vpop.f32.mrf.mxu1  ;;  %v11256_v12 = vld [vmem:[#allocation62_spill] sm:$0xff]  ;;  %v11258_v47 = vld [vmem:[#allocation64_spill] sm:$0xff] }
 0x6fa   :  { %v4198_v15 = vmul.f32 %v6537_v0, %v9522_v22  ;;  %v4418_v25 = vadd.f32 %v4412_v18, %v11238_v49  ;;  %v11267_v18 = vld [vmem:[#allocation73_spill] sm:$0xff]  ;;  %v11268_v49 = vld [vmem:[#allocation74_spill] sm:$0xff] }
 0x6fb   :  { %6538 = vpow2.f32 %v6222_v55  ;;  %v6223_v21 = vmul.f32 -1.442695, %v4416_v37  ;;  %v11257_v55 = vld [vmem:[#allocation63_spill] sm:$0xff]  ;;  %v11259_v37 = vld [vmem:[#allocation65_spill] sm:$0xff] }
 0x6fc   :  { %v9801_v45 = vadd.f32 %v4199_v6, %v4198_v15  ;;  %v6224_v63 = vmul.f32 -1.442695, %v4418_v25  ;;  %v11260_v15 = vld [vmem:[#allocation66_spill] sm:$0xff]  ;;  %v11269_v25 = vld [vmem:[#allocation75_spill] sm:$0xff] }
 0x6fd   :  { %6540 = vpow2.f32 %v6223_v21  ;;  %v11266_v21 = vld [vmem:[#allocation72_spill] sm:$0xff] }
 0x6fe   :  { %6542 = vrcp.f32 %v4195_v33 }
 0x6ff   :  { %6544 = vtanh.f32 %v9801_v45 }
 0x700   :  { %6546 = vtanh.f32 %v4417_v43  ;;  %v11272_v43 = vld [vmem:[#allocation113_spill] sm:$0xff] }
 0x701   :  { %6548 = vpow2.f32 %v6224_v63  ;;  %v11273_v63 = vld [vmem:[#allocation114_spill] sm:$0xff] }
 0x708   :  { %v6539_v4 = vpop.eup %6538 }
 0x709   :  { %v4422_v14 = vadd.f32 1.0, %v6539_v4  ;;  %v11274_v4 = vld [vmem:[#allocation115_spill] sm:$0xff] }
 0x70a   :  { %v6541_v22 = vpop.eup %6540 }
 0x70b   :  { %v6543_v51 = vpop.eup %6542  ;;  %6550 = vrcp.f32 %v4422_v14  ;;  %v4428_v13 = vadd.f32 1.0, %v6541_v22  ;;  %v11275_v14 = vld [vmem:[#allocation116_spill] sm:$0xff]  ;;  %v11276_v22 = vld [vmem:[#allocation117_spill] sm:$0xff] }
 0x70c   :  { %v6545_v9 = vpop.eup %6544 }
 0x70d   :  { %6552 = vrcp.f32 %v4428_v13  ;;  %v4202_v29 = vmul.f32 %v6545_v9, %v6543_v51  ;;  %v11277_v51 = vld [vmem:[#allocation118_spill] sm:$0xff]  ;;  %v11278_v13 = vld [vmem:[#allocation119_spill] sm:$0xff]  ;;  %v11279_v9 = vld [vmem:[#allocation120_spill] sm:$0xff] }
 0x70f   :  { %4443 = vst.msk [vmem:[#allocation9 + $0x20] sm:$0xff] %vm1424_vm1, %v4202_v29  ;;  %4584 = vmatmul.mubr.f32.vlgmr.msra.gmra.mxu0 %v4202_v29  ;;  %4655 = vmatmul.mubr.f32.vlgmr.msra.gmra.mxu1 %v4202_v29  ;;  %v11280_v29 = vld [vmem:[#allocation121_spill] sm:$0xff] }
 0x710   :  { %4760 = vmatpush1.msra.mxu0 %v9527_v1  ;;  %4831 = vmatpush1.msra.mxu1 %v9529_v24  ;;  %v11248_v1 = vld [vmem:[#allocation108_spill] sm:$0xff]  ;;  %v6547_v24 = vpop.eup %6546 }
 0x711   :  { %4761 = vmatprep.subr.mxu0 %v9531_v50  ;;  %4832 = vmatprep.subr.mxu1 %v11240_v8  ;;  %v11249_v50 = vld [vmem:[#allocation110_spill] sm:$0xff]  ;;  %v6549_v7 = vpop.eup %6548 }
 0x712   :  { %4762 = vmatpush1.msra.mxu0 %v11241_v35  ;;  %4833 = vmatpush1.msra.mxu1 %v11242_v36  ;;  %v4435_v6 = vadd.f32 1.0, %v6549_v7  ;;  %v11281_v8 = vld [vmem:[#allocation122_spill] sm:$0xff]  ;;  %v11282_v35 = vld [vmem:[#allocation123_spill] sm:$0xff]  ;;  %v11283_v36 = vld [vmem:[#allocation124_spill] sm:$0xff] }
 0x713   :  { %4763 = vmatprep.subr.mxu0 %v11243_v3  ;;  %4834 = vmatprep.subr.mxu1 %v11244_v60  ;;  %v11284_v3 = vld [vmem:[#allocation125_spill] sm:$0xff]  ;;  %v11285_v60 = vld [vmem:[#allocation126_spill] sm:$0xff]  ;;  %v9912_v7 = vld [vmem:[#allocation4 + $0x198] sm:$0xff] }
 0x714   :  { %4764 = vmatpush1.msra.mxu0 %v11245_v54  ;;  %4835 = vmatpush1.msra.mxu1 %v11246_v44  ;;  %6554 = vrcp.f32 %v4435_v6  ;;  %v9944_v6 = vld [vmem:[#allocation4 + $0x140] sm:$0xff] }
 0x715   :  { %4765 = vmatprep.subr.mxu0 %v11247_v46  ;;  %4836 = vmatprep.subr.mxu1 %v11248_v1  ;;  %v9902_v1 = vld [vmem:[#allocation4 + $0x1b8] sm:$0xff] }
 0x716   :  { %4766 = vmatpush1.msra.mxu0 %v11249_v50  ;;  %4837 = vmatpush1.msra.mxu1 %v11250_v39  ;;  %v9906_v50 = vld [vmem:[#allocation4 + $0x1b0] sm:$0xff]  ;;  %v9910_v39 = vld [vmem:[#allocation4 + $0x188] sm:$0xff] }
 0x717   :  { %4767 = vmatprep.subr.mxu0 %v11251_v16  ;;  %4838 = vmatprep.subr.mxu1 %v11252_v58  ;;  %v9920_v16 = vld [vmem:[#allocation4 + $0x180] sm:$0xff]  ;;  %v9922_v58 = vld [vmem:[#allocation4 + $0x190] sm:$0xff] }
 0x718   :  { %v6551_v56 = vpop.eup %6550  ;;  %4768 = vmatpush1.msra.mxu0 %v11253_v26  ;;  %4839 = vmatpush1.msra.mxu1 %v11254_v28  ;;  %v9928_v26 = vld [vmem:[#allocation4 + $0x178] sm:$0xff]  ;;  %v9932_v28 = vld [vmem:[#allocation4 + $0x160] sm:$0xff] }
 0x719   :  { %v4439_v34 = vmul.f32 %v6551_v56, %v6547_v24  ;;  %4769 = vmatprep.subr.mxu0 %v9578_v53  ;;  %4840 = vmatprep.subr.mxu1 %v11255_v32  ;;  %v11261_v53 = vld [vmem:[#allocation67_spill] sm:$0xff]  ;;  %v9904_v24 = vld [vmem:[#allocation4 + $0x1a0] sm:$0xff]  ;;  %v9926_v56 = vld [vmem:[#allocation4 + $0x168] sm:$0xff] }
 0x71a   :  { %v6553_v11 = vpop.eup %6552  ;;  %4770 = vmatpush1.msra.mxu0 %v9584_v17  ;;  %4841 = vmatpush1.msra.mxu1 %v11256_v12  ;;  %v11262_v17 = vld [vmem:[#allocation68_spill] sm:$0xff]  ;;  %v9938_v32 = vld [vmem:[#allocation4 + $0x148] sm:$0xff]  ;;  %v9946_v12 = vld [vmem:[#allocation4 + $0x150] sm:$0xff] }
 0x71b   :  { %v4438_v0 = vmul.f32 %v6553_v11, %v9625_v40  ;;  %4771 = vmatprep.subr.mxu0 %v9590_v19  ;;  %4842 = vmatprep.subr.mxu1 %v11257_v55  ;;  %v11263_v40 = vld [vmem:[#allocation69_spill] sm:$0xff]  ;;  %v11264_v19 = vld [vmem:[#allocation70_spill] sm:$0xff]  ;;  %v9940_v11 = vld [vmem:[#allocation4 + $0x158] sm:$0xff] }
 0x71c   :  { %4772 = vmatpush1.msra.mxu0 %v11258_v47  ;;  %4843 = vmatpush1.msra.mxu1 %v11259_v37  ;;  %v9952_v55 = vld [vmem:[#allocation4 + $0x138] sm:$0xff]  ;;  %v9956_v47 = vld [vmem:[#allocation4 + $0x120] sm:$0xff]  ;;  %v9958_v37 = vld [vmem:[#allocation4 + $0x130] sm:$0xff] }
 0x71d   :  { %4773 = vmatprep.subr.mxu0 %v11260_v15  ;;  %4844 = vmatprep.subr.mxu1 %v11261_v53  ;;  %v9836_v33 = vadd.f32 %v4439_v34, %v4438_v0  ;;  %v9934_v34 = vld [vmem:[#allocation4 + $0x170] sm:$0xff]  ;;  %v9950_v0 = vld [vmem:[#allocation4 + $0x128] sm:$0xff]  ;;  %v9964_v53 = vld [vmem:[#allocation4 + $0x118] sm:$0xff] }
 0x71e   :  { %4774 = vmatpush1.msra.mxu0 %v9609_v5  ;;  %4845 = vmatpush1.msra.mxu1 %v11262_v17  ;;  %v11271_v5 = vld [vmem:[#allocation77_spill] sm:$0xff]  ;;  %v9962_v15 = vld [vmem:[#allocation4 + $0x108] sm:$0xff] }
 0x71f   :  { %4775 = vmatprep.subr.mxu0 %v11263_v40  ;;  %4846 = vmatprep.subr.mxu1 %v11264_v19  ;;  %6556 = vtanh.f32 %v9836_v33  ;;  %v9968_v17 = vld [vmem:[#allocation4 + $0x100] sm:$0xff]  ;;  %v9970_v40 = vld [vmem:[#allocation4 + $0x110] sm:$0xff]  ;;  %v9974_v19 = vld [vmem:[#allocation4 + $0xe8] sm:$0xff] }
 0x720   :  { %4776 = vmatpush1.msra.mxu0 %v11265_v62  ;;  %4847 = vmatpush1.msra.mxu1 %v11266_v21  ;;  %v9976_v62 = vld [vmem:[#allocation4 + $0xf8] sm:$0xff]  ;;  %v9980_v21 = vld [vmem:[#allocation4 + $0xe0] sm:$0xff] }
 0x721   :  { %4777 = vmatprep.subr.mxu0 %v11267_v18  ;;  %4848 = vmatprep.subr.mxu1 %v11268_v49  ;;  %v6555_v54 = vpop.eup %6554  ;;  %v9982_v18 = vld [vmem:[#allocation4 + $0xf0] sm:$0xff]  ;;  %v9986_v49 = vld [vmem:[#allocation4 + $0xc8] sm:$0xff] }
 0x722   :  { %4778 = vmatpush1.msra.mxu0 %v11269_v25  ;;  %4849 = vmatpush1.msra.mxu1 %v11270_v10  ;;  %v9988_v25 = vld [vmem:[#allocation4 + $0xd8] sm:$0xff]  ;;  %v9992_v10 = vld [vmem:[#allocation4 + $0xc0] sm:$0xff] }
 0x723   :  { %4779 = vmatprep.subr.mxu0 %v11271_v5  ;;  %4850 = vmatprep.subr.mxu1 %v11272_v43  ;;  %v9994_v5 = vld [vmem:[#allocation4 + $0xd0] sm:$0xff]  ;;  %v9998_v43 = vld [vmem:[#allocation4 + $0xa8] sm:$0xff] }
 0x724   :  { %4780 = vmatpush1.msra.mxu0 %v11273_v63  ;;  %4851 = vmatpush1.msra.mxu1 %v11274_v4  ;;  %11286 = vst [vmem:[#allocation127_spill] sm:$0xff] %v9994_v5  ;;  %11287 = vst [vmem:[#allocation128_spill] sm:$0xff] %v9998_v43  ;;  %v10000_v63 = vld [vmem:[#allocation4 + $0xb8] sm:$0xff]  ;;  %v10004_v4 = vld [vmem:[#allocation4 + $0xa0] sm:$0xff] }
 0x725   :  { %4781 = vmatprep.subr.mxu0 %v11275_v14  ;;  %4852 = vmatprep.subr.mxu1 %v11276_v22  ;;  %11288 = vst [vmem:[#allocation129_spill] sm:$0xff] %v10000_v63  ;;  %11289 = vst [vmem:[#allocation130_spill] sm:$0xff] %v10004_v4  ;;  %v10006_v14 = vld [vmem:[#allocation4 + $0xb0] sm:$0xff]  ;;  %v10010_v22 = vld [vmem:[#allocation4 + $0x88] sm:$0xff] }
 0x726   :  { %4782 = vmatpush1.msra.mxu0 %v11277_v51  ;;  %4853 = vmatpush1.msra.mxu1 %v11278_v13  ;;  %11290 = vst [vmem:[#allocation131_spill] sm:$0xff] %v10006_v14  ;;  %11291 = vst [vmem:[#allocation132_spill] sm:$0xff] %v10010_v22  ;;  %v10012_v51 = vld [vmem:[#allocation4 + $0x98] sm:$0xff]  ;;  %v10016_v13 = vld [vmem:[#allocation4 + $0x80] sm:$0xff] }
 0x727   :  { %4783 = vmatprep.subr.mxu0 %v11279_v9  ;;  %4854 = vmatprep.subr.mxu1 %v11280_v29  ;;  %11292 = vst [vmem:[#allocation133_spill] sm:$0xff] %v10012_v51  ;;  %11293 = vst [vmem:[#allocation134_spill] sm:$0xff] %v10016_v13  ;;  %v10018_v9 = vld [vmem:[#allocation4 + $0x90] sm:$0xff]  ;;  %v10022_v29 = vld [vmem:[#allocation4 + $0x68] sm:$0xff] }
 0x728   :  { %4784 = vmatpush1.msra.mxu0 %v11281_v8  ;;  %4855 = vmatpush1.msra.mxu1 %v11282_v35  ;;  %11294 = vst [vmem:[#allocation13_spill] sm:$0xff] %v10018_v9  ;;  %11295 = vst [vmem:[#allocation15_spill] sm:$0xff] %v10022_v29  ;;  %v10024_v8 = vld [vmem:[#allocation4 + $0x78] sm:$0xff]  ;;  %v10028_v35 = vld [vmem:[#allocation4 + $0x60] sm:$0xff] }
 0x729   :  { %4785 = vmatprep.subr.mxu0 %v11283_v36  ;;  %4856 = vmatprep.subr.mxu1 %v11284_v3  ;;  %11296 = vst [vmem:[#allocation16_spill] sm:$0xff] %v10024_v8  ;;  %11297 = vst [vmem:[#allocation14_spill] sm:$0xff] %v10028_v35  ;;  %v10030_v36 = vld [vmem:[#allocation4 + $0x70] sm:$0xff]  ;;  %v10034_v3 = vld [vmem:[#allocation4 + $0x48] sm:$0xff] }
 0x72a   :  { %4786 = vmatpush1.msra.mxu0 %v9684_v52  ;;  %4857 = vmatpush1.msra.mxu1 %v11285_v60  ;;  %v9878_v52 = vld [vmem:[#allocation4 + $0x1e8] sm:$0xff]  ;;  %11298 = vst [vmem:[#allocation104_spill] sm:$0xff] %v10030_v36  ;;  %11299 = vst [vmem:[#allocation106_spill] sm:$0xff] %v10034_v3  ;;  %v10036_v60 = vld [vmem:[#allocation4 + $0x58] sm:$0xff] }
 0x72b   :  { %4787 = vmatprep.subr.mxu0 %v9690_v23  ;;  %4858 = vmatprep.subr.mxu1 %v9692_v48  ;;  %v9894_v23 = vld [vmem:[#allocation4 + $0x1c0] sm:$0xff]  ;;  %v9896_v48 = vld [vmem:[#allocation4 + $0x1d0] sm:$0xff]  ;;  %11300 = vst [vmem:[#allocation107_spill] sm:$0xff] %v10036_v60 }
 0x72c   :  { %v6557_v44 = vpop.eup %6556  ;;  %4788 = vmatpush1.msra.mxu0 %v9696_v57  ;;  %4859 = vmatpush1.msra.mxu1 %v9698_v59  ;;  %v9880_v59 = vld [vmem:[#allocation4 + $0x1f8] sm:$0xff]  ;;  %v9882_v57 = vld [vmem:[#allocation4 + $0x1e0] sm:$0xff] }
 0x72d   :  { %4789 = vmatprep.subr.mxu0 %v9702_v2  ;;  %4860 = vmatprep.subr.mxu1 %v9704_v41  ;;  %v4442_v46 = vmul.f32 %v6557_v44, %v6555_v54  ;;  %v9888_v2 = vld [vmem:[#allocation4 + $0x1c8] sm:$0xff]  ;;  %v9890_v41 = vld [vmem:[#allocation4 + $0x1d8] sm:$0xff]  ;;  %v10040_v54 = vld [vmem:[#allocation4 + $0x40] sm:$0xff] }
 0x72e   :  { %4790 = vmatpush1.msra.mxu0 %v9708_v61  ;;  %4823 = vmatprep.mubr.f32.mxu0 %v10797_v20  ;;  %v9898_v61 = vld [vmem:[#allocation4 + $0x1a8] sm:$0xff]  ;;  %11301 = vst [vmem:[#allocation105_spill] sm:$0xff] %v10040_v54  ;;  %v10042_v44 = vld [vmem:[#allocation4 + $0x50] sm:$0xff] }
 0x72f   :  { %4861 = vmatpush1.msra.mxu1 %v9712_v42  ;;  %4894 = vmatprep.mubr.f32.mxu1 %v10797_v20  ;;  %v9886_v42 = vld [vmem:[#allocation4 + $0x1f0] sm:$0xff]  ;;  %11302 = vst [vmem:[#allocation27_spill] sm:$0xff] %v10042_v44 }
 0x730   :  { %4445 = vrot.lane.b32.xlu1 %v4442_v46, %s6722_s9  ;;  %4824 = vmatmul.mubr.f32.vlgmr.msra.gmra.mxu0 %v4442_v46 }
 0x731   :  { %4895 = vmatmul.mubr.f32.vlgmr.msra.gmra.mxu1 %v4442_v46  ;;  %5069 = vmatprep.mubr.f32.mxu0 %v10797_v20  ;;  %v10044_v46 = vld [vmem:[#allocation4 + $0x28] sm:$0xff] }
 0x732   :  { %5140 = vmatprep.mubr.f32.mxu1 %v10797_v20  ;;  %5005 = vmatprep.subr.mxu0 %v9878_v52  ;;  %11303 = vst [vmem:[#allocation28_spill] sm:$0xff] %v10044_v46 }
 0x733   :  { %5076 = vmatprep.subr.mxu1 %v9880_v59  ;;  %5006 = vmatpush1.msra.mxu0 %v9882_v57 }
 0x734   :  { %5077 = vmatpush1.msra.mxu1 %v9886_v42  ;;  %5007 = vmatprep.subr.mxu0 %v9888_v2 }
 0x735   :  { %5078 = vmatprep.subr.mxu1 %v9890_v41  ;;  %5008 = vmatpush1.msra.mxu0 %v9894_v23 }
 0x736   :  { %5079 = vmatpush1.msra.mxu1 %v9896_v48  ;;  %5009 = vmatprep.subr.mxu0 %v9898_v61 }
 0x737   :  { %5080 = vmatprep.subr.mxu1 %v9902_v1  ;;  %5010 = vmatpush1.msra.mxu0 %v9904_v24 }
 0x738   :  { %5081 = vmatpush1.msra.mxu1 %v9906_v50  ;;  %5011 = vmatprep.subr.mxu0 %v9910_v39 }
 0x739   :  { %5082 = vmatprep.subr.mxu1 %v9912_v7  ;;  %5012 = vmatpush1.msra.mxu0 %v9920_v16 }
 0x73a   :  { %5083 = vmatpush1.msra.mxu1 %v9922_v58  ;;  %5013 = vmatprep.subr.mxu0 %v9926_v56 }
 0x73b   :  { %5084 = vmatprep.subr.mxu1 %v9928_v26  ;;  %5014 = vmatpush1.msra.mxu0 %v9932_v28 }
 0x73c   :  { %5085 = vmatpush1.msra.mxu1 %v9934_v34  ;;  %5015 = vmatprep.subr.mxu0 %v9938_v32 }
 0x73d   :  { %5086 = vmatprep.subr.mxu1 %v9940_v11  ;;  %5016 = vmatpush1.msra.mxu0 %v9944_v6 }
 0x73e   :  { %5087 = vmatpush1.msra.mxu1 %v9946_v12  ;;  %5017 = vmatprep.subr.mxu0 %v9950_v0 }
 0x73f   :  { %5088 = vmatprep.subr.mxu1 %v9952_v55  ;;  %5018 = vmatpush1.msra.mxu0 %v9956_v47 }
 0x740   :  { %5089 = vmatpush1.msra.mxu1 %v9958_v37  ;;  %5019 = vmatprep.subr.mxu0 %v9962_v15 }
 0x741   :  { %5090 = vmatprep.subr.mxu1 %v9964_v53  ;;  %5020 = vmatpush1.msra.mxu0 %v9968_v17 }
 0x742   :  { %5091 = vmatpush1.msra.mxu1 %v9970_v40  ;;  %5021 = vmatprep.subr.mxu0 %v9974_v19 }
 0x743   :  { %5092 = vmatprep.subr.mxu1 %v9976_v62  ;;  %5022 = vmatpush1.msra.mxu0 %v9980_v21 }
 0x744   :  { %5093 = vmatpush1.msra.mxu1 %v9982_v18  ;;  %5023 = vmatprep.subr.mxu0 %v9986_v49 }
 0x745   :  { %5094 = vmatprep.subr.mxu1 %v9988_v25  ;;  %5024 = vmatpush1.msra.mxu0 %v9992_v10 }
 0x746   :  { %5095 = vmatpush1.msra.mxu1 %v9994_v5  ;;  %5025 = vmatprep.subr.mxu0 %v9998_v43 }
 0x747   :  { %5096 = vmatprep.subr.mxu1 %v10000_v63  ;;  %5026 = vmatpush1.msra.mxu0 %v10004_v4  ;;  %v11316_v63 = vld [vmem:[#allocation26_spill] sm:$0xff] }
 0x748   :  { %5097 = vmatpush1.msra.mxu1 %v10006_v14  ;;  %5027 = vmatprep.subr.mxu0 %v10010_v22 }
 0x749   :  { %5098 = vmatprep.subr.mxu1 %v10012_v51  ;;  %5028 = vmatpush1.msra.mxu0 %v10016_v13  ;;  %v11314_v13 = vld [vmem:[#allocation78_spill] sm:$0xff] }
 0x74a   :  { %5099 = vmatpush1.msra.mxu1 %v10018_v9  ;;  %5029 = vmatprep.subr.mxu0 %v10022_v29  ;;  %v10060_v29 = vld [vmem:[#allocation4] sm:$0xff]  ;;  %v10068_v9 = vld [vmem:[#allocation7 + $0x1f8] sm:$0xff] }
 0x74b   :  { %5100 = vmatprep.subr.mxu1 %v10024_v8  ;;  %5030 = vmatpush1.msra.mxu0 %v10028_v35  ;;  %v10048_v35 = vld [vmem:[#allocation4 + $0x38] sm:$0xff]  ;;  %v10052_v8 = vld [vmem:[#allocation4 + $0x30] sm:$0xff]  ;;  %11309 = vst [vmem:[#allocation34_spill] sm:$0xff] %v10060_v29  ;;  %11312 = vst [vmem:[#allocation37_spill] sm:$0xff] %v10068_v9 }
 0x74c   :  { %5101 = vmatpush1.msra.mxu1 %v10030_v36  ;;  %5031 = vmatprep.subr.mxu0 %v10034_v3  ;;  %11304 = vst [vmem:[#allocation29_spill] sm:$0xff] %v10048_v35  ;;  %v10050_v36 = vld [vmem:[#allocation4 + $0x20] sm:$0xff]  ;;  %11306 = vst [vmem:[#allocation31_spill] sm:$0xff] %v10052_v8  ;;  %v10058_v3 = vld [vmem:[#allocation4 + $0x18] sm:$0xff] }
 0x74d   :  { %5102 = vmatprep.subr.mxu1 %v10036_v60  ;;  %5032 = vmatpush1.msra.mxu0 %v10040_v54  ;;  %11305 = vst [vmem:[#allocation30_spill] sm:$0xff] %v10050_v36  ;;  %v10056_v60 = vld [vmem:[#allocation4 + $0x8] sm:$0xff]  ;;  %11308 = vst [vmem:[#allocation33_spill] sm:$0xff] %v10058_v3 }
 0x74e   :  { %5103 = vmatpush1.msra.mxu1 %v10042_v44  ;;  %5033 = vmatprep.subr.mxu0 %v10044_v46  ;;  %11307 = vst [vmem:[#allocation32_spill] sm:$0xff] %v10056_v60  ;;  %v10064_v44 = vld [vmem:[#allocation4 + $0x10] sm:$0xff]  ;;  %v10066_v54 = vld [vmem:[#allocation7 + $0x1e8] sm:$0xff] }
 0x74f   :  { %5104 = vmatprep.subr.mxu1 %v10048_v35  ;;  %5034 = vmatpush1.msra.mxu0 %v10050_v36  ;;  %11310 = vst [vmem:[#allocation35_spill] sm:$0xff] %v10064_v44  ;;  %11311 = vst [vmem:[#allocation36_spill] sm:$0xff] %v10066_v54 }
 0x750   :  { %5105 = vmatpush1.msra.mxu1 %v10052_v8  ;;  %5035 = vmatprep.subr.mxu0 %v10056_v60  ;;  %v11313_v8 = vld [vmem:[#allocation25_spill] sm:$0xff]  ;;  %v1548_v60 = vadd.f32 %v11314_v13, %v8650_v31 }
 0x751   :  { %5106 = vmatprep.subr.mxu1 %v10058_v3  ;;  %5036 = vmatpush1.msra.mxu0 %v10060_v29  ;;  %v1546_v35 = vadd.f32 %v11313_v8, %v11231_v30  ;;  %v1659_v8 = vadd.f32 %v11316_v63, %v8664_v27 }
 0x752   :  { %5107 = vmatpush1.msra.mxu1 %v10064_v44  ;;  %5245 = vmatprep.subr.mxu0 %v10066_v54 }
 0x753   :  { %5316 = vmatprep.subr.mxu1 %v10068_v9  ;;  %v11315_v9 = vld [vmem:[#allocation79_spill] sm:$0xff] }
 0x754   :  { %v1661_v4 = vadd.f32 %v11315_v9, %v8658_v38 }
 0x7a2   :  { %v4446_v36 = vpop.permute.xlu1 %4445 }
 0x7a3   :  { %4448 = vst.msk [vmem:[#allocation9 + $0x18] sm:$0xff] %vm2491_vm2, %v4446_v36 }
 0x7cf   :  { %v4585_v46 = vpop.f32.mrf.mxu0  ;;  %v4656_v44 = vpop.f32.mrf.mxu1 }
 0x7d0   :  { %v4661_v51 = vadd.f32 %v4585_v46, %v1546_v35  ;;  %v4663_v30 = vadd.f32 %v4656_v44, %v1659_v8  ;;  %v11318_v44 = vld [vmem:[#allocation98_spill] sm:$0xff] }
 0x7d1   :  { %v4587_v3 = vpop.f32.mrf.mxu0  ;;  %v4658_v54 = vpop.f32.mrf.mxu1 }
 0x7d2   :  { %v6225_v22 = vmul.f32 -1.442695, %v4661_v51  ;;  %v4662_v29 = vadd.f32 %v4587_v3, %v1548_v60  ;;  %v4664_v36 = vadd.f32 %v4658_v54, %v1661_v4  ;;  %v11317_v60 = vld [vmem:[#allocation96_spill] sm:$0xff] }
 0x7d4   :  { %6558 = vpow2.f32 %v6225_v22  ;;  %v6226_v14 = vmul.f32 -1.442695, %v4662_v29  ;;  %v6227_v43 = vmul.f32 -1.442695, %v4664_v36 }
 0x7d6   :  { %6560 = vpow2.f32 %v6226_v14 }
 0x7d7   :  { %6562 = vtanh.f32 %v4663_v30 }
 0x7d8   :  { %6564 = vpow2.f32 %v6227_v43 }
 0x7e1   :  { %v6559_v5 = vpop.eup %6558 }
 0x7e2   :  { %v4668_v13 = vadd.f32 1.0, %v6559_v5 }
 0x7e3   :  { %v6561_v35 = vpop.eup %6560 }
 0x7e4   :  { %6566 = vrcp.f32 %v4668_v13  ;;  %v4674_v22 = vadd.f32 1.0, %v6561_v35  ;;  %v6563_v51 = vpop.eup %6562 }
 0x7e5   :  { %v6565_v14 = vpop.eup %6564 }
 0x7e6   :  { %6568 = vrcp.f32 %v4674_v22  ;;  %v4681_v30 = vadd.f32 1.0, %v6565_v14  ;;  %v11319_v22 = vld [vmem:[#allocation99_spill] sm:$0xff] }
 0x7f0   :  { %v4825_v29 = vpop.f32.mrf.mxu0 }
 0x7f1   :  { %v6567_v3 = vpop.eup %6566  ;;  %v4901_v9 = vadd.f32 %v4825_v29, %v11317_v60  ;;  %v4896_v43 = vpop.f32.mrf.mxu1  ;;  %v11320_v29 = vld [vmem:[#allocation97_spill] sm:$0xff] }
 0x7f2   :  { %v4685_v4 = vmul.f32 %v6567_v3, %v6563_v51  ;;  %v4827_v54 = vpop.f32.mrf.mxu0  ;;  %v4903_v3 = vadd.f32 %v4896_v43, %v11320_v29  ;;  %v10102_v43 = vld [vmem:[#allocation7 + $0x1c0] sm:$0xff]  ;;  %v10116_v29 = vld [vmem:[#allocation7 + $0x1b0] sm:$0xff] }
 0x7f3   :  { %v6569_v46 = vpop.eup %6568  ;;  %v6228_v63 = vmul.f32 -1.442695, %v4901_v9  ;;  %v4902_v36 = vadd.f32 %v4827_v54, %v11318_v44  ;;  %v4898_v35 = vpop.f32.mrf.mxu1  ;;  %v10093_v44 = vld [vmem:[#allocation7 + $0x1e0] sm:$0xff]  ;;  %11322 = vst [vmem:[#allocation39_spill] sm:$0xff] %v10102_v43  ;;  %11327 = vst [vmem:[#allocation44_spill] sm:$0xff] %v10116_v29 }
 0x7f4   :  { %v4684_v5 = vmul.f32 %v6569_v46, %v9801_v45  ;;  %v4904_v51 = vadd.f32 %v4898_v35, %v11319_v22  ;;  %v10108_v35 = vld [vmem:[#allocation7 + $0x1a8] sm:$0xff]  ;;  %v10110_v22 = vld [vmem:[#allocation7 + $0x1b8] sm:$0xff] }
 0x7f5   :  { %6570 = vpow2.f32 %v6228_v63  ;;  %v6229_v8 = vmul.f32 -1.442695, %v4902_v36  ;;  %v10095_v36 = vld [vmem:[#allocation7 + $0x1f0] sm:$0xff]  ;;  %11324 = vst [vmem:[#allocation41_spill] sm:$0xff] %v10108_v35  ;;  %11325 = vst [vmem:[#allocation42_spill] sm:$0xff] %v10110_v22 }
 0x7f6   :  { %v10088_v13 = vadd.f32 %v4685_v4, %v4684_v5  ;;  %v6230_v60 = vmul.f32 -1.442695, %v4904_v51  ;;  %v10097_v5 = vld [vmem:[#allocation7 + $0x1c8] sm:$0xff]  ;;  %v10114_v51 = vld [vmem:[#allocation7 + $0x1a0] sm:$0xff] }
 0x7f7   :  { %6572 = vpow2.f32 %v6229_v8  ;;  %v10104_v8 = vld [vmem:[#allocation7 + $0x1d0] sm:$0xff]  ;;  %11326 = vst [vmem:[#allocation43_spill] sm:$0xff] %v10114_v51 }
 0x7f8   :  { %6574 = vrcp.f32 %v4681_v30  ;;  %v10099_v30 = vld [vmem:[#allocation7 + $0x1d8] sm:$0xff]  ;;  %11323 = vst [vmem:[#allocation40_spill] sm:$0xff] %v10104_v8 }
 0x7f9   :  { %6576 = vtanh.f32 %v10088_v13  ;;  %11321 = vst [vmem:[#allocation38_spill] sm:$0xff] %v10099_v30 }
 0x7fa   :  { %6578 = vtanh.f32 %v4903_v3  ;;  %v10120_v3 = vld [vmem:[#allocation7 + $0x188] sm:$0xff] }
 0x7fb   :  { %6580 = vpow2.f32 %v6230_v60  ;;  %11328 = vst [vmem:[#allocation45_spill] sm:$0xff] %v10120_v3  ;;  %v10122_v60 = vld [vmem:[#allocation7 + $0x198] sm:$0xff] }
 0x7fc   :  { %11329 = vst [vmem:[#allocation46_spill] sm:$0xff] %v10122_v60 }
 0x802   :  { %v6571_v9 = vpop.eup %6570 }
 0x803   :  { %v4908_v54 = vadd.f32 1.0, %v6571_v9  ;;  %v10126_v9 = vld [vmem:[#allocation7 + $0x180] sm:$0xff] }
 0x804   :  { %v6573_v45 = vpop.eup %6572  ;;  %11330 = vst [vmem:[#allocation47_spill] sm:$0xff] %v10126_v9 }
 0x805   :  { %v6575_v14 = vpop.eup %6574  ;;  %6582 = vrcp.f32 %v4908_v54  ;;  %v4914_v46 = vadd.f32 1.0, %v6573_v45  ;;  %v10128_v54 = vld [vmem:[#allocation7 + $0x190] sm:$0xff]  ;;  %v10132_v45 = vld [vmem:[#allocation7 + $0x168] sm:$0xff] }
 0x806   :  { %v6577_v4 = vpop.eup %6576  ;;  %11331 = vst [vmem:[#allocation48_spill] sm:$0xff] %v10128_v54  ;;  %11332 = vst [vmem:[#allocation49_spill] sm:$0xff] %v10132_v45 }
 0x807   :  { %6584 = vrcp.f32 %v4914_v46  ;;  %v4688_v63 = vmul.f32 %v6577_v4, %v6575_v14  ;;  %v10134_v14 = vld [vmem:[#allocation7 + $0x178] sm:$0xff]  ;;  %v10138_v46 = vld [vmem:[#allocation7 + $0x160] sm:$0xff]  ;;  %v10140_v4 = vld [vmem:[#allocation7 + $0x170] sm:$0xff] }
 0x808   :  { %11333 = vst [vmem:[#allocation50_spill] sm:$0xff] %v10134_v14  ;;  %11334 = vst [vmem:[#allocation51_spill] sm:$0xff] %v10138_v46 }
 0x809   :  { %4929 = vst.msk [vmem:[#allocation9 + $0x28] sm:$0xff] %vm1424_vm1, %v4688_v63  ;;  %5070 = vmatmul.mubr.f32.vlgmr.msra.gmra.mxu0 %v4688_v63  ;;  %5141 = vmatmul.mubr.f32.vlgmr.msra.gmra.mxu1 %v4688_v63  ;;  %11335 = vst [vmem:[#allocation52_spill] sm:$0xff] %v10140_v4  ;;  %v6579_v63 = vpop.eup %6578 }
 0x80a   :  { %5246 = vmatpush1.msra.mxu0 %v10093_v44  ;;  %5317 = vmatpush1.msra.mxu1 %v10095_v36 }
 0x80b   :  { %5247 = vmatprep.subr.mxu0 %v10097_v5  ;;  %5318 = vmatprep.subr.mxu1 %v10099_v30 }
 0x80c   :  { %5248 = vmatpush1.msra.mxu0 %v10102_v43  ;;  %5319 = vmatpush1.msra.mxu1 %v10104_v8 }
 0x80d   :  { %5249 = vmatprep.subr.mxu0 %v10108_v35  ;;  %5320 = vmatprep.subr.mxu1 %v10110_v22  ;;  %v6581_v22 = vpop.eup %6580 }
 0x80e   :  { %5250 = vmatpush1.msra.mxu0 %v10114_v51  ;;  %5321 = vmatpush1.msra.mxu1 %v10116_v29  ;;  %v10144_v51 = vld [vmem:[#allocation7 + $0x148] sm:$0xff]  ;;  %v10146_v29 = vld [vmem:[#allocation7 + $0x158] sm:$0xff]  ;;  %v4921_v30 = vadd.f32 1.0, %v6581_v22 }
 0x80f   :  { %5251 = vmatprep.subr.mxu0 %v10120_v3  ;;  %5322 = vmatprep.subr.mxu1 %v10122_v60  ;;  %11336 = vst [vmem:[#allocation53_spill] sm:$0xff] %v10146_v29  ;;  %v10150_v3 = vld [vmem:[#allocation7 + $0x140] sm:$0xff]  ;;  %v10152_v60 = vld [vmem:[#allocation7 + $0x150] sm:$0xff]  ;;  %v10181_v22 = vld [vmem:[#allocation7 + $0xe8] sm:$0xff] }
 0x810   :  { %5252 = vmatpush1.msra.mxu0 %v10126_v9  ;;  %5323 = vmatpush1.msra.mxu1 %v10128_v54  ;;  %11337 = vst [vmem:[#allocation21_spill] sm:$0xff] %v10152_v60  ;;  %v10156_v9 = vld [vmem:[#allocation7 + $0x128] sm:$0xff]  ;;  %v10158_v54 = vld [vmem:[#allocation7 + $0x138] sm:$0xff]  ;;  %11344 = vst [vmem:[#allocation101_spill] sm:$0xff] %v10181_v22  ;;  %6586 = vrcp.f32 %v4921_v30 }
 0x811   :  { %5253 = vmatprep.subr.mxu0 %v10132_v45  ;;  %5324 = vmatprep.subr.mxu1 %v10134_v14  ;;  %11338 = vst [vmem:[#allocation23_spill] sm:$0xff] %v10158_v54  ;;  %v10162_v45 = vld [vmem:[#allocation7 + $0x120] sm:$0xff]  ;;  %v10164_v14 = vld [vmem:[#allocation7 + $0x130] sm:$0xff]  ;;  %v10208_v30 = vld [vmem:[#allocation7 + $0xa8] sm:$0xff] }
 0x812   :  { %v6583_v35 = vpop.eup %6582  ;;  %5254 = vmatpush1.msra.mxu0 %v10138_v46  ;;  %5325 = vmatpush1.msra.mxu1 %v10140_v4  ;;  %11339 = vst [vmem:[#allocation24_spill] sm:$0xff] %v10162_v45  ;;  %11340 = vst [vmem:[#allocation22_spill] sm:$0xff] %v10164_v14  ;;  %v10168_v4 = vld [vmem:[#allocation7 + $0x108] sm:$0xff]  ;;  %v10170_v46 = vld [vmem:[#allocation7 + $0x118] sm:$0xff] }
 0x813   :  { %v4925_v8 = vmul.f32 %v6583_v35, %v6579_v63  ;;  %5255 = vmatprep.subr.mxu0 %v10144_v51  ;;  %5326 = vmatprep.subr.mxu1 %v10146_v29  ;;  %11341 = vst [vmem:[#allocation100_spill] sm:$0xff] %v10168_v4  ;;  %11342 = vst [vmem:[#allocation102_spill] sm:$0xff] %v10170_v46  ;;  %v10175_v63 = vld [vmem:[#allocation7 + $0x100] sm:$0xff]  ;;  %v10177_v29 = vld [vmem:[#allocation7 + $0x110] sm:$0xff] }
 0x814   :  { %v6585_v43 = vpop.eup %6584  ;;  %5256 = vmatpush1.msra.mxu0 %v10150_v3  ;;  %5327 = vmatpush1.msra.mxu1 %v10152_v60  ;;  %11343 = vst [vmem:[#allocation103_spill] sm:$0xff] %v10177_v29  ;;  %v10183_v60 = vld [vmem:[#allocation7 + $0xf8] sm:$0xff]  ;;  %11352 = vst [vmem:[#allocation18_spill] sm:$0xff] %v10208_v30 }
 0x815   :  { %v4924_v35 = vmul.f32 %v6585_v43, %v9836_v33  ;;  %5257 = vmatprep.subr.mxu0 %v10156_v9  ;;  %5328 = vmatprep.subr.mxu1 %v10158_v54  ;;  %11345 = vst [vmem:[#allocation54_spill] sm:$0xff] %v10183_v60  ;;  %v10187_v33 = vld [vmem:[#allocation7 + $0xe0] sm:$0xff]  ;;  %v10189_v43 = vld [vmem:[#allocation7 + $0xf0] sm:$0xff] }
 0x816   :  { %5258 = vmatpush1.msra.mxu0 %v10162_v45  ;;  %5329 = vmatpush1.msra.mxu1 %v10164_v14  ;;  %11346 = vst [vmem:[#allocation55_spill] sm:$0xff] %v10187_v33  ;;  %11347 = vst [vmem:[#allocation56_spill] sm:$0xff] %v10189_v43  ;;  %v10195_v14 = vld [vmem:[#allocation7 + $0xc8] sm:$0xff]  ;;  %v10197_v45 = vld [vmem:[#allocation7 + $0xd8] sm:$0xff] }
 0x817   :  { %5259 = vmatprep.subr.mxu0 %v10168_v4  ;;  %5330 = vmatprep.subr.mxu1 %v10170_v46  ;;  %v10191_v54 = vadd.f32 %v4925_v8, %v4924_v35  ;;  %11348 = vst [vmem:[#allocation57_spill] sm:$0xff] %v10195_v14  ;;  %11349 = vst [vmem:[#allocation17_spill] sm:$0xff] %v10197_v45  ;;  %v10201_v46 = vld [vmem:[#allocation7 + $0xc0] sm:$0xff]  ;;  %v10203_v4 = vld [vmem:[#allocation7 + $0xd0] sm:$0xff] }
 0x818   :  { %5260 = vmatpush1.msra.mxu0 %v10175_v63  ;;  %5331 = vmatpush1.msra.mxu1 %v10177_v29  ;;  %11350 = vst [vmem:[#allocation19_spill] sm:$0xff] %v10201_v46  ;;  %11351 = vst [vmem:[#allocation20_spill] sm:$0xff] %v10203_v4  ;;  %v10210_v8 = vld [vmem:[#allocation7 + $0xb8] sm:$0xff]  ;;  %v10214_v35 = vld [vmem:[#allocation7 + $0xa0] sm:$0xff] }
 0x819   :  { %5261 = vmatprep.subr.mxu0 %v10181_v22  ;;  %5332 = vmatprep.subr.mxu1 %v10183_v60  ;;  %6588 = vtanh.f32 %v10191_v54  ;;  %11353 = vst [vmem:[#allocation108_spill] sm:$0xff] %v10210_v8  ;;  %11354 = vst [vmem:[#allocation110_spill] sm:$0xff] %v10214_v35  ;;  %v10216_v60 = vld [vmem:[#allocation7 + $0xb0] sm:$0xff]  ;;  %v10220_v22 = vld [vmem:[#allocation7 + $0x88] sm:$0xff] }
 0x81a   :  { %5262 = vmatpush1.msra.mxu0 %v10187_v33  ;;  %5333 = vmatpush1.msra.mxu1 %v10189_v43  ;;  %11355 = vst [vmem:[#allocation111_spill] sm:$0xff] %v10216_v60  ;;  %11356 = vst [vmem:[#allocation109_spill] sm:$0xff] %v10220_v22  ;;  %v10222_v33 = vld [vmem:[#allocation7 + $0x98] sm:$0xff]  ;;  %v10226_v43 = vld [vmem:[#allocation7 + $0x80] sm:$0xff] }
 0x81b   :  { %5263 = vmatprep.subr.mxu0 %v10195_v14  ;;  %5334 = vmatprep.subr.mxu1 %v10197_v45  ;;  %11357 = vst [vmem:[#allocation58_spill] sm:$0xff] %v10222_v33  ;;  %11358 = vst [vmem:[#allocation59_spill] sm:$0xff] %v10226_v43  ;;  %v10228_v14 = vld [vmem:[#allocation7 + $0x90] sm:$0xff]  ;;  %v10232_v45 = vld [vmem:[#allocation7 + $0x68] sm:$0xff] }
 0x81c   :  { %5264 = vmatpush1.msra.mxu0 %v10201_v46  ;;  %5335 = vmatpush1.msra.mxu1 %v10203_v4  ;;  %11359 = vst [vmem:[#allocation60_spill] sm:$0xff] %v10228_v14  ;;  %11360 = vst [vmem:[#allocation61_spill] sm:$0xff] %v10232_v45  ;;  %v10234_v46 = vld [vmem:[#allocation7 + $0x78] sm:$0xff]  ;;  %v10238_v4 = vld [vmem:[#allocation7 + $0x60] sm:$0xff] }
 0x81d   :  { %5265 = vmatprep.subr.mxu0 %v10208_v30  ;;  %5336 = vmatprep.subr.mxu1 %v10210_v8  ;;  %11361 = vst [vmem:[#allocation62_spill] sm:$0xff] %v10234_v46  ;;  %11362 = vst [vmem:[#allocation63_spill] sm:$0xff] %v10238_v4  ;;  %v10240_v30 = vld [vmem:[#allocation7 + $0x70] sm:$0xff]  ;;  %v10244_v8 = vld [vmem:[#allocation7 + $0x48] sm:$0xff] }
 0x81e   :  { %5266 = vmatpush1.msra.mxu0 %v10214_v35  ;;  %5337 = vmatpush1.msra.mxu1 %v10216_v60  ;;  %11363 = vst [vmem:[#allocation64_spill] sm:$0xff] %v10240_v30  ;;  %11364 = vst [vmem:[#allocation65_spill] sm:$0xff] %v10244_v8  ;;  %v10246_v35 = vld [vmem:[#allocation7 + $0x58] sm:$0xff]  ;;  %v10250_v60 = vld [vmem:[#allocation7 + $0x40] sm:$0xff] }
 0x81f   :  { %5267 = vmatprep.subr.mxu0 %v10220_v22  ;;  %5338 = vmatprep.subr.mxu1 %v10222_v33  ;;  %11365 = vst [vmem:[#allocation66_spill] sm:$0xff] %v10246_v35  ;;  %v10252_v22 = vld [vmem:[#allocation7 + $0x50] sm:$0xff]  ;;  %v10256_v33 = vld [vmem:[#allocation7 + $0x28] sm:$0xff] }
 0x820   :  { %5268 = vmatpush1.msra.mxu0 %v10226_v43  ;;  %5339 = vmatpush1.msra.mxu1 %v10228_v14  ;;  %11366 = vst [vmem:[#allocation67_spill] sm:$0xff] %v10252_v22  ;;  %v10258_v43 = vld [vmem:[#allocation7 + $0x38] sm:$0xff]  ;;  %v10262_v14 = vld [vmem:[#allocation7 + $0x20] sm:$0xff]  ;;  %v10278_v29 = vld [vmem:[#allocation7 + $0x10] sm:$0xff] }
 0x821   :  { %5269 = vmatprep.subr.mxu0 %v10232_v45  ;;  %5340 = vmatprep.subr.mxu1 %v10234_v46  ;;  %v10264_v45 = vld [vmem:[#allocation7 + $0x30] sm:$0xff]  ;;  %v10268_v46 = vld [vmem:[#allocation7 + $0x8] sm:$0xff] }
 0x822   :  { %5270 = vmatpush1.msra.mxu0 %v10238_v4  ;;  %5341 = vmatpush1.msra.mxu1 %v10240_v30  ;;  %v10270_v4 = vld [vmem:[#allocation7 + $0x18] sm:$0xff]  ;;  %v6587_v30 = vpop.eup %6586 }
 0x823   :  { %5271 = vmatprep.subr.mxu0 %v10244_v8  ;;  %5342 = vmatprep.subr.mxu1 %v10246_v35  ;;  %v10274_v8 = vld [vmem:[#allocation7] sm:$0xff] }
 0x824   :  { %5272 = vmatpush1.msra.mxu0 %v10250_v60  ;;  %5343 = vmatpush1.msra.mxu1 %v10252_v22 }
 0x825   :  { %5273 = vmatprep.subr.mxu0 %v10256_v33  ;;  %5344 = vmatprep.subr.mxu1 %v10258_v43 }
 0x826   :  { %v6589_v35 = vpop.eup %6588  ;;  %5274 = vmatpush1.msra.mxu0 %v10262_v14  ;;  %5345 = vmatpush1.msra.mxu1 %v10264_v45 }
 0x827   :  { %5275 = vmatprep.subr.mxu0 %v10268_v46  ;;  %5346 = vmatprep.subr.mxu1 %v10270_v4  ;;  %v4928_v22 = vmul.f32 %v6589_v35, %v6587_v30  ;;  %v11397_v35 = vld [vmem:[#allocation83_spill] sm:$0xff] }
 0x828   :  { %5276 = vmatpush1.msra.mxu0 %v10274_v8  ;;  %5309 = vmatprep.mubr.f32.mxu0 %v10797_v20 }
 0x829   :  { %5347 = vmatpush1.msra.mxu1 %v10278_v29  ;;  %5380 = vmatprep.mubr.f32.mxu1 %v10797_v20 }
 0x82a   :  { %4931 = vrot.lane.b32.xlu0 %v4928_v22, %s6722_s9  ;;  %5310 = vmatmul.mubr.f32.vlgmr.msra.gmra.mxu0 %v4928_v22 }
 0x82b   :  { %5381 = vmatmul.mubr.f32.vlgmr.msra.gmra.mxu1 %v4928_v22  ;;  %5491 = vmatprep.subr.mxu0 %v9878_v52  ;;  %v11367_v52 = vld [vmem:[#allocation127_spill] sm:$0xff] }
 0x82c   :  { %5562 = vmatprep.subr.mxu1 %v9880_v59  ;;  %5492 = vmatpush1.msra.mxu0 %v9882_v57  ;;  %v11368_v59 = vld [vmem:[#allocation128_spill] sm:$0xff]  ;;  %v11369_v57 = vld [vmem:[#allocation129_spill] sm:$0xff] }
 0x82d   :  { %5563 = vmatpush1.msra.mxu1 %v9886_v42  ;;  %5493 = vmatprep.subr.mxu0 %v9888_v2  ;;  %v11370_v42 = vld [vmem:[#allocation130_spill] sm:$0xff]  ;;  %v11371_v2 = vld [vmem:[#allocation131_spill] sm:$0xff] }
 0x82e   :  { %5564 = vmatprep.subr.mxu1 %v9890_v41  ;;  %5494 = vmatpush1.msra.mxu0 %v9894_v23  ;;  %v11372_v41 = vld [vmem:[#allocation132_spill] sm:$0xff]  ;;  %v11373_v23 = vld [vmem:[#allocation133_spill] sm:$0xff] }
 0x82f   :  { %5565 = vmatpush1.msra.mxu1 %v9896_v48  ;;  %5495 = vmatprep.subr.mxu0 %v9898_v61  ;;  %v11374_v48 = vld [vmem:[#allocation134_spill] sm:$0xff]  ;;  %v11375_v61 = vld [vmem:[#allocation13_spill] sm:$0xff] }
 0x830   :  { %5566 = vmatprep.subr.mxu1 %v9902_v1  ;;  %5496 = vmatpush1.msra.mxu0 %v9904_v24  ;;  %v11376_v1 = vld [vmem:[#allocation15_spill] sm:$0xff]  ;;  %v11377_v24 = vld [vmem:[#allocation16_spill] sm:$0xff] }
 0x831   :  { %5567 = vmatpush1.msra.mxu1 %v9906_v50  ;;  %5497 = vmatprep.subr.mxu0 %v9910_v39  ;;  %v11378_v50 = vld [vmem:[#allocation14_spill] sm:$0xff]  ;;  %v11379_v39 = vld [vmem:[#allocation104_spill] sm:$0xff] }
 0x832   :  { %5568 = vmatprep.subr.mxu1 %v9912_v7  ;;  %5498 = vmatpush1.msra.mxu0 %v9920_v16  ;;  %v11380_v7 = vld [vmem:[#allocation106_spill] sm:$0xff]  ;;  %v11381_v16 = vld [vmem:[#allocation107_spill] sm:$0xff] }
 0x833   :  { %5569 = vmatpush1.msra.mxu1 %v9922_v58  ;;  %5499 = vmatprep.subr.mxu0 %v9926_v56  ;;  %v11382_v58 = vld [vmem:[#allocation105_spill] sm:$0xff]  ;;  %v11383_v56 = vld [vmem:[#allocation27_spill] sm:$0xff] }
 0x834   :  { %5570 = vmatprep.subr.mxu1 %v9928_v26  ;;  %5500 = vmatpush1.msra.mxu0 %v9932_v28  ;;  %v11384_v26 = vld [vmem:[#allocation28_spill] sm:$0xff]  ;;  %v11385_v28 = vld [vmem:[#allocation29_spill] sm:$0xff] }
 0x835   :  { %5571 = vmatpush1.msra.mxu1 %v9934_v34  ;;  %5501 = vmatprep.subr.mxu0 %v9938_v32  ;;  %v11386_v34 = vld [vmem:[#allocation30_spill] sm:$0xff]  ;;  %v11387_v32 = vld [vmem:[#allocation31_spill] sm:$0xff] }
 0x836   :  { %5572 = vmatprep.subr.mxu1 %v9940_v11  ;;  %5502 = vmatpush1.msra.mxu0 %v9944_v6  ;;  %v11388_v11 = vld [vmem:[#allocation32_spill] sm:$0xff]  ;;  %v11389_v6 = vld [vmem:[#allocation33_spill] sm:$0xff] }
 0x837   :  { %5573 = vmatpush1.msra.mxu1 %v9946_v12  ;;  %5503 = vmatprep.subr.mxu0 %v9950_v0  ;;  %v11390_v12 = vld [vmem:[#allocation34_spill] sm:$0xff]  ;;  %v11391_v0 = vld [vmem:[#allocation35_spill] sm:$0xff] }
 0x838   :  { %5574 = vmatprep.subr.mxu1 %v9952_v55  ;;  %5504 = vmatpush1.msra.mxu0 %v9956_v47  ;;  %v11392_v55 = vld [vmem:[#allocation36_spill] sm:$0xff]  ;;  %v11393_v47 = vld [vmem:[#allocation37_spill] sm:$0xff] }
 0x839   :  { %5575 = vmatpush1.msra.mxu1 %v9958_v37  ;;  %5505 = vmatprep.subr.mxu0 %v9962_v15  ;;  %v11394_v15 = vld [vmem:[#allocation112_spill] sm:$0xff] }
 0x83a   :  { %5576 = vmatprep.subr.mxu1 %v9964_v53  ;;  %5506 = vmatpush1.msra.mxu0 %v9968_v17  ;;  %v11395_v53 = vld [vmem:[#allocation80_spill] sm:$0xff] }
 0x83b   :  { %5577 = vmatpush1.msra.mxu1 %v9970_v40  ;;  %5507 = vmatprep.subr.mxu0 %v9974_v19  ;;  %v1552_v17 = vadd.f32 %v11395_v53, %v11394_v15  ;;  %v11396_v19 = vld [vmem:[#allocation82_spill] sm:$0xff]  ;;  %v11401_v53 = vld [vmem:[#allocation95_spill] sm:$0xff] }
 0x83c   :  { %5578 = vmatprep.subr.mxu1 %v9976_v62  ;;  %5508 = vmatpush1.msra.mxu0 %v9980_v21  ;;  %v1554_v62 = vadd.f32 %v11396_v19, %v8650_v31 }
 0x83d   :  { %5579 = vmatpush1.msra.mxu1 %v9982_v18  ;;  %5509 = vmatprep.subr.mxu0 %v9986_v49 }
 0x83e   :  { %5580 = vmatprep.subr.mxu1 %v9988_v25  ;;  %5510 = vmatpush1.msra.mxu0 %v9992_v10 }
 0x83f   :  { %5581 = vmatpush1.msra.mxu1 %v11367_v52  ;;  %5511 = vmatprep.subr.mxu0 %v11368_v59  ;;  %v1667_v52 = vadd.f32 %v11397_v35, %v8658_v38  ;;  %v11404_v35 = vld [vmem:[#allocation39_spill] sm:$0xff] }
 0x840   :  { %5582 = vmatprep.subr.mxu1 %v11369_v57  ;;  %5512 = vmatpush1.msra.mxu0 %v11370_v42  ;;  %v11398_v57 = vld [vmem:[#allocation81_spill] sm:$0xff] }
 0x841   :  { %5583 = vmatpush1.msra.mxu1 %v11371_v2  ;;  %5513 = vmatprep.subr.mxu0 %v11372_v41  ;;  %v1665_v42 = vadd.f32 %v11398_v57, %v8664_v27  ;;  %v11407_v57 = vld [vmem:[#allocation42_spill] sm:$0xff] }
 0x842   :  { %5584 = vmatprep.subr.mxu1 %v11373_v23  ;;  %5514 = vmatpush1.msra.mxu0 %v11374_v48 }
 0x843   :  { %5585 = vmatpush1.msra.mxu1 %v11375_v61  ;;  %5515 = vmatprep.subr.mxu0 %v11376_v1 }
 0x844   :  { %5586 = vmatprep.subr.mxu1 %v11377_v24  ;;  %5516 = vmatpush1.msra.mxu0 %v11378_v50 }
 0x845   :  { %5587 = vmatpush1.msra.mxu1 %v11379_v39  ;;  %5517 = vmatprep.subr.mxu0 %v11380_v7 }
 0x846   :  { %5588 = vmatprep.subr.mxu1 %v11381_v16  ;;  %5518 = vmatpush1.msra.mxu0 %v11382_v58  ;;  %v11399_v16 = vld [vmem:[#allocation92_spill] sm:$0xff] }
 0x847   :  { %5589 = vmatpush1.msra.mxu1 %v11383_v56  ;;  %5519 = vmatprep.subr.mxu0 %v11384_v26 }
 0x848   :  { %5590 = vmatprep.subr.mxu1 %v11385_v28  ;;  %5520 = vmatpush1.msra.mxu0 %v11386_v34 }
 0x849   :  { %5591 = vmatpush1.msra.mxu1 %v11387_v32  ;;  %5521 = vmatprep.subr.mxu0 %v11388_v11  ;;  %v11400_v32 = vld [vmem:[#allocation94_spill] sm:$0xff] }
 0x84a   :  { %5592 = vmatprep.subr.mxu1 %v11389_v6  ;;  %5522 = vmatpush1.msra.mxu0 %v11390_v12 }
 0x84b   :  { %5593 = vmatpush1.msra.mxu1 %v11391_v0  ;;  %5555 = vmatprep.mubr.f32.mxu0 %v10797_v20 }
 0x84c   :  { %5626 = vmatprep.mubr.f32.mxu1 %v10797_v20  ;;  %5731 = vmatprep.subr.mxu0 %v11392_v55 }
 0x84d   :  { %5802 = vmatprep.subr.mxu1 %v11393_v47 }
 0x89c   :  { %v4932_v37 = vpop.permute.xlu0 %4931 }
 0x89d   :  { %4934 = vst.msk [vmem:[#allocation9 + $0x10] sm:$0xff] %vm2491_vm2, %v4932_v37 }
 0x8c9   :  { %v5071_v40 = vpop.f32.mrf.mxu0  ;;  %v5142_v10 = vpop.f32.mrf.mxu1 }
 0x8ca   :  { %v5147_v21 = vadd.f32 %v5071_v40, %v1552_v17  ;;  %v5149_v2 = vadd.f32 %v5142_v10, %v1665_v42  ;;  %v11402_v40 = vld [vmem:[#allocation93_spill] sm:$0xff]  ;;  %v11408_v42 = vld [vmem:[#allocation43_spill] sm:$0xff] }
 0x8cb   :  { %v5073_v18 = vpop.f32.mrf.mxu0  ;;  %v5144_v30 = vpop.f32.mrf.mxu1 }
 0x8cc   :  { %v6231_v49 = vmul.f32 -1.442695, %v5147_v21  ;;  %v5148_v25 = vadd.f32 %v5073_v18, %v1554_v62  ;;  %v5150_v59 = vadd.f32 %v5144_v30, %v1667_v52  ;;  %v11403_v30 = vld [vmem:[#allocation38_spill] sm:$0xff]  ;;  %v11405_v52 = vld [vmem:[#allocation40_spill] sm:$0xff] }
 0x8ce   :  { %6590 = vpow2.f32 %v6231_v49  ;;  %v6232_v22 = vmul.f32 -1.442695, %v5148_v25  ;;  %v6233_v41 = vmul.f32 -1.442695, %v5150_v59  ;;  %v11406_v59 = vld [vmem:[#allocation41_spill] sm:$0xff] }
 0x8d0   :  { %6592 = vpow2.f32 %v6232_v22 }
 0x8d1   :  { %6594 = vtanh.f32 %v5149_v2  ;;  %v11409_v2 = vld [vmem:[#allocation44_spill] sm:$0xff] }
 0x8d2   :  { %6596 = vpow2.f32 %v6233_v41  ;;  %v11410_v41 = vld [vmem:[#allocation45_spill] sm:$0xff] }
 0x8db   :  { %v6591_v23 = vpop.eup %6590 }
 0x8dc   :  { %v5154_v48 = vadd.f32 1.0, %v6591_v23  ;;  %v11413_v23 = vld [vmem:[#allocation48_spill] sm:$0xff] }
 0x8dd   :  { %v6593_v61 = vpop.eup %6592 }
 0x8de   :  { %6598 = vrcp.f32 %v5154_v48  ;;  %v5160_v1 = vadd.f32 1.0, %v6593_v61  ;;  %v6595_v24 = vpop.eup %6594  ;;  %v11414_v61 = vld [vmem:[#allocation49_spill] sm:$0xff] }
 0x8df   :  { %v6597_v50 = vpop.eup %6596 }
 0x8e0   :  { %6600 = vrcp.f32 %v5160_v1  ;;  %v5167_v12 = vadd.f32 1.0, %v6597_v50  ;;  %v11415_v1 = vld [vmem:[#allocation50_spill] sm:$0xff]  ;;  %v11416_v50 = vld [vmem:[#allocation51_spill] sm:$0xff] }
 0x8ea   :  { %v5311_v39 = vpop.f32.mrf.mxu0 }
 0x8eb   :  { %v6599_v7 = vpop.eup %6598  ;;  %v5387_v58 = vadd.f32 %v5311_v39, %v11399_v16  ;;  %v5382_v0 = vpop.f32.mrf.mxu1  ;;  %v11417_v39 = vld [vmem:[#allocation52_spill] sm:$0xff]  ;;  %v11418_v16 = vld [vmem:[#allocation53_spill] sm:$0xff] }
 0x8ec   :  { %v5171_v56 = vmul.f32 %v6599_v7, %v6595_v24  ;;  %v5313_v26 = vpop.f32.mrf.mxu0  ;;  %v5389_v19 = vadd.f32 %v5382_v0, %v11402_v40  ;;  %v11428_v0 = vld [vmem:[#allocation55_spill] sm:$0xff]  ;;  %v11433_v40 = vld [vmem:[#allocation20_spill] sm:$0xff] }
 0x8ed   :  { %v6601_v28 = vpop.eup %6600  ;;  %v6234_v34 = vmul.f32 -1.442695, %v5387_v58  ;;  %v5388_v11 = vadd.f32 %v5313_v26, %v11400_v32  ;;  %v5384_v37 = vpop.f32.mrf.mxu1  ;;  %v11419_v26 = vld [vmem:[#allocation21_spill] sm:$0xff]  ;;  %v11421_v32 = vld [vmem:[#allocation24_spill] sm:$0xff] }
 0x8ee   :  { %v5170_v6 = vmul.f32 %v6601_v28, %v10088_v13  ;;  %v5390_v17 = vadd.f32 %v5384_v37, %v11401_v53  ;;  %v11430_v37 = vld [vmem:[#allocation57_spill] sm:$0xff] }
 0x8ef   :  { %6602 = vpow2.f32 %v6234_v34  ;;  %v6235_v55 = vmul.f32 -1.442695, %v5388_v11  ;;  %v11420_v34 = vld [vmem:[#allocation23_spill] sm:$0xff]  ;;  %v11422_v11 = vld [vmem:[#allocation22_spill] sm:$0xff]  ;;  %v11431_v53 = vld [vmem:[#allocation17_spill] sm:$0xff] }
 0x8f0   :  { %v10367_v47 = vadd.f32 %v5171_v56, %v5170_v6  ;;  %v6236_v62 = vmul.f32 -1.442695, %v5390_v17  ;;  %v11423_v6 = vld [vmem:[#allocation100_spill] sm:$0xff]  ;;  %v11432_v17 = vld [vmem:[#allocation19_spill] sm:$0xff] }
 0x8f1   :  { %6604 = vpow2.f32 %v6235_v55  ;;  %v11429_v55 = vld [vmem:[#allocation56_spill] sm:$0xff] }
 0x8f2   :  { %6606 = vrcp.f32 %v5167_v12 }
 0x8f3   :  { %6608 = vtanh.f32 %v10367_v47 }
 0x8f4   :  { %6610 = vtanh.f32 %v5389_v19  ;;  %v11435_v19 = vld [vmem:[#allocation108_spill] sm:$0xff] }
 0x8f5   :  { %6612 = vpow2.f32 %v6236_v62  ;;  %v11436_v62 = vld [vmem:[#allocation110_spill] sm:$0xff] }
 0x8fc   :  { %v6603_v21 = vpop.eup %6602 }
 0x8fd   :  { %v5394_v18 = vadd.f32 1.0, %v6603_v21  ;;  %v11437_v21 = vld [vmem:[#allocation111_spill] sm:$0xff] }
 0x8fe   :  { %v6605_v13 = vpop.eup %6604 }
 0x8ff   :  { %v6607_v49 = vpop.eup %6606  ;;  %6614 = vrcp.f32 %v5394_v18  ;;  %v5400_v25 = vadd.f32 1.0, %v6605_v13  ;;  %v11438_v18 = vld [vmem:[#allocation109_spill] sm:$0xff]  ;;  %v11439_v13 = vld [vmem:[#allocation58_spill] sm:$0xff] }
 0x900   :  { %v6609_v10 = vpop.eup %6608 }
 0x901   :  { %6616 = vrcp.f32 %v5400_v25  ;;  %v5174_v22 = vmul.f32 %v6609_v10, %v6607_v49  ;;  %v11440_v49 = vld [vmem:[#allocation59_spill] sm:$0xff]  ;;  %v11441_v25 = vld [vmem:[#allocation60_spill] sm:$0xff]  ;;  %v11442_v10 = vld [vmem:[#allocation61_spill] sm:$0xff] }
 0x903   :  { %5415 = vst.msk [vmem:[#allocation9 + $0x30] sm:$0xff] %vm1424_vm1, %v5174_v22  ;;  %5556 = vmatmul.mubr.f32.vlgmr.msra.gmra.mxu0 %v5174_v22  ;;  %5627 = vmatmul.mubr.f32.vlgmr.msra.gmra.mxu1 %v5174_v22  ;;  %v11443_v22 = vld [vmem:[#allocation62_spill] sm:$0xff] }
 0x904   :  { %5732 = vmatpush1.msra.mxu0 %v10093_v44  ;;  %5803 = vmatpush1.msra.mxu1 %v10095_v36  ;;  %v11411_v44 = vld [vmem:[#allocation46_spill] sm:$0xff]  ;;  %v6611_v36 = vpop.eup %6610 }
 0x905   :  { %5733 = vmatprep.subr.mxu0 %v10097_v5  ;;  %5804 = vmatprep.subr.mxu1 %v11403_v30  ;;  %v11412_v5 = vld [vmem:[#allocation47_spill] sm:$0xff]  ;;  %v6613_v48 = vpop.eup %6612 }
 0x906   :  { %5734 = vmatpush1.msra.mxu0 %v11404_v35  ;;  %5805 = vmatpush1.msra.mxu1 %v11405_v52  ;;  %v5407_v56 = vadd.f32 1.0, %v6613_v48  ;;  %v11444_v30 = vld [vmem:[#allocation63_spill] sm:$0xff]  ;;  %v11445_v35 = vld [vmem:[#allocation64_spill] sm:$0xff]  ;;  %v11446_v52 = vld [vmem:[#allocation65_spill] sm:$0xff] }
 0x907   :  { %5735 = vmatprep.subr.mxu0 %v11406_v59  ;;  %5806 = vmatprep.subr.mxu1 %v11407_v57  ;;  %v11447_v59 = vld [vmem:[#allocation66_spill] sm:$0xff]  ;;  %v11448_v57 = vld [vmem:[#allocation67_spill] sm:$0xff] }
 0x908   :  { %5736 = vmatpush1.msra.mxu0 %v11408_v42  ;;  %5807 = vmatpush1.msra.mxu1 %v11409_v2  ;;  %6618 = vrcp.f32 %v5407_v56 }
 0x909   :  { %5737 = vmatprep.subr.mxu0 %v11410_v41  ;;  %5808 = vmatprep.subr.mxu1 %v11411_v44 }
 0x90a   :  { %5738 = vmatpush1.msra.mxu0 %v11412_v5  ;;  %5809 = vmatpush1.msra.mxu1 %v11413_v23  ;;  %v11451_v23 = vld [vmem:[#allocation87_spill] sm:$0xff] }
 0x90b   :  { %5739 = vmatprep.subr.mxu0 %v11414_v61  ;;  %5810 = vmatprep.subr.mxu1 %v11415_v1  ;;  %v1673_v48 = vadd.f32 %v11451_v23, %v8658_v38  ;;  %v11452_v1 = vld [vmem:[#allocation85_spill] sm:$0xff] }
 0x90c   :  { %v6615_v24 = vpop.eup %6614  ;;  %5740 = vmatpush1.msra.mxu0 %v11416_v50  ;;  %5811 = vmatpush1.msra.mxu1 %v11417_v39 }
 0x90d   :  { %v5411_v7 = vmul.f32 %v6615_v24, %v6611_v36  ;;  %5741 = vmatprep.subr.mxu0 %v10144_v51  ;;  %5812 = vmatprep.subr.mxu1 %v11418_v16  ;;  %v11424_v51 = vld [vmem:[#allocation102_spill] sm:$0xff] }
 0x90e   :  { %v6617_v58 = vpop.eup %6616  ;;  %5742 = vmatpush1.msra.mxu0 %v10150_v3  ;;  %5813 = vmatpush1.msra.mxu1 %v11419_v26  ;;  %v11425_v3 = vld [vmem:[#allocation103_spill] sm:$0xff] }
 0x90f   :  { %v5410_v28 = vmul.f32 %v6617_v58, %v10191_v54  ;;  %5743 = vmatprep.subr.mxu0 %v10156_v9  ;;  %5814 = vmatprep.subr.mxu1 %v11420_v34  ;;  %v11426_v54 = vld [vmem:[#allocation101_spill] sm:$0xff]  ;;  %v11427_v9 = vld [vmem:[#allocation54_spill] sm:$0xff]  ;;  %v11453_v34 = vld [vmem:[#allocation88_spill] sm:$0xff] }
 0x910   :  { %5744 = vmatpush1.msra.mxu0 %v11421_v32  ;;  %5815 = vmatpush1.msra.mxu1 %v11422_v11 }
 0x911   :  { %5745 = vmatprep.subr.mxu0 %v11423_v6  ;;  %5816 = vmatprep.subr.mxu1 %v11424_v51  ;;  %v10402_v12 = vadd.f32 %v5411_v7, %v5410_v28 }
 0x912   :  { %5746 = vmatpush1.msra.mxu0 %v10175_v63  ;;  %5817 = vmatpush1.msra.mxu1 %v11425_v3  ;;  %v11434_v63 = vld [vmem:[#allocation18_spill] sm:$0xff] }
 0x913   :  { %5747 = vmatprep.subr.mxu0 %v11426_v54  ;;  %5818 = vmatprep.subr.mxu1 %v11427_v9  ;;  %6620 = vtanh.f32 %v10402_v12  ;;  %v11454_v3 = vld [vmem:[#allocation90_spill] sm:$0xff] }
 0x914   :  { %5748 = vmatpush1.msra.mxu0 %v11428_v0  ;;  %5819 = vmatpush1.msra.mxu1 %v11429_v55 }
 0x915   :  { %5749 = vmatprep.subr.mxu0 %v11430_v37  ;;  %5820 = vmatprep.subr.mxu1 %v11431_v53  ;;  %v6619_v42 = vpop.eup %6618 }
 0x916   :  { %5750 = vmatpush1.msra.mxu0 %v11432_v17  ;;  %5821 = vmatpush1.msra.mxu1 %v11433_v40  ;;  %v11455_v17 = vld [vmem:[#allocation91_spill] sm:$0xff] }
 0x917   :  { %5751 = vmatprep.subr.mxu0 %v11434_v63  ;;  %5822 = vmatprep.subr.mxu1 %v11435_v19  ;;  %v11456_v63 = vld [vmem:[#allocation89_spill] sm:$0xff] }
 0x918   :  { %5752 = vmatpush1.msra.mxu0 %v11436_v62  ;;  %5823 = vmatpush1.msra.mxu1 %v11437_v21 }
 0x919   :  { %5753 = vmatprep.subr.mxu0 %v11438_v18  ;;  %5824 = vmatprep.subr.mxu1 %v11439_v13 }
 0x91a   :  { %5754 = vmatpush1.msra.mxu0 %v11440_v49  ;;  %5825 = vmatpush1.msra.mxu1 %v11441_v25 }
 0x91b   :  { %5755 = vmatprep.subr.mxu0 %v11442_v10  ;;  %5826 = vmatprep.subr.mxu1 %v11443_v22 }
 0x91c   :  { %5756 = vmatpush1.msra.mxu0 %v11444_v30  ;;  %5827 = vmatpush1.msra.mxu1 %v11445_v35 }
 0x91d   :  { %5757 = vmatprep.subr.mxu0 %v11446_v52  ;;  %5828 = vmatprep.subr.mxu1 %v11447_v59 }
 0x91e   :  { %5758 = vmatpush1.msra.mxu0 %v10250_v60  ;;  %5829 = vmatpush1.msra.mxu1 %v11448_v57 }
 0x91f   :  { %5759 = vmatprep.subr.mxu0 %v10256_v33  ;;  %5830 = vmatprep.subr.mxu1 %v10258_v43 }
 0x920   :  { %v6621_v2 = vpop.eup %6620  ;;  %5760 = vmatpush1.msra.mxu0 %v10262_v14  ;;  %5831 = vmatpush1.msra.mxu1 %v10264_v45  ;;  %v11449_v45 = vld [vmem:[#allocation84_spill] sm:$0xff] }
 0x921   :  { %5761 = vmatprep.subr.mxu0 %v10268_v46  ;;  %5832 = vmatprep.subr.mxu1 %v10270_v4  ;;  %v5414_v41 = vmul.f32 %v6621_v2, %v6619_v42  ;;  %v1558_v14 = vadd.f32 %v11449_v45, %v11394_v15  ;;  %v11450_v4 = vld [vmem:[#allocation86_spill] sm:$0xff]  ;;  %v1671_v15 = vadd.f32 %v11452_v1, %v8664_v27 }
 0x922   :  { %5762 = vmatpush1.msra.mxu0 %v10274_v8  ;;  %5795 = vmatprep.mubr.f32.mxu0 %v10797_v20  ;;  %v1560_v33 = vadd.f32 %v11450_v4, %v8650_v31 }
 0x923   :  { %5833 = vmatpush1.msra.mxu1 %v10278_v29  ;;  %5866 = vmatprep.mubr.f32.mxu1 %v10797_v20 }
 0x924   :  { %5417 = vrot.lane.b32.xlu1 %v5414_v41, %s6722_s9  ;;  %5796 = vmatmul.mubr.f32.vlgmr.msra.gmra.mxu0 %v5414_v41 }
 0x925   :  { %5867 = vmatmul.mubr.f32.vlgmr.msra.gmra.mxu1 %v5414_v41 }
 0x996   :  { %v5418_v60 = vpop.permute.xlu1 %5417 }
 0x997   :  { %5420 = vst.msk [vmem:[#allocation9 + $0x8] sm:$0xff] %vm2491_vm2, %v5418_v60 }
 0x9c3   :  { %v5557_v46 = vpop.f32.mrf.mxu0  ;;  %v5628_v36 = vpop.f32.mrf.mxu1 }
 0x9c4   :  { %v5633_v43 = vadd.f32 %v5557_v46, %v1558_v14  ;;  %v5635_v50 = vadd.f32 %v5628_v36, %v1671_v15 }
 0x9c5   :  { %v5559_v8 = vpop.f32.mrf.mxu0  ;;  %v5630_v5 = vpop.f32.mrf.mxu1 }
 0x9c6   :  { %v6237_v44 = vmul.f32 -1.442695, %v5633_v43  ;;  %v5634_v29 = vadd.f32 %v5559_v8, %v1560_v33  ;;  %v5636_v61 = vadd.f32 %v5630_v5, %v1673_v48 }
 0x9c8   :  { %6622 = vpow2.f32 %v6237_v44  ;;  %v6238_v20 = vmul.f32 -1.442695, %v5634_v29  ;;  %v6239_v24 = vmul.f32 -1.442695, %v5636_v61 }
 0x9ca   :  { %6624 = vpow2.f32 %v6238_v20 }
 0x9cb   :  { %6626 = vpow2.f32 %v6239_v24 }
 0x9cc   :  { %6628 = vtanh.f32 %v5635_v50 }
 0x9d5   :  { %v6623_v39 = vpop.eup %6622 }
 0x9d6   :  { %v5640_v31 = vadd.f32 1.0, %v6623_v39 }
 0x9d7   :  { %v6625_v7 = vpop.eup %6624 }
 0x9d8   :  { %6630 = vrcp.f32 %v5640_v31  ;;  %v5646_v16 = vadd.f32 1.0, %v6625_v7  ;;  %v6627_v58 = vpop.eup %6626 }
 0x9d9   :  { %v6629_v56 = vpop.eup %6628  ;;  %v5653_v11 = vadd.f32 1.0, %v6627_v58 }
 0x9da   :  { %6632 = vrcp.f32 %v5646_v16 }
 0x9e4   :  { %v5797_v26 = vpop.f32.mrf.mxu0 }
 0x9e5   :  { %v6631_v28 = vpop.eup %6630  ;;  %v5873_v38 = vadd.f32 %v5797_v26, %v11453_v34  ;;  %v5868_v0 = vpop.f32.mrf.mxu1 }
 0x9e6   :  { %v5657_v32 = vmul.f32 %v6631_v28, %v6629_v56  ;;  %v5799_v6 = vpop.f32.mrf.mxu0  ;;  %v5875_v19 = vadd.f32 %v5868_v0, %v11456_v63 }
 0x9e7   :  { %v6633_v27 = vpop.eup %6632  ;;  %v6240_v51 = vmul.f32 -1.442695, %v5873_v38  ;;  %v5874_v54 = vadd.f32 %v5799_v6, %v11454_v3  ;;  %v5870_v53 = vpop.f32.mrf.mxu1 }
 0x9e8   :  { %v5656_v9 = vmul.f32 %v6633_v27, %v10367_v47  ;;  %v5876_v40 = vadd.f32 %v5870_v53, %v11455_v17 }
 0x9e9   :  { %6634 = vpow2.f32 %v6240_v51  ;;  %v6241_v55 = vmul.f32 -1.442695, %v5874_v54 }
 0x9ea   :  { %v5658_v37 = vadd.f32 %v5657_v32, %v5656_v9  ;;  %6636 = vrcp.f32 %v5653_v11  ;;  %v6242_v62 = vmul.f32 -1.442695, %v5876_v40 }
 0x9eb   :  { %6638 = vpow2.f32 %v6241_v55 }
 0x9ec   :  { %6640 = vtanh.f32 %v5658_v37 }
 0x9ed   :  { %6642 = vtanh.f32 %v5875_v19 }
 0x9ee   :  { %6644 = vpow2.f32 %v6242_v62 }
 0x9f6   :  { %v6635_v21 = vpop.eup %6634 }
 0x9f7   :  { %v6637_v18 = vpop.eup %6636  ;;  %v5880_v13 = vadd.f32 1.0, %v6635_v21 }
 0x9f8   :  { %v6639_v49 = vpop.eup %6638 }
 0x9f9   :  { %v6641_v47 = vpop.eup %6640  ;;  %6646 = vrcp.f32 %v5880_v13  ;;  %v5886_v25 = vadd.f32 1.0, %v6639_v49 }
 0x9fa   :  { %v5660_v10 = vmul.f32 %v6641_v47, %v6637_v18  ;;  %v6643_v22 = vpop.eup %6642 }
 0x9fb   :  { %6648 = vrcp.f32 %v5886_v25  ;;  %v6645_v30 = vpop.eup %6644 }
 0x9fc   :  { %5901 = vst.msk [vmem:[#allocation9 + $0x38] sm:$0xff] %vm1424_vm1, %v5660_v10  ;;  %v5893_v57 = vadd.f32 1.0, %v6645_v30 }
 0x9fe   :  { %6650 = vrcp.f32 %v5893_v57 }
 0xa06   :  { %v6647_v35 = vpop.eup %6646 }
 0xa07   :  { %v5897_v52 = vmul.f32 %v6647_v35, %v6643_v22 }
 0xa08   :  { %v6649_v59 = vpop.eup %6648 }
 0xa09   :  { %v5896_v42 = vmul.f32 %v6649_v59, %v10402_v12 }
 0xa0b   :  { %v5898_v2 = vadd.f32 %v5897_v52, %v5896_v42  ;;  %v6651_v41 = vpop.eup %6650 }
 0xa0d   :  { %6652 = vtanh.f32 %v5898_v2 }
 0xa1a   :  { %v6653_v60 = vpop.eup %6652 }
 0xa1b   :  { %v5900_v45 = vmul.f32 %v6653_v60, %v6651_v41 }
 0xa1d   :  { %5903 = vrot.lane.b32.xlu0 %v5900_v45, %s6722_s9 }
 0xa8f   :  { %v5904_v14 = vpop.permute.xlu0 %5903 }
 0xa90   :  { %5906 = vst.msk [vmem:[#allocation9] sm:$0xff] %vm2491_vm2, %v5904_v14 }
 0xa91   :  { %6705 = shalt.err (!%p6702_p0)
}
 0xa92   :  { %s6732_s17 = smov 128   ;;  %s6733_s0 = smov 8  }
 0xa93   :  { %5918 = dma.vmem_to_hbm [thread:$0]  %s5913_s16, 1024, %s10471_s8, [#allocation6], %s6732_s17, %s6732_s17, %s6733_s0  }
 0xa94   :  { %6718 = dma.done.wait [#allocation6], 1024  }
 0xa95   :  { %6719 = vsyncadd [#allocation6], 4294966272 }
 0xa96   :  { %5922 = vsyncpa [#allocation5], 1 }
 0xa97   :  { %5923 = vsyncpa [#allocation8], 1 }
 0xa98   :  { %5924 = vsyncpa [#allocation6], 1 }

</bundles_post_ra>
